<compile_context>
chip_gen: v5e
topology: v5e:2x2
jax: 0.10.0
libtpu: 0.0.40
codegen_flags: <defaults>
</compile_context>

<pallas_src>
import functools
import math

import jax
import jax.numpy as jnp
from jax.experimental import pallas as pl
from jax.experimental.pallas import tpu as pltpu

# ---------------- configuration (small shapes consistent with the module) ----------------
BATCH      = 2
IN_CHANS   = 1
IMAGE_SIZE = (16, 16)
PATCH      = 4
KEEP       = 0.25
ENC_WIDTH  = 128
DEC_WIDTH  = int(0.25 * ENC_WIDTH)            # dec_width given as a fraction of enc_width
ENC_DEPTH  = 2
DEC_DEPTH  = 2
NUM_HEADS  = 8                                # VitBlocks default num_heads (also for the
                                              # decoder: width 32 -> head_dim 4, per spec)
MLP_RATIO  = 4                                # timm ViT default
N_TOKENS   = (IMAGE_SIZE[0] // PATCH) * (IMAGE_SIZE[1] // PATCH)
K_KEEP     = int(KEEP * N_TOKENS)
LN_EPS     = 1e-6                             # timm VisionTransformer LayerNorm eps
PATCH_DIM  = IN_CHANS * PATCH * PATCH

COMPUTE_DTYPE = jnp.bfloat16                  # MXU input dtype; accumulation stays f32

assert ENC_WIDTH % NUM_HEADS == 0 and DEC_WIDTH % NUM_HEADS == 0


# ---------------- in-kernel helpers (operate on values, not refs) ----------------
def _ln(v, g, b):
    mu = jnp.mean(v, axis=-1, keepdims=True)
    var = jnp.mean(jnp.square(v - mu), axis=-1, keepdims=True)
    return (v - mu) * jax.lax.rsqrt(var + LN_EPS) * g + b


def _gelu(x):
    # TODO(synk): PyTorch nn.GELU default is the exact erf formulation; the tanh
    #             approximation is used because erf lowering is not guaranteed in
    #             Mosaic (deviation ~1e-3).
    return 0.5 * x * (1.0 + jnp.tanh(0.7978845608028654 * (x + 0.044715 * x * x * x)))


def _vit_block(x, bp, num_heads):
    """One timm ViT block (pre-norm MHSA + pre-norm MLP).  x: (T, D) f32 value,
    bp: dict of VMEM refs.  Attention is head-batched (no per-head matmul loop)."""
    T, D = x.shape
    dh = D // num_heads
    scale = 1.0 / math.sqrt(dh)

    # ---- multi-head self attention ----
    h = _ln(x, bp["ln1_w"][...], bp["ln1_b"][...])
    qkv = jnp.dot(h.astype(COMPUTE_DTYPE), bp["wqkv"][...],
                  preferred_element_type=jnp.float32) + bp["bqkv"][...]        # (T, 3D)
    q, k, v = qkv[:, :D], qkv[:, D:2 * D], qkv[:, 2 * D:]
    qh = jnp.stack([q[:, i * dh:(i + 1) * dh] for i in range(num_heads)], axis=0)  # (H,T,dh)
    kh = jnp.stack([k[:, i * dh:(i + 1) * dh] for i in range(num_heads)], axis=0)
    vh = jnp.stack([v[:, i * dh:(i + 1) * dh] for i in range(num_heads)], axis=0)

    s = jnp.einsum("hqd,hkd->hqk", qh * scale, kh,
                   preferred_element_type=jnp.float32)                          # (H,T,T)
    s = s - jnp.max(s, axis=-1, keepdims=True)
    p = jnp.exp(s)
    p = p * pl.reciprocal(jnp.sum(p, axis=-1, keepdims=True), approx=True)
    o = jnp.einsum("hqk,hkd->hqd", p, vh, preferred_element_type=jnp.float32)   # (H,T,dh)

    # head-combining projection: wproj stored head-major (H, dh, D); summing the
    # per-head partial projections replaces the lane-concat of the old version.
    po = jnp.einsum("hqd,hde->hqe", o, bp["wproj"][...],
                    preferred_element_type=jnp.float32)                          # (H,T,D)
    x = x + jnp.sum(po, axis=0) + bp["bproj"][...]

    # ---- MLP ----
    h2 = _ln(x, bp["ln2_w"][...], bp["ln2_b"][...])
    h2 = jnp.dot(h2.astype(COMPUTE_DTYPE), bp["wfc1"][...],
                 preferred_element_type=jnp.float32) + bp["bfc1"][...]
    h2 = _gelu(h2)
    h2 = jnp.dot(h2.astype(COMPUTE_DTYPE), bp["wfc2"][...],
                 preferred_element_type=jnp.float32) + bp["bfc2"][...]
    return x + h2


# ---------------- the single fused kernel ----------------
def _mae_kernel(idx_ref, patches_ref, *rest, treedef, n_leaves):
    params = jax.tree_util.tree_unflatten(treedef, rest[:n_leaves])
    o_ref   = rest[n_leaves]
    tok_scr = rest[n_leaves + 1]          # (N_TOKENS, ENC_WIDTH) f32 scratch
    dec_scr = rest[n_leaves + 2]          # (N_TOKENS, DEC_WIDTH) f32 scratch
    b = pl.program_id(0)

    # ---- patch embed (conv with kernel==stride == dense on flattened patches) + pos enc ----
    patches = patches_ref[0]                                              # (n, C*p*p)
    tok = jnp.dot(patches.astype(COMPUTE_DTYPE), params["embed_w"][...],
                  preferred_element_type=jnp.float32) + params["embed_b"][...]
    tok_scr[...] = tok + params["pos_enc"][...]

    # ---- mask_input: keep the first K_KEEP tokens of this image's permutation ----
    rows = [tok_scr[pl.ds(idx_ref[b, j], 1), :] for j in range(K_KEEP)]
    x = jnp.concatenate(rows, axis=0)                                     # (K_KEEP, ENC_W)

    # ---- encoder (ViT blocks + final LayerNorm) ----
    for d in range(ENC_DEPTH):
        x = _vit_block(x, params["enc_blocks"][d], NUM_HEADS)
    x = _ln(x, params["enc_norm_w"][...], params["enc_norm_b"][...])

    # ---- project to decoder width ----
    x = jnp.dot(x.astype(COMPUTE_DTYPE), params["proj_w"][...],
                preferred_element_type=jnp.float32) + params["proj_b"][...]   # (K_KEEP, DEC_W)

    # ---- un-shuffle: kept token j goes back to original position idx[b, j],
    #      every other position gets the mask token; then add decoder pos enc ----
    dec_scr[...] = jnp.broadcast_to(params["mask_token"][...], (N_TOKENS, DEC_WIDTH))
    for j in range(K_KEEP):
        dec_scr[pl.ds(idx_ref[b, j], 1), :] = x[j:j + 1, :]
    xd = dec_scr[...] + params["pos_dec"][...]

    # ---- decoder (ViT blocks, no end norm) ----
    for d in range(DEC_DEPTH):
        xd = _vit_block(xd, params["dec_blocks"][d], NUM_HEADS)

    # ---- pixel projection ----
    out = jnp.dot(xd.astype(COMPUTE_DTYPE), params["pix_w"][...],
                  preferred_element_type=jnp.float32) + params["pix_b"][...]
    # TODO(synk): last dim is 16 (<128 lanes) -> masked stores; at 2 KiB total this is
    #             immaterial, but reshape to a (B, n*p*p) lane-dense slab if scaled up.
    o_ref[0] = out.astype(o_ref.dtype)


# ---------------- plain-JAX glue ----------------
def pos_encoding(n, d, k=10000.0):
    """Matches MaskedAutoencoder.pos_encoding exactly."""
    i = jnp.arange(n, dtype=jnp.float32)[:, None]
    j = jnp.arange(d, dtype=jnp.float32)[None, :]
    ang = i / jnp.power(k, j / (d // 2))
    even = (jnp.arange(d) % 2) == 0
    return jnp.where(even[None, :], jnp.sin(ang), jnp.cos(ang)).astype(jnp.float32)


def image_as_patches(x):
    """(B,C,H,W) -> (B, n_tokens, C*p*p) in (c, ph, pw) order (== strided-conv patch order)."""
    B, C, H, W = x.shape
    p = PATCH
    x = x.reshape(B, C, H // p, p, W // p, p)
    x = jnp.transpose(x, (0, 2, 4, 1, 3, 5))
    return x.reshape(B, (H // p) * (W // p), C * p * p)


def init_block_params(key, width, num_heads, mlp_ratio=MLP_RATIO):
    hidden = width * mlp_ratio
    dh = width // num_heads
    k1, k2, k3, k4 = jax.random.split(key, 4)
    s, f32, mm = 0.02, jnp.float32, COMPUTE_DTYPE
    wproj = s * jax.random.normal(k2, (width, width), f32)
    return dict(
        ln1_w=jnp.ones((1, width), f32), ln1_b=jnp.zeros((1, width), f32),
        wqkv=(s * jax.random.normal(k1, (width, 3 * width), f32)).astype(mm),
        bqkv=jnp.zeros((1, 3 * width), f32),
        # head-major layout (H, dh, D) so the kernel can combine heads with a
        # batched matmul + sum instead of a lane concat.  Kept in f32 (tiny).
        wproj=wproj.reshape(num_heads, dh, width),
        bproj=jnp.zeros((1, width), f32),
        ln2_w=jnp.ones((1, width), f32), ln2_b=jnp.zeros((1, width), f32),
        wfc1=(s * jax.random.normal(k3, (width, hidden), f32)).astype(mm),
        bfc1=jnp.zeros((1, hidden), f32),
        wfc2=(s * jax.random.normal(k4, (hidden, width), f32)).astype(mm),
        bfc2=jnp.zeros((1, width), f32),
    )


def init_params(key):
    ks = jax.random.split(key, 8)
    f32, mm = jnp.float32, COMPUTE_DTYPE
    return dict(
        # Conv2d(kernel=stride=patch) == dense over flattened patches
        embed_w=(0.02 * jax.random.normal(ks[0], (PATCH_DIM, ENC_WIDTH), f32)).astype(mm),
        embed_b=jnp.zeros((1, ENC_WIDTH), f32),
        pos_enc=pos_encoding(N_TOKENS, ENC_WIDTH),
        pos_dec=pos_encoding(N_TOKENS, DEC_WIDTH),
        mask_token=jnp.zeros((1, DEC_WIDTH), f32),        # zeros, as in the module __init__
        enc_norm_w=jnp.ones((1, ENC_WIDTH), f32),
        enc_norm_b=jnp.zeros((1, ENC_WIDTH), f32),
        proj_w=(0.02 * jax.random.normal(ks[1], (ENC_WIDTH, DEC_WIDTH), f32)).astype(mm),
        proj_b=jnp.zeros((1, DEC_WIDTH), f32),
        pix_w=(0.02 * jax.random.normal(ks[2], (DEC_WIDTH, PATCH * PATCH), f32)).astype(mm),
        pix_b=jnp.zeros((1, PATCH * PATCH), f32),
        enc_blocks=[init_block_params(k, ENC_WIDTH, NUM_HEADS)
                    for k in jax.random.split(ks[3], ENC_DEPTH)],
        dec_blocks=[init_block_params(k, DEC_WIDTH, NUM_HEADS)
                    for k in jax.random.split(ks[4], DEC_DEPTH)],
    )


def mae_forward(x_img, params, idx):
    """Full MaskedAutoencoder.forward as a single fused Pallas kernel.
    idx: (B, n_tokens) per-image random permutation (int32)."""
    B = x_img.shape[0]
    patches = image_as_patches(x_img)                               # (B, n, C*p*p)

    leaves, treedef = jax.tree_util.tree_flatten(params)
    n_leaves = len(leaves)

    kernel = functools.partial(_mae_kernel, treedef=treedef, n_leaves=n_leaves)

    grid_spec = pltpu.PrefetchScalarGridSpec(
        num_scalar_prefetch=1,                                      # idx -> SMEM
        grid=(B,),
        in_specs=(
            [pl.BlockSpec((1, N_TOKENS, PATCH_DIM), lambda b, idx_ref: (b, 0, 0))]
            # weights: untiled, single-buffered, resident in VMEM for the whole kernel
            + [pl.BlockSpec(memory_space=pltpu.MemorySpace.VMEM)] * n_leaves
        ),
        out_specs=pl.BlockSpec((1, N_TOKENS, PATCH * PATCH), lambda b, idx_ref: (b, 0, 0)),
        scratch_shapes=[pltpu.VMEM((N_TOKENS, ENC_WIDTH), jnp.float32),
                        pltpu.VMEM((N_TOKENS, DEC_WIDTH), jnp.float32)],
    )

    out = pl.pallas_call(
        kernel,
        out_shape=jax.ShapeDtypeStruct((B, N_TOKENS, PATCH * PATCH), jnp.float32),
        grid_spec=grid_spec,
        compiler_params=pltpu.CompilerParams(dimension_semantics=("parallel",)),
    )(idx, patches, *leaves)
    return out


if __name__ == "__main__":
    key = jax.random.PRNGKey(0)
    k_img, k_par, k_msk = jax.random.split(key, 3)

    x = jax.random.normal(k_img, (BATCH, IN_CHANS, *IMAGE_SIZE), jnp.float32)
    params = init_params(k_par)

    # generate_mask_index: per-image random permutation of token indices
    idx = jax.vmap(lambda kk: jax.random.permutation(kk, N_TOKENS))(
        jax.random.split(k_msk, BATCH)).astype(jnp.int32)

    out = jax.jit(mae_forward)(x, params, idx)
    out = jax.block_until_ready(out)
    assert out.shape == (BATCH, N_TOKENS, PATCH * PATCH), out.shape
    assert bool(jnp.all(jnp.isfinite(out)))
    print("KERNEL_OK")
</pallas_src>

<mosaic_0001>
module attributes {stable_mosaic.version = 11 : i64} {
  func.func @_mae_kernel(%arg0: i32, %arg1: memref<2x16xi32, #tpu.memory_space<smem>>, %arg2: memref<1x16x16xf32, #tpu.memory_space<vmem>>, %arg3: memref<1x128xf32, #tpu.memory_space<vmem>>, %arg4: memref<1x32xf32, #tpu.memory_space<vmem>>, %arg5: memref<1x32xf32, #tpu.memory_space<vmem>>, %arg6: memref<1x96xf32, #tpu.memory_space<vmem>>, %arg7: memref<1x32xf32, #tpu.memory_space<vmem>>, %arg8: memref<1x32xf32, #tpu.memory_space<vmem>>, %arg9: memref<1x32xf32, #tpu.memory_space<vmem>>, %arg10: memref<1x32xf32, #tpu.memory_space<vmem>>, %arg11: memref<32x128xbf16, #tpu.memory_space<vmem>>, %arg12: memref<128x32xbf16, #tpu.memory_space<vmem>>, %arg13: memref<8x4x32xf32, #tpu.memory_space<vmem>>, %arg14: memref<32x96xbf16, #tpu.memory_space<vmem>>, %arg15: memref<1x128xf32, #tpu.memory_space<vmem>>, %arg16: memref<1x32xf32, #tpu.memory_space<vmem>>, %arg17: memref<1x32xf32, #tpu.memory_space<vmem>>, %arg18: memref<1x96xf32, #tpu.memory_space<vmem>>, %arg19: memref<1x32xf32, #tpu.memory_space<vmem>>, %arg20: memref<1x32xf32, #tpu.memory_space<vmem>>, %arg21: memref<1x32xf32, #tpu.memory_space<vmem>>, %arg22: memref<1x32xf32, #tpu.memory_space<vmem>>, %arg23: memref<32x128xbf16, #tpu.memory_space<vmem>>, %arg24: memref<128x32xbf16, #tpu.memory_space<vmem>>, %arg25: memref<8x4x32xf32, #tpu.memory_space<vmem>>, %arg26: memref<32x96xbf16, #tpu.memory_space<vmem>>, %arg27: memref<1x128xf32, #tpu.memory_space<vmem>>, %arg28: memref<16x128xbf16, #tpu.memory_space<vmem>>, %arg29: memref<1x512xf32, #tpu.memory_space<vmem>>, %arg30: memref<1x128xf32, #tpu.memory_space<vmem>>, %arg31: memref<1x128xf32, #tpu.memory_space<vmem>>, %arg32: memref<1x384xf32, #tpu.memory_space<vmem>>, %arg33: memref<1x128xf32, #tpu.memory_space<vmem>>, %arg34: memref<1x128xf32, #tpu.memory_space<vmem>>, %arg35: memref<1x128xf32, #tpu.memory_space<vmem>>, %arg36: memref<1x128xf32, #tpu.memory_space<vmem>>, %arg37: memref<128x512xbf16, #tpu.memory_space<vmem>>, %arg38: memref<512x128xbf16, #tpu.memory_space<vmem>>, %arg39: memref<8x16x128xf32, #tpu.memory_space<vmem>>, %arg40: memref<128x384xbf16, #tpu.memory_space<vmem>>, %arg41: memref<1x512xf32, #tpu.memory_space<vmem>>, %arg42: memref<1x128xf32, #tpu.memory_space<vmem>>, %arg43: memref<1x128xf32, #tpu.memory_space<vmem>>, %arg44: memref<1x384xf32, #tpu.memory_space<vmem>>, %arg45: memref<1x128xf32, #tpu.memory_space<vmem>>, %arg46: memref<1x128xf32, #tpu.memory_space<vmem>>, %arg47: memref<1x128xf32, #tpu.memory_space<vmem>>, %arg48: memref<1x128xf32, #tpu.memory_space<vmem>>, %arg49: memref<128x512xbf16, #tpu.memory_space<vmem>>, %arg50: memref<512x128xbf16, #tpu.memory_space<vmem>>, %arg51: memref<8x16x128xf32, #tpu.memory_space<vmem>>, %arg52: memref<128x384xbf16, #tpu.memory_space<vmem>>, %arg53: memref<1x128xf32, #tpu.memory_space<vmem>>, %arg54: memref<1x128xf32, #tpu.memory_space<vmem>>, %arg55: memref<1x32xf32, #tpu.memory_space<vmem>>, %arg56: memref<1x16xf32, #tpu.memory_space<vmem>>, %arg57: memref<32x16xbf16, #tpu.memory_space<vmem>>, %arg58: memref<16x32xf32, #tpu.memory_space<vmem>>, %arg59: memref<16x128xf32, #tpu.memory_space<vmem>>, %arg60: memref<1x32xf32, #tpu.memory_space<vmem>>, %arg61: memref<128x32xbf16, #tpu.memory_space<vmem>>, %arg62: memref<1x16x16xf32, #tpu.memory_space<vmem>>, %arg63: memref<16x128xf32, #tpu.memory_space<vmem>>, %arg64: memref<16x32xf32, #tpu.memory_space<vmem>>) attributes {dimension_semantics = [#tpu.dimension_semantics<parallel>], iteration_bounds = array<i64: 2>, scalar_prefetch = 1 : i64, scratch_operands = 2 : i64, tpu.core_type = #tpu.core_type<tc>, window_params = [{transform_indices = @transform_0, window_bounds = array<i64: 1, 16, 16>}, {pipeline_mode = #tpu.pipeline_mode<synchronous>, transform_indices = @transform_1, window_bounds = array<i64: 1, 128>}, {pipeline_mode = #tpu.pipeline_mode<synchronous>, transform_indices = @transform_2, window_bounds = array<i64: 1, 32>}, {pipeline_mode = #tpu.pipeline_mode<synchronous>, transform_indices = @transform_3, window_bounds = array<i64: 1, 32>}, {pipeline_mode = #tpu.pipeline_mode<synchronous>, transform_indices = @transform_4, window_bounds = array<i64: 1, 96>}, {pipeline_mode = #tpu.pipeline_mode<synchronous>, transform_indices = @transform_5, window_bounds = array<i64: 1, 32>}, {pipeline_mode = #tpu.pipeline_mode<synchronous>, transform_indices = @transform_6, window_bounds = array<i64: 1, 32>}, {pipeline_mode = #tpu.pipeline_mode<synchronous>, transform_indices = @transform_7, window_bounds = array<i64: 1, 32>}, {pipeline_mode = #tpu.pipeline_mode<synchronous>, transform_indices = @transform_8, window_bounds = array<i64: 1, 32>}, {pipeline_mode = #tpu.pipeline_mode<synchronous>, transform_indices = @transform_9, window_bounds = array<i64: 32, 128>}, {pipeline_mode = #tpu.pipeline_mode<synchronous>, transform_indices = @transform_10, window_bounds = array<i64: 128, 32>}, {pipeline_mode = #tpu.pipeline_mode<synchronous>, transform_indices = @transform_11, window_bounds = array<i64: 8, 4, 32>}, {pipeline_mode = #tpu.pipeline_mode<synchronous>, transform_indices = @transform_12, window_bounds = array<i64: 32, 96>}, {pipeline_mode = #tpu.pipeline_mode<synchronous>, transform_indices = @transform_13, window_bounds = array<i64: 1, 128>}, {pipeline_mode = #tpu.pipeline_mode<synchronous>, transform_indices = @transform_14, window_bounds = array<i64: 1, 32>}, {pipeline_mode = #tpu.pipeline_mode<synchronous>, transform_indices = @transform_15, window_bounds = array<i64: 1, 32>}, {pipeline_mode = #tpu.pipeline_mode<synchronous>, transform_indices = @transform_16, window_bounds = array<i64: 1, 96>}, {pipeline_mode = #tpu.pipeline_mode<synchronous>, transform_indices = @transform_17, window_bounds = array<i64: 1, 32>}, {pipeline_mode = #tpu.pipeline_mode<synchronous>, transform_indices = @transform_18, window_bounds = array<i64: 1, 32>}, {pipeline_mode = #tpu.pipeline_mode<synchronous>, transform_indices = @transform_19, window_bounds = array<i64: 1, 32>}, {pipeline_mode = #tpu.pipeline_mode<synchronous>, transform_indices = @transform_20, window_bounds = array<i64: 1, 32>}, {pipeline_mode = #tpu.pipeline_mode<synchronous>, transform_indices = @transform_21, window_bounds = array<i64: 32, 128>}, {pipeline_mode = #tpu.pipeline_mode<synchronous>, transform_indices = @transform_22, window_bounds = array<i64: 128, 32>}, {pipeline_mode = #tpu.pipeline_mode<synchronous>, transform_indices = @transform_23, window_bounds = array<i64: 8, 4, 32>}, {pipeline_mode = #tpu.pipeline_mode<synchronous>, transform_indices = @transform_24, window_bounds = array<i64: 32, 96>}, {pipeline_mode = #tpu.pipeline_mode<synchronous>, transform_indices = @transform_25, window_bounds = array<i64: 1, 128>}, {pipeline_mode = #tpu.pipeline_mode<synchronous>, transform_indices = @transform_26, window_bounds = array<i64: 16, 128>}, {pipeline_mode = #tpu.pipeline_mode<synchronous>, transform_indices = @transform_27, window_bounds = array<i64: 1, 512>}, {pipeline_mode = #tpu.pipeline_mode<synchronous>, transform_indices = @transform_28, window_bounds = array<i64: 1, 128>}, {pipeline_mode = #tpu.pipeline_mode<synchronous>, transform_indices = @transform_29, window_bounds = array<i64: 1, 128>}, {pipeline_mode = #tpu.pipeline_mode<synchronous>, transform_indices = @transform_30, window_bounds = array<i64: 1, 384>}, {pipeline_mode = #tpu.pipeline_mode<synchronous>, transform_indices = @transform_31, window_bounds = array<i64: 1, 128>}, {pipeline_mode = #tpu.pipeline_mode<synchronous>, transform_indices = @transform_32, window_bounds = array<i64: 1, 128>}, {pipeline_mode = #tpu.pipeline_mode<synchronous>, transform_indices = @transform_33, window_bounds = array<i64: 1, 128>}, {pipeline_mode = #tpu.pipeline_mode<synchronous>, transform_indices = @transform_34, window_bounds = array<i64: 1, 128>}, {pipeline_mode = #tpu.pipeline_mode<synchronous>, transform_indices = @transform_35, window_bounds = array<i64: 128, 512>}, {pipeline_mode = #tpu.pipeline_mode<synchronous>, transform_indices = @transform_36, window_bounds = array<i64: 512, 128>}, {pipeline_mode = #tpu.pipeline_mode<synchronous>, transform_indices = @transform_37, window_bounds = array<i64: 8, 16, 128>}, {pipeline_mode = #tpu.pipeline_mode<synchronous>, transform_indices = @transform_38, window_bounds = array<i64: 128, 384>}, {pipeline_mode = #tpu.pipeline_mode<synchronous>, transform_indices = @transform_39, window_bounds = array<i64: 1, 512>}, {pipeline_mode = #tpu.pipeline_mode<synchronous>, transform_indices = @transform_40, window_bounds = array<i64: 1, 128>}, {pipeline_mode = #tpu.pipeline_mode<synchronous>, transform_indices = @transform_41, window_bounds = array<i64: 1, 128>}, {pipeline_mode = #tpu.pipeline_mode<synchronous>, transform_indices = @transform_42, window_bounds = array<i64: 1, 384>}, {pipeline_mode = #tpu.pipeline_mode<synchronous>, transform_indices = @transform_43, window_bounds = array<i64: 1, 128>}, {pipeline_mode = #tpu.pipeline_mode<synchronous>, transform_indices = @transform_44, window_bounds = array<i64: 1, 128>}, {pipeline_mode = #tpu.pipeline_mode<synchronous>, transform_indices = @transform_45, window_bounds = array<i64: 1, 128>}, {pipeline_mode = #tpu.pipeline_mode<synchronous>, transform_indices = @transform_46, window_bounds = array<i64: 1, 128>}, {pipeline_mode = #tpu.pipeline_mode<synchronous>, transform_indices = @transform_47, window_bounds = array<i64: 128, 512>}, {pipeline_mode = #tpu.pipeline_mode<synchronous>, transform_indices = @transform_48, window_bounds = array<i64: 512, 128>}, {pipeline_mode = #tpu.pipeline_mode<synchronous>, transform_indices = @transform_49, window_bounds = array<i64: 8, 16, 128>}, {pipeline_mode = #tpu.pipeline_mode<synchronous>, transform_indices = @transform_50, window_bounds = array<i64: 128, 384>}, {pipeline_mode = #tpu.pipeline_mode<synchronous>, transform_indices = @transform_51, window_bounds = array<i64: 1, 128>}, {pipeline_mode = #tpu.pipeline_mode<synchronous>, transform_indices = @transform_52, window_bounds = array<i64: 1, 128>}, {pipeline_mode = #tpu.pipeline_mode<synchronous>, transform_indices = @transform_53, window_bounds = array<i64: 1, 32>}, {pipeline_mode = #tpu.pipeline_mode<synchronous>, transform_indices = @transform_54, window_bounds = array<i64: 1, 16>}, {pipeline_mode = #tpu.pipeline_mode<synchronous>, transform_indices = @transform_55, window_bounds = array<i64: 32, 16>}, {pipeline_mode = #tpu.pipeline_mode<synchronous>, transform_indices = @transform_56, window_bounds = array<i64: 16, 32>}, {pipeline_mode = #tpu.pipeline_mode<synchronous>, transform_indices = @transform_57, window_bounds = array<i64: 16, 128>}, {pipeline_mode = #tpu.pipeline_mode<synchronous>, transform_indices = @transform_58, window_bounds = array<i64: 1, 32>}, {pipeline_mode = #tpu.pipeline_mode<synchronous>, transform_indices = @transform_59, window_bounds = array<i64: 128, 32>}, {transform_indices = @transform_60, window_bounds = array<i64: 1, 16, 16>}]} {
    %c0 = arith.constant 0 : index
    %c0_0 = arith.constant 0 : index
    %c0_1 = arith.constant 0 : index
    %0 = vector.load %arg2[%c0, %c0_0, %c0_1] : memref<1x16x16xf32, #tpu.memory_space<vmem>>, vector<1x16x16xf32>
    %1 = vector.shape_cast %0 : vector<1x16x16xf32> to vector<16x16xf32>
    %2 = arith.truncf %1 : vector<16x16xf32> to vector<16x16xbf16>
    %c0_2 = arith.constant 0 : index
    %c0_3 = arith.constant 0 : index
    %3 = vector.load %arg28[%c0_2, %c0_3] : memref<16x128xbf16, #tpu.memory_space<vmem>>, vector<16x128xbf16>
    %cst = arith.constant dense<0.000000e+00> : vector<16x128xf32>
    %4 = tpu.matmul %2, %3, %cst {dimension_numbers = #tpu.dot_dimension_numbers<[1], [0], [0], [1], [0, 0, 1, 1], [], []>} : vector<16x16xbf16>, vector<16x128xbf16>, vector<16x128xf32> -> vector<16x128xf32>
    %c0_4 = arith.constant 0 : index
    %c0_5 = arith.constant 0 : index
    %5 = vector.load %arg27[%c0_4, %c0_5] : memref<1x128xf32, #tpu.memory_space<vmem>>, vector<1x128xf32>
    %6 = vector.broadcast %5 : vector<1x128xf32> to vector<16x128xf32>
    %7 = arith.addf %4, %6 : vector<16x128xf32>
    %c0_6 = arith.constant 0 : index
    %c0_7 = arith.constant 0 : index
    %8 = vector.load %arg59[%c0_6, %c0_7] : memref<16x128xf32, #tpu.memory_space<vmem>>, vector<16x128xf32>
    %9 = arith.addf %7, %8 : vector<16x128xf32>
    %c0_8 = arith.constant 0 : index
    %c0_9 = arith.constant 0 : index
    %10 = vector.load %arg63[%c0_8, %c0_9] : memref<16x128xf32, #tpu.memory_space<vmem>>, vector<16x128xf32>
    tpu.vector_store %arg63[%c0_8, %c0_9], %9 {strides = array<i32>} : memref<16x128xf32, #tpu.memory_space<vmem>>, vector<16x128xf32>,
    %11 = arith.index_cast %arg0 : i32 to index
    %c0_10 = arith.constant 0 : index
    %12 = memref.load %arg1[%11, %c0_10] : memref<2x16xi32, #tpu.memory_space<smem>>
    %13 = arith.index_cast %12 : i32 to index
    %c0_11 = arith.constant 0 : index
    %14 = vector.load %arg63[%13, %c0_11] : memref<16x128xf32, #tpu.memory_space<vmem>>, vector<1x128xf32>
    %15 = arith.index_cast %arg0 : i32 to index
    %c1 = arith.constant 1 : index
    %16 = memref.load %arg1[%15, %c1] : memref<2x16xi32, #tpu.memory_space<smem>>
    %17 = arith.index_cast %16 : i32 to index
    %c0_12 = arith.constant 0 : index
    %18 = vector.load %arg63[%17, %c0_12] : memref<16x128xf32, #tpu.memory_space<vmem>>, vector<1x128xf32>
    %19 = arith.index_cast %arg0 : i32 to index
    %c2 = arith.constant 2 : index
    %20 = memref.load %arg1[%19, %c2] : memref<2x16xi32, #tpu.memory_space<smem>>
    %21 = arith.index_cast %20 : i32 to index
    %c0_13 = arith.constant 0 : index
    %22 = vector.load %arg63[%21, %c0_13] : memref<16x128xf32, #tpu.memory_space<vmem>>, vector<1x128xf32>
    %23 = arith.index_cast %arg0 : i32 to index
    %c3 = arith.constant 3 : index
    %24 = memref.load %arg1[%23, %c3] : memref<2x16xi32, #tpu.memory_space<smem>>
    %25 = arith.index_cast %24 : i32 to index
    %c0_14 = arith.constant 0 : index
    %26 = vector.load %arg63[%25, %c0_14] : memref<16x128xf32, #tpu.memory_space<vmem>>, vector<1x128xf32>
    %27 = tpu.concatenate %14, %18, %22, %26 in 0 : vector<1x128xf32>, vector<1x128xf32>, vector<1x128xf32>, vector<1x128xf32> -> vector<4x128xf32>
    %c0_15 = arith.constant 0 : index
    %c0_16 = arith.constant 0 : index
    %28 = vector.load %arg34[%c0_15, %c0_16] : memref<1x128xf32, #tpu.memory_space<vmem>>, vector<1x128xf32>
    %c0_17 = arith.constant 0 : index
    %c0_18 = arith.constant 0 : index
    %29 = vector.load %arg33[%c0_17, %c0_18] : memref<1x128xf32, #tpu.memory_space<vmem>>, vector<1x128xf32>
    %cst_19 = arith.constant dense<0.000000e+00> : vector<4xf32>
    %30 = vector.multi_reduction <add>, %27, %cst_19 [1] : vector<4x128xf32> to vector<4xf32>
    %31 = vector.shape_cast %30 : vector<4xf32> to vector<4x1xf32>
    %cst_20 = arith.constant 1.280000e+02 : f32
    %32 = vector.broadcast %cst_20 : f32 to vector<4x1xf32>
    %33 = arith.divf %31, %32 : vector<4x1xf32>
    %34 = vector.broadcast %33 : vector<4x1xf32> to vector<4x128xf32>
    %35 = arith.subf %27, %34 : vector<4x128xf32>
    %36 = arith.mulf %35, %35 : vector<4x128xf32>
    %cst_21 = arith.constant dense<0.000000e+00> : vector<4xf32>
    %37 = vector.multi_reduction <add>, %36, %cst_21 [1] : vector<4x128xf32> to vector<4xf32>
    %38 = vector.shape_cast %37 : vector<4xf32> to vector<4x1xf32>
    %cst_22 = arith.constant 1.280000e+02 : f32
    %39 = vector.broadcast %cst_22 : f32 to vector<4x1xf32>
    %40 = arith.divf %38, %39 : vector<4x1xf32>
    %41 = vector.broadcast %33 : vector<4x1xf32> to vector<4x128xf32>
    %42 = arith.subf %27, %41 : vector<4x128xf32>
    %cst_23 = arith.constant 9.99999997E-7 : f32
    %43 = vector.broadcast %cst_23 : f32 to vector<4x1xf32>
    %44 = arith.addf %40, %43 : vector<4x1xf32>
    %45 = math.rsqrt %44 : vector<4x1xf32>
    %46 = vector.broadcast %45 : vector<4x1xf32> to vector<4x128xf32>
    %47 = arith.mulf %42, %46 : vector<4x128xf32>
    %48 = vector.broadcast %28 : vector<1x128xf32> to vector<4x128xf32>
    %49 = arith.mulf %47, %48 : vector<4x128xf32>
    %50 = vector.broadcast %29 : vector<1x128xf32> to vector<4x128xf32>
    %51 = arith.addf %49, %50 : vector<4x128xf32>
    %52 = arith.truncf %51 : vector<4x128xf32> to vector<4x128xbf16>
    %c0_24 = arith.constant 0 : index
    %c0_25 = arith.constant 0 : index
    %53 = vector.load %arg40[%c0_24, %c0_25] : memref<128x384xbf16, #tpu.memory_space<vmem>>, vector<128x384xbf16>
    %cst_26 = arith.constant dense<0.000000e+00> : vector<4x384xf32>
    %54 = tpu.matmul %52, %53, %cst_26 {dimension_numbers = #tpu.dot_dimension_numbers<[1], [0], [0], [1], [0, 0, 1, 1], [], []>} : vector<4x128xbf16>, vector<128x384xbf16>, vector<4x384xf32> -> vector<4x384xf32>
    %c0_27 = arith.constant 0 : index
    %c0_28 = arith.constant 0 : index
    %55 = vector.load %arg32[%c0_27, %c0_28] : memref<1x384xf32, #tpu.memory_space<vmem>>, vector<1x384xf32>
    %56 = vector.broadcast %55 : vector<1x384xf32> to vector<4x384xf32>
    %57 = arith.addf %54, %56 : vector<4x384xf32>
    %58 = vector.extract_strided_slice %57 {offsets = [0, 0], sizes = [4, 128], strides = [1, 1]} : vector<4x384xf32> to vector<4x128xf32>
    %59 = vector.extract_strided_slice %57 {offsets = [0, 128], sizes = [4, 128], strides = [1, 1]} : vector<4x384xf32> to vector<4x128xf32>
    %60 = vector.extract_strided_slice %57 {offsets = [0, 256], sizes = [4, 128], strides = [1, 1]} : vector<4x384xf32> to vector<4x128xf32>
    %61 = vector.extract_strided_slice %58 {offsets = [0, 0], sizes = [4, 16], strides = [1, 1]} : vector<4x128xf32> to vector<4x16xf32>
    %62 = vector.extract_strided_slice %58 {offsets = [0, 16], sizes = [4, 16], strides = [1, 1]} : vector<4x128xf32> to vector<4x16xf32>
    %63 = vector.extract_strided_slice %58 {offsets = [0, 32], sizes = [4, 16], strides = [1, 1]} : vector<4x128xf32> to vector<4x16xf32>
    %64 = vector.extract_strided_slice %58 {offsets = [0, 48], sizes = [4, 16], strides = [1, 1]} : vector<4x128xf32> to vector<4x16xf32>
    %65 = vector.extract_strided_slice %58 {offsets = [0, 64], sizes = [4, 16], strides = [1, 1]} : vector<4x128xf32> to vector<4x16xf32>
    %66 = vector.extract_strided_slice %58 {offsets = [0, 80], sizes = [4, 16], strides = [1, 1]} : vector<4x128xf32> to vector<4x16xf32>
    %67 = vector.extract_strided_slice %58 {offsets = [0, 96], sizes = [4, 16], strides = [1, 1]} : vector<4x128xf32> to vector<4x16xf32>
    %68 = vector.extract_strided_slice %58 {offsets = [0, 112], sizes = [4, 16], strides = [1, 1]} : vector<4x128xf32> to vector<4x16xf32>
    %69 = vector.shape_cast %61 : vector<4x16xf32> to vector<1x4x16xf32>
    %70 = vector.shape_cast %62 : vector<4x16xf32> to vector<1x4x16xf32>
    %71 = vector.shape_cast %63 : vector<4x16xf32> to vector<1x4x16xf32>
    %72 = vector.shape_cast %64 : vector<4x16xf32> to vector<1x4x16xf32>
    %73 = vector.shape_cast %65 : vector<4x16xf32> to vector<1x4x16xf32>
    %74 = vector.shape_cast %66 : vector<4x16xf32> to vector<1x4x16xf32>
    %75 = vector.shape_cast %67 : vector<4x16xf32> to vector<1x4x16xf32>
    %76 = vector.shape_cast %68 : vector<4x16xf32> to vector<1x4x16xf32>
    %77 = tpu.concatenate %69, %70, %71, %72, %73, %74, %75, %76 in 0 : vector<1x4x16xf32>, vector<1x4x16xf32>, vector<1x4x16xf32>, vector<1x4x16xf32>, vector<1x4x16xf32>, vector<1x4x16xf32>, vector<1x4x16xf32>, vector<1x4x16xf32> -> vector<8x4x16xf32>
    %78 = vector.extract_strided_slice %59 {offsets = [0, 0], sizes = [4, 16], strides = [1, 1]} : vector<4x128xf32> to vector<4x16xf32>
    %79 = vector.extract_strided_slice %59 {offsets = [0, 16], sizes = [4, 16], strides = [1, 1]} : vector<4x128xf32> to vector<4x16xf32>
    %80 = vector.extract_strided_slice %59 {offsets = [0, 32], sizes = [4, 16], strides = [1, 1]} : vector<4x128xf32> to vector<4x16xf32>
    %81 = vector.extract_strided_slice %59 {offsets = [0, 48], sizes = [4, 16], strides = [1, 1]} : vector<4x128xf32> to vector<4x16xf32>
    %82 = vector.extract_strided_slice %59 {offsets = [0, 64], sizes = [4, 16], strides = [1, 1]} : vector<4x128xf32> to vector<4x16xf32>
    %83 = vector.extract_strided_slice %59 {offsets = [0, 80], sizes = [4, 16], strides = [1, 1]} : vector<4x128xf32> to vector<4x16xf32>
    %84 = vector.extract_strided_slice %59 {offsets = [0, 96], sizes = [4, 16], strides = [1, 1]} : vector<4x128xf32> to vector<4x16xf32>
    %85 = vector.extract_strided_slice %59 {offsets = [0, 112], sizes = [4, 16], strides = [1, 1]} : vector<4x128xf32> to vector<4x16xf32>
    %86 = vector.shape_cast %78 : vector<4x16xf32> to vector<1x4x16xf32>
    %87 = vector.shape_cast %79 : vector<4x16xf32> to vector<1x4x16xf32>
    %88 = vector.shape_cast %80 : vector<4x16xf32> to vector<1x4x16xf32>
    %89 = vector.shape_cast %81 : vector<4x16xf32> to vector<1x4x16xf32>
    %90 = vector.shape_cast %82 : vector<4x16xf32> to vector<1x4x16xf32>
    %91 = vector.shape_cast %83 : vector<4x16xf32> to vector<1x4x16xf32>
    %92 = vector.shape_cast %84 : vector<4x16xf32> to vector<1x4x16xf32>
    %93 = vector.shape_cast %85 : vector<4x16xf32> to vector<1x4x16xf32>
    %94 = tpu.concatenate %86, %87, %88, %89, %90, %91, %92, %93 in 0 : vector<1x4x16xf32>, vector<1x4x16xf32>, vector<1x4x16xf32>, vector<1x4x16xf32>, vector<1x4x16xf32>, vector<1x4x16xf32>, vector<1x4x16xf32>, vector<1x4x16xf32> -> vector<8x4x16xf32>
    %95 = vector.extract_strided_slice %60 {offsets = [0, 0], sizes = [4, 16], strides = [1, 1]} : vector<4x128xf32> to vector<4x16xf32>
    %96 = vector.extract_strided_slice %60 {offsets = [0, 16], sizes = [4, 16], strides = [1, 1]} : vector<4x128xf32> to vector<4x16xf32>
    %97 = vector.extract_strided_slice %60 {offsets = [0, 32], sizes = [4, 16], strides = [1, 1]} : vector<4x128xf32> to vector<4x16xf32>
    %98 = vector.extract_strided_slice %60 {offsets = [0, 48], sizes = [4, 16], strides = [1, 1]} : vector<4x128xf32> to vector<4x16xf32>
    %99 = vector.extract_strided_slice %60 {offsets = [0, 64], sizes = [4, 16], strides = [1, 1]} : vector<4x128xf32> to vector<4x16xf32>
    %100 = vector.extract_strided_slice %60 {offsets = [0, 80], sizes = [4, 16], strides = [1, 1]} : vector<4x128xf32> to vector<4x16xf32>
    %101 = vector.extract_strided_slice %60 {offsets = [0, 96], sizes = [4, 16], strides = [1, 1]} : vector<4x128xf32> to vector<4x16xf32>
    %102 = vector.extract_strided_slice %60 {offsets = [0, 112], sizes = [4, 16], strides = [1, 1]} : vector<4x128xf32> to vector<4x16xf32>
    %103 = vector.shape_cast %95 : vector<4x16xf32> to vector<1x4x16xf32>
    %104 = vector.shape_cast %96 : vector<4x16xf32> to vector<1x4x16xf32>
    %105 = vector.shape_cast %97 : vector<4x16xf32> to vector<1x4x16xf32>
    %106 = vector.shape_cast %98 : vector<4x16xf32> to vector<1x4x16xf32>
    %107 = vector.shape_cast %99 : vector<4x16xf32> to vector<1x4x16xf32>
    %108 = vector.shape_cast %100 : vector<4x16xf32> to vector<1x4x16xf32>
    %109 = vector.shape_cast %101 : vector<4x16xf32> to vector<1x4x16xf32>
    %110 = vector.shape_cast %102 : vector<4x16xf32> to vector<1x4x16xf32>
    %111 = tpu.concatenate %103, %104, %105, %106, %107, %108, %109, %110 in 0 : vector<1x4x16xf32>, vector<1x4x16xf32>, vector<1x4x16xf32>, vector<1x4x16xf32>, vector<1x4x16xf32>, vector<1x4x16xf32>, vector<1x4x16xf32>, vector<1x4x16xf32> -> vector<8x4x16xf32>
    %cst_29 = arith.constant 2.500000e-01 : f32
    %112 = vector.broadcast %cst_29 : f32 to vector<8x4x16xf32>
    %113 = arith.mulf %77, %112 : vector<8x4x16xf32>
    "tpu.trace_start"() <{level = 10 : i32, message = "hqd,hkd->hqk"}> : () -> ()
    %cst_30 = arith.constant dense<0.000000e+00> : vector<8x4x4xf32>
    %114 = tpu.matmul %113, %94, %cst_30 {dimension_numbers = #tpu.dot_dimension_numbers<[2], [2], [1], [1], [0, 0, 0, 1, 1, 1], [0], [0]>} : vector<8x4x16xf32>, vector<8x4x16xf32>, vector<8x4x4xf32> -> vector<8x4x4xf32>
    "tpu.trace_stop"() : () -> ()
    %cst_31 = arith.constant dense<0xFF800000> : vector<8x4xf32>
    %115 = vector.multi_reduction <maximumf>, %114, %cst_31 [2] : vector<8x4x4xf32> to vector<8x4xf32>
    %116 = vector.shape_cast %115 : vector<8x4xf32> to vector<8x4x1xf32>
    %117 = vector.broadcast %116 : vector<8x4x1xf32> to vector<8x4x4xf32>
    %118 = arith.subf %114, %117 : vector<8x4x4xf32>
    %119 = math.exp %118 : vector<8x4x4xf32>
    %cst_32 = arith.constant dense<0.000000e+00> : vector<8x4xf32>
    %120 = vector.multi_reduction <add>, %119, %cst_32 [2] : vector<8x4x4xf32> to vector<8x4xf32>
    %121 = vector.shape_cast %120 : vector<8x4xf32> to vector<8x4x1xf32>
    %122 = tpu.reciprocal %121 {approx = true} : vector<8x4x1xf32> -> vector<8x4x1xf32>
    %123 = vector.broadcast %122 : vector<8x4x1xf32> to vector<8x4x4xf32>
    %124 = arith.mulf %119, %123 : vector<8x4x4xf32>
    "tpu.trace_start"() <{level = 10 : i32, message = "hqk,hkd->hqd"}> : () -> ()
    %cst_33 = arith.constant dense<0.000000e+00> : vector<8x4x16xf32>
    %125 = tpu.matmul %124, %111, %cst_33 {dimension_numbers = #tpu.dot_dimension_numbers<[2], [1], [1], [2], [0, 0, 0, 1, 1, 2], [0], [0]>} : vector<8x4x4xf32>, vector<8x4x16xf32>, vector<8x4x16xf32> -> vector<8x4x16xf32>
    "tpu.trace_stop"() : () -> ()
    %c0_34 = arith.constant 0 : index
    %c0_35 = arith.constant 0 : index
    %c0_36 = arith.constant 0 : index
    %126 = vector.load %arg39[%c0_34, %c0_35, %c0_36] : memref<8x16x128xf32, #tpu.memory_space<vmem>>, vector<8x16x128xf32>
    "tpu.trace_start"() <{level = 10 : i32, message = "hqd,hde->hqe"}> : () -> ()
    %cst_37 = arith.constant dense<0.000000e+00> : vector<8x4x128xf32>
    %127 = tpu.matmul %125, %126, %cst_37 {dimension_numbers = #tpu.dot_dimension_numbers<[2], [1], [1], [2], [0, 0, 0, 1, 1, 2], [0], [0]>} : vector<8x4x16xf32>, vector<8x16x128xf32>, vector<8x4x128xf32> -> vector<8x4x128xf32>
    "tpu.trace_stop"() : () -> ()
    %cst_38 = arith.constant dense<0.000000e+00> : vector<4x128xf32>
    %128 = vector.multi_reduction <add>, %127, %cst_38 [0] : vector<8x4x128xf32> to vector<4x128xf32>
    %129 = arith.addf %27, %128 : vector<4x128xf32>
    %c0_39 = arith.constant 0 : index
    %c0_40 = arith.constant 0 : index
    %130 = vector.load %arg31[%c0_39, %c0_40] : memref<1x128xf32, #tpu.memory_space<vmem>>, vector<1x128xf32>
    %131 = vector.broadcast %130 : vector<1x128xf32> to vector<4x128xf32>
    %132 = arith.addf %129, %131 : vector<4x128xf32>
    %c0_41 = arith.constant 0 : index
    %c0_42 = arith.constant 0 : index
    %133 = vector.load %arg36[%c0_41, %c0_42] : memref<1x128xf32, #tpu.memory_space<vmem>>, vector<1x128xf32>
    %c0_43 = arith.constant 0 : index
    %c0_44 = arith.constant 0 : index
    %134 = vector.load %arg35[%c0_43, %c0_44] : memref<1x128xf32, #tpu.memory_space<vmem>>, vector<1x128xf32>
    %cst_45 = arith.constant dense<0.000000e+00> : vector<4xf32>
    %135 = vector.multi_reduction <add>, %132, %cst_45 [1] : vector<4x128xf32> to vector<4xf32>
    %136 = vector.shape_cast %135 : vector<4xf32> to vector<4x1xf32>
    %cst_46 = arith.constant 1.280000e+02 : f32
    %137 = vector.broadcast %cst_46 : f32 to vector<4x1xf32>
    %138 = arith.divf %136, %137 : vector<4x1xf32>
    %139 = vector.broadcast %138 : vector<4x1xf32> to vector<4x128xf32>
    %140 = arith.subf %132, %139 : vector<4x128xf32>
    %141 = arith.mulf %140, %140 : vector<4x128xf32>
    %cst_47 = arith.constant dense<0.000000e+00> : vector<4xf32>
    %142 = vector.multi_reduction <add>, %141, %cst_47 [1] : vector<4x128xf32> to vector<4xf32>
    %143 = vector.shape_cast %142 : vector<4xf32> to vector<4x1xf32>
    %cst_48 = arith.constant 1.280000e+02 : f32
    %144 = vector.broadcast %cst_48 : f32 to vector<4x1xf32>
    %145 = arith.divf %143, %144 : vector<4x1xf32>
    %146 = vector.broadcast %138 : vector<4x1xf32> to vector<4x128xf32>
    %147 = arith.subf %132, %146 : vector<4x128xf32>
    %cst_49 = arith.constant 9.99999997E-7 : f32
    %148 = vector.broadcast %cst_49 : f32 to vector<4x1xf32>
    %149 = arith.addf %145, %148 : vector<4x1xf32>
    %150 = math.rsqrt %149 : vector<4x1xf32>
    %151 = vector.broadcast %150 : vector<4x1xf32> to vector<4x128xf32>
    %152 = arith.mulf %147, %151 : vector<4x128xf32>
    %153 = vector.broadcast %133 : vector<1x128xf32> to vector<4x128xf32>
    %154 = arith.mulf %152, %153 : vector<4x128xf32>
    %155 = vector.broadcast %134 : vector<1x128xf32> to vector<4x128xf32>
    %156 = arith.addf %154, %155 : vector<4x128xf32>
    %157 = arith.truncf %156 : vector<4x128xf32> to vector<4x128xbf16>
    %c0_50 = arith.constant 0 : index
    %c0_51 = arith.constant 0 : index
    %158 = vector.load %arg37[%c0_50, %c0_51] : memref<128x512xbf16, #tpu.memory_space<vmem>>, vector<128x512xbf16>
    %cst_52 = arith.constant dense<0.000000e+00> : vector<4x512xf32>
    %159 = tpu.matmul %157, %158, %cst_52 {dimension_numbers = #tpu.dot_dimension_numbers<[1], [0], [0], [1], [0, 0, 1, 1], [], []>} : vector<4x128xbf16>, vector<128x512xbf16>, vector<4x512xf32> -> vector<4x512xf32>
    %c0_53 = arith.constant 0 : index
    %c0_54 = arith.constant 0 : index
    %160 = vector.load %arg29[%c0_53, %c0_54] : memref<1x512xf32, #tpu.memory_space<vmem>>, vector<1x512xf32>
    %161 = vector.broadcast %160 : vector<1x512xf32> to vector<4x512xf32>
    %162 = arith.addf %159, %161 : vector<4x512xf32>
    %cst_55 = arith.constant 5.000000e-01 : f32
    %163 = vector.broadcast %cst_55 : f32 to vector<4x512xf32>
    %164 = arith.mulf %163, %162 : vector<4x512xf32>
    %cst_56 = arith.constant 4.471500e-02 : f32
    %165 = vector.broadcast %cst_56 : f32 to vector<4x512xf32>
    %166 = arith.mulf %165, %162 : vector<4x512xf32>
    %167 = arith.mulf %166, %162 : vector<4x512xf32>
    %168 = arith.mulf %167, %162 : vector<4x512xf32>
    %169 = arith.addf %162, %168 : vector<4x512xf32>
    %cst_57 = arith.constant 0.797884583 : f32
    %170 = vector.broadcast %cst_57 : f32 to vector<4x512xf32>
    %171 = arith.mulf %170, %169 : vector<4x512xf32>
    %172 = math.tanh %171 : vector<4x512xf32>
    %cst_58 = arith.constant 1.000000e+00 : f32
    %173 = vector.broadcast %cst_58 : f32 to vector<4x512xf32>
    %174 = arith.addf %173, %172 : vector<4x512xf32>
    %175 = arith.mulf %164, %174 : vector<4x512xf32>
    %176 = arith.truncf %175 : vector<4x512xf32> to vector<4x512xbf16>
    %c0_59 = arith.constant 0 : index
    %c0_60 = arith.constant 0 : index
    %177 = vector.load %arg38[%c0_59, %c0_60] : memref<512x128xbf16, #tpu.memory_space<vmem>>, vector<512x128xbf16>
    %cst_61 = arith.constant dense<0.000000e+00> : vector<4x128xf32>
    %178 = tpu.matmul %176, %177, %cst_61 {dimension_numbers = #tpu.dot_dimension_numbers<[1], [0], [0], [1], [0, 0, 1, 1], [], []>} : vector<4x512xbf16>, vector<512x128xbf16>, vector<4x128xf32> -> vector<4x128xf32>
    %c0_62 = arith.constant 0 : index
    %c0_63 = arith.constant 0 : index
    %179 = vector.load %arg30[%c0_62, %c0_63] : memref<1x128xf32, #tpu.memory_space<vmem>>, vector<1x128xf32>
    %180 = vector.broadcast %179 : vector<1x128xf32> to vector<4x128xf32>
    %181 = arith.addf %178, %180 : vector<4x128xf32>
    %182 = arith.addf %132, %181 : vector<4x128xf32>
    %c0_64 = arith.constant 0 : index
    %c0_65 = arith.constant 0 : index
    %183 = vector.load %arg46[%c0_64, %c0_65] : memref<1x128xf32, #tpu.memory_space<vmem>>, vector<1x128xf32>
    %c0_66 = arith.constant 0 : index
    %c0_67 = arith.constant 0 : index
    %184 = vector.load %arg45[%c0_66, %c0_67] : memref<1x128xf32, #tpu.memory_space<vmem>>, vector<1x128xf32>
    %cst_68 = arith.constant dense<0.000000e+00> : vector<4xf32>
    %185 = vector.multi_reduction <add>, %182, %cst_68 [1] : vector<4x128xf32> to vector<4xf32>
    %186 = vector.shape_cast %185 : vector<4xf32> to vector<4x1xf32>
    %cst_69 = arith.constant 1.280000e+02 : f32
    %187 = vector.broadcast %cst_69 : f32 to vector<4x1xf32>
    %188 = arith.divf %186, %187 : vector<4x1xf32>
    %189 = vector.broadcast %188 : vector<4x1xf32> to vector<4x128xf32>
    %190 = arith.subf %182, %189 : vector<4x128xf32>
    %191 = arith.mulf %190, %190 : vector<4x128xf32>
    %cst_70 = arith.constant dense<0.000000e+00> : vector<4xf32>
    %192 = vector.multi_reduction <add>, %191, %cst_70 [1] : vector<4x128xf32> to vector<4xf32>
    %193 = vector.shape_cast %192 : vector<4xf32> to vector<4x1xf32>
    %cst_71 = arith.constant 1.280000e+02 : f32
    %194 = vector.broadcast %cst_71 : f32 to vector<4x1xf32>
    %195 = arith.divf %193, %194 : vector<4x1xf32>
    %196 = vector.broadcast %188 : vector<4x1xf32> to vector<4x128xf32>
    %197 = arith.subf %182, %196 : vector<4x128xf32>
    %cst_72 = arith.constant 9.99999997E-7 : f32
    %198 = vector.broadcast %cst_72 : f32 to vector<4x1xf32>
    %199 = arith.addf %195, %198 : vector<4x1xf32>
    %200 = math.rsqrt %199 : vector<4x1xf32>
    %201 = vector.broadcast %200 : vector<4x1xf32> to vector<4x128xf32>
    %202 = arith.mulf %197, %201 : vector<4x128xf32>
    %203 = vector.broadcast %183 : vector<1x128xf32> to vector<4x128xf32>
    %204 = arith.mulf %202, %203 : vector<4x128xf32>
    %205 = vector.broadcast %184 : vector<1x128xf32> to vector<4x128xf32>
    %206 = arith.addf %204, %205 : vector<4x128xf32>
    %207 = arith.truncf %206 : vector<4x128xf32> to vector<4x128xbf16>
    %c0_73 = arith.constant 0 : index
    %c0_74 = arith.constant 0 : index
    %208 = vector.load %arg52[%c0_73, %c0_74] : memref<128x384xbf16, #tpu.memory_space<vmem>>, vector<128x384xbf16>
    %cst_75 = arith.constant dense<0.000000e+00> : vector<4x384xf32>
    %209 = tpu.matmul %207, %208, %cst_75 {dimension_numbers = #tpu.dot_dimension_numbers<[1], [0], [0], [1], [0, 0, 1, 1], [], []>} : vector<4x128xbf16>, vector<128x384xbf16>, vector<4x384xf32> -> vector<4x384xf32>
    %c0_76 = arith.constant 0 : index
    %c0_77 = arith.constant 0 : index
    %210 = vector.load %arg44[%c0_76, %c0_77] : memref<1x384xf32, #tpu.memory_space<vmem>>, vector<1x384xf32>
    %211 = vector.broadcast %210 : vector<1x384xf32> to vector<4x384xf32>
    %212 = arith.addf %209, %211 : vector<4x384xf32>
    %213 = vector.extract_strided_slice %212 {offsets = [0, 0], sizes = [4, 128], strides = [1, 1]} : vector<4x384xf32> to vector<4x128xf32>
    %214 = vector.extract_strided_slice %212 {offsets = [0, 128], sizes = [4, 128], strides = [1, 1]} : vector<4x384xf32> to vector<4x128xf32>
    %215 = vector.extract_strided_slice %212 {offsets = [0, 256], sizes = [4, 128], strides = [1, 1]} : vector<4x384xf32> to vector<4x128xf32>
    %216 = vector.extract_strided_slice %213 {offsets = [0, 0], sizes = [4, 16], strides = [1, 1]} : vector<4x128xf32> to vector<4x16xf32>
    %217 = vector.extract_strided_slice %213 {offsets = [0, 16], sizes = [4, 16], strides = [1, 1]} : vector<4x128xf32> to vector<4x16xf32>
    %218 = vector.extract_strided_slice %213 {offsets = [0, 32], sizes = [4, 16], strides = [1, 1]} : vector<4x128xf32> to vector<4x16xf32>
    %219 = vector.extract_strided_slice %213 {offsets = [0, 48], sizes = [4, 16], strides = [1, 1]} : vector<4x128xf32> to vector<4x16xf32>
    %220 = vector.extract_strided_slice %213 {offsets = [0, 64], sizes = [4, 16], strides = [1, 1]} : vector<4x128xf32> to vector<4x16xf32>
    %221 = vector.extract_strided_slice %213 {offsets = [0, 80], sizes = [4, 16], strides = [1, 1]} : vector<4x128xf32> to vector<4x16xf32>
    %222 = vector.extract_strided_slice %213 {offsets = [0, 96], sizes = [4, 16], strides = [1, 1]} : vector<4x128xf32> to vector<4x16xf32>
    %223 = vector.extract_strided_slice %213 {offsets = [0, 112], sizes = [4, 16], strides = [1, 1]} : vector<4x128xf32> to vector<4x16xf32>
    %224 = vector.shape_cast %216 : vector<4x16xf32> to vector<1x4x16xf32>
    %225 = vector.shape_cast %217 : vector<4x16xf32> to vector<1x4x16xf32>
    %226 = vector.shape_cast %218 : vector<4x16xf32> to vector<1x4x16xf32>
    %227 = vector.shape_cast %219 : vector<4x16xf32> to vector<1x4x16xf32>
    %228 = vector.shape_cast %220 : vector<4x16xf32> to vector<1x4x16xf32>
    %229 = vector.shape_cast %221 : vector<4x16xf32> to vector<1x4x16xf32>
    %230 = vector.shape_cast %222 : vector<4x16xf32> to vector<1x4x16xf32>
    %231 = vector.shape_cast %223 : vector<4x16xf32> to vector<1x4x16xf32>
    %232 = tpu.concatenate %224, %225, %226, %227, %228, %229, %230, %231 in 0 : vector<1x4x16xf32>, vector<1x4x16xf32>, vector<1x4x16xf32>, vector<1x4x16xf32>, vector<1x4x16xf32>, vector<1x4x16xf32>, vector<1x4x16xf32>, vector<1x4x16xf32> -> vector<8x4x16xf32>
    %233 = vector.extract_strided_slice %214 {offsets = [0, 0], sizes = [4, 16], strides = [1, 1]} : vector<4x128xf32> to vector<4x16xf32>
    %234 = vector.extract_strided_slice %214 {offsets = [0, 16], sizes = [4, 16], strides = [1, 1]} : vector<4x128xf32> to vector<4x16xf32>
    %235 = vector.extract_strided_slice %214 {offsets = [0, 32], sizes = [4, 16], strides = [1, 1]} : vector<4x128xf32> to vector<4x16xf32>
    %236 = vector.extract_strided_slice %214 {offsets = [0, 48], sizes = [4, 16], strides = [1, 1]} : vector<4x128xf32> to vector<4x16xf32>
    %237 = vector.extract_strided_slice %214 {offsets = [0, 64], sizes = [4, 16], strides = [1, 1]} : vector<4x128xf32> to vector<4x16xf32>
    %238 = vector.extract_strided_slice %214 {offsets = [0, 80], sizes = [4, 16], strides = [1, 1]} : vector<4x128xf32> to vector<4x16xf32>
    %239 = vector.extract_strided_slice %214 {offsets = [0, 96], sizes = [4, 16], strides = [1, 1]} : vector<4x128xf32> to vector<4x16xf32>
    %240 = vector.extract_strided_slice %214 {offsets = [0, 112], sizes = [4, 16], strides = [1, 1]} : vector<4x128xf32> to vector<4x16xf32>
    %241 = vector.shape_cast %233 : vector<4x16xf32> to vector<1x4x16xf32>
    %242 = vector.shape_cast %234 : vector<4x16xf32> to vector<1x4x16xf32>
    %243 = vector.shape_cast %235 : vector<4x16xf32> to vector<1x4x16xf32>
    %244 = vector.shape_cast %236 : vector<4x16xf32> to vector<1x4x16xf32>
    %245 = vector.shape_cast %237 : vector<4x16xf32> to vector<1x4x16xf32>
    %246 = vector.shape_cast %238 : vector<4x16xf32> to vector<1x4x16xf32>
    %247 = vector.shape_cast %239 : vector<4x16xf32> to vector<1x4x16xf32>
    %248 = vector.shape_cast %240 : vector<4x16xf32> to vector<1x4x16xf32>
    %249 = tpu.concatenate %241, %242, %243, %244, %245, %246, %247, %248 in 0 : vector<1x4x16xf32>, vector<1x4x16xf32>, vector<1x4x16xf32>, vector<1x4x16xf32>, vector<1x4x16xf32>, vector<1x4x16xf32>, vector<1x4x16xf32>, vector<1x4x16xf32> -> vector<8x4x16xf32>
    %250 = vector.extract_strided_slice %215 {offsets = [0, 0], sizes = [4, 16], strides = [1, 1]} : vector<4x128xf32> to vector<4x16xf32>
    %251 = vector.extract_strided_slice %215 {offsets = [0, 16], sizes = [4, 16], strides = [1, 1]} : vector<4x128xf32> to vector<4x16xf32>
    %252 = vector.extract_strided_slice %215 {offsets = [0, 32], sizes = [4, 16], strides = [1, 1]} : vector<4x128xf32> to vector<4x16xf32>
    %253 = vector.extract_strided_slice %215 {offsets = [0, 48], sizes = [4, 16], strides = [1, 1]} : vector<4x128xf32> to vector<4x16xf32>
    %254 = vector.extract_strided_slice %215 {offsets = [0, 64], sizes = [4, 16], strides = [1, 1]} : vector<4x128xf32> to vector<4x16xf32>
    %255 = vector.extract_strided_slice %215 {offsets = [0, 80], sizes = [4, 16], strides = [1, 1]} : vector<4x128xf32> to vector<4x16xf32>
    %256 = vector.extract_strided_slice %215 {offsets = [0, 96], sizes = [4, 16], strides = [1, 1]} : vector<4x128xf32> to vector<4x16xf32>
    %257 = vector.extract_strided_slice %215 {offsets = [0, 112], sizes = [4, 16], strides = [1, 1]} : vector<4x128xf32> to vector<4x16xf32>
    %258 = vector.shape_cast %250 : vector<4x16xf32> to vector<1x4x16xf32>
    %259 = vector.shape_cast %251 : vector<4x16xf32> to vector<1x4x16xf32>
    %260 = vector.shape_cast %252 : vector<4x16xf32> to vector<1x4x16xf32>
    %261 = vector.shape_cast %253 : vector<4x16xf32> to vector<1x4x16xf32>
    %262 = vector.shape_cast %254 : vector<4x16xf32> to vector<1x4x16xf32>
    %263 = vector.shape_cast %255 : vector<4x16xf32> to vector<1x4x16xf32>
    %264 = vector.shape_cast %256 : vector<4x16xf32> to vector<1x4x16xf32>
    %265 = vector.shape_cast %257 : vector<4x16xf32> to vector<1x4x16xf32>
    %266 = tpu.concatenate %258, %259, %260, %261, %262, %263, %264, %265 in 0 : vector<1x4x16xf32>, vector<1x4x16xf32>, vector<1x4x16xf32>, vector<1x4x16xf32>, vector<1x4x16xf32>, vector<1x4x16xf32>, vector<1x4x16xf32>, vector<1x4x16xf32> -> vector<8x4x16xf32>
    %cst_78 = arith.constant 2.500000e-01 : f32
    %267 = vector.broadcast %cst_78 : f32 to vector<8x4x16xf32>
    %268 = arith.mulf %232, %267 : vector<8x4x16xf32>
    "tpu.trace_start"() <{level = 10 : i32, message = "hqd,hkd->hqk"}> : () -> ()
    %cst_79 = arith.constant dense<0.000000e+00> : vector<8x4x4xf32>
    %269 = tpu.matmul %268, %249, %cst_79 {dimension_numbers = #tpu.dot_dimension_numbers<[2], [2], [1], [1], [0, 0, 0, 1, 1, 1], [0], [0]>} : vector<8x4x16xf32>, vector<8x4x16xf32>, vector<8x4x4xf32> -> vector<8x4x4xf32>
    "tpu.trace_stop"() : () -> ()
    %cst_80 = arith.constant dense<0xFF800000> : vector<8x4xf32>
    %270 = vector.multi_reduction <maximumf>, %269, %cst_80 [2] : vector<8x4x4xf32> to vector<8x4xf32>
    %271 = vector.shape_cast %270 : vector<8x4xf32> to vector<8x4x1xf32>
    %272 = vector.broadcast %271 : vector<8x4x1xf32> to vector<8x4x4xf32>
    %273 = arith.subf %269, %272 : vector<8x4x4xf32>
    %274 = math.exp %273 : vector<8x4x4xf32>
    %cst_81 = arith.constant dense<0.000000e+00> : vector<8x4xf32>
    %275 = vector.multi_reduction <add>, %274, %cst_81 [2] : vector<8x4x4xf32> to vector<8x4xf32>
    %276 = vector.shape_cast %275 : vector<8x4xf32> to vector<8x4x1xf32>
    %277 = tpu.reciprocal %276 {approx = true} : vector<8x4x1xf32> -> vector<8x4x1xf32>
    %278 = vector.broadcast %277 : vector<8x4x1xf32> to vector<8x4x4xf32>
    %279 = arith.mulf %274, %278 : vector<8x4x4xf32>
    "tpu.trace_start"() <{level = 10 : i32, message = "hqk,hkd->hqd"}> : () -> ()
    %cst_82 = arith.constant dense<0.000000e+00> : vector<8x4x16xf32>
    %280 = tpu.matmul %279, %266, %cst_82 {dimension_numbers = #tpu.dot_dimension_numbers<[2], [1], [1], [2], [0, 0, 0, 1, 1, 2], [0], [0]>} : vector<8x4x4xf32>, vector<8x4x16xf32>, vector<8x4x16xf32> -> vector<8x4x16xf32>
    "tpu.trace_stop"() : () -> ()
    %c0_83 = arith.constant 0 : index
    %c0_84 = arith.constant 0 : index
    %c0_85 = arith.constant 0 : index
    %281 = vector.load %arg51[%c0_83, %c0_84, %c0_85] : memref<8x16x128xf32, #tpu.memory_space<vmem>>, vector<8x16x128xf32>
    "tpu.trace_start"() <{level = 10 : i32, message = "hqd,hde->hqe"}> : () -> ()
    %cst_86 = arith.constant dense<0.000000e+00> : vector<8x4x128xf32>
    %282 = tpu.matmul %280, %281, %cst_86 {dimension_numbers = #tpu.dot_dimension_numbers<[2], [1], [1], [2], [0, 0, 0, 1, 1, 2], [0], [0]>} : vector<8x4x16xf32>, vector<8x16x128xf32>, vector<8x4x128xf32> -> vector<8x4x128xf32>
    "tpu.trace_stop"() : () -> ()
    %cst_87 = arith.constant dense<0.000000e+00> : vector<4x128xf32>
    %283 = vector.multi_reduction <add>, %282, %cst_87 [0] : vector<8x4x128xf32> to vector<4x128xf32>
    %284 = arith.addf %182, %283 : vector<4x128xf32>
    %c0_88 = arith.constant 0 : index
    %c0_89 = arith.constant 0 : index
    %285 = vector.load %arg43[%c0_88, %c0_89] : memref<1x128xf32, #tpu.memory_space<vmem>>, vector<1x128xf32>
    %286 = vector.broadcast %285 : vector<1x128xf32> to vector<4x128xf32>
    %287 = arith.addf %284, %286 : vector<4x128xf32>
    %c0_90 = arith.constant 0 : index
    %c0_91 = arith.constant 0 : index
    %288 = vector.load %arg48[%c0_90, %c0_91] : memref<1x128xf32, #tpu.memory_space<vmem>>, vector<1x128xf32>
    %c0_92 = arith.constant 0 : index
    %c0_93 = arith.constant 0 : index
    %289 = vector.load %arg47[%c0_92, %c0_93] : memref<1x128xf32, #tpu.memory_space<vmem>>, vector<1x128xf32>
    %cst_94 = arith.constant dense<0.000000e+00> : vector<4xf32>
    %290 = vector.multi_reduction <add>, %287, %cst_94 [1] : vector<4x128xf32> to vector<4xf32>
    %291 = vector.shape_cast %290 : vector<4xf32> to vector<4x1xf32>
    %cst_95 = arith.constant 1.280000e+02 : f32
    %292 = vector.broadcast %cst_95 : f32 to vector<4x1xf32>
    %293 = arith.divf %291, %292 : vector<4x1xf32>
    %294 = vector.broadcast %293 : vector<4x1xf32> to vector<4x128xf32>
    %295 = arith.subf %287, %294 : vector<4x128xf32>
    %296 = arith.mulf %295, %295 : vector<4x128xf32>
    %cst_96 = arith.constant dense<0.000000e+00> : vector<4xf32>
    %297 = vector.multi_reduction <add>, %296, %cst_96 [1] : vector<4x128xf32> to vector<4xf32>
    %298 = vector.shape_cast %297 : vector<4xf32> to vector<4x1xf32>
    %cst_97 = arith.constant 1.280000e+02 : f32
    %299 = vector.broadcast %cst_97 : f32 to vector<4x1xf32>
    %300 = arith.divf %298, %299 : vector<4x1xf32>
    %301 = vector.broadcast %293 : vector<4x1xf32> to vector<4x128xf32>
    %302 = arith.subf %287, %301 : vector<4x128xf32>
    %cst_98 = arith.constant 9.99999997E-7 : f32
    %303 = vector.broadcast %cst_98 : f32 to vector<4x1xf32>
    %304 = arith.addf %300, %303 : vector<4x1xf32>
    %305 = math.rsqrt %304 : vector<4x1xf32>
    %306 = vector.broadcast %305 : vector<4x1xf32> to vector<4x128xf32>
    %307 = arith.mulf %302, %306 : vector<4x128xf32>
    %308 = vector.broadcast %288 : vector<1x128xf32> to vector<4x128xf32>
    %309 = arith.mulf %307, %308 : vector<4x128xf32>
    %310 = vector.broadcast %289 : vector<1x128xf32> to vector<4x128xf32>
    %311 = arith.addf %309, %310 : vector<4x128xf32>
    %312 = arith.truncf %311 : vector<4x128xf32> to vector<4x128xbf16>
    %c0_99 = arith.constant 0 : index
    %c0_100 = arith.constant 0 : index
    %313 = vector.load %arg49[%c0_99, %c0_100] : memref<128x512xbf16, #tpu.memory_space<vmem>>, vector<128x512xbf16>
    %cst_101 = arith.constant dense<0.000000e+00> : vector<4x512xf32>
    %314 = tpu.matmul %312, %313, %cst_101 {dimension_numbers = #tpu.dot_dimension_numbers<[1], [0], [0], [1], [0, 0, 1, 1], [], []>} : vector<4x128xbf16>, vector<128x512xbf16>, vector<4x512xf32> -> vector<4x512xf32>
    %c0_102 = arith.constant 0 : index
    %c0_103 = arith.constant 0 : index
    %315 = vector.load %arg41[%c0_102, %c0_103] : memref<1x512xf32, #tpu.memory_space<vmem>>, vector<1x512xf32>
    %316 = vector.broadcast %315 : vector<1x512xf32> to vector<4x512xf32>
    %317 = arith.addf %314, %316 : vector<4x512xf32>
    %cst_104 = arith.constant 5.000000e-01 : f32
    %318 = vector.broadcast %cst_104 : f32 to vector<4x512xf32>
    %319 = arith.mulf %318, %317 : vector<4x512xf32>
    %cst_105 = arith.constant 4.471500e-02 : f32
    %320 = vector.broadcast %cst_105 : f32 to vector<4x512xf32>
    %321 = arith.mulf %320, %317 : vector<4x512xf32>
    %322 = arith.mulf %321, %317 : vector<4x512xf32>
    %323 = arith.mulf %322, %317 : vector<4x512xf32>
    %324 = arith.addf %317, %323 : vector<4x512xf32>
    %cst_106 = arith.constant 0.797884583 : f32
    %325 = vector.broadcast %cst_106 : f32 to vector<4x512xf32>
    %326 = arith.mulf %325, %324 : vector<4x512xf32>
    %327 = math.tanh %326 : vector<4x512xf32>
    %cst_107 = arith.constant 1.000000e+00 : f32
    %328 = vector.broadcast %cst_107 : f32 to vector<4x512xf32>
    %329 = arith.addf %328, %327 : vector<4x512xf32>
    %330 = arith.mulf %319, %329 : vector<4x512xf32>
    %331 = arith.truncf %330 : vector<4x512xf32> to vector<4x512xbf16>
    %c0_108 = arith.constant 0 : index
    %c0_109 = arith.constant 0 : index
    %332 = vector.load %arg50[%c0_108, %c0_109] : memref<512x128xbf16, #tpu.memory_space<vmem>>, vector<512x128xbf16>
    %cst_110 = arith.constant dense<0.000000e+00> : vector<4x128xf32>
    %333 = tpu.matmul %331, %332, %cst_110 {dimension_numbers = #tpu.dot_dimension_numbers<[1], [0], [0], [1], [0, 0, 1, 1], [], []>} : vector<4x512xbf16>, vector<512x128xbf16>, vector<4x128xf32> -> vector<4x128xf32>
    %c0_111 = arith.constant 0 : index
    %c0_112 = arith.constant 0 : index
    %334 = vector.load %arg42[%c0_111, %c0_112] : memref<1x128xf32, #tpu.memory_space<vmem>>, vector<1x128xf32>
    %335 = vector.broadcast %334 : vector<1x128xf32> to vector<4x128xf32>
    %336 = arith.addf %333, %335 : vector<4x128xf32>
    %337 = arith.addf %287, %336 : vector<4x128xf32>
    %c0_113 = arith.constant 0 : index
    %c0_114 = arith.constant 0 : index
    %338 = vector.load %arg54[%c0_113, %c0_114] : memref<1x128xf32, #tpu.memory_space<vmem>>, vector<1x128xf32>
    %c0_115 = arith.constant 0 : index
    %c0_116 = arith.constant 0 : index
    %339 = vector.load %arg53[%c0_115, %c0_116] : memref<1x128xf32, #tpu.memory_space<vmem>>, vector<1x128xf32>
    %cst_117 = arith.constant dense<0.000000e+00> : vector<4xf32>
    %340 = vector.multi_reduction <add>, %337, %cst_117 [1] : vector<4x128xf32> to vector<4xf32>
    %341 = vector.shape_cast %340 : vector<4xf32> to vector<4x1xf32>
    %cst_118 = arith.constant 1.280000e+02 : f32
    %342 = vector.broadcast %cst_118 : f32 to vector<4x1xf32>
    %343 = arith.divf %341, %342 : vector<4x1xf32>
    %344 = vector.broadcast %343 : vector<4x1xf32> to vector<4x128xf32>
    %345 = arith.subf %337, %344 : vector<4x128xf32>
    %346 = arith.mulf %345, %345 : vector<4x128xf32>
    %cst_119 = arith.constant dense<0.000000e+00> : vector<4xf32>
    %347 = vector.multi_reduction <add>, %346, %cst_119 [1] : vector<4x128xf32> to vector<4xf32>
    %348 = vector.shape_cast %347 : vector<4xf32> to vector<4x1xf32>
    %cst_120 = arith.constant 1.280000e+02 : f32
    %349 = vector.broadcast %cst_120 : f32 to vector<4x1xf32>
    %350 = arith.divf %348, %349 : vector<4x1xf32>
    %351 = vector.broadcast %343 : vector<4x1xf32> to vector<4x128xf32>
    %352 = arith.subf %337, %351 : vector<4x128xf32>
    %cst_121 = arith.constant 9.99999997E-7 : f32
    %353 = vector.broadcast %cst_121 : f32 to vector<4x1xf32>
    %354 = arith.addf %350, %353 : vector<4x1xf32>
    %355 = math.rsqrt %354 : vector<4x1xf32>
    %356 = vector.broadcast %355 : vector<4x1xf32> to vector<4x128xf32>
    %357 = arith.mulf %352, %356 : vector<4x128xf32>
    %358 = vector.broadcast %338 : vector<1x128xf32> to vector<4x128xf32>
    %359 = arith.mulf %357, %358 : vector<4x128xf32>
    %360 = vector.broadcast %339 : vector<1x128xf32> to vector<4x128xf32>
    %361 = arith.addf %359, %360 : vector<4x128xf32>
    %362 = arith.truncf %361 : vector<4x128xf32> to vector<4x128xbf16>
    %c0_122 = arith.constant 0 : index
    %c0_123 = arith.constant 0 : index
    %363 = vector.load %arg61[%c0_122, %c0_123] : memref<128x32xbf16, #tpu.memory_space<vmem>>, vector<128x32xbf16>
    %cst_124 = arith.constant dense<0.000000e+00> : vector<4x32xf32>
    %364 = tpu.matmul %362, %363, %cst_124 {dimension_numbers = #tpu.dot_dimension_numbers<[1], [0], [0], [1], [0, 0, 1, 1], [], []>} : vector<4x128xbf16>, vector<128x32xbf16>, vector<4x32xf32> -> vector<4x32xf32>
    %c0_125 = arith.constant 0 : index
    %c0_126 = arith.constant 0 : index
    %365 = vector.load %arg60[%c0_125, %c0_126] : memref<1x32xf32, #tpu.memory_space<vmem>>, vector<1x32xf32>
    %366 = vector.broadcast %365 : vector<1x32xf32> to vector<4x32xf32>
    %367 = arith.addf %364, %366 : vector<4x32xf32>
    %c0_127 = arith.constant 0 : index
    %c0_128 = arith.constant 0 : index
    %368 = vector.load %arg55[%c0_127, %c0_128] : memref<1x32xf32, #tpu.memory_space<vmem>>, vector<1x32xf32>
    %369 = vector.shape_cast %368 : vector<1x32xf32> to vector<1x32xf32>
    %370 = vector.broadcast %369 : vector<1x32xf32> to vector<16x32xf32>
    %c0_129 = arith.constant 0 : index
    %c0_130 = arith.constant 0 : index
    %371 = vector.load %arg64[%c0_129, %c0_130] : memref<16x32xf32, #tpu.memory_space<vmem>>, vector<16x32xf32>
    tpu.vector_store %arg64[%c0_129, %c0_130], %370 {strides = array<i32>} : memref<16x32xf32, #tpu.memory_space<vmem>>, vector<16x32xf32>,
    %372 = vector.extract_strided_slice %367 {offsets = [0, 0], sizes = [1, 32], strides = [1, 1]} : vector<4x32xf32> to vector<1x32xf32>
    %373 = arith.index_cast %arg0 : i32 to index
    %c0_131 = arith.constant 0 : index
    %374 = memref.load %arg1[%373, %c0_131] : memref<2x16xi32, #tpu.memory_space<smem>>
    %375 = arith.index_cast %374 : i32 to index
    %c0_132 = arith.constant 0 : index
    %376 = vector.load %arg64[%375, %c0_132] : memref<16x32xf32, #tpu.memory_space<vmem>>, vector<1x32xf32>
    tpu.vector_store %arg64[%375, %c0_132], %372 {strides = array<i32>} : memref<16x32xf32, #tpu.memory_space<vmem>>, vector<1x32xf32>,
    %377 = vector.extract_strided_slice %367 {offsets = [1, 0], sizes = [1, 32], strides = [1, 1]} : vector<4x32xf32> to vector<1x32xf32>
    %378 = arith.index_cast %arg0 : i32 to index
    %c1_133 = arith.constant 1 : index
    %379 = memref.load %arg1[%378, %c1_133] : memref<2x16xi32, #tpu.memory_space<smem>>
    %380 = arith.index_cast %379 : i32 to index
    %c0_134 = arith.constant 0 : index
    %381 = vector.load %arg64[%380, %c0_134] : memref<16x32xf32, #tpu.memory_space<vmem>>, vector<1x32xf32>
    tpu.vector_store %arg64[%380, %c0_134], %377 {strides = array<i32>} : memref<16x32xf32, #tpu.memory_space<vmem>>, vector<1x32xf32>,
    %382 = vector.extract_strided_slice %367 {offsets = [2, 0], sizes = [1, 32], strides = [1, 1]} : vector<4x32xf32> to vector<1x32xf32>
    %383 = arith.index_cast %arg0 : i32 to index
    %c2_135 = arith.constant 2 : index
    %384 = memref.load %arg1[%383, %c2_135] : memref<2x16xi32, #tpu.memory_space<smem>>
    %385 = arith.index_cast %384 : i32 to index
    %c0_136 = arith.constant 0 : index
    %386 = vector.load %arg64[%385, %c0_136] : memref<16x32xf32, #tpu.memory_space<vmem>>, vector<1x32xf32>
    tpu.vector_store %arg64[%385, %c0_136], %382 {strides = array<i32>} : memref<16x32xf32, #tpu.memory_space<vmem>>, vector<1x32xf32>,
    %387 = vector.extract_strided_slice %367 {offsets = [3, 0], sizes = [1, 32], strides = [1, 1]} : vector<4x32xf32> to vector<1x32xf32>
    %388 = arith.index_cast %arg0 : i32 to index
    %c3_137 = arith.constant 3 : index
    %389 = memref.load %arg1[%388, %c3_137] : memref<2x16xi32, #tpu.memory_space<smem>>
    %390 = arith.index_cast %389 : i32 to index
    %c0_138 = arith.constant 0 : index
    %391 = vector.load %arg64[%390, %c0_138] : memref<16x32xf32, #tpu.memory_space<vmem>>, vector<1x32xf32>
    tpu.vector_store %arg64[%390, %c0_138], %387 {strides = array<i32>} : memref<16x32xf32, #tpu.memory_space<vmem>>, vector<1x32xf32>,
    %c0_139 = arith.constant 0 : index
    %c0_140 = arith.constant 0 : index
    %392 = vector.load %arg64[%c0_139, %c0_140] : memref<16x32xf32, #tpu.memory_space<vmem>>, vector<16x32xf32>
    %c0_141 = arith.constant 0 : index
    %c0_142 = arith.constant 0 : index
    %393 = vector.load %arg58[%c0_141, %c0_142] : memref<16x32xf32, #tpu.memory_space<vmem>>, vector<16x32xf32>
    %394 = arith.addf %392, %393 : vector<16x32xf32>
    %c0_143 = arith.constant 0 : index
    %c0_144 = arith.constant 0 : index
    %395 = vector.load %arg8[%c0_143, %c0_144] : memref<1x32xf32, #tpu.memory_space<vmem>>, vector<1x32xf32>
    %c0_145 = arith.constant 0 : index
    %c0_146 = arith.constant 0 : index
    %396 = vector.load %arg7[%c0_145, %c0_146] : memref<1x32xf32, #tpu.memory_space<vmem>>, vector<1x32xf32>
    %cst_147 = arith.constant dense<0.000000e+00> : vector<16xf32>
    %397 = vector.multi_reduction <add>, %394, %cst_147 [1] : vector<16x32xf32> to vector<16xf32>
    %398 = vector.shape_cast %397 : vector<16xf32> to vector<16x1xf32>
    %cst_148 = arith.constant 3.200000e+01 : f32
    %399 = vector.broadcast %cst_148 : f32 to vector<16x1xf32>
    %400 = arith.divf %398, %399 : vector<16x1xf32>
    %401 = vector.broadcast %400 : vector<16x1xf32> to vector<16x32xf32>
    %402 = arith.subf %394, %401 : vector<16x32xf32>
    %403 = arith.mulf %402, %402 : vector<16x32xf32>
    %cst_149 = arith.constant dense<0.000000e+00> : vector<16xf32>
    %404 = vector.multi_reduction <add>, %403, %cst_149 [1] : vector<16x32xf32> to vector<16xf32>
    %405 = vector.shape_cast %404 : vector<16xf32> to vector<16x1xf32>
    %cst_150 = arith.constant 3.200000e+01 : f32
    %406 = vector.broadcast %cst_150 : f32 to vector<16x1xf32>
    %407 = arith.divf %405, %406 : vector<16x1xf32>
    %408 = vector.broadcast %400 : vector<16x1xf32> to vector<16x32xf32>
    %409 = arith.subf %394, %408 : vector<16x32xf32>
    %cst_151 = arith.constant 9.99999997E-7 : f32
    %410 = vector.broadcast %cst_151 : f32 to vector<16x1xf32>
    %411 = arith.addf %407, %410 : vector<16x1xf32>
    %412 = math.rsqrt %411 : vector<16x1xf32>
    %413 = vector.broadcast %412 : vector<16x1xf32> to vector<16x32xf32>
    %414 = arith.mulf %409, %413 : vector<16x32xf32>
    %415 = vector.broadcast %395 : vector<1x32xf32> to vector<16x32xf32>
    %416 = arith.mulf %414, %415 : vector<16x32xf32>
    %417 = vector.broadcast %396 : vector<1x32xf32> to vector<16x32xf32>
    %418 = arith.addf %416, %417 : vector<16x32xf32>
    %419 = arith.truncf %418 : vector<16x32xf32> to vector<16x32xbf16>
    %c0_152 = arith.constant 0 : index
    %c0_153 = arith.constant 0 : index
    %420 = vector.load %arg14[%c0_152, %c0_153] : memref<32x96xbf16, #tpu.memory_space<vmem>>, vector<32x96xbf16>
    %cst_154 = arith.constant dense<0.000000e+00> : vector<16x96xf32>
    %421 = tpu.matmul %419, %420, %cst_154 {dimension_numbers = #tpu.dot_dimension_numbers<[1], [0], [0], [1], [0, 0, 1, 1], [], []>} : vector<16x32xbf16>, vector<32x96xbf16>, vector<16x96xf32> -> vector<16x96xf32>
    %c0_155 = arith.constant 0 : index
    %c0_156 = arith.constant 0 : index
    %422 = vector.load %arg6[%c0_155, %c0_156] : memref<1x96xf32, #tpu.memory_space<vmem>>, vector<1x96xf32>
    %423 = vector.broadcast %422 : vector<1x96xf32> to vector<16x96xf32>
    %424 = arith.addf %421, %423 : vector<16x96xf32>
    %425 = vector.extract_strided_slice %424 {offsets = [0, 0], sizes = [16, 32], strides = [1, 1]} : vector<16x96xf32> to vector<16x32xf32>
    %426 = vector.extract_strided_slice %424 {offsets = [0, 32], sizes = [16, 32], strides = [1, 1]} : vector<16x96xf32> to vector<16x32xf32>
    %427 = vector.extract_strided_slice %424 {offsets = [0, 64], sizes = [16, 32], strides = [1, 1]} : vector<16x96xf32> to vector<16x32xf32>
    %428 = vector.extract_strided_slice %425 {offsets = [0, 0], sizes = [16, 4], strides = [1, 1]} : vector<16x32xf32> to vector<16x4xf32>
    %429 = vector.extract_strided_slice %425 {offsets = [0, 4], sizes = [16, 4], strides = [1, 1]} : vector<16x32xf32> to vector<16x4xf32>
    %430 = vector.extract_strided_slice %425 {offsets = [0, 8], sizes = [16, 4], strides = [1, 1]} : vector<16x32xf32> to vector<16x4xf32>
    %431 = vector.extract_strided_slice %425 {offsets = [0, 12], sizes = [16, 4], strides = [1, 1]} : vector<16x32xf32> to vector<16x4xf32>
    %432 = vector.extract_strided_slice %425 {offsets = [0, 16], sizes = [16, 4], strides = [1, 1]} : vector<16x32xf32> to vector<16x4xf32>
    %433 = vector.extract_strided_slice %425 {offsets = [0, 20], sizes = [16, 4], strides = [1, 1]} : vector<16x32xf32> to vector<16x4xf32>
    %434 = vector.extract_strided_slice %425 {offsets = [0, 24], sizes = [16, 4], strides = [1, 1]} : vector<16x32xf32> to vector<16x4xf32>
    %435 = vector.extract_strided_slice %425 {offsets = [0, 28], sizes = [16, 4], strides = [1, 1]} : vector<16x32xf32> to vector<16x4xf32>
    %436 = vector.shape_cast %428 : vector<16x4xf32> to vector<1x16x4xf32>
    %437 = vector.shape_cast %429 : vector<16x4xf32> to vector<1x16x4xf32>
    %438 = vector.shape_cast %430 : vector<16x4xf32> to vector<1x16x4xf32>
    %439 = vector.shape_cast %431 : vector<16x4xf32> to vector<1x16x4xf32>
    %440 = vector.shape_cast %432 : vector<16x4xf32> to vector<1x16x4xf32>
    %441 = vector.shape_cast %433 : vector<16x4xf32> to vector<1x16x4xf32>
    %442 = vector.shape_cast %434 : vector<16x4xf32> to vector<1x16x4xf32>
    %443 = vector.shape_cast %435 : vector<16x4xf32> to vector<1x16x4xf32>
    %444 = tpu.concatenate %436, %437, %438, %439, %440, %441, %442, %443 in 0 : vector<1x16x4xf32>, vector<1x16x4xf32>, vector<1x16x4xf32>, vector<1x16x4xf32>, vector<1x16x4xf32>, vector<1x16x4xf32>, vector<1x16x4xf32>, vector<1x16x4xf32> -> vector<8x16x4xf32>
    %445 = vector.extract_strided_slice %426 {offsets = [0, 0], sizes = [16, 4], strides = [1, 1]} : vector<16x32xf32> to vector<16x4xf32>
    %446 = vector.extract_strided_slice %426 {offsets = [0, 4], sizes = [16, 4], strides = [1, 1]} : vector<16x32xf32> to vector<16x4xf32>
    %447 = vector.extract_strided_slice %426 {offsets = [0, 8], sizes = [16, 4], strides = [1, 1]} : vector<16x32xf32> to vector<16x4xf32>
    %448 = vector.extract_strided_slice %426 {offsets = [0, 12], sizes = [16, 4], strides = [1, 1]} : vector<16x32xf32> to vector<16x4xf32>
    %449 = vector.extract_strided_slice %426 {offsets = [0, 16], sizes = [16, 4], strides = [1, 1]} : vector<16x32xf32> to vector<16x4xf32>
    %450 = vector.extract_strided_slice %426 {offsets = [0, 20], sizes = [16, 4], strides = [1, 1]} : vector<16x32xf32> to vector<16x4xf32>
    %451 = vector.extract_strided_slice %426 {offsets = [0, 24], sizes = [16, 4], strides = [1, 1]} : vector<16x32xf32> to vector<16x4xf32>
    %452 = vector.extract_strided_slice %426 {offsets = [0, 28], sizes = [16, 4], strides = [1, 1]} : vector<16x32xf32> to vector<16x4xf32>
    %453 = vector.shape_cast %445 : vector<16x4xf32> to vector<1x16x4xf32>
    %454 = vector.shape_cast %446 : vector<16x4xf32> to vector<1x16x4xf32>
    %455 = vector.shape_cast %447 : vector<16x4xf32> to vector<1x16x4xf32>
    %456 = vector.shape_cast %448 : vector<16x4xf32> to vector<1x16x4xf32>
    %457 = vector.shape_cast %449 : vector<16x4xf32> to vector<1x16x4xf32>
    %458 = vector.shape_cast %450 : vector<16x4xf32> to vector<1x16x4xf32>
    %459 = vector.shape_cast %451 : vector<16x4xf32> to vector<1x16x4xf32>
    %460 = vector.shape_cast %452 : vector<16x4xf32> to vector<1x16x4xf32>
    %461 = tpu.concatenate %453, %454, %455, %456, %457, %458, %459, %460 in 0 : vector<1x16x4xf32>, vector<1x16x4xf32>, vector<1x16x4xf32>, vector<1x16x4xf32>, vector<1x16x4xf32>, vector<1x16x4xf32>, vector<1x16x4xf32>, vector<1x16x4xf32> -> vector<8x16x4xf32>
    %462 = vector.extract_strided_slice %427 {offsets = [0, 0], sizes = [16, 4], strides = [1, 1]} : vector<16x32xf32> to vector<16x4xf32>
    %463 = vector.extract_strided_slice %427 {offsets = [0, 4], sizes = [16, 4], strides = [1, 1]} : vector<16x32xf32> to vector<16x4xf32>
    %464 = vector.extract_strided_slice %427 {offsets = [0, 8], sizes = [16, 4], strides = [1, 1]} : vector<16x32xf32> to vector<16x4xf32>
    %465 = vector.extract_strided_slice %427 {offsets = [0, 12], sizes = [16, 4], strides = [1, 1]} : vector<16x32xf32> to vector<16x4xf32>
    %466 = vector.extract_strided_slice %427 {offsets = [0, 16], sizes = [16, 4], strides = [1, 1]} : vector<16x32xf32> to vector<16x4xf32>
    %467 = vector.extract_strided_slice %427 {offsets = [0, 20], sizes = [16, 4], strides = [1, 1]} : vector<16x32xf32> to vector<16x4xf32>
    %468 = vector.extract_strided_slice %427 {offsets = [0, 24], sizes = [16, 4], strides = [1, 1]} : vector<16x32xf32> to vector<16x4xf32>
    %469 = vector.extract_strided_slice %427 {offsets = [0, 28], sizes = [16, 4], strides = [1, 1]} : vector<16x32xf32> to vector<16x4xf32>
    %470 = vector.shape_cast %462 : vector<16x4xf32> to vector<1x16x4xf32>
    %471 = vector.shape_cast %463 : vector<16x4xf32> to vector<1x16x4xf32>
    %472 = vector.shape_cast %464 : vector<16x4xf32> to vector<1x16x4xf32>
    %473 = vector.shape_cast %465 : vector<16x4xf32> to vector<1x16x4xf32>
    %474 = vector.shape_cast %466 : vector<16x4xf32> to vector<1x16x4xf32>
    %475 = vector.shape_cast %467 : vector<16x4xf32> to vector<1x16x4xf32>
    %476 = vector.shape_cast %468 : vector<16x4xf32> to vector<1x16x4xf32>
    %477 = vector.shape_cast %469 : vector<16x4xf32> to vector<1x16x4xf32>
    %478 = tpu.concatenate %470, %471, %472, %473, %474, %475, %476, %477 in 0 : vector<1x16x4xf32>, vector<1x16x4xf32>, vector<1x16x4xf32>, vector<1x16x4xf32>, vector<1x16x4xf32>, vector<1x16x4xf32>, vector<1x16x4xf32>, vector<1x16x4xf32> -> vector<8x16x4xf32>
    %cst_157 = arith.constant 5.000000e-01 : f32
    %479 = vector.broadcast %cst_157 : f32 to vector<8x16x4xf32>
    %480 = arith.mulf %444, %479 : vector<8x16x4xf32>
    "tpu.trace_start"() <{level = 10 : i32, message = "hqd,hkd->hqk"}> : () -> ()
    %cst_158 = arith.constant dense<0.000000e+00> : vector<8x16x16xf32>
    %481 = tpu.matmul %480, %461, %cst_158 {dimension_numbers = #tpu.dot_dimension_numbers<[2], [2], [1], [1], [0, 0, 0, 1, 1, 1], [0], [0]>} : vector<8x16x4xf32>, vector<8x16x4xf32>, vector<8x16x16xf32> -> vector<8x16x16xf32>
    "tpu.trace_stop"() : () -> ()
    %cst_159 = arith.constant dense<0xFF800000> : vector<8x16xf32>
    %482 = vector.multi_reduction <maximumf>, %481, %cst_159 [2] : vector<8x16x16xf32> to vector<8x16xf32>
    %483 = vector.shape_cast %482 : vector<8x16xf32> to vector<8x16x1xf32>
    %484 = vector.broadcast %483 : vector<8x16x1xf32> to vector<8x16x16xf32>
    %485 = arith.subf %481, %484 : vector<8x16x16xf32>
    %486 = math.exp %485 : vector<8x16x16xf32>
    %cst_160 = arith.constant dense<0.000000e+00> : vector<8x16xf32>
    %487 = vector.multi_reduction <add>, %486, %cst_160 [2] : vector<8x16x16xf32> to vector<8x16xf32>
    %488 = vector.shape_cast %487 : vector<8x16xf32> to vector<8x16x1xf32>
    %489 = tpu.reciprocal %488 {approx = true} : vector<8x16x1xf32> -> vector<8x16x1xf32>
    %490 = vector.broadcast %489 : vector<8x16x1xf32> to vector<8x16x16xf32>
    %491 = arith.mulf %486, %490 : vector<8x16x16xf32>
    "tpu.trace_start"() <{level = 10 : i32, message = "hqk,hkd->hqd"}> : () -> ()
    %cst_161 = arith.constant dense<0.000000e+00> : vector<8x16x4xf32>
    %492 = tpu.matmul %491, %478, %cst_161 {dimension_numbers = #tpu.dot_dimension_numbers<[2], [1], [1], [2], [0, 0, 0, 1, 1, 2], [0], [0]>} : vector<8x16x16xf32>, vector<8x16x4xf32>, vector<8x16x4xf32> -> vector<8x16x4xf32>
    "tpu.trace_stop"() : () -> ()
    %c0_162 = arith.constant 0 : index
    %c0_163 = arith.constant 0 : index
    %c0_164 = arith.constant 0 : index
    %493 = vector.load %arg13[%c0_162, %c0_163, %c0_164] : memref<8x4x32xf32, #tpu.memory_space<vmem>>, vector<8x4x32xf32>
    "tpu.trace_start"() <{level = 10 : i32, message = "hqd,hde->hqe"}> : () -> ()
    %cst_165 = arith.constant dense<0.000000e+00> : vector<8x16x32xf32>
    %494 = tpu.matmul %492, %493, %cst_165 {dimension_numbers = #tpu.dot_dimension_numbers<[2], [1], [1], [2], [0, 0, 0, 1, 1, 2], [0], [0]>} : vector<8x16x4xf32>, vector<8x4x32xf32>, vector<8x16x32xf32> -> vector<8x16x32xf32>
    "tpu.trace_stop"() : () -> ()
    %cst_166 = arith.constant dense<0.000000e+00> : vector<16x32xf32>
    %495 = vector.multi_reduction <add>, %494, %cst_166 [0] : vector<8x16x32xf32> to vector<16x32xf32>
    %496 = arith.addf %394, %495 : vector<16x32xf32>
    %c0_167 = arith.constant 0 : index
    %c0_168 = arith.constant 0 : index
    %497 = vector.load %arg5[%c0_167, %c0_168] : memref<1x32xf32, #tpu.memory_space<vmem>>, vector<1x32xf32>
    %498 = vector.broadcast %497 : vector<1x32xf32> to vector<16x32xf32>
    %499 = arith.addf %496, %498 : vector<16x32xf32>
    %c0_169 = arith.constant 0 : index
    %c0_170 = arith.constant 0 : index
    %500 = vector.load %arg10[%c0_169, %c0_170] : memref<1x32xf32, #tpu.memory_space<vmem>>, vector<1x32xf32>
    %c0_171 = arith.constant 0 : index
    %c0_172 = arith.constant 0 : index
    %501 = vector.load %arg9[%c0_171, %c0_172] : memref<1x32xf32, #tpu.memory_space<vmem>>, vector<1x32xf32>
    %cst_173 = arith.constant dense<0.000000e+00> : vector<16xf32>
    %502 = vector.multi_reduction <add>, %499, %cst_173 [1] : vector<16x32xf32> to vector<16xf32>
    %503 = vector.shape_cast %502 : vector<16xf32> to vector<16x1xf32>
    %cst_174 = arith.constant 3.200000e+01 : f32
    %504 = vector.broadcast %cst_174 : f32 to vector<16x1xf32>
    %505 = arith.divf %503, %504 : vector<16x1xf32>
    %506 = vector.broadcast %505 : vector<16x1xf32> to vector<16x32xf32>
    %507 = arith.subf %499, %506 : vector<16x32xf32>
    %508 = arith.mulf %507, %507 : vector<16x32xf32>
    %cst_175 = arith.constant dense<0.000000e+00> : vector<16xf32>
    %509 = vector.multi_reduction <add>, %508, %cst_175 [1] : vector<16x32xf32> to vector<16xf32>
    %510 = vector.shape_cast %509 : vector<16xf32> to vector<16x1xf32>
    %cst_176 = arith.constant 3.200000e+01 : f32
    %511 = vector.broadcast %cst_176 : f32 to vector<16x1xf32>
    %512 = arith.divf %510, %511 : vector<16x1xf32>
    %513 = vector.broadcast %505 : vector<16x1xf32> to vector<16x32xf32>
    %514 = arith.subf %499, %513 : vector<16x32xf32>
    %cst_177 = arith.constant 9.99999997E-7 : f32
    %515 = vector.broadcast %cst_177 : f32 to vector<16x1xf32>
    %516 = arith.addf %512, %515 : vector<16x1xf32>
    %517 = math.rsqrt %516 : vector<16x1xf32>
    %518 = vector.broadcast %517 : vector<16x1xf32> to vector<16x32xf32>
    %519 = arith.mulf %514, %518 : vector<16x32xf32>
    %520 = vector.broadcast %500 : vector<1x32xf32> to vector<16x32xf32>
    %521 = arith.mulf %519, %520 : vector<16x32xf32>
    %522 = vector.broadcast %501 : vector<1x32xf32> to vector<16x32xf32>
    %523 = arith.addf %521, %522 : vector<16x32xf32>
    %524 = arith.truncf %523 : vector<16x32xf32> to vector<16x32xbf16>
    %c0_178 = arith.constant 0 : index
    %c0_179 = arith.constant 0 : index
    %525 = vector.load %arg11[%c0_178, %c0_179] : memref<32x128xbf16, #tpu.memory_space<vmem>>, vector<32x128xbf16>
    %cst_180 = arith.constant dense<0.000000e+00> : vector<16x128xf32>
    %526 = tpu.matmul %524, %525, %cst_180 {dimension_numbers = #tpu.dot_dimension_numbers<[1], [0], [0], [1], [0, 0, 1, 1], [], []>} : vector<16x32xbf16>, vector<32x128xbf16>, vector<16x128xf32> -> vector<16x128xf32>
    %c0_181 = arith.constant 0 : index
    %c0_182 = arith.constant 0 : index
    %527 = vector.load %arg3[%c0_181, %c0_182] : memref<1x128xf32, #tpu.memory_space<vmem>>, vector<1x128xf32>
    %528 = vector.broadcast %527 : vector<1x128xf32> to vector<16x128xf32>
    %529 = arith.addf %526, %528 : vector<16x128xf32>
    %cst_183 = arith.constant 5.000000e-01 : f32
    %530 = vector.broadcast %cst_183 : f32 to vector<16x128xf32>
    %531 = arith.mulf %530, %529 : vector<16x128xf32>
    %cst_184 = arith.constant 4.471500e-02 : f32
    %532 = vector.broadcast %cst_184 : f32 to vector<16x128xf32>
    %533 = arith.mulf %532, %529 : vector<16x128xf32>
    %534 = arith.mulf %533, %529 : vector<16x128xf32>
    %535 = arith.mulf %534, %529 : vector<16x128xf32>
    %536 = arith.addf %529, %535 : vector<16x128xf32>
    %cst_185 = arith.constant 0.797884583 : f32
    %537 = vector.broadcast %cst_185 : f32 to vector<16x128xf32>
    %538 = arith.mulf %537, %536 : vector<16x128xf32>
    %539 = math.tanh %538 : vector<16x128xf32>
    %cst_186 = arith.constant 1.000000e+00 : f32
    %540 = vector.broadcast %cst_186 : f32 to vector<16x128xf32>
    %541 = arith.addf %540, %539 : vector<16x128xf32>
    %542 = arith.mulf %531, %541 : vector<16x128xf32>
    %543 = arith.truncf %542 : vector<16x128xf32> to vector<16x128xbf16>
    %c0_187 = arith.constant 0 : index
    %c0_188 = arith.constant 0 : index
    %544 = vector.load %arg12[%c0_187, %c0_188] : memref<128x32xbf16, #tpu.memory_space<vmem>>, vector<128x32xbf16>
    %cst_189 = arith.constant dense<0.000000e+00> : vector<16x32xf32>
    %545 = tpu.matmul %543, %544, %cst_189 {dimension_numbers = #tpu.dot_dimension_numbers<[1], [0], [0], [1], [0, 0, 1, 1], [], []>} : vector<16x128xbf16>, vector<128x32xbf16>, vector<16x32xf32> -> vector<16x32xf32>
    %c0_190 = arith.constant 0 : index
    %c0_191 = arith.constant 0 : index
    %546 = vector.load %arg4[%c0_190, %c0_191] : memref<1x32xf32, #tpu.memory_space<vmem>>, vector<1x32xf32>
    %547 = vector.broadcast %546 : vector<1x32xf32> to vector<16x32xf32>
    %548 = arith.addf %545, %547 : vector<16x32xf32>
    %549 = arith.addf %499, %548 : vector<16x32xf32>
    %c0_192 = arith.constant 0 : index
    %c0_193 = arith.constant 0 : index
    %550 = vector.load %arg20[%c0_192, %c0_193] : memref<1x32xf32, #tpu.memory_space<vmem>>, vector<1x32xf32>
    %c0_194 = arith.constant 0 : index
    %c0_195 = arith.constant 0 : index
    %551 = vector.load %arg19[%c0_194, %c0_195] : memref<1x32xf32, #tpu.memory_space<vmem>>, vector<1x32xf32>
    %cst_196 = arith.constant dense<0.000000e+00> : vector<16xf32>
    %552 = vector.multi_reduction <add>, %549, %cst_196 [1] : vector<16x32xf32> to vector<16xf32>
    %553 = vector.shape_cast %552 : vector<16xf32> to vector<16x1xf32>
    %cst_197 = arith.constant 3.200000e+01 : f32
    %554 = vector.broadcast %cst_197 : f32 to vector<16x1xf32>
    %555 = arith.divf %553, %554 : vector<16x1xf32>
    %556 = vector.broadcast %555 : vector<16x1xf32> to vector<16x32xf32>
    %557 = arith.subf %549, %556 : vector<16x32xf32>
    %558 = arith.mulf %557, %557 : vector<16x32xf32>
    %cst_198 = arith.constant dense<0.000000e+00> : vector<16xf32>
    %559 = vector.multi_reduction <add>, %558, %cst_198 [1] : vector<16x32xf32> to vector<16xf32>
    %560 = vector.shape_cast %559 : vector<16xf32> to vector<16x1xf32>
    %cst_199 = arith.constant 3.200000e+01 : f32
    %561 = vector.broadcast %cst_199 : f32 to vector<16x1xf32>
    %562 = arith.divf %560, %561 : vector<16x1xf32>
    %563 = vector.broadcast %555 : vector<16x1xf32> to vector<16x32xf32>
    %564 = arith.subf %549, %563 : vector<16x32xf32>
    %cst_200 = arith.constant 9.99999997E-7 : f32
    %565 = vector.broadcast %cst_200 : f32 to vector<16x1xf32>
    %566 = arith.addf %562, %565 : vector<16x1xf32>
    %567 = math.rsqrt %566 : vector<16x1xf32>
    %568 = vector.broadcast %567 : vector<16x1xf32> to vector<16x32xf32>
    %569 = arith.mulf %564, %568 : vector<16x32xf32>
    %570 = vector.broadcast %550 : vector<1x32xf32> to vector<16x32xf32>
    %571 = arith.mulf %569, %570 : vector<16x32xf32>
    %572 = vector.broadcast %551 : vector<1x32xf32> to vector<16x32xf32>
    %573 = arith.addf %571, %572 : vector<16x32xf32>
    %574 = arith.truncf %573 : vector<16x32xf32> to vector<16x32xbf16>
    %c0_201 = arith.constant 0 : index
    %c0_202 = arith.constant 0 : index
    %575 = vector.load %arg26[%c0_201, %c0_202] : memref<32x96xbf16, #tpu.memory_space<vmem>>, vector<32x96xbf16>
    %cst_203 = arith.constant dense<0.000000e+00> : vector<16x96xf32>
    %576 = tpu.matmul %574, %575, %cst_203 {dimension_numbers = #tpu.dot_dimension_numbers<[1], [0], [0], [1], [0, 0, 1, 1], [], []>} : vector<16x32xbf16>, vector<32x96xbf16>, vector<16x96xf32> -> vector<16x96xf32>
    %c0_204 = arith.constant 0 : index
    %c0_205 = arith.constant 0 : index
    %577 = vector.load %arg18[%c0_204, %c0_205] : memref<1x96xf32, #tpu.memory_space<vmem>>, vector<1x96xf32>
    %578 = vector.broadcast %577 : vector<1x96xf32> to vector<16x96xf32>
    %579 = arith.addf %576, %578 : vector<16x96xf32>
    %580 = vector.extract_strided_slice %579 {offsets = [0, 0], sizes = [16, 32], strides = [1, 1]} : vector<16x96xf32> to vector<16x32xf32>
    %581 = vector.extract_strided_slice %579 {offsets = [0, 32], sizes = [16, 32], strides = [1, 1]} : vector<16x96xf32> to vector<16x32xf32>
    %582 = vector.extract_strided_slice %579 {offsets = [0, 64], sizes = [16, 32], strides = [1, 1]} : vector<16x96xf32> to vector<16x32xf32>
    %583 = vector.extract_strided_slice %580 {offsets = [0, 0], sizes = [16, 4], strides = [1, 1]} : vector<16x32xf32> to vector<16x4xf32>
    %584 = vector.extract_strided_slice %580 {offsets = [0, 4], sizes = [16, 4], strides = [1, 1]} : vector<16x32xf32> to vector<16x4xf32>
    %585 = vector.extract_strided_slice %580 {offsets = [0, 8], sizes = [16, 4], strides = [1, 1]} : vector<16x32xf32> to vector<16x4xf32>
    %586 = vector.extract_strided_slice %580 {offsets = [0, 12], sizes = [16, 4], strides = [1, 1]} : vector<16x32xf32> to vector<16x4xf32>
    %587 = vector.extract_strided_slice %580 {offsets = [0, 16], sizes = [16, 4], strides = [1, 1]} : vector<16x32xf32> to vector<16x4xf32>
    %588 = vector.extract_strided_slice %580 {offsets = [0, 20], sizes = [16, 4], strides = [1, 1]} : vector<16x32xf32> to vector<16x4xf32>
    %589 = vector.extract_strided_slice %580 {offsets = [0, 24], sizes = [16, 4], strides = [1, 1]} : vector<16x32xf32> to vector<16x4xf32>
    %590 = vector.extract_strided_slice %580 {offsets = [0, 28], sizes = [16, 4], strides = [1, 1]} : vector<16x32xf32> to vector<16x4xf32>
    %591 = vector.shape_cast %583 : vector<16x4xf32> to vector<1x16x4xf32>
    %592 = vector.shape_cast %584 : vector<16x4xf32> to vector<1x16x4xf32>
    %593 = vector.shape_cast %585 : vector<16x4xf32> to vector<1x16x4xf32>
    %594 = vector.shape_cast %586 : vector<16x4xf32> to vector<1x16x4xf32>
    %595 = vector.shape_cast %587 : vector<16x4xf32> to vector<1x16x4xf32>
    %596 = vector.shape_cast %588 : vector<16x4xf32> to vector<1x16x4xf32>
    %597 = vector.shape_cast %589 : vector<16x4xf32> to vector<1x16x4xf32>
    %598 = vector.shape_cast %590 : vector<16x4xf32> to vector<1x16x4xf32>
    %599 = tpu.concatenate %591, %592, %593, %594, %595, %596, %597, %598 in 0 : vector<1x16x4xf32>, vector<1x16x4xf32>, vector<1x16x4xf32>, vector<1x16x4xf32>, vector<1x16x4xf32>, vector<1x16x4xf32>, vector<1x16x4xf32>, vector<1x16x4xf32> -> vector<8x16x4xf32>
    %600 = vector.extract_strided_slice %581 {offsets = [0, 0], sizes = [16, 4], strides = [1, 1]} : vector<16x32xf32> to vector<16x4xf32>
    %601 = vector.extract_strided_slice %581 {offsets = [0, 4], sizes = [16, 4], strides = [1, 1]} : vector<16x32xf32> to vector<16x4xf32>
    %602 = vector.extract_strided_slice %581 {offsets = [0, 8], sizes = [16, 4], strides = [1, 1]} : vector<16x32xf32> to vector<16x4xf32>
    %603 = vector.extract_strided_slice %581 {offsets = [0, 12], sizes = [16, 4], strides = [1, 1]} : vector<16x32xf32> to vector<16x4xf32>
    %604 = vector.extract_strided_slice %581 {offsets = [0, 16], sizes = [16, 4], strides = [1, 1]} : vector<16x32xf32> to vector<16x4xf32>
    %605 = vector.extract_strided_slice %581 {offsets = [0, 20], sizes = [16, 4], strides = [1, 1]} : vector<16x32xf32> to vector<16x4xf32>
    %606 = vector.extract_strided_slice %581 {offsets = [0, 24], sizes = [16, 4], strides = [1, 1]} : vector<16x32xf32> to vector<16x4xf32>
    %607 = vector.extract_strided_slice %581 {offsets = [0, 28], sizes = [16, 4], strides = [1, 1]} : vector<16x32xf32> to vector<16x4xf32>
    %608 = vector.shape_cast %600 : vector<16x4xf32> to vector<1x16x4xf32>
    %609 = vector.shape_cast %601 : vector<16x4xf32> to vector<1x16x4xf32>
    %610 = vector.shape_cast %602 : vector<16x4xf32> to vector<1x16x4xf32>
    %611 = vector.shape_cast %603 : vector<16x4xf32> to vector<1x16x4xf32>
    %612 = vector.shape_cast %604 : vector<16x4xf32> to vector<1x16x4xf32>
    %613 = vector.shape_cast %605 : vector<16x4xf32> to vector<1x16x4xf32>
    %614 = vector.shape_cast %606 : vector<16x4xf32> to vector<1x16x4xf32>
    %615 = vector.shape_cast %607 : vector<16x4xf32> to vector<1x16x4xf32>
    %616 = tpu.concatenate %608, %609, %610, %611, %612, %613, %614, %615 in 0 : vector<1x16x4xf32>, vector<1x16x4xf32>, vector<1x16x4xf32>, vector<1x16x4xf32>, vector<1x16x4xf32>, vector<1x16x4xf32>, vector<1x16x4xf32>, vector<1x16x4xf32> -> vector<8x16x4xf32>
    %617 = vector.extract_strided_slice %582 {offsets = [0, 0], sizes = [16, 4], strides = [1, 1]} : vector<16x32xf32> to vector<16x4xf32>
    %618 = vector.extract_strided_slice %582 {offsets = [0, 4], sizes = [16, 4], strides = [1, 1]} : vector<16x32xf32> to vector<16x4xf32>
    %619 = vector.extract_strided_slice %582 {offsets = [0, 8], sizes = [16, 4], strides = [1, 1]} : vector<16x32xf32> to vector<16x4xf32>
    %620 = vector.extract_strided_slice %582 {offsets = [0, 12], sizes = [16, 4], strides = [1, 1]} : vector<16x32xf32> to vector<16x4xf32>
    %621 = vector.extract_strided_slice %582 {offsets = [0, 16], sizes = [16, 4], strides = [1, 1]} : vector<16x32xf32> to vector<16x4xf32>
    %622 = vector.extract_strided_slice %582 {offsets = [0, 20], sizes = [16, 4], strides = [1, 1]} : vector<16x32xf32> to vector<16x4xf32>
    %623 = vector.extract_strided_slice %582 {offsets = [0, 24], sizes = [16, 4], strides = [1, 1]} : vector<16x32xf32> to vector<16x4xf32>
    %624 = vector.extract_strided_slice %582 {offsets = [0, 28], sizes = [16, 4], strides = [1, 1]} : vector<16x32xf32> to vector<16x4xf32>
    %625 = vector.shape_cast %617 : vector<16x4xf32> to vector<1x16x4xf32>
    %626 = vector.shape_cast %618 : vector<16x4xf32> to vector<1x16x4xf32>
    %627 = vector.shape_cast %619 : vector<16x4xf32> to vector<1x16x4xf32>
    %628 = vector.shape_cast %620 : vector<16x4xf32> to vector<1x16x4xf32>
    %629 = vector.shape_cast %621 : vector<16x4xf32> to vector<1x16x4xf32>
    %630 = vector.shape_cast %622 : vector<16x4xf32> to vector<1x16x4xf32>
    %631 = vector.shape_cast %623 : vector<16x4xf32> to vector<1x16x4xf32>
    %632 = vector.shape_cast %624 : vector<16x4xf32> to vector<1x16x4xf32>
    %633 = tpu.concatenate %625, %626, %627, %628, %629, %630, %631, %632 in 0 : vector<1x16x4xf32>, vector<1x16x4xf32>, vector<1x16x4xf32>, vector<1x16x4xf32>, vector<1x16x4xf32>, vector<1x16x4xf32>, vector<1x16x4xf32>, vector<1x16x4xf32> -> vector<8x16x4xf32>
    %cst_206 = arith.constant 5.000000e-01 : f32
    %634 = vector.broadcast %cst_206 : f32 to vector<8x16x4xf32>
    %635 = arith.mulf %599, %634 : vector<8x16x4xf32>
    "tpu.trace_start"() <{level = 10 : i32, message = "hqd,hkd->hqk"}> : () -> ()
    %cst_207 = arith.constant dense<0.000000e+00> : vector<8x16x16xf32>
    %636 = tpu.matmul %635, %616, %cst_207 {dimension_numbers = #tpu.dot_dimension_numbers<[2], [2], [1], [1], [0, 0, 0, 1, 1, 1], [0], [0]>} : vector<8x16x4xf32>, vector<8x16x4xf32>, vector<8x16x16xf32> -> vector<8x16x16xf32>
    "tpu.trace_stop"() : () -> ()
    %cst_208 = arith.constant dense<0xFF800000> : vector<8x16xf32>
    %637 = vector.multi_reduction <maximumf>, %636, %cst_208 [2] : vector<8x16x16xf32> to vector<8x16xf32>
    %638 = vector.shape_cast %637 : vector<8x16xf32> to vector<8x16x1xf32>
    %639 = vector.broadcast %638 : vector<8x16x1xf32> to vector<8x16x16xf32>
    %640 = arith.subf %636, %639 : vector<8x16x16xf32>
    %641 = math.exp %640 : vector<8x16x16xf32>
    %cst_209 = arith.constant dense<0.000000e+00> : vector<8x16xf32>
    %642 = vector.multi_reduction <add>, %641, %cst_209 [2] : vector<8x16x16xf32> to vector<8x16xf32>
    %643 = vector.shape_cast %642 : vector<8x16xf32> to vector<8x16x1xf32>
    %644 = tpu.reciprocal %643 {approx = true} : vector<8x16x1xf32> -> vector<8x16x1xf32>
    %645 = vector.broadcast %644 : vector<8x16x1xf32> to vector<8x16x16xf32>
    %646 = arith.mulf %641, %645 : vector<8x16x16xf32>
    "tpu.trace_start"() <{level = 10 : i32, message = "hqk,hkd->hqd"}> : () -> ()
    %cst_210 = arith.constant dense<0.000000e+00> : vector<8x16x4xf32>
    %647 = tpu.matmul %646, %633, %cst_210 {dimension_numbers = #tpu.dot_dimension_numbers<[2], [1], [1], [2], [0, 0, 0, 1, 1, 2], [0], [0]>} : vector<8x16x16xf32>, vector<8x16x4xf32>, vector<8x16x4xf32> -> vector<8x16x4xf32>
    "tpu.trace_stop"() : () -> ()
    %c0_211 = arith.constant 0 : index
    %c0_212 = arith.constant 0 : index
    %c0_213 = arith.constant 0 : index
    %648 = vector.load %arg25[%c0_211, %c0_212, %c0_213] : memref<8x4x32xf32, #tpu.memory_space<vmem>>, vector<8x4x32xf32>
    "tpu.trace_start"() <{level = 10 : i32, message = "hqd,hde->hqe"}> : () -> ()
    %cst_214 = arith.constant dense<0.000000e+00> : vector<8x16x32xf32>
    %649 = tpu.matmul %647, %648, %cst_214 {dimension_numbers = #tpu.dot_dimension_numbers<[2], [1], [1], [2], [0, 0, 0, 1, 1, 2], [0], [0]>} : vector<8x16x4xf32>, vector<8x4x32xf32>, vector<8x16x32xf32> -> vector<8x16x32xf32>
    "tpu.trace_stop"() : () -> ()
    %cst_215 = arith.constant dense<0.000000e+00> : vector<16x32xf32>
    %650 = vector.multi_reduction <add>, %649, %cst_215 [0] : vector<8x16x32xf32> to vector<16x32xf32>
    %651 = arith.addf %549, %650 : vector<16x32xf32>
    %c0_216 = arith.constant 0 : index
    %c0_217 = arith.constant 0 : index
    %652 = vector.load %arg17[%c0_216, %c0_217] : memref<1x32xf32, #tpu.memory_space<vmem>>, vector<1x32xf32>
    %653 = vector.broadcast %652 : vector<1x32xf32> to vector<16x32xf32>
    %654 = arith.addf %651, %653 : vector<16x32xf32>
    %c0_218 = arith.constant 0 : index
    %c0_219 = arith.constant 0 : index
    %655 = vector.load %arg22[%c0_218, %c0_219] : memref<1x32xf32, #tpu.memory_space<vmem>>, vector<1x32xf32>
    %c0_220 = arith.constant 0 : index
    %c0_221 = arith.constant 0 : index
    %656 = vector.load %arg21[%c0_220, %c0_221] : memref<1x32xf32, #tpu.memory_space<vmem>>, vector<1x32xf32>
    %cst_222 = arith.constant dense<0.000000e+00> : vector<16xf32>
    %657 = vector.multi_reduction <add>, %654, %cst_222 [1] : vector<16x32xf32> to vector<16xf32>
    %658 = vector.shape_cast %657 : vector<16xf32> to vector<16x1xf32>
    %cst_223 = arith.constant 3.200000e+01 : f32
    %659 = vector.broadcast %cst_223 : f32 to vector<16x1xf32>
    %660 = arith.divf %658, %659 : vector<16x1xf32>
    %661 = vector.broadcast %660 : vector<16x1xf32> to vector<16x32xf32>
    %662 = arith.subf %654, %661 : vector<16x32xf32>
    %663 = arith.mulf %662, %662 : vector<16x32xf32>
    %cst_224 = arith.constant dense<0.000000e+00> : vector<16xf32>
    %664 = vector.multi_reduction <add>, %663, %cst_224 [1] : vector<16x32xf32> to vector<16xf32>
    %665 = vector.shape_cast %664 : vector<16xf32> to vector<16x1xf32>
    %cst_225 = arith.constant 3.200000e+01 : f32
    %666 = vector.broadcast %cst_225 : f32 to vector<16x1xf32>
    %667 = arith.divf %665, %666 : vector<16x1xf32>
    %668 = vector.broadcast %660 : vector<16x1xf32> to vector<16x32xf32>
    %669 = arith.subf %654, %668 : vector<16x32xf32>
    %cst_226 = arith.constant 9.99999997E-7 : f32
    %670 = vector.broadcast %cst_226 : f32 to vector<16x1xf32>
    %671 = arith.addf %667, %670 : vector<16x1xf32>
    %672 = math.rsqrt %671 : vector<16x1xf32>
    %673 = vector.broadcast %672 : vector<16x1xf32> to vector<16x32xf32>
    %674 = arith.mulf %669, %673 : vector<16x32xf32>
    %675 = vector.broadcast %655 : vector<1x32xf32> to vector<16x32xf32>
    %676 = arith.mulf %674, %675 : vector<16x32xf32>
    %677 = vector.broadcast %656 : vector<1x32xf32> to vector<16x32xf32>
    %678 = arith.addf %676, %677 : vector<16x32xf32>
    %679 = arith.truncf %678 : vector<16x32xf32> to vector<16x32xbf16>
    %c0_227 = arith.constant 0 : index
    %c0_228 = arith.constant 0 : index
    %680 = vector.load %arg23[%c0_227, %c0_228] : memref<32x128xbf16, #tpu.memory_space<vmem>>, vector<32x128xbf16>
    %cst_229 = arith.constant dense<0.000000e+00> : vector<16x128xf32>
    %681 = tpu.matmul %679, %680, %cst_229 {dimension_numbers = #tpu.dot_dimension_numbers<[1], [0], [0], [1], [0, 0, 1, 1], [], []>} : vector<16x32xbf16>, vector<32x128xbf16>, vector<16x128xf32> -> vector<16x128xf32>
    %c0_230 = arith.constant 0 : index
    %c0_231 = arith.constant 0 : index
    %682 = vector.load %arg15[%c0_230, %c0_231] : memref<1x128xf32, #tpu.memory_space<vmem>>, vector<1x128xf32>
    %683 = vector.broadcast %682 : vector<1x128xf32> to vector<16x128xf32>
    %684 = arith.addf %681, %683 : vector<16x128xf32>
    %cst_232 = arith.constant 5.000000e-01 : f32
    %685 = vector.broadcast %cst_232 : f32 to vector<16x128xf32>
    %686 = arith.mulf %685, %684 : vector<16x128xf32>
    %cst_233 = arith.constant 4.471500e-02 : f32
    %687 = vector.broadcast %cst_233 : f32 to vector<16x128xf32>
    %688 = arith.mulf %687, %684 : vector<16x128xf32>
    %689 = arith.mulf %688, %684 : vector<16x128xf32>
    %690 = arith.mulf %689, %684 : vector<16x128xf32>
    %691 = arith.addf %684, %690 : vector<16x128xf32>
    %cst_234 = arith.constant 0.797884583 : f32
    %692 = vector.broadcast %cst_234 : f32 to vector<16x128xf32>
    %693 = arith.mulf %692, %691 : vector<16x128xf32>
    %694 = math.tanh %693 : vector<16x128xf32>
    %cst_235 = arith.constant 1.000000e+00 : f32
    %695 = vector.broadcast %cst_235 : f32 to vector<16x128xf32>
    %696 = arith.addf %695, %694 : vector<16x128xf32>
    %697 = arith.mulf %686, %696 : vector<16x128xf32>
    %698 = arith.truncf %697 : vector<16x128xf32> to vector<16x128xbf16>
    %c0_236 = arith.constant 0 : index
    %c0_237 = arith.constant 0 : index
    %699 = vector.load %arg24[%c0_236, %c0_237] : memref<128x32xbf16, #tpu.memory_space<vmem>>, vector<128x32xbf16>
    %cst_238 = arith.constant dense<0.000000e+00> : vector<16x32xf32>
    %700 = tpu.matmul %698, %699, %cst_238 {dimension_numbers = #tpu.dot_dimension_numbers<[1], [0], [0], [1], [0, 0, 1, 1], [], []>} : vector<16x128xbf16>, vector<128x32xbf16>, vector<16x32xf32> -> vector<16x32xf32>
    %c0_239 = arith.constant 0 : index
    %c0_240 = arith.constant 0 : index
    %701 = vector.load %arg16[%c0_239, %c0_240] : memref<1x32xf32, #tpu.memory_space<vmem>>, vector<1x32xf32>
    %702 = vector.broadcast %701 : vector<1x32xf32> to vector<16x32xf32>
    %703 = arith.addf %700, %702 : vector<16x32xf32>
    %704 = arith.addf %654, %703 : vector<16x32xf32>
    %705 = arith.truncf %704 : vector<16x32xf32> to vector<16x32xbf16>
    %c0_241 = arith.constant 0 : index
    %c0_242 = arith.constant 0 : index
    %706 = vector.load %arg57[%c0_241, %c0_242] : memref<32x16xbf16, #tpu.memory_space<vmem>>, vector<32x16xbf16>
    %cst_243 = arith.constant dense<0.000000e+00> : vector<16x16xf32>
    %707 = tpu.matmul %705, %706, %cst_243 {dimension_numbers = #tpu.dot_dimension_numbers<[1], [0], [0], [1], [0, 0, 1, 1], [], []>} : vector<16x32xbf16>, vector<32x16xbf16>, vector<16x16xf32> -> vector<16x16xf32>
    %c0_244 = arith.constant 0 : index
    %c0_245 = arith.constant 0 : index
    %708 = vector.load %arg56[%c0_244, %c0_245] : memref<1x16xf32, #tpu.memory_space<vmem>>, vector<1x16xf32>
    %709 = vector.broadcast %708 : vector<1x16xf32> to vector<16x16xf32>
    %710 = arith.addf %707, %709 : vector<16x16xf32>
    %c0_246 = arith.constant 0 : index
    %c0_247 = arith.constant 0 : index
    %c0_248 = arith.constant 0 : index
    %711 = vector.load %arg62[%c0_246, %c0_247, %c0_248] : memref<1x16x16xf32, #tpu.memory_space<vmem>>, vector<1x16x16xf32>
    %712 = vector.shape_cast %711 : vector<1x16x16xf32> to vector<16x16xf32>
    %713 = vector.shape_cast %710 : vector<16x16xf32> to vector<1x16x16xf32>
    tpu.vector_store %arg62[%c0_246, %c0_247, %c0_248], %713 {strides = array<i32>} : memref<1x16x16xf32, #tpu.memory_space<vmem>>, vector<1x16x16xf32>,
    return
  }
  func.func @transform_0(%arg0: i32, %arg1: memref<2x16xi32, #tpu.memory_space<smem>>) -> (i32, i32, i32) {
    %c0_i32 = arith.constant 0 : i32
    %c0_i32_0 = arith.constant 0 : i32
    %c0_i32_1 = arith.constant 0 : i32
    return %arg0, %c0_i32, %c0_i32_0 : i32, i32, i32
  }
  func.func @transform_1(%arg0: i32, %arg1: memref<2x16xi32, #tpu.memory_space<smem>>) -> (i32, i32) {
    %c0_i32 = arith.constant 0 : i32
    %c0_i32_0 = arith.constant 0 : i32
    %c0_i32_1 = arith.constant 0 : i32
    return %c0_i32, %c0_i32_0 : i32, i32
  }
  func.func @transform_2(%arg0: i32, %arg1: memref<2x16xi32, #tpu.memory_space<smem>>) -> (i32, i32) {
    %c0_i32 = arith.constant 0 : i32
    %c0_i32_0 = arith.constant 0 : i32
    %c0_i32_1 = arith.constant 0 : i32
    return %c0_i32, %c0_i32_0 : i32, i32
  }
  func.func @transform_3(%arg0: i32, %arg1: memref<2x16xi32, #tpu.memory_space<smem>>) -> (i32, i32) {
    %c0_i32 = arith.constant 0 : i32
    %c0_i32_0 = arith.constant 0 : i32
    %c0_i32_1 = arith.constant 0 : i32
    return %c0_i32, %c0_i32_0 : i32, i32
  }
  func.func @transform_4(%arg0: i32, %arg1: memref<2x16xi32, #tpu.memory_space<smem>>) -> (i32, i32) {
    %c0_i32 = arith.constant 0 : i32
    %c0_i32_0 = arith.constant 0 : i32
    %c0_i32_1 = arith.constant 0 : i32
    return %c0_i32, %c0_i32_0 : i32, i32
  }
  func.func @transform_5(%arg0: i32, %arg1: memref<2x16xi32, #tpu.memory_space<smem>>) -> (i32, i32) {
    %c0_i32 = arith.constant 0 : i32
    %c0_i32_0 = arith.constant 0 : i32
    %c0_i32_1 = arith.constant 0 : i32
    return %c0_i32, %c0_i32_0 : i32, i32
  }
  func.func @transform_6(%arg0: i32, %arg1: memref<2x16xi32, #tpu.memory_space<smem>>) -> (i32, i32) {
    %c0_i32 = arith.constant 0 : i32
    %c0_i32_0 = arith.constant 0 : i32
    %c0_i32_1 = arith.constant 0 : i32
    return %c0_i32, %c0_i32_0 : i32, i32
  }
  func.func @transform_7(%arg0: i32, %arg1: memref<2x16xi32, #tpu.memory_space<smem>>) -> (i32, i32) {
    %c0_i32 = arith.constant 0 : i32
    %c0_i32_0 = arith.constant 0 : i32
    %c0_i32_1 = arith.constant 0 : i32
    return %c0_i32, %c0_i32_0 : i32, i32
  }
  func.func @transform_8(%arg0: i32, %arg1: memref<2x16xi32, #tpu.memory_space<smem>>) -> (i32, i32) {
    %c0_i32 = arith.constant 0 : i32
    %c0_i32_0 = arith.constant 0 : i32
    %c0_i32_1 = arith.constant 0 : i32
    return %c0_i32, %c0_i32_0 : i32, i32
  }
  func.func @transform_9(%arg0: i32, %arg1: memref<2x16xi32, #tpu.memory_space<smem>>) -> (i32, i32) {
    %c0_i32 = arith.constant 0 : i32
    %c0_i32_0 = arith.constant 0 : i32
    %c0_i32_1 = arith.constant 0 : i32
    return %c0_i32, %c0_i32_0 : i32, i32
  }
  func.func @transform_10(%arg0: i32, %arg1: memref<2x16xi32, #tpu.memory_space<smem>>) -> (i32, i32) {
    %c0_i32 = arith.constant 0 : i32
    %c0_i32_0 = arith.constant 0 : i32
    %c0_i32_1 = arith.constant 0 : i32
    return %c0_i32, %c0_i32_0 : i32, i32
  }
  func.func @transform_11(%arg0: i32, %arg1: memref<2x16xi32, #tpu.memory_space<smem>>) -> (i32, i32, i32) {
    %c0_i32 = arith.constant 0 : i32
    %c0_i32_0 = arith.constant 0 : i32
    %c0_i32_1 = arith.constant 0 : i32
    %c0_i32_2 = arith.constant 0 : i32
    return %c0_i32, %c0_i32_0, %c0_i32_1 : i32, i32, i32
  }
  func.func @transform_12(%arg0: i32, %arg1: memref<2x16xi32, #tpu.memory_space<smem>>) -> (i32, i32) {
    %c0_i32 = arith.constant 0 : i32
    %c0_i32_0 = arith.constant 0 : i32
    %c0_i32_1 = arith.constant 0 : i32
    return %c0_i32, %c0_i32_0 : i32, i32
  }
  func.func @transform_13(%arg0: i32, %arg1: memref<2x16xi32, #tpu.memory_space<smem>>) -> (i32, i32) {
    %c0_i32 = arith.constant 0 : i32
    %c0_i32_0 = arith.constant 0 : i32
    %c0_i32_1 = arith.constant 0 : i32
    return %c0_i32, %c0_i32_0 : i32, i32
  }
  func.func @transform_14(%arg0: i32, %arg1: memref<2x16xi32, #tpu.memory_space<smem>>) -> (i32, i32) {
    %c0_i32 = arith.constant 0 : i32
    %c0_i32_0 = arith.constant 0 : i32
    %c0_i32_1 = arith.constant 0 : i32
    return %c0_i32, %c0_i32_0 : i32, i32
  }
  func.func @transform_15(%arg0: i32, %arg1: memref<2x16xi32, #tpu.memory_space<smem>>) -> (i32, i32) {
    %c0_i32 = arith.constant 0 : i32
    %c0_i32_0 = arith.constant 0 : i32
    %c0_i32_1 = arith.constant 0 : i32
    return %c0_i32, %c0_i32_0 : i32, i32
  }
  func.func @transform_16(%arg0: i32, %arg1: memref<2x16xi32, #tpu.memory_space<smem>>) -> (i32, i32) {
    %c0_i32 = arith.constant 0 : i32
    %c0_i32_0 = arith.constant 0 : i32
    %c0_i32_1 = arith.constant 0 : i32
    return %c0_i32, %c0_i32_0 : i32, i32
  }
  func.func @transform_17(%arg0: i32, %arg1: memref<2x16xi32, #tpu.memory_space<smem>>) -> (i32, i32) {
    %c0_i32 = arith.constant 0 : i32
    %c0_i32_0 = arith.constant 0 : i32
    %c0_i32_1 = arith.constant 0 : i32
    return %c0_i32, %c0_i32_0 : i32, i32
  }
  func.func @transform_18(%arg0: i32, %arg1: memref<2x16xi32, #tpu.memory_space<smem>>) -> (i32, i32) {
    %c0_i32 = arith.constant 0 : i32
    %c0_i32_0 = arith.constant 0 : i32
    %c0_i32_1 = arith.constant 0 : i32
    return %c0_i32, %c0_i32_0 : i32, i32
  }
  func.func @transform_19(%arg0: i32, %arg1: memref<2x16xi32, #tpu.memory_space<smem>>) -> (i32, i32) {
    %c0_i32 = arith.constant 0 : i32
    %c0_i32_0 = arith.constant 0 : i32
    %c0_i32_1 = arith.constant 0 : i32
    return %c0_i32, %c0_i32_0 : i32, i32
  }
  func.func @transform_20(%arg0: i32, %arg1: memref<2x16xi32, #tpu.memory_space<smem>>) -> (i32, i32) {
    %c0_i32 = arith.constant 0 : i32
    %c0_i32_0 = arith.constant 0 : i32
    %c0_i32_1 = arith.constant 0 : i32
    return %c0_i32, %c0_i32_0 : i32, i32
  }
  func.func @transform_21(%arg0: i32, %arg1: memref<2x16xi32, #tpu.memory_space<smem>>) -> (i32, i32) {
    %c0_i32 = arith.constant 0 : i32
    %c0_i32_0 = arith.constant 0 : i32
    %c0_i32_1 = arith.constant 0 : i32
    return %c0_i32, %c0_i32_0 : i32, i32
  }
  func.func @transform_22(%arg0: i32, %arg1: memref<2x16xi32, #tpu.memory_space<smem>>) -> (i32, i32) {
    %c0_i32 = arith.constant 0 : i32
    %c0_i32_0 = arith.constant 0 : i32
    %c0_i32_1 = arith.constant 0 : i32
    return %c0_i32, %c0_i32_0 : i32, i32
  }
  func.func @transform_23(%arg0: i32, %arg1: memref<2x16xi32, #tpu.memory_space<smem>>) -> (i32, i32, i32) {
    %c0_i32 = arith.constant 0 : i32
    %c0_i32_0 = arith.constant 0 : i32
    %c0_i32_1 = arith.constant 0 : i32
    %c0_i32_2 = arith.constant 0 : i32
    return %c0_i32, %c0_i32_0, %c0_i32_1 : i32, i32, i32
  }
  func.func @transform_24(%arg0: i32, %arg1: memref<2x16xi32, #tpu.memory_space<smem>>) -> (i32, i32) {
    %c0_i32 = arith.constant 0 : i32
    %c0_i32_0 = arith.constant 0 : i32
    %c0_i32_1 = arith.constant 0 : i32
    return %c0_i32, %c0_i32_0 : i32, i32
  }
  func.func @transform_25(%arg0: i32, %arg1: memref<2x16xi32, #tpu.memory_space<smem>>) -> (i32, i32) {
    %c0_i32 = arith.constant 0 : i32
    %c0_i32_0 = arith.constant 0 : i32
    %c0_i32_1 = arith.constant 0 : i32
    return %c0_i32, %c0_i32_0 : i32, i32
  }
  func.func @transform_26(%arg0: i32, %arg1: memref<2x16xi32, #tpu.memory_space<smem>>) -> (i32, i32) {
    %c0_i32 = arith.constant 0 : i32
    %c0_i32_0 = arith.constant 0 : i32
    %c0_i32_1 = arith.constant 0 : i32
    return %c0_i32, %c0_i32_0 : i32, i32
  }
  func.func @transform_27(%arg0: i32, %arg1: memref<2x16xi32, #tpu.memory_space<smem>>) -> (i32, i32) {
    %c0_i32 = arith.constant 0 : i32
    %c0_i32_0 = arith.constant 0 : i32
    %c0_i32_1 = arith.constant 0 : i32
    return %c0_i32, %c0_i32_0 : i32, i32
  }
  func.func @transform_28(%arg0: i32, %arg1: memref<2x16xi32, #tpu.memory_space<smem>>) -> (i32, i32) {
    %c0_i32 = arith.constant 0 : i32
    %c0_i32_0 = arith.constant 0 : i32
    %c0_i32_1 = arith.constant 0 : i32
    return %c0_i32, %c0_i32_0 : i32, i32
  }
  func.func @transform_29(%arg0: i32, %arg1: memref<2x16xi32, #tpu.memory_space<smem>>) -> (i32, i32) {
    %c0_i32 = arith.constant 0 : i32
    %c0_i32_0 = arith.constant 0 : i32
    %c0_i32_1 = arith.constant 0 : i32
    return %c0_i32, %c0_i32_0 : i32, i32
  }
  func.func @transform_30(%arg0: i32, %arg1: memref<2x16xi32, #tpu.memory_space<smem>>) -> (i32, i32) {
    %c0_i32 = arith.constant 0 : i32
    %c0_i32_0 = arith.constant 0 : i32
    %c0_i32_1 = arith.constant 0 : i32
    return %c0_i32, %c0_i32_0 : i32, i32
  }
  func.func @transform_31(%arg0: i32, %arg1: memref<2x16xi32, #tpu.memory_space<smem>>) -> (i32, i32) {
    %c0_i32 = arith.constant 0 : i32
    %c0_i32_0 = arith.constant 0 : i32
    %c0_i32_1 = arith.constant 0 : i32
    return %c0_i32, %c0_i32_0 : i32, i32
  }
  func.func @transform_32(%arg0: i32, %arg1: memref<2x16xi32, #tpu.memory_space<smem>>) -> (i32, i32) {
    %c0_i32 = arith.constant 0 : i32
    %c0_i32_0 = arith.constant 0 : i32
    %c0_i32_1 = arith.constant 0 : i32
    return %c0_i32, %c0_i32_0 : i32, i32
  }
  func.func @transform_33(%arg0: i32, %arg1: memref<2x16xi32, #tpu.memory_space<smem>>) -> (i32, i32) {
    %c0_i32 = arith.constant 0 : i32
    %c0_i32_0 = arith.constant 0 : i32
    %c0_i32_1 = arith.constant 0 : i32
    return %c0_i32, %c0_i32_0 : i32, i32
  }
  func.func @transform_34(%arg0: i32, %arg1: memref<2x16xi32, #tpu.memory_space<smem>>) -> (i32, i32) {
    %c0_i32 = arith.constant 0 : i32
    %c0_i32_0 = arith.constant 0 : i32
    %c0_i32_1 = arith.constant 0 : i32
    return %c0_i32, %c0_i32_0 : i32, i32
  }
  func.func @transform_35(%arg0: i32, %arg1: memref<2x16xi32, #tpu.memory_space<smem>>) -> (i32, i32) {
    %c0_i32 = arith.constant 0 : i32
    %c0_i32_0 = arith.constant 0 : i32
    %c0_i32_1 = arith.constant 0 : i32
    return %c0_i32, %c0_i32_0 : i32, i32
  }
  func.func @transform_36(%arg0: i32, %arg1: memref<2x16xi32, #tpu.memory_space<smem>>) -> (i32, i32) {
    %c0_i32 = arith.constant 0 : i32
    %c0_i32_0 = arith.constant 0 : i32
    %c0_i32_1 = arith.constant 0 : i32
    return %c0_i32, %c0_i32_0 : i32, i32
  }
  func.func @transform_37(%arg0: i32, %arg1: memref<2x16xi32, #tpu.memory_space<smem>>) -> (i32, i32, i32) {
    %c0_i32 = arith.constant 0 : i32
    %c0_i32_0 = arith.constant 0 : i32
    %c0_i32_1 = arith.constant 0 : i32
    %c0_i32_2 = arith.constant 0 : i32
    return %c0_i32, %c0_i32_0, %c0_i32_1 : i32, i32, i32
  }
  func.func @transform_38(%arg0: i32, %arg1: memref<2x16xi32, #tpu.memory_space<smem>>) -> (i32, i32) {
    %c0_i32 = arith.constant 0 : i32
    %c0_i32_0 = arith.constant 0 : i32
    %c0_i32_1 = arith.constant 0 : i32
    return %c0_i32, %c0_i32_0 : i32, i32
  }
  func.func @transform_39(%arg0: i32, %arg1: memref<2x16xi32, #tpu.memory_space<smem>>) -> (i32, i32) {
    %c0_i32 = arith.constant 0 : i32
    %c0_i32_0 = arith.constant 0 : i32
    %c0_i32_1 = arith.constant 0 : i32
    return %c0_i32, %c0_i32_0 : i32, i32
  }
  func.func @transform_40(%arg0: i32, %arg1: memref<2x16xi32, #tpu.memory_space<smem>>) -> (i32, i32) {
    %c0_i32 = arith.constant 0 : i32
    %c0_i32_0 = arith.constant 0 : i32
    %c0_i32_1 = arith.constant 0 : i32
    return %c0_i32, %c0_i32_0 : i32, i32
  }
  func.func @transform_41(%arg0: i32, %arg1: memref<2x16xi32, #tpu.memory_space<smem>>) -> (i32, i32) {
    %c0_i32 = arith.constant 0 : i32
    %c0_i32_0 = arith.constant 0 : i32
    %c0_i32_1 = arith.constant 0 : i32
    return %c0_i32, %c0_i32_0 : i32, i32
  }
  func.func @transform_42(%arg0: i32, %arg1: memref<2x16xi32, #tpu.memory_space<smem>>) -> (i32, i32) {
    %c0_i32 = arith.constant 0 : i32
    %c0_i32_0 = arith.constant 0 : i32
    %c0_i32_1 = arith.constant 0 : i32
    return %c0_i32, %c0_i32_0 : i32, i32
  }
  func.func @transform_43(%arg0: i32, %arg1: memref<2x16xi32, #tpu.memory_space<smem>>) -> (i32, i32) {
    %c0_i32 = arith.constant 0 : i32
    %c0_i32_0 = arith.constant 0 : i32
    %c0_i32_1 = arith.constant 0 : i32
    return %c0_i32, %c0_i32_0 : i32, i32
  }
  func.func @transform_44(%arg0: i32, %arg1: memref<2x16xi32, #tpu.memory_space<smem>>) -> (i32, i32) {
    %c0_i32 = arith.constant 0 : i32
    %c0_i32_0 = arith.constant 0 : i32
    %c0_i32_1 = arith.constant 0 : i32
    return %c0_i32, %c0_i32_0 : i32, i32
  }
  func.func @transform_45(%arg0: i32, %arg1: memref<2x16xi32, #tpu.memory_space<smem>>) -> (i32, i32) {
    %c0_i32 = arith.constant 0 : i32
    %c0_i32_0 = arith.constant 0 : i32
    %c0_i32_1 = arith.constant 0 : i32
    return %c0_i32, %c0_i32_0 : i32, i32
  }
  func.func @transform_46(%arg0: i32, %arg1: memref<2x16xi32, #tpu.memory_space<smem>>) -> (i32, i32) {
    %c0_i32 = arith.constant 0 : i32
    %c0_i32_0 = arith.constant 0 : i32
    %c0_i32_1 = arith.constant 0 : i32
    return %c0_i32, %c0_i32_0 : i32, i32
  }
  func.func @transform_47(%arg0: i32, %arg1: memref<2x16xi32, #tpu.memory_space<smem>>) -> (i32, i32) {
    %c0_i32 = arith.constant 0 : i32
    %c0_i32_0 = arith.constant 0 : i32
    %c0_i32_1 = arith.constant 0 : i32
    return %c0_i32, %c0_i32_0 : i32, i32
  }
  func.func @transform_48(%arg0: i32, %arg1: memref<2x16xi32, #tpu.memory_space<smem>>) -> (i32, i32) {
    %c0_i32 = arith.constant 0 : i32
    %c0_i32_0 = arith.constant 0 : i32
    %c0_i32_1 = arith.constant 0 : i32
    return %c0_i32, %c0_i32_0 : i32, i32
  }
  func.func @transform_49(%arg0: i32, %arg1: memref<2x16xi32, #tpu.memory_space<smem>>) -> (i32, i32, i32) {
    %c0_i32 = arith.constant 0 : i32
    %c0_i32_0 = arith.constant 0 : i32
    %c0_i32_1 = arith.constant 0 : i32
    %c0_i32_2 = arith.constant 0 : i32
    return %c0_i32, %c0_i32_0, %c0_i32_1 : i32, i32, i32
  }
  func.func @transform_50(%arg0: i32, %arg1: memref<2x16xi32, #tpu.memory_space<smem>>) -> (i32, i32) {
    %c0_i32 = arith.constant 0 : i32
    %c0_i32_0 = arith.constant 0 : i32
    %c0_i32_1 = arith.constant 0 : i32
    return %c0_i32, %c0_i32_0 : i32, i32
  }
  func.func @transform_51(%arg0: i32, %arg1: memref<2x16xi32, #tpu.memory_space<smem>>) -> (i32, i32) {
    %c0_i32 = arith.constant 0 : i32
    %c0_i32_0 = arith.constant 0 : i32
    %c0_i32_1 = arith.constant 0 : i32
    return %c0_i32, %c0_i32_0 : i32, i32
  }
  func.func @transform_52(%arg0: i32, %arg1: memref<2x16xi32, #tpu.memory_space<smem>>) -> (i32, i32) {
    %c0_i32 = arith.constant 0 : i32
    %c0_i32_0 = arith.constant 0 : i32
    %c0_i32_1 = arith.constant 0 : i32
    return %c0_i32, %c0_i32_0 : i32, i32
  }
  func.func @transform_53(%arg0: i32, %arg1: memref<2x16xi32, #tpu.memory_space<smem>>) -> (i32, i32) {
    %c0_i32 = arith.constant 0 : i32
    %c0_i32_0 = arith.constant 0 : i32
    %c0_i32_1 = arith.constant 0 : i32
    return %c0_i32, %c0_i32_0 : i32, i32
  }
  func.func @transform_54(%arg0: i32, %arg1: memref<2x16xi32, #tpu.memory_space<smem>>) -> (i32, i32) {
    %c0_i32 = arith.constant 0 : i32
    %c0_i32_0 = arith.constant 0 : i32
    %c0_i32_1 = arith.constant 0 : i32
    return %c0_i32, %c0_i32_0 : i32, i32
  }
  func.func @transform_55(%arg0: i32, %arg1: memref<2x16xi32, #tpu.memory_space<smem>>) -> (i32, i32) {
    %c0_i32 = arith.constant 0 : i32
    %c0_i32_0 = arith.constant 0 : i32
    %c0_i32_1 = arith.constant 0 : i32
    return %c0_i32, %c0_i32_0 : i32, i32
  }
  func.func @transform_56(%arg0: i32, %arg1: memref<2x16xi32, #tpu.memory_space<smem>>) -> (i32, i32) {
    %c0_i32 = arith.constant 0 : i32
    %c0_i32_0 = arith.constant 0 : i32
    %c0_i32_1 = arith.constant 0 : i32
    return %c0_i32, %c0_i32_0 : i32, i32
  }
  func.func @transform_57(%arg0: i32, %arg1: memref<2x16xi32, #tpu.memory_space<smem>>) -> (i32, i32) {
    %c0_i32 = arith.constant 0 : i32
    %c0_i32_0 = arith.constant 0 : i32
    %c0_i32_1 = arith.constant 0 : i32
    return %c0_i32, %c0_i32_0 : i32, i32
  }
  func.func @transform_58(%arg0: i32, %arg1: memref<2x16xi32, #tpu.memory_space<smem>>) -> (i32, i32) {
    %c0_i32 = arith.constant 0 : i32
    %c0_i32_0 = arith.constant 0 : i32
    %c0_i32_1 = arith.constant 0 : i32
    return %c0_i32, %c0_i32_0 : i32, i32
  }
  func.func @transform_59(%arg0: i32, %arg1: memref<2x16xi32, #tpu.memory_space<smem>>) -> (i32, i32) {
    %c0_i32 = arith.constant 0 : i32
    %c0_i32_0 = arith.constant 0 : i32
    %c0_i32_1 = arith.constant 0 : i32
    return %c0_i32, %c0_i32_0 : i32, i32
  }
  func.func @transform_60(%arg0: i32, %arg1: memref<2x16xi32, #tpu.memory_space<smem>>) -> (i32, i32, i32) {
    %c0_i32 = arith.constant 0 : i32
    %c0_i32_0 = arith.constant 0 : i32
    %c0_i32_1 = arith.constant 0 : i32
    return %arg0, %c0_i32, %c0_i32_0 : i32, i32, i32
  }
}

</mosaic_0001>

<bundles_post_ra>
// kernel: mae_forward.1
= control target key start
LH: loop header
LB: loop body
LE: loop exit
PB: predicated region body
PF: predicated region fallthrough
CT: control target
= control target key end

     0   :  { %s12517_s6 = smov 1   ;;  %s12518_s10 = smov 2   ;;  %s14772_s0 = inlined_call_operand.smem [shape: u32[62], index: -1, kind: input, shape index: {}] }
   0x1   :  { %s12649_s5 = sld [smem:[%s14772_s0]]   ;;  %s12519_s14 = smov 3  }
   0x2   :  { %s12654_s9 = sld [smem:[%s14772_s0 + %s12517_s6]]   ;;  %s12520_s18 = smov 4  }
   0x3   :  { %s12659_s13 = sld [smem:[%s14772_s0 + %s12518_s10]]   ;;  %s12521_s22 = smov 5  }
   0x4   :  { %s12664_s17 = sld [smem:[%s14772_s0 + %s12519_s14]]   ;;  %s12522_s26 = smov 6  }
   0x5   :  { %s12669_s21 = sld [smem:[%s14772_s0 + %s12520_s18]]   ;;  %s12523_s30 = smov 7  }
   0x6   :  { %s12674_s25 = sld [smem:[%s14772_s0 + %s12521_s22]]   ;;  %s12524_s4 = smov 8  }
   0x7   :  { %s12679_s29 = sld [smem:[%s14772_s0 + %s12522_s26]]   ;;  %s12525_s10 = smov 9  }
   0x8   :  { %14872 = sst [smem:[#allocation85_spill]] %s12654_s9  ;;  %s12526_s15 = smov 10  }
   0x9   :  { %14873 = sst [smem:[#allocation86_spill]] %s12659_s13  ;;  %s12527_s20 = smov 11  }
   0xa   :  { %14874 = sst [smem:[#allocation87_spill]] %s12664_s17  ;;  %s12528_s26 = smov 12  }
   0xb   :  { %14875 = sst [smem:[#allocation88_spill]] %s12669_s21  ;;  %s12529_s1 = smov 13  }
   0xc   :  { %14876 = sst [smem:[#allocation89_spill]] %s12674_s25  ;;  %s12530_s7 = smov 14  }
   0xd   :  { %14877 = sst [smem:[#allocation90_spill]] %s12679_s29  ;;  %s12532_s22 = smov 16  }
   0xe   :  { %s12684_s3 = sld [smem:[%s14772_s0 + %s12523_s30]]   ;;  %s12533_s28 = smov 17  }
   0xf   :  { %s12689_s8 = sld [smem:[%s14772_s0 + %s12524_s4]]   ;;  %s12577_s2 = smov 61  }
  0x10   :  { %s12694_s14 = sld [smem:[%s14772_s0 + %s12525_s10]]  }
  0x11   :  { %s12699_s19 = sld [smem:[%s14772_s0 + %s12526_s15]]   ;;  %s12531_s15 = smov 15  }
  0x12   :  { %s12704_s24 = sld [smem:[%s14772_s0 + %s12527_s20]]  }
  0x13   :  { %s12709_s30 = sld [smem:[%s14772_s0 + %s12528_s26]]   ;;  %s12576_s26 = smov 60  }
  0x14   :  { %14878 = sst [smem:[#allocation91_spill]] %s12684_s3 }
  0x15   :  { %14879 = sst [smem:[#allocation92_spill]] %s12689_s8 }
  0x16   :  { %14880 = sst [smem:[#allocation93_spill]] %s12694_s14 }
  0x17   :  { %14881 = sst [smem:[#allocation94_spill]] %s12699_s19 }
  0x18   :  { %14882 = sst [smem:[#allocation95_spill]] %s12704_s24 }
  0x19   :  { %14883 = sst [smem:[#allocation96_spill]] %s12709_s30 }
  0x1a   :  { %s12714_s6 = sld [smem:[%s14772_s0 + %s12529_s1]]  }
  0x1b   :  { %s12719_s12 = sld [smem:[%s14772_s0 + %s12530_s7]]   ;;  %s12534_s7 = smov 18  }
  0x1c   :  { %s12724_s20 = sld [smem:[%s14772_s0 + %s12531_s15]]   ;;  %s12535_s15 = smov 19  }
  0x1d   :  { %s12729_s27 = sld [smem:[%s14772_s0 + %s12532_s22]]   ;;  %s12536_s22 = smov 20  }
  0x1e   :  { %s12734_s4 = sld [smem:[%s14772_s0 + %s12533_s28]]   ;;  %s12537_s28 = smov 21  }
  0x1f   :  { %s12739_s17 = sld [smem:[%s14772_s0 + %s12534_s7]]   ;;  %s12538_s7 = smov 22  }
  0x20   :  { %14884 = sst [smem:[#allocation97_spill]] %s12714_s6 }
  0x21   :  { %14885 = sst [smem:[#allocation98_spill]] %s12719_s12 }
  0x22   :  { %s12744_s13 = sld [smem:[%s14772_s0 + %s12535_s15]]   ;;  %s12539_s15 = smov 23  }
  0x23   :  { %14886 = sst [smem:[#allocation99_spill]] %s12729_s27 }
  0x24   :  { %14887 = sst [smem:[#allocation100_spill]] %s12734_s4 }
  0x25   :  { %14888 = sst [smem:[#allocation101_spill]] %s12739_s17 }
  0x26   :  { %s12749_s24 = sld [smem:[%s14772_s0 + %s12536_s22]]   ;;  %s12540_s22 = smov 24  }
  0x27   :  { %s12754_s19 = sld [smem:[%s14772_s0 + %s12537_s28]]   ;;  %s12541_s28 = smov 25  }
  0x28   :  { %14889 = sst [smem:[#allocation102_spill]] %s12744_s13 }
  0x29   :  { %s12759_s21 = sld [smem:[%s14772_s0 + %s12538_s7]]   ;;  %s12542_s7 = smov 26  }
  0x2a   :  { %s12764_s30 = sld [smem:[%s14772_s0 + %s12539_s15]]   ;;  %s12543_s15 = smov 27  }
  0x2b   :  { %s12769_s25 = sld [smem:[%s14772_s0 + %s12540_s22]]   ;;  %s12544_s22 = smov 28  }
  0x2c   :  { %14890 = sst [smem:[#allocation103_spill]] %s12749_s24 }
  0x2d   :  { %s12774_s6 = sld [smem:[%s14772_s0 + %s12541_s28]]   ;;  %s12545_s28 = smov 29  }
  0x2f   :  { %14891 = sst [smem:[#allocation104_spill]] %s12759_s21 }
  0x30   :  { %14892 = sst [smem:[#allocation105_spill]] %s12764_s30 }
  0x31   :  { %14893 = sst [smem:[#allocation106_spill]] %s12769_s25 }
  0x32   :  { %s12779_s21 = sld [smem:[%s14772_s0 + %s12542_s7]]   ;;  %s12546_s7 = smov 30  }
  0x33   :  { %14894 = sst [smem:[#allocation107_spill]] %s12774_s6 }
  0x34   :  { %s12784_s30 = sld [smem:[%s14772_s0 + %s12543_s15]]   ;;  %s12547_s15 = smov 31  }
  0x35   :  { %s12789_s25 = sld [smem:[%s14772_s0 + %s12544_s22]]   ;;  %s12548_s22 = smov 32  }
  0x36   :  { %s12794_s6 = sld [smem:[%s14772_s0 + %s12545_s28]]   ;;  %s12549_s28 = smov 33  }
  0x37   :  { %s12799_s9 = sld [smem:[%s14772_s0 + %s12546_s7]]   ;;  %s12550_s7 = smov 34  }
  0x38   :  { %14895 = sst [smem:[#allocation108_spill]] %s12779_s21 }
  0x39   :  { %s12814_s21 = sld [smem:[%s14772_s0 + %s12549_s28]]   ;;  %s12553_s28 = smov 37  }
  0x3a   :  { %14896 = sst [smem:[#allocation109_spill]] %s12784_s30 }
  0x3b   :  { %14897 = sst [smem:[#allocation110_spill]] %s12789_s25 }
  0x3c   :  { %14898 = sst [smem:[#allocation111_spill]] %s12794_s6 }
  0x3d   :  { %14899 = sst [smem:[#allocation112_spill]] %s12799_s9 }
  0x3e   :  { %s12804_s30 = sld [smem:[%s14772_s0 + %s12547_s15]]   ;;  %s12551_s15 = smov 35  }
  0x3f   :  { %s12809_s25 = sld [smem:[%s14772_s0 + %s12548_s22]]   ;;  %s12552_s22 = smov 36  }
  0x40   :  { %14901 = sst [smem:[#allocation114_spill]] %s12814_s21 }
  0x41   :  { %s12819_s9 = sld [smem:[%s14772_s0 + %s12550_s7]]   ;;  %s12554_s7 = smov 38  }
  0x42   :  { %s12829_s24 = sld [smem:[%s14772_s0 + %s12552_s22]]   ;;  %s12556_s22 = smov 40  }
  0x43   :  { %s12834_s21 = sld [smem:[%s14772_s0 + %s12553_s28]]   ;;  %s12557_s28 = smov 41  }
  0x44   :  { %14900 = sst [smem:[#allocation113_spill]] %s12804_s30 }
  0x45   :  { %s12824_s30 = sld [smem:[%s14772_s0 + %s12551_s15]]   ;;  %s12555_s15 = smov 39  }
  0x46   :  { %s12839_s17 = sld [smem:[%s14772_s0 + %s12554_s7]]   ;;  %s12558_s7 = smov 42  }
  0x47   :  { %14902 = sst [smem:[#allocation115_spill]] %s12819_s9 }
  0x48   :  { %14904 = sst [smem:[#allocation117_spill]] %s12829_s24 }
  0x49   :  { %14905 = sst [smem:[#allocation118_spill]] %s12834_s21 }
  0x4a   :  { %s12849_s24 = sld [smem:[%s14772_s0 + %s12556_s22]]   ;;  %s12560_s22 = smov 44  }
  0x4b   :  { %14903 = sst [smem:[#allocation116_spill]] %s12824_s30 }
  0x4c   :  { %14906 = sst [smem:[#allocation119_spill]] %s12839_s17 }
  0x4d   :  { %s12844_s30 = sld [smem:[%s14772_s0 + %s12555_s15]]   ;;  %s12559_s15 = smov 43  }
  0x4e   :  { %s12854_s21 = sld [smem:[%s14772_s0 + %s12557_s28]]   ;;  %s12561_s28 = smov 45  }
  0x4f   :  { %s12859_s17 = sld [smem:[%s14772_s0 + %s12558_s7]]   ;;  %s12562_s7 = smov 46  }
  0x50   :  { %14907 = sst [smem:[#allocation120_spill]] %s12849_s24 }
  0x51   :  { %s12864_s27 = sld [smem:[%s14772_s0 + %s12559_s15]]   ;;  %s12563_s15 = smov 47  }
  0x52   :  { %s12869_s24 = sld [smem:[%s14772_s0 + %s12560_s22]]   ;;  %s12564_s22 = smov 48  }
  0x53   :  { %s12879_s12 = sld [smem:[%s14772_s0 + %s12562_s7]]   ;;  %s12566_s7 = smov 50  }
  0x54   :  { %14908 = sst [smem:[#allocation121_spill]] %s12854_s21 }
  0x55   :  { %14909 = sst [smem:[#allocation122_spill]] %s12859_s17 }
  0x56   :  { %s12874_s21 = sld [smem:[%s14772_s0 + %s12561_s28]]   ;;  %s12565_s28 = smov 49  }
  0x57   :  { %14910 = sst [smem:[#allocation123_spill]] %s12864_s27 }
  0x58   :  { %s12884_s27 = sld [smem:[%s14772_s0 + %s12563_s15]]   ;;  %s12567_s15 = smov 51  }
  0x59   :  { %14912 = sst [smem:[#allocation125_spill]] %s12879_s12 }
  0x5a   :  { %s12889_s8 = sld [smem:[%s14772_s0 + %s12564_s22]]   ;;  %s12568_s22 = smov 52  }
  0x5b   :  { %s12899_s29 = sld [smem:[%s14772_s0 + %s12566_s7]]   ;;  %s12570_s7 = smov 54  }
  0x5c   :  { %14911 = sst [smem:[#allocation124_spill]] %s12874_s21 }
  0x5d   :  { %s12894_s21 = sld [smem:[%s14772_s0 + %s12565_s28]]   ;;  %s12569_s28 = smov 53  }
  0x5e   :  { %14913 = sst [smem:[#allocation126_spill]] %s12884_s27 }
  0x5f   :  { %s12904_s27 = sld [smem:[%s14772_s0 + %s12567_s15]]   ;;  %s12571_s15 = smov 55  }
  0x60   :  { %14914 = sst [smem:[#allocation127_spill]] %s12889_s8 }
  0x61   :  { %14916 = sst [smem:[#allocation129_spill]] %s12899_s29 }
  0x62   :  { %s12909_s1 = sld [smem:[%s14772_s0 + %s12568_s22]]   ;;  %s12572_s22 = smov 56  }
  0x63   :  { %14915 = sst [smem:[#allocation128_spill]] %s12894_s21  ;;  %s12573_s21 = smov 57  }
  0x64   :  { %s12914_s10 = sld [smem:[%s14772_s0 + %s12569_s28]]  }
  0x65   :  { %14917 = sst [smem:[#allocation130_spill]] %s12904_s27 }
  0x66   :  { %s12919_s16 = sld [smem:[%s14772_s0 + %s12570_s7]]   ;;  %s12574_s7 = smov 58  }
  0x67   :  { %s12924_s23 = sld [smem:[%s14772_s0 + %s12571_s15]]   ;;  %s12575_s15 = smov 59  }
  0x68   :  { %14918 = sst [smem:[#allocation131_spill]] %s12909_s1 }
  0x69   :  { %s12929_s8 = sld [smem:[%s14772_s0 + %s12572_s22]]   ;;  %s129_s22 = sshll.u32 %s12649_s5, 4  ;;  %s130_s22 = int_to_ptr.vmem [resolvable:$true] %s129_s22 }
  0x6a   :  { %14919 = sst [smem:[#allocation132_spill]] %s12914_s10 }
  0x6b   :  { %s12934_s29 = sld [smem:[%s14772_s0 + %s12573_s21]]  }
  0x6c   :  { %14920 = sst [smem:[#allocation133_spill]] %s12919_s16 }
  0x6d   :  { %14921 = sst [smem:[#allocation134_spill]] %s12924_s23  ;;  %s11331_s23 = scalar_lea.vmem %s12649_s5, 2 }
  0x6e   :  { %s12939_s27 = sld [smem:[%s14772_s0 + %s12574_s7]]   ;;  %s11327_s7 = sshra.s32 %s130_s22, 4  ;;  %s11328_s7 = int_to_ptr.vmem [resolvable:$true] %s11327_s7 }
  0x6f   :  { %14922 = sst [smem:[#allocation135_spill]] %s12929_s8  ;;  %s11329_s11 = scalar_lea.vmem %s11328_s7, 2 }
  0x70   :  { %s12944_s1 = sld [smem:[%s14772_s0 + %s12575_s15]]   ;;  %p11330_p0 = scmp.ne.s32.totalorder %s11328_s7, %s11329_s11 }
  0x71   :  { %14923 = sst [smem:[#allocation136_spill]] %s12934_s29  ;;  %p11332_p1 = scmp.lt.s32.totalorder %s11328_s7, %s12649_s5 }
  0x72   :  { %s12950_s21 = sld [smem:[%s14772_s0 + %s12576_s26]]   ;;  %p11333_p2 = scmp.lt.s32.totalorder %s11331_s23, %s11329_s11 }
  0x73   :  { %s12955_s10 = sld [smem:[%s14772_s0 + %s12577_s2]]  }
  0x74   :  { %p11334_p3 = por %p11333_p2, %p11332_p1 }
  0x76   :  { %14924 = sst [smem:[#allocation137_spill]] %s12944_s1  ;;  %p11335_p4 = pnand %p11334_p3, %p11330_p0 }
  0x78   :  { %11338 = shalt.err (!%p11335_p4)  }
  0x79   :  { %s12578_s8 = smov [#allocation5]  }
  0x7a   :  { %132 = dma.vmem_to_smem %s130_s22, 32, %s12578_s8, [#allocation4] }
  0x7b   :  { %12419 = dma.done.wait [#allocation4], 32 }
  0x7c   :  { %12420 = vsyncadd [#allocation4], 4294967264 }
  0x7d   :  { %135 = sfence }
  0x7e   :  { %136 = vsyncpa [#allocation7], 0 }
  0x7f   :  { %137 = vsyncpa [#allocation10], 0 }
  0x80   :  { %138 = vsyncpa [#allocation13], 0 }
  0x81   :  { %139 = vsyncpa [#allocation16], 0 }
  0x82   :  { %140 = vsyncpa [#allocation19], 0 }
  0x83   :  { %141 = vsyncpa [#allocation22], 0 }
  0x84   :  { %142 = vsyncpa [#allocation25], 0 }
  0x85   :  { %143 = vsyncpa [#allocation28], 0 }
  0x86   :  { %144 = vsyncpa [#allocation31], 0 }
  0x87   :  { %145 = vsyncpa [#allocation34], 0 }
  0x88   :  { %146 = vsyncpa [#allocation37], 0 }
  0x89   :  { %147 = vsyncpa [#allocation40], 0 }
  0x8a   :  { %148 = vsyncpa [#allocation43], 0 }
  0x8b   :  { %149 = vsyncpa [#allocation46], 0 }
  0x8c   :  { %150 = vsyncpa [#allocation49], 0 }
  0x8d   :  { %151 = vsyncpa [#allocation52], 0 }
  0x8e   :  { %152 = vsyncpa [#allocation55], 0 }
  0x8f   :  { %153 = vsyncpa [#allocation58], 0 }
  0x90   :  { %154 = vsyncpa [#allocation61], 0 }
  0x91   :  { %155 = vsyncpa [#allocation8], 0 }
  0x92   :  { %157 = vsyncpa [#allocation8 + $0x1], 0  ;;  %s12959_s0 = smov 0   ;;  %s12961_s5 = smov 0  }
  0x93   :  { %s12963_s16 = smov 0   ;;  %s12965_s29 = smov 0  }
  0x94 LB: > { %s14925_s1 = sld [smem:[#allocation137_spill]]  ;;  %s12980_s15 = sadd.s32 4294967295, %s12515_s29   ;;  %s12503_s0 = sphi %s12959_s0, %s15015_s0   ;;  %s12515_s29 = sphi %s12965_s29, %s15012_s29   ;;  %s12511_s16 = sphi %s12963_s16, %s15014_s16   ;;  %s12507_s5 = sphi %s12961_s5, %s15016_s5  }
  0x95   : > { %s14926_s17 = sld [smem:[#allocation122_spill]]  ;;  %s9208_s18 = sadd.s32 4294967294, %s12515_s29  }
  0x96   : > { %s14927_s14 = sld [smem:[#allocation93_spill]]  ;;  %s12984_s22 = sadd.s32 1, %s12515_s29  }
  0x97   : > { %s14928_s13 = sld [smem:[#allocation102_spill]]  ;;  %s1435_s26 = sadd.s32 1, %s12511_s16 }
  0x98   : > { %s14929_s12 = sld [smem:[#allocation125_spill]]  ;;  %s1432_s28 = ssub.s32 %s12515_s29, %s12984_s22 }
  0x99   : > { %s14930_s9 = sld [smem:[#allocation115_spill]]  ;;  %p1445_p5 = scmp.ne.s32.totalorder %s12511_s16, %s12507_s5 }
  0x9a   : > { %s14931_s6 = sld [smem:[#allocation111_spill]]  ;;  %p1433_p6 = scmp.eq.s32.totalorder %s1432_s28, 0 }
  0x9b   : > { %s14932_s4 = sld [smem:[#allocation100_spill]]  ;;  %p1446_p7 = scmp.eq.s32.totalorder %s12980_s15, 1 }
  0x9c   : > { %s14933_s3 = sld [smem:[#allocation91_spill]]  ;;  %p1451_p8 = scmp.ne.s32.totalorder %s12507_s5, %s12503_s0 }
  0x9d   : > { %14934 = sst [smem:[#allocation138_spill]] %s12503_s0  ;;  %p1452_p9 = scmp.eq.s32.totalorder %s9208_s18, 1 }
  0x9e   : > { %14935 = sst [smem:[#allocation139_spill]] %s12511_s16  ;;  %p12997_p10 = por %p1446_p7, %p1445_p5 }
  0x9f   : > { %14936 = sst [smem:[#allocation140_spill]] %s12515_s29  ;;  %p13001_p11 = por %p1452_p9, %p1451_p8 }
  0xa0   : > { %14937 = sst [smem:[#allocation141_spill]] %s12984_s22  ;;  %p9209_p12 = scmp.ge.s32.totalorder %s12515_s29, 1 }
  0xa1   : > { %s12995_s2 = scalar_select %p1433_p6, %s12511_s16, %s1435_s26  }
  0xa2   : > { %s14940_s11 = scalar_select %p13001_p11, 1, 0 }
  0xa3   : > { %14938 = sst [smem:[#allocation142_spill]] %s12995_s2  ;;  %p1459_p13 = scmp.lt.s32.totalorder %s12515_s29, 3 }
  0xa4   : > { %14941 = sst [smem:[#allocation143_spill]] %s14940_s11 }
  0xa5   : > { %p13007_p0 = pnand %p9209_p12, %p1459_p13 }
  0xa6   : > { %p10736_p1 = scmp.eq.s32.totalorder (!%p13007_p0), %s12980_s15, 0  ;;  %s1495_s8 = sshll.u32 (!%p13007_p0), %s14933_s3, 4  ;;  %s1496_s8 = int_to_ptr.hbm [resolvable:$true] %s1495_s8 }
  0xa7   : > { %1463 = sbr.rel (%p13007_p0) target bundleno = 658 (0x292), region = 12  ;;  %s12579_s18 = smov (!%p13007_p0), [#allocation9]  }
  0xa8   : > { %s1497_s26 = sshll.u32 (!%p13007_p0), %s12579_s18, 4  ;;  %s1519_s28 = sshll.u32 (!%p13007_p0), %s14927_s14, 4  ;;  %s1498_s26 = int_to_ptr.vmem [resolvable:$true] %s1497_s26  ;;  %s13016_s28 = int_to_ptr.hbm [resolvable:$true] %s1519_s28 }
  0xa9   : > { %s11339_s2 = sshra.s32 (!%p13007_p0), %s1496_s8, 4  ;;  %s11345_s22 = scalar_lea.hbm (!%p13007_p0), %s14933_s3, 1  ;;  %s11340_s2 = int_to_ptr.hbm [resolvable:$true] %s11339_s2 }
  0xaa   : > { %s11341_s16 = scalar_lea.hbm (!%p13007_p0), %s11340_s2, 1  ;;  %p11346_p5 = scmp.lt.s32.totalorder (!%p13007_p0), %s11340_s2, %s14933_s3 }
  0xab   : > { %p11342_p2 = scmp.ne.s32.totalorder (!%p13007_p0), %s11340_s2, %s11341_s16  ;;  %p11347_p6 = scmp.lt.s32.totalorder (!%p13007_p0), %s11345_s22, %s11341_s16 }
  0xad   : > { %p11343_p3 = pnand %p11342_p2, %p10736_p1  ;;  %p11348_p7 = por %p11347_p6, %p11346_p5 }
  0xaf   : > { %p11344_p4 = pneg %p11343_p3 }
  0xb1   : > { %p11349_p8 = pnand %p11348_p7, %p11344_p4 }
  0xb3   : > { %11352 = shalt.err (!%p11349_p8)
}
  0xb4   : > { %10585 = dma.hbm_to_vmem [thread:$0]  (%p10736_p1), %s1496_s8, 16, %s1498_s26, [#allocation10]  }
  0xb5   : > { %s1555_s18 = sshll.u32 %s12724_s20, 4  ;;  %s12580_s11 = smov [#allocation12]   ;;  %s13025_s18 = int_to_ptr.hbm [resolvable:$true] %s1555_s18 }
  0xb6   : > { %s1521_s0 = sshll.u32 %s12580_s11, 4  ;;  %s11367_s29 = sshra.s32 %s13016_s28, 4  ;;  %s1522_s0 = int_to_ptr.vmem [resolvable:$true] %s1521_s0  ;;  %s11368_s29 = int_to_ptr.hbm [resolvable:$true] %s11367_s29 }
  0xb7   : > { %s11369_s16 = scalar_lea.hbm %s11368_s29, 1  ;;  %s11373_s22 = scalar_lea.hbm %s14927_s14, 1 }
  0xb8   : > { %p11370_p9 = scmp.ne.s32.totalorder %s11368_s29, %s11369_s16  ;;  %p11374_p2 = scmp.lt.s32.totalorder %s11368_s29, %s14927_s14 }
  0xb9   : > { %p11375_p3 = scmp.lt.s32.totalorder %s11373_s22, %s11369_s16 }
  0xba   : > { %p11371_p12 = pnand %p11370_p9, %p10736_p1 }
  0xbb   : > { %p11376_p4 = por %p11375_p3, %p11374_p2 }
  0xbc   : > { %p11372_p13 = pneg %p11371_p12 }
  0xbe   : > { %p11377_p5 = pnand %p11376_p4, %p11372_p13 }
  0xc0   : > { %11380 = shalt.err (!%p11377_p5)
}
  0xc1   : > { %10589 = dma.hbm_to_vmem [thread:$0]  (%p10736_p1), %s13016_s28, 16, %s1522_s0, [#allocation13]  }
  0xc2   : > { %s12581_s2 = smov [#allocation15]   ;;  %s1579_s8 = sshll.u32 %s14932_s4, 4  ;;  %s13036_s8 = int_to_ptr.hbm [resolvable:$true] %s1579_s8 }
  0xc3   : > { %s1557_s11 = sshll.u32 %s12581_s2, 4  ;;  %s11395_s29 = sshra.s32 %s13025_s18, 4  ;;  %s1558_s11 = int_to_ptr.vmem [resolvable:$true] %s1557_s11  ;;  %s11396_s29 = int_to_ptr.hbm [resolvable:$true] %s11395_s29 }
  0xc4   : > { %s11397_s26 = scalar_lea.hbm %s11396_s29, 1  ;;  %s11401_s16 = scalar_lea.hbm %s12724_s20, 1 }
  0xc5   : > { %p11398_p6 = scmp.ne.s32.totalorder %s11396_s29, %s11397_s26  ;;  %p11402_p9 = scmp.lt.s32.totalorder %s11396_s29, %s12724_s20 }
  0xc6   : > { %p11403_p12 = scmp.lt.s32.totalorder %s11401_s16, %s11397_s26 }
  0xc7   : > { %p11399_p7 = pnand %p11398_p6, %p10736_p1 }
  0xc8   : > { %p11404_p13 = por %p11403_p12, %p11402_p9 }
  0xc9   : > { %p11400_p8 = pneg %p11399_p7 }
  0xcb   : > { %p11405_p2 = pnand %p11404_p13, %p11400_p8 }
  0xcd   : > { %11408 = shalt.err (!%p11405_p2)
}
  0xce   : > { %10593 = dma.hbm_to_vmem [thread:$0]  (%p10736_p1), %s13025_s18, 16, %s1558_s11, [#allocation16]  }
  0xcf   : > { %s1603_s0 = sshll.u32 %s14928_s13, 4  ;;  %s12582_s28 = smov [#allocation18]   ;;  %s13047_s0 = int_to_ptr.hbm [resolvable:$true] %s1603_s0 }
  0xd0   : > { %s1581_s22 = sshll.u32 %s12582_s28, 4  ;;  %s11423_s2 = sshra.s32 %s13036_s8, 4  ;;  %s1582_s22 = int_to_ptr.vmem [resolvable:$true] %s1581_s22  ;;  %s11424_s2 = int_to_ptr.hbm [resolvable:$true] %s11423_s2 }
  0xd1   : > { %s11425_s29 = scalar_lea.hbm %s11424_s2, 1  ;;  %s11429_s26 = scalar_lea.hbm %s14932_s4, 1 }
  0xd2   : > { %p11426_p3 = scmp.ne.s32.totalorder %s11424_s2, %s11425_s29  ;;  %p11430_p6 = scmp.lt.s32.totalorder %s11424_s2, %s14932_s4 }
  0xd3   : > { %p11431_p7 = scmp.lt.s32.totalorder %s11429_s26, %s11425_s29 }
  0xd4   : > { %p11427_p4 = pnand %p11426_p3, %p10736_p1 }
  0xd5   : > { %p11432_p8 = por %p11431_p7, %p11430_p6 }
  0xd6   : > { %p11428_p5 = pneg %p11427_p4 }
  0xd8   : > { %p11433_p9 = pnand %p11432_p8, %p11428_p5 }
  0xda   : > { %11436 = shalt.err (!%p11433_p9)
}
  0xdb   : > { %10597 = dma.hbm_to_vmem [thread:$0]  (%p10736_p1), %s13036_s8, 16, %s1582_s22, [#allocation19]  }
  0xdc   : > { %s12583_s18 = smov [#allocation21]   ;;  %s1627_s16 = sshll.u32 %s12754_s19, 4  ;;  %s13058_s16 = int_to_ptr.hbm [resolvable:$true] %s1627_s16 }
  0xdd   : > { %s1605_s11 = sshll.u32 %s12583_s18, 4  ;;  %s11451_s28 = sshra.s32 %s13047_s0, 4  ;;  %s1606_s11 = int_to_ptr.vmem [resolvable:$true] %s1605_s11  ;;  %s11452_s28 = int_to_ptr.hbm [resolvable:$true] %s11451_s28 }
  0xde   : > { %s11453_s2 = scalar_lea.hbm %s11452_s28, 1  ;;  %s11457_s29 = scalar_lea.hbm %s14928_s13, 1 }
  0xdf   : > { %p11454_p12 = scmp.ne.s32.totalorder %s11452_s28, %s11453_s2  ;;  %p11458_p3 = scmp.lt.s32.totalorder %s11452_s28, %s14928_s13 }
  0xe0   : > { %p11459_p4 = scmp.lt.s32.totalorder %s11457_s29, %s11453_s2 }
  0xe1   : > { %p11455_p13 = pnand %p11454_p12, %p10736_p1 }
  0xe2   : > { %p11460_p5 = por %p11459_p4, %p11458_p3 }
  0xe3   : > { %p11456_p2 = pneg %p11455_p13 }
  0xe5   : > { %p11461_p6 = pnand %p11460_p5, %p11456_p2 }
  0xe7   : > { %11464 = shalt.err (!%p11461_p6)
}
  0xe8   : > { %10601 = dma.hbm_to_vmem [thread:$0]  (%p10736_p1), %s13047_s0, 16, %s1606_s11, [#allocation22]  }
  0xe9   : > { %s1669_s8 = sshll.u32 %s14931_s6, 4  ;;  %s12584_s22 = smov [#allocation24]   ;;  %s13069_s8 = int_to_ptr.hbm [resolvable:$true] %s1669_s8 }
  0xea   : > { %s1629_s26 = sshll.u32 %s12584_s22, 4  ;;  %s11479_s18 = sshra.s32 %s13058_s16, 4  ;;  %s1630_s26 = int_to_ptr.vmem [resolvable:$true] %s1629_s26  ;;  %s11480_s18 = int_to_ptr.hbm [resolvable:$true] %s11479_s18 }
  0xeb   : > { %s11481_s28 = scalar_lea.hbm %s11480_s18, 1  ;;  %s11485_s2 = scalar_lea.hbm %s12754_s19, 1 }
  0xec   : > { %p11482_p7 = scmp.ne.s32.totalorder %s11480_s18, %s11481_s28  ;;  %p11486_p12 = scmp.lt.s32.totalorder %s11480_s18, %s12754_s19 }
  0xed   : > { %p11487_p13 = scmp.lt.s32.totalorder %s11485_s2, %s11481_s28 }
  0xee   : > { %p11483_p8 = pnand %p11482_p7, %p10736_p1 }
  0xef   : > { %p11488_p2 = por %p11487_p13, %p11486_p12 }
  0xf0   : > { %p11484_p9 = pneg %p11483_p8 }
  0xf2   : > { %p11489_p3 = pnand %p11488_p2, %p11484_p9 }
  0xf4   : > { %11492 = shalt.err (!%p11489_p3)
}
  0xf5   : > { %10605 = dma.hbm_to_vmem [thread:$0]  (%p10736_p1), %s13058_s16, 16, %s1630_s26, [#allocation25]  }
  0xf6   : > { %s12585_s0 = smov [#allocation27]   ;;  %s1696_s29 = sshll.u32 %s12809_s25, 4  ;;  %s13080_s29 = int_to_ptr.hbm [resolvable:$true] %s1696_s29 }
  0xf7   : > { %s1671_s11 = sshll.u32 %s12585_s0, 4  ;;  %s11507_s22 = sshra.s32 %s13069_s8, 4  ;;  %s1672_s11 = int_to_ptr.vmem [resolvable:$true] %s1671_s11  ;;  %s11508_s22 = int_to_ptr.hbm [resolvable:$true] %s11507_s22 }
  0xf8   : > { %s11509_s18 = scalar_lea.hbm %s11508_s22, 1  ;;  %s11513_s28 = scalar_lea.hbm %s14931_s6, 1 }
  0xf9   : > { %p11510_p4 = scmp.ne.s32.totalorder %s11508_s22, %s11509_s18  ;;  %p11514_p7 = scmp.lt.s32.totalorder %s11508_s22, %s14931_s6 }
  0xfa   : > { %p11515_p8 = scmp.lt.s32.totalorder %s11513_s28, %s11509_s18 }
  0xfb   : > { %p11511_p5 = pnand %p11510_p4, %p10736_p1 }
  0xfc   : > { %p11516_p9 = por %p11515_p8, %p11514_p7 }
  0xfd   : > { %p11512_p6 = pneg %p11511_p5 }
  0xff   : > { %p11517_p12 = pnand %p11516_p9, %p11512_p6 }
 0x101   : > { %11520 = shalt.err (!%p11517_p12)
}
 0x102   : > { %10609 = dma.hbm_to_vmem [thread:$0]  (%p10736_p1), %s13069_s8, 16, %s1672_s11, [#allocation28]  }
 0x103   : > { %s1720_s16 = sshll.u32 %s14930_s9, 4  ;;  %s12586_s26 = smov [#allocation30]   ;;  %s13091_s16 = int_to_ptr.hbm [resolvable:$true] %s1720_s16 }
 0x104   : > { %s1698_s2 = sshll.u32 %s12586_s26, 4  ;;  %s11535_s0 = sshra.s32 %s13080_s29, 4  ;;  %s1699_s2 = int_to_ptr.vmem [resolvable:$true] %s1698_s2  ;;  %s11536_s0 = int_to_ptr.hbm [resolvable:$true] %s11535_s0 }
 0x105   : > { %s11537_s22 = scalar_lea.hbm %s11536_s0, 1  ;;  %s11541_s18 = scalar_lea.hbm %s12809_s25, 1 }
 0x106   : > { %p11538_p13 = scmp.ne.s32.totalorder %s11536_s0, %s11537_s22  ;;  %p11542_p4 = scmp.lt.s32.totalorder %s11536_s0, %s12809_s25 }
 0x107   : > { %p11543_p5 = scmp.lt.s32.totalorder %s11541_s18, %s11537_s22 }
 0x108   : > { %p11539_p2 = pnand %p11538_p13, %p10736_p1 }
 0x109   : > { %p11544_p6 = por %p11543_p5, %p11542_p4 }
 0x10a   : > { %p11540_p3 = pneg %p11539_p2 }
 0x10c   : > { %p11545_p7 = pnand %p11544_p6, %p11540_p3 }
 0x10e   : > { %11548 = shalt.err (!%p11545_p7)
}
 0x10f   : > { %10613 = dma.hbm_to_vmem [thread:$0]  (%p10736_p1), %s13080_s29, 16, %s1699_s2, [#allocation31]  }
 0x110   : > { %s12587_s8 = smov [#allocation33]   ;;  %s1752_s28 = sshll.u32 %s12844_s30, 4  ;;  %s13102_s28 = int_to_ptr.hbm [resolvable:$true] %s1752_s28 }
 0x111   : > { %s1722_s11 = sshll.u32 %s12587_s8, 4  ;;  %s11563_s26 = sshra.s32 %s13091_s16, 4  ;;  %s1723_s11 = int_to_ptr.vmem [resolvable:$true] %s1722_s11  ;;  %s11564_s26 = int_to_ptr.hbm [resolvable:$true] %s11563_s26 }
 0x112   : > { %s11565_s0 = scalar_lea.hbm %s11564_s26, 1  ;;  %s11569_s22 = scalar_lea.hbm %s14930_s9, 1 }
 0x113   : > { %p11566_p8 = scmp.ne.s32.totalorder %s11564_s26, %s11565_s0  ;;  %p11570_p13 = scmp.lt.s32.totalorder %s11564_s26, %s14930_s9 }
 0x114   : > { %p11571_p2 = scmp.lt.s32.totalorder %s11569_s22, %s11565_s0 }
 0x115   : > { %p11567_p9 = pnand %p11566_p8, %p10736_p1 }
 0x116   : > { %p11572_p3 = por %p11571_p2, %p11570_p13 }
 0x117   : > { %p11568_p12 = pneg %p11567_p9 }
 0x119   : > { %p11573_p4 = pnand %p11572_p3, %p11568_p12 }
 0x11b   : > { %11576 = shalt.err (!%p11573_p4)
}
 0x11c   : > { %10617 = dma.hbm_to_vmem [thread:$0]  (%p10736_p1), %s13091_s16, 16, %s1723_s11, [#allocation34]  }
 0x11d   : > { %s12588_s29 = smov [#allocation36]   ;;  %s1782_s18 = sshll.u32 %s14926_s17, 4  ;;  %s1783_s18 = int_to_ptr.hbm [resolvable:$true] %s1782_s18 }
 0x11e   : > { %s1754_s2 = sshll.u32 %s12588_s29, 4  ;;  %s11591_s8 = sshra.s32 %s13102_s28, 4  ;;  %s1755_s2 = int_to_ptr.vmem [resolvable:$true] %s1754_s2  ;;  %s11592_s8 = int_to_ptr.hbm [resolvable:$true] %s11591_s8 }
 0x11f   : > { %s11593_s26 = scalar_lea.hbm %s11592_s8, 192  ;;  %s11597_s0 = scalar_lea.hbm %s12844_s30, 192 }
 0x120   : > { %p11594_p5 = scmp.ne.s32.totalorder %s11592_s8, %s11593_s26  ;;  %p11598_p8 = scmp.lt.s32.totalorder %s11592_s8, %s12844_s30 }
 0x121   : > { %p11599_p9 = scmp.lt.s32.totalorder %s11597_s0, %s11593_s26 }
 0x122   : > { %p11595_p6 = pnand %p11594_p5, %p10736_p1 }
 0x123   : > { %p11600_p12 = por %p11599_p9, %p11598_p8 }
 0x124   : > { %p11596_p7 = pneg %p11595_p6 }
 0x126   : > { %p11601_p13 = pnand %p11600_p12, %p11596_p7 }
 0x128   : > { %11604 = shalt.err (!%p11601_p13)
}
 0x129   : > { %s14815_s22 = smov 192   ;;  %s14816_s16 = smov 12  }
 0x12a   : > { %10621 = dma.hbm_to_vmem [thread:$0]  (%p10736_p1), %s13102_s28, 3072, %s1755_s2, [#allocation37], %s14815_s22, %s14815_s22, %s14816_s16  }
 0x12b   : > { %s12591_s11 = smov [#allocation39]   ;;  %s1806_s8 = sshll.u32 %s12869_s24, 4  ;;  %s13125_s8 = int_to_ptr.hbm [resolvable:$true] %s1806_s8 }
 0x12c   : > { %s1784_s29 = sshll.u32 %s12591_s11, 4  ;;  %s11619_s26 = sshra.s32 %s1783_s18, 4  ;;  %s1785_s29 = int_to_ptr.vmem [resolvable:$true] %s1784_s29  ;;  %s11620_s26 = int_to_ptr.hbm [resolvable:$true] %s11619_s26 }
 0x12d   : > { %s11621_s0 = scalar_lea.hbm %s11620_s26, 1  ;;  %s11625_s3 = scalar_lea.hbm %s14926_s17, 1 }
 0x12e   : > { %p11622_p2 = scmp.ne.s32.totalorder %s11620_s26, %s11621_s0  ;;  %p11626_p5 = scmp.lt.s32.totalorder %s11620_s26, %s14926_s17 }
 0x12f   : > { %p11627_p6 = scmp.lt.s32.totalorder %s11625_s3, %s11621_s0 }
 0x130   : > { %p11623_p3 = pnand %p11622_p2, %p10736_p1 }
 0x131   : > { %p11628_p7 = por %p11627_p6, %p11626_p5 }
 0x132   : > { %p11624_p4 = pneg %p11623_p3 }
 0x134   : > { %p11629_p8 = pnand %p11628_p7, %p11624_p4 }
 0x136   : > { %11632 = shalt.err (!%p11629_p8)
}
 0x137   : > { %10625 = dma.hbm_to_vmem [thread:$0]  (%p10736_p1), %s1783_s18, 16, %s1785_s29, [#allocation40]  }
 0x138   : > { %s1830_s28 = sshll.u32 %s14929_s12, 4  ;;  %s12592_s2 = smov [#allocation42]   ;;  %s13134_s28 = int_to_ptr.hbm [resolvable:$true] %s1830_s28 }
 0x139   : > { %s1808_s11 = sshll.u32 %s12592_s2, 4  ;;  %s11647_s22 = sshra.s32 %s13125_s8, 4  ;;  %s1809_s11 = int_to_ptr.vmem [resolvable:$true] %s1808_s11  ;;  %s11648_s22 = int_to_ptr.hbm [resolvable:$true] %s11647_s22 }
 0x13a   : > { %s11649_s3 = scalar_lea.hbm %s11648_s22, 1  ;;  %s11653_s26 = scalar_lea.hbm %s12869_s24, 1 }
 0x13b   : > { %p11650_p9 = scmp.ne.s32.totalorder %s11648_s22, %s11649_s3  ;;  %p11654_p2 = scmp.lt.s32.totalorder %s11648_s22, %s12869_s24 }
 0x13c   : > { %p11655_p3 = scmp.lt.s32.totalorder %s11653_s26, %s11649_s3 }
 0x13d   : > { %p11651_p12 = pnand %p11650_p9, %p10736_p1 }
 0x13e   : > { %p11656_p4 = por %p11655_p3, %p11654_p2 }
 0x13f   : > { %p11652_p13 = pneg %p11651_p12 }
 0x141   : > { %p11657_p5 = pnand %p11656_p4, %p11652_p13 }
 0x143   : > { %11660 = shalt.err (!%p11657_p5)
}
 0x144   : > { %s14943_s18 = sld [smem:[#allocation127_spill]]  ;;  %s12593_s29 = smov [#allocation45]  }
 0x145   : > { %10629 = dma.hbm_to_vmem [thread:$0]  (%p10736_p1), %s13125_s8, 16, %s1809_s11, [#allocation43]  }
 0x146   : > { %s1832_s0 = sshll.u32 %s12593_s29, 4  ;;  %s11675_s22 = sshra.s32 %s13134_s28, 4  ;;  %s1833_s0 = int_to_ptr.vmem [resolvable:$true] %s1832_s0  ;;  %s11676_s22 = int_to_ptr.hbm [resolvable:$true] %s11675_s22 }
 0x147   : > { %s11677_s3 = scalar_lea.hbm %s11676_s22, 1  ;;  %s11681_s26 = scalar_lea.hbm %s14929_s12, 1 }
 0x148   : > { %p11678_p6 = scmp.ne.s32.totalorder %s11676_s22, %s11677_s3  ;;  %p11682_p9 = scmp.lt.s32.totalorder %s11676_s22, %s14929_s12 }
 0x149   : > { %p11683_p12 = scmp.lt.s32.totalorder %s11681_s26, %s11677_s3 }
 0x14a   : > { %s1853_s2 = sshll.u32 %s14943_s18, 4  ;;  %p11679_p7 = pnand %p11678_p6, %p10736_p1  ;;  %s13145_s2 = int_to_ptr.hbm [resolvable:$true] %s1853_s2 }
 0x14b   : > { %p11684_p13 = por %p11683_p12, %p11682_p9 }
 0x14c   : > { %p11680_p8 = pneg %p11679_p7 }
 0x14e   : > { %p11685_p2 = pnand %p11684_p13, %p11680_p8 }
 0x150   : > { %11688 = shalt.err (!%p11685_p2)
}
 0x151   : > { %s14944_s8 = sld [smem:[#allocation129_spill]]  ;;  %s12594_s11 = smov [#allocation48]  }
 0x152   : > { %10633 = dma.hbm_to_vmem [thread:$0]  (%p10736_p1), %s13134_s28, 16, %s1833_s0, [#allocation46]  }
 0x153   : > { %s1855_s29 = sshll.u32 %s12594_s11, 4  ;;  %s11703_s4 = sshra.s32 %s13145_s2, 4  ;;  %s1856_s29 = int_to_ptr.vmem [resolvable:$true] %s1855_s29  ;;  %s11704_s4 = int_to_ptr.hbm [resolvable:$true] %s11703_s4 }
 0x154   : > { %s11705_s22 = scalar_lea.hbm %s11704_s4, 256  ;;  %s11709_s3 = scalar_lea.hbm %s14943_s18, 256 }
 0x155   : > { %p11706_p3 = scmp.ne.s32.totalorder %s11704_s4, %s11705_s22  ;;  %p11710_p6 = scmp.lt.s32.totalorder %s11704_s4, %s14943_s18 }
 0x156   : > { %p11711_p7 = scmp.lt.s32.totalorder %s11709_s3, %s11705_s22 }
 0x157   : > { %s1881_s16 = sshll.u32 %s14944_s8, 4  ;;  %p11707_p4 = pnand %p11706_p3, %p10736_p1  ;;  %s1882_s16 = int_to_ptr.hbm [resolvable:$true] %s1881_s16 }
 0x158   : > { %p11712_p8 = por %p11711_p7, %p11710_p6 }
 0x159   : > { %p11708_p5 = pneg %p11707_p4 }
 0x15b   : > { %p11713_p9 = pnand %p11712_p8, %p11708_p5 }
 0x15d   : > { %11716 = shalt.err (!%p11713_p9)
}
 0x15e   : > { %s12595_s26 = smov 256   ;;  %s12596_s28 = smov 16  }
 0x15f   : > { %10637 = dma.hbm_to_vmem [thread:$0]  (%p10736_p1), %s13145_s2, 4096, %s1856_s29, [#allocation49], %s12595_s26, %s12595_s26, %s12596_s28  }
 0x160   : > { %s12597_s0 = smov [#allocation51]   ;;  %s11731_s6 = sshra.s32 %s1882_s16, 4  ;;  %s11732_s6 = int_to_ptr.hbm [resolvable:$true] %s11731_s6 }
 0x161   : > { %s1883_s11 = sshll.u32 %s12597_s0, 4  ;;  %s11733_s4 = scalar_lea.hbm %s11732_s6, 128  ;;  %s1884_s11 = int_to_ptr.vmem [resolvable:$true] %s1883_s11 }
 0x162   : > { %p11734_p12 = scmp.ne.s32.totalorder %s11732_s6, %s11733_s4  ;;  %s11737_s22 = scalar_lea.hbm %s14944_s8, 128 }
 0x163   : > { %p11738_p3 = scmp.lt.s32.totalorder %s11732_s6, %s14944_s8  ;;  %p11739_p4 = scmp.lt.s32.totalorder %s11737_s22, %s11733_s4 }
 0x164   : > { %p11735_p13 = pnand %p11734_p12, %p10736_p1 }
 0x165   : > { %p11740_p5 = por %p11739_p4, %p11738_p3 }
 0x166   : > { %p11736_p2 = pneg %p11735_p13 }
 0x168   : > { %p11741_p6 = pnand %p11740_p5, %p11736_p2 }
 0x16a   : > { %11744 = shalt.err (!%p11741_p6)
}
 0x16b   : > { %s14822_s3 = smov 128   ;;  %s14945_s2 = sld [smem:[#allocation131_spill]] }
 0x16c   : > { %s14946_s29 = sld [smem:[#allocation133_spill]]  ;;  %s12599_s28 = smov 8  }
 0x16d   : > { %10641 = dma.hbm_to_vmem [thread:$0]  (%p10736_p1), %s1882_s16, 2048, %s1884_s11, [#allocation52], %s14822_s3, %s14822_s3, %s12599_s28  }
 0x16e   : > { %s12600_s6 = smov [#allocation54]  }
 0x16f   : > { %s1912_s4 = sshll.u32 %s12600_s6, 4  ;;  %s1913_s4 = int_to_ptr.vmem [resolvable:$true] %s1912_s4 }
 0x171   : > { %s1910_s0 = sshll.u32 %s14945_s2, 4  ;;  %s11765_s12 = scalar_lea.hbm %s14945_s2, 1  ;;  %s1911_s0 = int_to_ptr.hbm [resolvable:$true] %s1910_s0 }
 0x172   : > { %s14947_s26 = smov %s14946_s29  ;;  %s1934_s22 = sshll.u32 %s14946_s29, 4  ;;  %s1935_s22 = int_to_ptr.hbm [resolvable:$true] %s1934_s22 }
 0x173   : > { %s11759_s8 = sshra.s32 %s1911_s0, 4  ;;  %s11760_s8 = int_to_ptr.hbm [resolvable:$true] %s11759_s8 }
 0x174   : > { %s11761_s9 = scalar_lea.hbm %s11760_s8, 1  ;;  %p11766_p12 = scmp.lt.s32.totalorder %s11760_s8, %s14945_s2 }
 0x175   : > { %p11762_p7 = scmp.ne.s32.totalorder %s11760_s8, %s11761_s9  ;;  %p11767_p13 = scmp.lt.s32.totalorder %s11765_s12, %s11761_s9 }
 0x177   : > { %p11763_p8 = pnand %p11762_p7, %p10736_p1  ;;  %p11768_p2 = por %p11767_p13, %p11766_p12 }
 0x179   : > { %p11764_p9 = pneg %p11763_p8 }
 0x17b   : > { %p11769_p3 = pnand %p11768_p2, %p11764_p9 }
 0x17d   : > { %11772 = shalt.err (!%p11769_p3)
}
 0x17e   : > { %10645 = dma.hbm_to_vmem [thread:$0]  (%p10736_p1), %s1911_s0, 16, %s1913_s4, [#allocation55]  }
 0x17f   : > { %s12601_s16 = smov [#allocation57]   ;;  %s1963_s29 = sshll.u32 %s12939_s27, 4  ;;  %s13182_s29 = int_to_ptr.hbm [resolvable:$true] %s1963_s29 }
 0x180   : > { %s1936_s11 = sshll.u32 %s12601_s16, 4  ;;  %s11787_s6 = sshra.s32 %s1935_s22, 4  ;;  %s1937_s11 = int_to_ptr.vmem [resolvable:$true] %s1936_s11  ;;  %s11788_s6 = int_to_ptr.hbm [resolvable:$true] %s11787_s6 }
 0x181   : > { %s11789_s9 = scalar_lea.hbm %s11788_s6, 1  ;;  %s11793_s12 = scalar_lea.hbm %s14947_s26, 1 }
 0x182   : > { %p11790_p4 = scmp.ne.s32.totalorder %s11788_s6, %s11789_s9  ;;  %p11794_p7 = scmp.lt.s32.totalorder %s11788_s6, %s14947_s26 }
 0x183   : > { %p11795_p8 = scmp.lt.s32.totalorder %s11793_s12, %s11789_s9 }
 0x184   : > { %p11791_p5 = pnand %p11790_p4, %p10736_p1 }
 0x185   : > { %p11796_p9 = por %p11795_p8, %p11794_p7 }
 0x186   : > { %p11792_p6 = pneg %p11791_p5 }
 0x188   : > { %p11797_p12 = pnand %p11796_p9, %p11792_p6 }
 0x18a   : > { %11800 = shalt.err (!%p11797_p12)
}
 0x18b   : > { %s14948_s8 = sld [smem:[#allocation90_spill]]  ;;  %s12602_s0 = smov [#allocation60]  }
 0x18c   : > { %10649 = dma.hbm_to_vmem [thread:$0]  (%p10736_p1), %s1935_s22, 16, %s1937_s11, [#allocation58]  }
 0x18d   : > { %s1965_s4 = sshll.u32 %s12602_s0, 4  ;;  %s11815_s3 = sshra.s32 %s13182_s29, 4  ;;  %s1966_s4 = int_to_ptr.vmem [resolvable:$true] %s1965_s4  ;;  %s11816_s3 = int_to_ptr.hbm [resolvable:$true] %s11815_s3 }
 0x18e   : > { %s11817_s6 = scalar_lea.hbm %s11816_s3, 16  ;;  %s11821_s9 = scalar_lea.hbm %s12939_s27, 16 }
 0x18f   : > { %p11818_p13 = scmp.ne.s32.totalorder %s11816_s3, %s11817_s6  ;;  %p11822_p4 = scmp.lt.s32.totalorder %s11816_s3, %s12939_s27 }
 0x190   : > { %p11823_p5 = scmp.lt.s32.totalorder %s11821_s9, %s11817_s6 }
 0x191   : > { %s1483_s16 = sshll.u32 %s14948_s8, 4  ;;  %p11819_p2 = pnand %p11818_p13, %p10736_p1  ;;  %s13191_s16 = int_to_ptr.hbm [resolvable:$true] %s1483_s16 }
 0x192   : > { %p11824_p6 = por %p11823_p5, %p11822_p4 }
 0x193   : > { %p11820_p3 = pneg %p11819_p2 }
 0x195   : > { %p11825_p7 = pnand %p11824_p6, %p11820_p3 }
 0x197   : > { %11828 = shalt.err (!%p11825_p7)
}
 0x198   : > { %s14949_s22 = smov 128   ;;  %s14950_s11 = sld [smem:[#allocation92_spill]] }
 0x199   : > { %10653 = dma.hbm_to_vmem [thread:$0]  (%p10736_p1), %s13182_s29, 256, %s1966_s4, [#allocation61], %s14949_s22, %s14949_s22, %s12599_s28  }
 0x19a   : > { %s12603_s0 = smov [#allocation6]   ;;  %s11843_s3 = sshra.s32 %s13191_s16, 4  ;;  %s11844_s3 = int_to_ptr.hbm [resolvable:$true] %s11843_s3 }
 0x19b   : > { %s1485_s2 = sshll.u32 %s12603_s0, 4  ;;  %s11845_s6 = scalar_lea.hbm %s11844_s3, 1  ;;  %s1486_s2 = int_to_ptr.vmem [resolvable:$true] %s1485_s2 }
 0x19c   : > { %p11846_p8 = scmp.ne.s32.totalorder %s11844_s3, %s11845_s6  ;;  %s11849_s9 = scalar_lea.hbm %s14948_s8, 1 }
 0x19d   : > { %p11850_p13 = scmp.lt.s32.totalorder %s11844_s3, %s14948_s8  ;;  %p11851_p2 = scmp.lt.s32.totalorder %s11849_s9, %s11845_s6 }
 0x19e   : > { %s1507_s12 = sshll.u32 %s14950_s11, 4  ;;  %p11847_p9 = pnand %p11846_p8, %p10736_p1  ;;  %s13205_s12 = int_to_ptr.hbm [resolvable:$true] %s1507_s12 }
 0x19f   : > { %p11852_p3 = por %p11851_p2, %p11850_p13 }
 0x1a0   : > { %p11848_p12 = pneg %p11847_p9 }
 0x1a2   : > { %p11853_p4 = pnand %p11852_p3, %p11848_p12 }
 0x1a4   : > { %11856 = shalt.err (!%p11853_p4)
}
 0x1a5   : > { %s14951_s28 = sld [smem:[#allocation98_spill]]  ;;  %s12604_s29 = smov [#allocation11]  }
 0x1a6   : > { %10583 = dma.hbm_to_vmem [thread:$0]  (%p10736_p1), %s13191_s16, 16, %s1486_s2, [#allocation7]  }
 0x1a7   : > { %s1509_s4 = sshll.u32 %s12604_s29, 4  ;;  %s11871_s0 = sshra.s32 %s13205_s12, 4  ;;  %s1510_s4 = int_to_ptr.vmem [resolvable:$true] %s1509_s4  ;;  %s11872_s0 = int_to_ptr.hbm [resolvable:$true] %s11871_s0 }
 0x1a8   : > { %s11873_s3 = scalar_lea.hbm %s11872_s0, 1  ;;  %s11877_s6 = scalar_lea.hbm %s14950_s11, 1 }
 0x1a9   : > { %p11874_p5 = scmp.ne.s32.totalorder %s11872_s0, %s11873_s3  ;;  %p11878_p8 = scmp.lt.s32.totalorder %s11872_s0, %s14950_s11 }
 0x1aa   : > { %p11879_p9 = scmp.lt.s32.totalorder %s11877_s6, %s11873_s3 }
 0x1ab   : > { %s1543_s22 = sshll.u32 %s14951_s28, 4  ;;  %p11875_p6 = pnand %p11874_p5, %p10736_p1  ;;  %s13216_s22 = int_to_ptr.hbm [resolvable:$true] %s1543_s22 }
 0x1ac   : > { %p11880_p12 = por %p11879_p9, %p11878_p8 }
 0x1ad   : > { %p11876_p7 = pneg %p11875_p6 }
 0x1af   : > { %p11881_p13 = pnand %p11880_p12, %p11876_p7 }
 0x1b1   : > { %11884 = shalt.err (!%p11881_p13)
}
 0x1b2   : > { %s14952_s2 = sld [smem:[#allocation99_spill]]  ;;  %s12605_s9 = smov [#allocation14]  }
 0x1b3   : > { %10587 = dma.hbm_to_vmem [thread:$0]  (%p10736_p1), %s13205_s12, 16, %s1510_s4, [#allocation10]  }
 0x1b4   : > { %s1545_s29 = sshll.u32 %s12605_s9, 4  ;;  %s11899_s0 = sshra.s32 %s13216_s22, 4  ;;  %s1546_s29 = int_to_ptr.vmem [resolvable:$true] %s1545_s29  ;;  %s11900_s0 = int_to_ptr.hbm [resolvable:$true] %s11899_s0 }
 0x1b5   : > { %s11901_s3 = scalar_lea.hbm %s11900_s0, 1  ;;  %s11905_s6 = scalar_lea.hbm %s14951_s28, 1 }
 0x1b6   : > { %p11902_p2 = scmp.ne.s32.totalorder %s11900_s0, %s11901_s3  ;;  %p11906_p5 = scmp.lt.s32.totalorder %s11900_s0, %s14951_s28 }
 0x1b7   : > { %p11907_p6 = scmp.lt.s32.totalorder %s11905_s6, %s11901_s3 }
 0x1b8   : > { %s1567_s16 = sshll.u32 %s14952_s2, 4  ;;  %p11903_p3 = pnand %p11902_p2, %p10736_p1  ;;  %s13227_s16 = int_to_ptr.hbm [resolvable:$true] %s1567_s16 }
 0x1b9   : > { %p11908_p7 = por %p11907_p6, %p11906_p5 }
 0x1ba   : > { %p11904_p4 = pneg %p11903_p3 }
 0x1bc   : > { %p11909_p8 = pnand %p11908_p7, %p11904_p4 }
 0x1be   : > { %11912 = shalt.err (!%p11909_p8)
}
 0x1bf   : > { %s14953_s12 = sld [smem:[#allocation101_spill]]  ;;  %s12606_s4 = smov [#allocation17]  }
 0x1c0   : > { %10591 = dma.hbm_to_vmem [thread:$0]  (%p10736_p1), %s13216_s22, 16, %s1546_s29, [#allocation13]  }
 0x1c1   : > { %s1569_s9 = sshll.u32 %s12606_s4, 4  ;;  %s11927_s0 = sshra.s32 %s13227_s16, 4  ;;  %s1570_s9 = int_to_ptr.vmem [resolvable:$true] %s1569_s9  ;;  %s11928_s0 = int_to_ptr.hbm [resolvable:$true] %s11927_s0 }
 0x1c2   : > { %s11929_s3 = scalar_lea.hbm %s11928_s0, 1  ;;  %s11933_s6 = scalar_lea.hbm %s14952_s2, 1 }
 0x1c3   : > { %p11930_p9 = scmp.ne.s32.totalorder %s11928_s0, %s11929_s3  ;;  %p11934_p2 = scmp.lt.s32.totalorder %s11928_s0, %s14952_s2 }
 0x1c4   : > { %p11935_p3 = scmp.lt.s32.totalorder %s11933_s6, %s11929_s3 }
 0x1c5   : > { %s1591_s8 = sshll.u32 %s14953_s12, 4  ;;  %p11931_p12 = pnand %p11930_p9, %p10736_p1  ;;  %s13238_s8 = int_to_ptr.hbm [resolvable:$true] %s1591_s8 }
 0x1c6   : > { %p11936_p4 = por %p11935_p3, %p11934_p2 }
 0x1c7   : > { %p11932_p13 = pneg %p11931_p12 }
 0x1c9   : > { %p11937_p5 = pnand %p11936_p4, %p11932_p13 }
 0x1cb   : > { %11940 = shalt.err (!%p11937_p5)
}
 0x1cc   : > { %s14954_s22 = sld [smem:[#allocation103_spill]]  ;;  %s12607_s4 = smov [#allocation20]  }
 0x1cd   : > { %10595 = dma.hbm_to_vmem [thread:$0]  (%p10736_p1), %s13227_s16, 16, %s1570_s9, [#allocation16]  }
 0x1ce   : > { %s1593_s11 = sshll.u32 %s12607_s4, 4  ;;  %s11955_s0 = sshra.s32 %s13238_s8, 4  ;;  %s1594_s11 = int_to_ptr.vmem [resolvable:$true] %s1593_s11  ;;  %s11956_s0 = int_to_ptr.hbm [resolvable:$true] %s11955_s0 }
 0x1cf   : > { %s11957_s3 = scalar_lea.hbm %s11956_s0, 1  ;;  %s11961_s6 = scalar_lea.hbm %s14953_s12, 1 }
 0x1d0   : > { %p11958_p6 = scmp.ne.s32.totalorder %s11956_s0, %s11957_s3  ;;  %p11962_p9 = scmp.lt.s32.totalorder %s11956_s0, %s14953_s12 }
 0x1d1   : > { %p11963_p12 = scmp.lt.s32.totalorder %s11961_s6, %s11957_s3 }
 0x1d2   : > { %s1615_s29 = sshll.u32 %s14954_s22, 4  ;;  %p11959_p7 = pnand %p11958_p6, %p10736_p1  ;;  %s13249_s29 = int_to_ptr.hbm [resolvable:$true] %s1615_s29 }
 0x1d3   : > { %p11964_p13 = por %p11963_p12, %p11962_p9 }
 0x1d4   : > { %p11960_p8 = pneg %p11959_p7 }
 0x1d6   : > { %p11965_p2 = pnand %p11964_p13, %p11960_p8 }
 0x1d8   : > { %11968 = shalt.err (!%p11965_p2)
}
 0x1d9   : > { %s14955_s16 = sld [smem:[#allocation108_spill]]  ;;  %s12608_s4 = smov [#allocation23]  }
 0x1da   : > { %10599 = dma.hbm_to_vmem [thread:$0]  (%p10736_p1), %s13238_s8, 16, %s1594_s11, [#allocation19]  }
 0x1db   : > { %s1617_s2 = sshll.u32 %s12608_s4, 4  ;;  %s11983_s0 = sshra.s32 %s13249_s29, 4  ;;  %s1618_s2 = int_to_ptr.vmem [resolvable:$true] %s1617_s2  ;;  %s11984_s0 = int_to_ptr.hbm [resolvable:$true] %s11983_s0 }
 0x1dc   : > { %s11985_s3 = scalar_lea.hbm %s11984_s0, 1  ;;  %s11989_s6 = scalar_lea.hbm %s14954_s22, 1 }
 0x1dd   : > { %p11986_p3 = scmp.ne.s32.totalorder %s11984_s0, %s11985_s3  ;;  %p11990_p6 = scmp.lt.s32.totalorder %s11984_s0, %s14954_s22 }
 0x1de   : > { %p11991_p7 = scmp.lt.s32.totalorder %s11989_s6, %s11985_s3 }
 0x1df   : > { %s14956_s9 = smov %s14955_s16  ;;  %s1651_s13 = sshll.u32 %s14955_s16, 4  ;;  %s13260_s13 = int_to_ptr.hbm [resolvable:$true] %s1651_s13 }
 0x1e0   : > { %p11987_p4 = pnand %p11986_p3, %p10736_p1  ;;  %p11992_p8 = por %p11991_p7, %p11990_p6 }
 0x1e2   : > { %p11988_p5 = pneg %p11987_p4 }
 0x1e4   : > { %p11993_p9 = pnand %p11992_p8, %p11988_p5 }
 0x1e6   : > { %11996 = shalt.err (!%p11993_p9)
}
 0x1e7   : > { %s14957_s8 = sld [smem:[#allocation112_spill]]  ;;  %s12609_s16 = smov [#allocation26]  }
 0x1e8   : > { %10603 = dma.hbm_to_vmem [thread:$0]  (%p10736_p1), %s13249_s29, 16, %s1618_s2, [#allocation22]  }
 0x1e9   : > { %s1653_s4 = sshll.u32 %s12609_s16, 4  ;;  %s12011_s0 = sshra.s32 %s13260_s13, 4  ;;  %s1654_s4 = int_to_ptr.vmem [resolvable:$true] %s1653_s4  ;;  %s12012_s0 = int_to_ptr.hbm [resolvable:$true] %s12011_s0 }
 0x1ea   : > { %s12013_s3 = scalar_lea.hbm %s12012_s0, 1  ;;  %s12017_s6 = scalar_lea.hbm %s14956_s9, 1 }
 0x1eb   : > { %p12014_p12 = scmp.ne.s32.totalorder %s12012_s0, %s12013_s3  ;;  %p12018_p3 = scmp.lt.s32.totalorder %s12012_s0, %s14956_s9 }
 0x1ec   : > { %p12019_p4 = scmp.lt.s32.totalorder %s12017_s6, %s12013_s3 }
 0x1ed   : > { %s1681_s11 = sshll.u32 %s14957_s8, 4  ;;  %p12015_p13 = pnand %p12014_p12, %p10736_p1  ;;  %s13271_s11 = int_to_ptr.hbm [resolvable:$true] %s1681_s11 }
 0x1ee   : > { %p12020_p5 = por %p12019_p4, %p12018_p3 }
 0x1ef   : > { %p12016_p2 = pneg %p12015_p13 }
 0x1f1   : > { %p12021_p6 = pnand %p12020_p5, %p12016_p2 }
 0x1f3   : > { %12024 = shalt.err (!%p12021_p6)
}
 0x1f4   : > { %s14958_s2 = sld [smem:[#allocation114_spill]]  ;;  %s12610_s29 = smov [#allocation29]  }
 0x1f5   : > { %10607 = dma.hbm_to_vmem [thread:$0]  (%p10736_p1), %s13260_s13, 16, %s1654_s4, [#allocation25]  }
 0x1f6   : > { %s1683_s16 = sshll.u32 %s12610_s29, 4  ;;  %s12039_s0 = sshra.s32 %s13271_s11, 4  ;;  %s1684_s16 = int_to_ptr.vmem [resolvable:$true] %s1683_s16  ;;  %s12040_s0 = int_to_ptr.hbm [resolvable:$true] %s12039_s0 }
 0x1f7   : > { %s12041_s3 = scalar_lea.hbm %s12040_s0, 1  ;;  %s12045_s6 = scalar_lea.hbm %s14957_s8, 1 }
 0x1f8   : > { %p12042_p7 = scmp.ne.s32.totalorder %s12040_s0, %s12041_s3  ;;  %p12046_p12 = scmp.lt.s32.totalorder %s12040_s0, %s14957_s8 }
 0x1f9   : > { %p12047_p13 = scmp.lt.s32.totalorder %s12045_s6, %s12041_s3 }
 0x1fa   : > { %s1708_s12 = sshll.u32 %s14958_s2, 4  ;;  %p12043_p8 = pnand %p12042_p7, %p10736_p1  ;;  %s13282_s12 = int_to_ptr.hbm [resolvable:$true] %s1708_s12 }
 0x1fb   : > { %p12048_p2 = por %p12047_p13, %p12046_p12 }
 0x1fc   : > { %p12044_p9 = pneg %p12043_p8 }
 0x1fe   : > { %p12049_p3 = pnand %p12048_p2, %p12044_p9 }
 0x200   : > { %12052 = shalt.err (!%p12049_p3)
}
 0x201   : > { %s14959_s13 = sld [smem:[#allocation116_spill]]  ;;  %s12611_s29 = smov [#allocation32]  }
 0x202   : > { %10611 = dma.hbm_to_vmem [thread:$0]  (%p10736_p1), %s13271_s11, 16, %s1684_s16, [#allocation28]  }
 0x203   : > { %s1710_s9 = sshll.u32 %s12611_s29, 4  ;;  %s12067_s0 = sshra.s32 %s13282_s12, 4  ;;  %s1711_s9 = int_to_ptr.vmem [resolvable:$true] %s1710_s9  ;;  %s12068_s0 = int_to_ptr.hbm [resolvable:$true] %s12067_s0 }
 0x204   : > { %s12069_s3 = scalar_lea.hbm %s12068_s0, 1  ;;  %s12073_s6 = scalar_lea.hbm %s14958_s2, 1 }
 0x205   : > { %p12070_p4 = scmp.ne.s32.totalorder %s12068_s0, %s12069_s3  ;;  %p12074_p7 = scmp.lt.s32.totalorder %s12068_s0, %s14958_s2 }
 0x206   : > { %p12075_p8 = scmp.lt.s32.totalorder %s12073_s6, %s12069_s3 }
 0x207   : > { %s1732_s4 = sshll.u32 %s14959_s13, 4  ;;  %p12071_p5 = pnand %p12070_p4, %p10736_p1  ;;  %s13293_s4 = int_to_ptr.hbm [resolvable:$true] %s1732_s4 }
 0x208   : > { %p12076_p9 = por %p12075_p8, %p12074_p7 }
 0x209   : > { %p12072_p6 = pneg %p12071_p5 }
 0x20b   : > { %p12077_p12 = pnand %p12076_p9, %p12072_p6 }
 0x20d   : > { %12080 = shalt.err (!%p12077_p12)
}
 0x20e   : > { %s14960_s11 = sld [smem:[#allocation121_spill]]  ;;  %s12612_s16 = smov [#allocation35]  }
 0x20f   : > { %10615 = dma.hbm_to_vmem [thread:$0]  (%p10736_p1), %s13282_s12, 16, %s1711_s9, [#allocation31]  }
 0x210   : > { %s1734_s29 = sshll.u32 %s12612_s16, 4  ;;  %s12095_s0 = sshra.s32 %s13293_s4, 4  ;;  %s1735_s29 = int_to_ptr.vmem [resolvable:$true] %s1734_s29  ;;  %s12096_s0 = int_to_ptr.hbm [resolvable:$true] %s12095_s0 }
 0x211   : > { %s12097_s3 = scalar_lea.hbm %s12096_s0, 1  ;;  %s12101_s6 = scalar_lea.hbm %s14959_s13, 1 }
 0x212   : > { %p12098_p13 = scmp.ne.s32.totalorder %s12096_s0, %s12097_s3  ;;  %p12102_p4 = scmp.lt.s32.totalorder %s12096_s0, %s14959_s13 }
 0x213   : > { %p12103_p5 = scmp.lt.s32.totalorder %s12101_s6, %s12097_s3 }
 0x214   : > { %s1770_s8 = sshll.u32 %s14960_s11, 4  ;;  %p12099_p2 = pnand %p12098_p13, %p10736_p1  ;;  %s13304_s8 = int_to_ptr.hbm [resolvable:$true] %s1770_s8 }
 0x215   : > { %p12104_p6 = por %p12103_p5, %p12102_p4 }
 0x216   : > { %p12100_p3 = pneg %p12099_p2 }
 0x218   : > { %p12105_p7 = pnand %p12104_p6, %p12100_p3 }
 0x21a   : > { %12108 = shalt.err (!%p12105_p7)
}
 0x21b   : > { %s14961_s12 = sld [smem:[#allocation123_spill]]  ;;  %s12613_s16 = smov [#allocation38]  }
 0x21c   : > { %10619 = dma.hbm_to_vmem [thread:$0]  (%p10736_p1), %s13293_s4, 16, %s1735_s29, [#allocation34]  }
 0x21d   : > { %s1772_s2 = sshll.u32 %s12613_s16, 4  ;;  %s12123_s0 = sshra.s32 %s13304_s8, 4  ;;  %s1773_s2 = int_to_ptr.vmem [resolvable:$true] %s1772_s2  ;;  %s12124_s0 = int_to_ptr.hbm [resolvable:$true] %s12123_s0 }
 0x21e   : > { %s12125_s3 = scalar_lea.hbm %s12124_s0, 1  ;;  %s12129_s6 = scalar_lea.hbm %s14960_s11, 1 }
 0x21f   : > { %p12126_p8 = scmp.ne.s32.totalorder %s12124_s0, %s12125_s3  ;;  %p12130_p13 = scmp.lt.s32.totalorder %s12124_s0, %s14960_s11 }
 0x220   : > { %p12131_p2 = scmp.lt.s32.totalorder %s12129_s6, %s12125_s3 }
 0x221   : > { %s1794_s9 = sshll.u32 %s14961_s12, 4  ;;  %p12127_p9 = pnand %p12126_p8, %p10736_p1  ;;  %s13315_s9 = int_to_ptr.hbm [resolvable:$true] %s1794_s9 }
 0x222   : > { %p12132_p3 = por %p12131_p2, %p12130_p13 }
 0x223   : > { %p12128_p12 = pneg %p12127_p9 }
 0x225   : > { %p12133_p4 = pnand %p12132_p3, %p12128_p12 }
 0x227   : > { %12136 = shalt.err (!%p12133_p4)
}
 0x228   : > { %s14962_s4 = sld [smem:[#allocation124_spill]]  ;;  %s12614_s29 = smov [#allocation41]  }
 0x229   : > { %10623 = dma.hbm_to_vmem [thread:$0]  (%p10736_p1), %s13304_s8, 16, %s1773_s2, [#allocation37]  }
 0x22a   : > { %s1796_s16 = sshll.u32 %s12614_s29, 4  ;;  %s12151_s0 = sshra.s32 %s13315_s9, 4  ;;  %s1797_s16 = int_to_ptr.vmem [resolvable:$true] %s1796_s16  ;;  %s12152_s0 = int_to_ptr.hbm [resolvable:$true] %s12151_s0 }
 0x22b   : > { %s12153_s3 = scalar_lea.hbm %s12152_s0, 3  ;;  %s12157_s6 = scalar_lea.hbm %s14961_s12, 3 }
 0x22c   : > { %p12154_p5 = scmp.ne.s32.totalorder %s12152_s0, %s12153_s3  ;;  %p12158_p8 = scmp.lt.s32.totalorder %s12152_s0, %s14961_s12 }
 0x22d   : > { %p12159_p9 = scmp.lt.s32.totalorder %s12157_s6, %s12153_s3 }
 0x22e   : > { %s1818_s13 = sshll.u32 %s14962_s4, 4  ;;  %p12155_p6 = pnand %p12154_p5, %p10736_p1  ;;  %s13326_s13 = int_to_ptr.hbm [resolvable:$true] %s1818_s13 }
 0x22f   : > { %p12160_p12 = por %p12159_p9, %p12158_p8 }
 0x230   : > { %p12156_p7 = pneg %p12155_p6 }
 0x232   : > { %p12161_p13 = pnand %p12160_p12, %p12156_p7 }
 0x234   : > { %12164 = shalt.err (!%p12161_p13)
}
 0x235   : > { %s14963_s8 = sld [smem:[#allocation126_spill]]  ;;  %s12615_s29 = smov [#allocation44]  }
 0x236   : > { %10627 = dma.hbm_to_vmem [thread:$0]  (%p10736_p1), %s13315_s9, 48, %s1797_s16, [#allocation40]  }
 0x237   : > { %s1820_s11 = sshll.u32 %s12615_s29, 4  ;;  %s12179_s0 = sshra.s32 %s13326_s13, 4  ;;  %s1821_s11 = int_to_ptr.vmem [resolvable:$true] %s1820_s11  ;;  %s12180_s0 = int_to_ptr.hbm [resolvable:$true] %s12179_s0 }
 0x238   : > { %s12181_s3 = scalar_lea.hbm %s12180_s0, 1  ;;  %s12185_s6 = scalar_lea.hbm %s14962_s4, 1 }
 0x239   : > { %p12182_p2 = scmp.ne.s32.totalorder %s12180_s0, %s12181_s3  ;;  %p12186_p5 = scmp.lt.s32.totalorder %s12180_s0, %s14962_s4 }
 0x23a   : > { %p12187_p6 = scmp.lt.s32.totalorder %s12185_s6, %s12181_s3 }
 0x23b   : > { %s1842_s2 = sshll.u32 %s14963_s8, 4  ;;  %p12183_p3 = pnand %p12182_p2, %p10736_p1  ;;  %s13337_s2 = int_to_ptr.hbm [resolvable:$true] %s1842_s2 }
 0x23c   : > { %p12188_p7 = por %p12187_p6, %p12186_p5 }
 0x23d   : > { %p12184_p4 = pneg %p12183_p3 }
 0x23f   : > { %p12189_p8 = pnand %p12188_p7, %p12184_p4 }
 0x241   : > { %12192 = shalt.err (!%p12189_p8)
}
 0x242   : > { %s14964_s9 = sld [smem:[#allocation128_spill]]  ;;  %s12616_s16 = smov [#allocation47]  }
 0x243   : > { %10631 = dma.hbm_to_vmem [thread:$0]  (%p10736_p1), %s13326_s13, 16, %s1821_s11, [#allocation43]  }
 0x244   : > { %s1844_s29 = sshll.u32 %s12616_s16, 4  ;;  %s12207_s0 = sshra.s32 %s13337_s2, 4  ;;  %s1845_s29 = int_to_ptr.vmem [resolvable:$true] %s1844_s29  ;;  %s12208_s0 = int_to_ptr.hbm [resolvable:$true] %s12207_s0 }
 0x245   : > { %s12209_s3 = scalar_lea.hbm %s12208_s0, 1  ;;  %s12213_s6 = scalar_lea.hbm %s14963_s8, 1 }
 0x246   : > { %p12210_p9 = scmp.ne.s32.totalorder %s12208_s0, %s12209_s3  ;;  %p12214_p2 = scmp.lt.s32.totalorder %s12208_s0, %s14963_s8 }
 0x247   : > { %p12215_p3 = scmp.lt.s32.totalorder %s12213_s6, %s12209_s3 }
 0x248   : > { %s1867_s12 = sshll.u32 %s14964_s9, 4  ;;  %p12211_p12 = pnand %p12210_p9, %p10736_p1  ;;  %s13348_s12 = int_to_ptr.hbm [resolvable:$true] %s1867_s12 }
 0x249   : > { %p12216_p4 = por %p12215_p3, %p12214_p2 }
 0x24a   : > { %p12212_p13 = pneg %p12211_p12 }
 0x24c   : > { %p12217_p5 = pnand %p12216_p4, %p12212_p13 }
 0x24e   : > { %12220 = shalt.err (!%p12217_p5)
}
 0x24f   : > { %s14965_s13 = sld [smem:[#allocation130_spill]]  ;;  %s12617_s11 = smov [#allocation50]  }
 0x250   : > { %10635 = dma.hbm_to_vmem [thread:$0]  (%p10736_p1), %s13337_s2, 16, %s1845_s29, [#allocation46]  }
 0x251   : > { %s1869_s16 = sshll.u32 %s12617_s11, 4  ;;  %s12235_s14 = sshra.s32 %s13348_s12, 4  ;;  %s1870_s16 = int_to_ptr.vmem [resolvable:$true] %s1869_s16  ;;  %s12236_s14 = int_to_ptr.hbm [resolvable:$true] %s12235_s14 }
 0x252   : > { %s12237_s0 = scalar_lea.hbm %s12236_s14, 256  ;;  %s12241_s3 = scalar_lea.hbm %s14964_s9, 256 }
 0x253   : > { %p12238_p6 = scmp.ne.s32.totalorder %s12236_s14, %s12237_s0  ;;  %p12242_p9 = scmp.lt.s32.totalorder %s12236_s14, %s14964_s9 }
 0x254   : > { %p12243_p12 = scmp.lt.s32.totalorder %s12241_s3, %s12237_s0 }
 0x255   : > { %s1895_s4 = sshll.u32 %s14965_s13, 4  ;;  %p12239_p7 = pnand %p12238_p6, %p10736_p1  ;;  %s1896_s4 = int_to_ptr.hbm [resolvable:$true] %s1895_s4 }
 0x256   : > { %p12244_p13 = por %p12243_p12, %p12242_p9 }
 0x257   : > { %p12240_p8 = pneg %p12239_p7 }
 0x259   : > { %p12245_p2 = pnand %p12244_p13, %p12240_p8 }
 0x25b   : > { %12248 = shalt.err (!%p12245_p2)
}
 0x25c   : > { %s12618_s6 = smov 64   ;;  %s14966_s2 = sld [smem:[#allocation132_spill]] }
 0x25d   : > { %s12619_s29 = smov 4   ;;  %s12620_s11 = smov [#allocation53]  }
 0x25e   : > { %10639 = dma.hbm_to_vmem [thread:$0]  (%p10736_p1), %s13348_s12, 4096, %s1870_s16, [#allocation49], %s12618_s6, %s12618_s6, %s12619_s29  }
 0x25f   : > { %s1897_s8 = sshll.u32 %s12620_s11, 4  ;;  %s12263_s14 = sshra.s32 %s1896_s4, 4  ;;  %s1898_s8 = int_to_ptr.vmem [resolvable:$true] %s1897_s8  ;;  %s12264_s14 = int_to_ptr.hbm [resolvable:$true] %s12263_s14 }
 0x260   : > { %s12265_s0 = scalar_lea.hbm %s12264_s14, 192  ;;  %s12269_s3 = scalar_lea.hbm %s14965_s13, 192 }
 0x261   : > { %p12266_p3 = scmp.ne.s32.totalorder %s12264_s14, %s12265_s0  ;;  %p12270_p6 = scmp.lt.s32.totalorder %s12264_s14, %s14965_s13 }
 0x262   : > { %s1922_s17 = sshll.u32 %s14966_s2, 4  ;;  %p12271_p7 = scmp.lt.s32.totalorder %s12269_s3, %s12265_s0  ;;  %s13368_s17 = int_to_ptr.hbm [resolvable:$true] %s1922_s17 }
 0x263   : > { %p12267_p4 = pnand %p12266_p3, %p10736_p1 }
 0x264   : > { %p12272_p8 = por %p12271_p7, %p12270_p6 }
 0x265   : > { %p12268_p5 = pneg %p12267_p4 }
 0x267   : > { %p12273_p9 = pnand %p12272_p8, %p12268_p5 }
 0x269   : > { %12276 = shalt.err (!%p12273_p9)
}
 0x26a   : > { %s14967_s12 = smov 12   ;;  %s14968_s16 = smov 192  }
 0x26b   : > { %s14969_s6 = sld [smem:[#allocation134_spill]]  ;;  %s12621_s11 = smov [#allocation56]  }
 0x26c   : > { %10643 = dma.hbm_to_vmem [thread:$0]  (%p10736_p1), %s1896_s4, 3072, %s1898_s8, [#allocation52], %s14968_s16, %s14968_s16, %s14967_s12  }
 0x26d   : > { %s1924_s9 = sshll.u32 %s12621_s11, 4  ;;  %s12291_s14 = sshra.s32 %s13368_s17, 4  ;;  %s1925_s9 = int_to_ptr.vmem [resolvable:$true] %s1924_s9  ;;  %s12292_s14 = int_to_ptr.hbm [resolvable:$true] %s12291_s14 }
 0x26e   : > { %s12293_s0 = scalar_lea.hbm %s12292_s14, 1  ;;  %s12297_s3 = scalar_lea.hbm %s14966_s2, 1 }
 0x26f   : > { %p12294_p12 = scmp.ne.s32.totalorder %s12292_s14, %s12293_s0  ;;  %p12298_p3 = scmp.lt.s32.totalorder %s12292_s14, %s14966_s2 }
 0x270   : > { %p12299_p4 = scmp.lt.s32.totalorder %s12297_s3, %s12293_s0 }
 0x271   : > { %s1946_s29 = sshll.u32 %s14969_s6, 4  ;;  %p12295_p13 = pnand %p12294_p12, %p10736_p1  ;;  %s13380_s29 = int_to_ptr.hbm [resolvable:$true] %s1946_s29 }
 0x272   : > { %p12300_p5 = por %p12299_p4, %p12298_p3 }
 0x273   : > { %p12296_p2 = pneg %p12295_p13 }
 0x275   : > { %p12301_p6 = pnand %p12300_p5, %p12296_p2 }
 0x277   : > { %12304 = shalt.err (!%p12301_p6)
}
 0x278   : > { %10647 = dma.hbm_to_vmem [thread:$0]  (%p10736_p1), %s13368_s17, 16, %s1925_s9, [#allocation55]  }
 0x279   : > { %s12622_s4 = smov [#allocation59]   ;;  %s1978_s12 = sshll.u32 %s14925_s1, 4  ;;  %s1979_s12 = int_to_ptr.hbm [resolvable:$true] %s1978_s12 }
 0x27a   : > { %s1948_s8 = sshll.u32 %s12622_s4, 4  ;;  %s12319_s16 = sshra.s32 %s13380_s29, 4  ;;  %s1949_s8 = int_to_ptr.vmem [resolvable:$true] %s1948_s8  ;;  %s12320_s16 = int_to_ptr.hbm [resolvable:$true] %s12319_s16 }
 0x27b   : > { %s12321_s11 = scalar_lea.hbm %s12320_s16, 1  ;;  %s12325_s14 = scalar_lea.hbm %s14969_s6, 1 }
 0x27c   : > { %p12322_p7 = scmp.ne.s32.totalorder %s12320_s16, %s12321_s11  ;;  %p12326_p12 = scmp.lt.s32.totalorder %s12320_s16, %s14969_s6 }
 0x27d   : > { %p12327_p13 = scmp.lt.s32.totalorder %s12325_s14, %s12321_s11 }
 0x27e   : > { %p12323_p8 = pnand %p12322_p7, %p10736_p1 }
 0x27f   : > { %p12328_p2 = por %p12327_p13, %p12326_p12 }
 0x280   : > { %p12324_p9 = pneg %p12323_p8 }
 0x282   : > { %p12329_p3 = pnand %p12328_p2, %p12324_p9 }
 0x284   : > { %12332 = shalt.err (!%p12329_p3)
}
 0x285   : > { %10651 = dma.hbm_to_vmem [thread:$0]  (%p10736_p1), %s13380_s29, 16, %s1949_s8, [#allocation58]  }
 0x286   : > { %s12623_s17 = smov [#allocation62]   ;;  %s12347_s0 = sshra.s32 %s1979_s12, 4  ;;  %s12348_s0 = int_to_ptr.hbm [resolvable:$true] %s12347_s0 }
 0x287   : > { %s1980_s9 = sshll.u32 %s12623_s17, 4  ;;  %s12349_s3 = scalar_lea.hbm %s12348_s0, 1  ;;  %s1981_s9 = int_to_ptr.vmem [resolvable:$true] %s1980_s9 }
 0x288   : > { %p12350_p4 = scmp.ne.s32.totalorder %s12348_s0, %s12349_s3  ;;  %s12353_s4 = scalar_lea.hbm %s14925_s1, 1 }
 0x289   : > { %p12354_p7 = scmp.lt.s32.totalorder %s12348_s0, %s14925_s1  ;;  %p12355_p8 = scmp.lt.s32.totalorder %s12353_s4, %s12349_s3 }
 0x28a   : > { %p12351_p5 = pnand %p12350_p4, %p10736_p1 }
 0x28b   : > { %p12356_p9 = por %p12355_p8, %p12354_p7 }
 0x28c   : > { %p12352_p6 = pneg %p12351_p5 }
 0x28e   : > { %p12357_p12 = pnand %p12356_p9, %p12352_p6 }
 0x290   : > { %12360 = shalt.err (!%p12357_p12)
}
 0x291   : > { %10655 = dma.hbm_to_vmem [thread:$0]  (%p10736_p1), %s1979_s12, 16, %s1981_s9, [#allocation61]  }
 0x292 PF: > { %2004 = sbr.rel (%p13007_p0) target bundleno = 9020 (0x233c), region = 260  ;;  %p10773_p13 = scmp.eq.s32.totalorder (!%p13007_p0), %s12980_s15, 0 }
 0x297   : > { %12422 = dma.done.wait (%p10773_p13), [#allocation7], 16  }
 0x298   : > { %12424 = vsyncadd (%p10773_p13), [#allocation7], 4294967280 }
 0x299   : > { %12426 = dma.done.wait (%p10773_p13), [#allocation10], 32  }
 0x29a   : > { %12428 = vsyncadd (%p10773_p13), [#allocation10], 4294967264 }
 0x29b   : > { %12430 = dma.done.wait (%p10773_p13), [#allocation13], 32  }
 0x29c   : > { %12432 = vsyncadd (%p10773_p13), [#allocation13], 4294967264 }
 0x29d   : > { %12434 = dma.done.wait (%p10773_p13), [#allocation16], 32  }
 0x29e   : > { %12436 = vsyncadd (%p10773_p13), [#allocation16], 4294967264 }
 0x29f   : > { %12438 = dma.done.wait (%p10773_p13), [#allocation19], 32  }
 0x2a0   : > { %12440 = vsyncadd (%p10773_p13), [#allocation19], 4294967264 }
 0x2a1   : > { %12442 = dma.done.wait (%p10773_p13), [#allocation22], 32  }
 0x2a2   : > { %12444 = vsyncadd (%p10773_p13), [#allocation22], 4294967264 }
 0x2a3   : > { %12446 = dma.done.wait (%p10773_p13), [#allocation25], 32  }
 0x2a4   : > { %12448 = vsyncadd (%p10773_p13), [#allocation25], 4294967264 }
 0x2a5   : > { %12450 = dma.done.wait (%p10773_p13), [#allocation28], 32  }
 0x2a6   : > { %12452 = vsyncadd (%p10773_p13), [#allocation28], 4294967264 }
 0x2a7   : > { %12454 = dma.done.wait (%p10773_p13), [#allocation31], 32  }
 0x2a8   : > { %12456 = vsyncadd (%p10773_p13), [#allocation31], 4294967264 }
 0x2a9   : > { %12458 = dma.done.wait (%p10773_p13), [#allocation34], 32  }
 0x2aa   : > { %12460 = vsyncadd (%p10773_p13), [#allocation34], 4294967264 }
 0x2ab   : > { %12462 = dma.done.wait (%p10773_p13), [#allocation37], 3088  }
 0x2ac   : > { %12464 = vsyncadd (%p10773_p13), [#allocation37], 4294964208 }
 0x2ad   : > { %12466 = dma.done.wait (%p10773_p13), [#allocation40], 64  }
 0x2ae   : > { %12468 = vsyncadd (%p10773_p13), [#allocation40], 4294967232 }
 0x2af   : > { %12470 = dma.done.wait (%p10773_p13), [#allocation43], 32  }
 0x2b0   : > { %12472 = vsyncadd (%p10773_p13), [#allocation43], 4294967264 }
 0x2b1   : > { %12474 = dma.done.wait (%p10773_p13), [#allocation46], 32  }
 0x2b2   : > { %12476 = vsyncadd (%p10773_p13), [#allocation46], 4294967264 }
 0x2b3   : > { %12478 = dma.done.wait (%p10773_p13), [#allocation49], 8192  }
 0x2b4   : > { %12480 = vsyncadd (%p10773_p13), [#allocation49], 4294959104 }
 0x2b5   : > { %12482 = dma.done.wait (%p10773_p13), [#allocation52], 5120  }
 0x2b6   : > { %12484 = vsyncadd (%p10773_p13), [#allocation52], 4294962176 }
 0x2b7   : > { %12486 = dma.done.wait (%p10773_p13), [#allocation55], 32  }
 0x2b8   : > { %12488 = vsyncadd (%p10773_p13), [#allocation55], 4294967264 }
 0x2b9   : > { %12490 = dma.done.wait (%p10773_p13), [#allocation58], 32  }
 0x2ba   : > { %12492 = vsyncadd (%p10773_p13), [#allocation58], 4294967264 }
 0x2bb   : > { %12494 = dma.done.wait (%p10773_p13), [#allocation61], 272  }
 0x2bc   : > { %12496 = vsyncadd (%p10773_p13), [#allocation61], 4294967024  ;;  %s14970_s23 = sld [smem:[#allocation85_spill]]  ;;  %p2323_p0 = scmp.lt.s32.totalorder %s12980_s15, 1  ;;  %vm2344_vm0 = vcmask 130048   ;;  %v2362_v6 = vld [vmem:[#allocation60] sm:$0xff] }
 0x2bd   : > { %s14971_s29 = sld [smem:[#allocation109_spill]]  ;;  %v11047_v4 = vld [vmem:[#allocation26] ss:$0 sm:$0xff]  ;;  %s13490_s11 = sshll.u32 %s12980_s15, 7  ;;  %v2363_v10 = vld [vmem:[#allocation60 + $0x8] sm:$0xff]  ;;  %vm2393_vm1 = vcmask 1040384  }
 0x2be   : > { %s2324_s8 = scalar_select %p2323_p0, %s12980_s15, 1  ;;  %vm2395_vm2 = vcmask 1041408   ;;  %vm2397_vm3 = vcmask 1042432   ;;  %vm2401_vm4 = vcmask 1043456   ;;  %v12624_v24 = vmov 128.0  }
 0x2bf   : > { %s14842_s14 = sadd.s32 1, %s13490_s11  ;;  %s14841_s17 = sadd.s32 2, %s13490_s11  ;;  %11081 = vrcp.f32 %v12624_v24  ;;  %v9381_v25 = vld [vmem:[#allocation36 + $0xa8] sm:$0xf]  ;;  %v10393_v26 = vld [vmem:[#allocation36 + $0xb0] sm:$0xf0] }
 0x2c0   : > { %s10369_s12 = sshll.u32 %s2324_s8, 4  ;;  %s14840_s9 = sadd.s32 3, %s13490_s11  ;;  %v10392_v27 = vld [vmem:[#allocation36 + $0xac] sm:$0xf]  ;;  %v9382_v28 = vor.u32 %v10393_v26, %v9381_v25  ;;  %v9383_v29 = vld [vmem:[#allocation36 + $0xb4] sm:$0xf0] }
 0x2c1   : > { %s2373_s0 = sld [smem:[#allocation5 + %s14842_s14]]  ;;  %v9389_v30 = vld [vmem:[#allocation36 + $0xb0] sm:$0xf]  ;;  %v10394_v31 = vld [vmem:[#allocation36 + $0xb8] sm:$0xf0]  ;;  %v9386_v32 = vor.u32 %v10392_v27, %v9383_v29  ;;  %vm2907_vm9 = vcmask 27648  }
 0x2c2   : > { %s2327_s16 = scalar_lea.vmem %s14970_s23, %s10369_s12  ;;  %s2377_s3 = sld [smem:[#allocation5 + %s14841_s17]]  ;;  %v9390_v33 = vor.u32 %v10394_v31, %v9389_v30  ;;  %2608 = vmatpush.bf16.msra.mxu1 %v9382_v28  ;;  %v9369_v45 = vld [vmem:[#allocation36 + $0x90] sm:$0xf]  ;;  %v10390_v46 = vld [vmem:[#allocation36 + $0x98] sm:$0xf0]  ;;  %vm2996_vm10 = vcmask 31744  }
 0x2c3   : > { %v10370_v0 = vld [vmem:[%s14971_s29] sm:$0xff]  ;;  %v2330_v2 = vld [vmem:[%s2327_s16 + $0x8] sm:$0xff]  ;;  %s2381_s4 = sld [smem:[#allocation5 + %s14840_s9]]  ;;  %2621 = vmatpush.bf16.msra.mxu2 %v9386_v32  ;;  %v10389_v47 = vld [vmem:[#allocation36 + $0x94] sm:$0xf]  ;;  %v9370_v48 = vor.u32 %v10390_v46, %v9369_v45 }
 0x2c4   : > { %v2329_v1 = vld [vmem:[%s2327_s16] sm:$0xff]  ;;  %2355 = vmatpush.bf16.msra.mxu0 %v10370_v0  ;;  %s2369_s23 = sld [smem:[#allocation5 + %s13490_s11]]  ;;  %2634 = vmatpush.bf16.msra.mxu3 %v9390_v33  ;;  %v10391_v51 = vld [vmem:[#allocation36 + $0xa0] sm:$0xf0]  ;;  %v9359_v58 = vld [vmem:[#allocation36 + $0x84] sm:$0xf0] }
 0x2c5   : > { %v2331_v3 = vpack.c.bf16 %v2330_v2, %v2329_v1  ;;  %v11082_v34 = vpop.eup %11081  ;;  %v9371_v49 = vld [vmem:[#allocation36 + $0x9c] sm:$0xf0]  ;;  %v9377_v50 = vld [vmem:[#allocation36 + $0x98] sm:$0xf]  ;;  %v10387_v55 = vld [vmem:[#allocation36 + $0x80] sm:$0xf0] }
 0x2c6   : > { %v2406_v35 = vmul.f32 128.0, %v11082_v34  ;;  %vm2410_vm5 = vweird.f32 %v11082_v34  ;;  %v9374_v52 = vor.u32 %v10389_v47, %v9371_v49  ;;  %v9378_v53 = vor.u32 %v10391_v51, %v9377_v50  ;;  %2609 = vmatpush.bf16.msra.mxu1 %v9370_v48  ;;  %v9357_v54 = vld [vmem:[#allocation36 + $0x78] sm:$0xf]  ;;  %v10386_v56 = vld [vmem:[#allocation36 + $0x7c] sm:$0xf] }
 0x2c7   : > { %9293 = vmatmul.msk.bf16.vlgmr.msra.gmra.mxu0 %vm2344_vm0, %v2331_v3  ;;  %s2374_s29 = scalar_lea.vmem [#allocation2], %s2373_s0  ;;  %v9358_v57 = vor.u32 %v10387_v55, %v9357_v54  ;;  %v9365_v59 = vld [vmem:[#allocation36 + $0x80] sm:$0xf]  ;;  %v10388_v60 = vld [vmem:[#allocation36 + $0x88] sm:$0xf0]  ;;  %v9362_v61 = vor.u32 %v10386_v56, %v9359_v58  ;;  %s14972_s0 = sld [smem:[#allocation113_spill]] }
 0x2c8   : > { %s2378_s8 = scalar_lea.vmem [#allocation2], %s2377_s3  ;;  %v2407_v36 = vsub.f32 1.0, %v2406_v35  ;;  %2622 = vmatpush.bf16.msra.mxu2 %v9374_v52  ;;  %2635 = vmatpush.bf16.msra.mxu3 %v9378_v53  ;;  %v9366_v62 = vor.u32 %v10388_v60, %v9365_v59  ;;  %v9345_v63 = vld [vmem:[#allocation36 + $0x60] sm:$0xf]  ;;  %v10384_v0 = vld [vmem:[#allocation36 + $0x68] sm:$0xf0] }
 0x2c9   : > { %s2382_s12 = scalar_lea.vmem [#allocation2], %s2381_s4  ;;  %v10383_v1 = vld [vmem:[#allocation36 + $0x64] sm:$0xf]  ;;  %v9346_v2 = vor.u32 %v10384_v0, %v9345_v63  ;;  %v9347_v3 = vld [vmem:[#allocation36 + $0x6c] sm:$0xf0]  ;;  %s14847_s3 = smov 96  }
 0x2ca   : > { %s2370_s16 = scalar_lea.vmem [#allocation2], %s2369_s23  ;;  %v2408_v37 = vmul.f32 %v11082_v34, %v2407_v36  ;;  %2610 = vmatpush.bf16.msra.mxu1 %v9358_v57  ;;  %v10379_v24 = vld [vmem:[#allocation36 + $0x40] sm:$0xf0]  ;;  %v9309_v27 = vld [vmem:[#allocation36 + $0x18] sm:$0xf]  ;;  %s14845_s4 = smov 112  }
 0x2cb   : > { %v10375_v28 = vld [vmem:[#allocation36 + $0x20] sm:$0xf0]  ;;  %v10374_v29 = vld [vmem:[#allocation36 + $0x1c] sm:$0xf]  ;;  %v9311_v31 = vld [vmem:[#allocation36 + $0x24] sm:$0xf0] }
 0x2cc   : > { %v2409_v38 = vadd.f32 %v11082_v34, %v2408_v37  ;;  %2623 = vmatpush.bf16.msra.mxu2 %v9362_v61  ;;  %2636 = vmatpush.bf16.msra.mxu3 %v9366_v62  ;;  %v9310_v30 = vor.u32 %v10375_v28, %v9309_v27  ;;  %v9317_v32 = vld [vmem:[#allocation36 + $0x20] sm:$0xf]  ;;  %v10376_v33 = vld [vmem:[#allocation36 + $0x28] sm:$0xf0]  ;;  %v11048_v56 = vld [vmem:[#allocation32] ss:$0 sm:$0xff] }
 0x2cd   : > { %v9318_v35 = vor.u32 %v10376_v33, %v9317_v32  ;;  %v9297_v36 = vld [vmem:[#allocation36] sm:$0xf]  ;;  %v10372_v37 = vld [vmem:[#allocation36 + $0x8] sm:$0xf0]  ;;  %v11049_v59 = vld [vmem:[#allocation30] ss:$0 sm:$0xff] }
 0x2ce   : > { %v13506_v39 = vsel %vm2410_vm5, %v11082_v34, %v2409_v38  ;;  %2611 = vmatpush.bf16.msra.mxu1 %v9346_v2  ;;  %v9314_v34 = vor.u32 %v10374_v29, %v9311_v31  ;;  %v10371_v38 = vld [vmem:[#allocation36 + $0x4] sm:$0xf]  ;;  %v2472_v63 = vld [vmem:[%s14972_s0] sm:$0x7]  ;;  %s12627_s23 = smov 48   ;;  %s14973_s0 = sld [smem:[#allocation119_spill]] }
 0x2cf   : > { %v2474_v0 = vperm.slane %v2472_v63, 0 }
 0x2d4   : > { %s14974_s9 = smov %s14973_s0 }
 0x344   : > { %v2357_v5 = vpop.f32.mrf.mxu0 }
 0x345   : > { %v2358_v7 = vadd.f32 %v11047_v4, %v2357_v5  ;;  %v10385_v5 = vld [vmem:[#allocation36 + $0x70] sm:$0xf0] }
 0x347   : > { %v2364_v8 = vadd.f32 %v2362_v6, %v2358_v7  ;;  %v9350_v6 = vor.u32 %v10383_v1, %v9347_v3  ;;  %v2475_v3 = vperm.slane %v2472_v63, 1 }
 0x349   : > { %2366 = vst [vmem:[#allocation2] sm:$0xff] %v2364_v8  ;;  %2624 = vmatpush.bf16.msra.mxu2 %v9350_v6  ;;  %v9333_v8 = vld [vmem:[#allocation36 + $0x48] sm:$0xf] }
 0x34c   : > { %v2359_v9 = vpop.f32.mrf.mxu0 }
 0x34d   : > { %v2360_v11 = vadd.f32 %v11047_v4, %v2359_v9  ;;  %v9353_v4 = vld [vmem:[#allocation36 + $0x68] sm:$0xf]  ;;  %v10381_v9 = vld [vmem:[#allocation36 + $0x50] sm:$0xf0] }
 0x34e   : > { %v9354_v7 = vor.u32 %v10385_v5, %v9353_v4  ;;  %v2476_v4 = vperm.slane %v2472_v63, 2 }
 0x34f   : > { %v2365_v12 = vadd.f32 %v2363_v10, %v2360_v11  ;;  %v10380_v10 = vld [vmem:[#allocation36 + $0x4c] sm:$0xf]  ;;  %v9334_v11 = vor.u32 %v10381_v9, %v9333_v8 }
 0x350   : > { %2637 = vmatpush.bf16.msra.mxu3 %v9354_v7 }
 0x351   : > { %2367 = vst [vmem:[#allocation2 + $0x8] sm:$0xff] %v2365_v12  ;;  %v9335_v12 = vld [vmem:[#allocation36 + $0x54] sm:$0xf0]  ;;  %2612 = vmatpush.bf16.msra.mxu1 %v9334_v11 }
 0x358   : > { %v2375_v13 = vld [vmem:[%s2374_s29] sm:$0x1]  ;;  %s14843_s29 = smov 64  }
 0x359   : > { %v2379_v14 = vld [vmem:[%s2378_s8] sm:$0x1]  ;;  %v2385_v16 = vrot.slane %v2375_v13, 7  ;;  %v9341_v13 = vld [vmem:[#allocation36 + $0x50] sm:$0xf]  ;;  %s12629_s8 = smov 32  }
 0x35a   : > { %v2383_v15 = vld [vmem:[%s2382_s12] sm:$0x1]  ;;  %v2388_v17 = vrot.slane %v2379_v14, 6  ;;  %v10382_v14 = vld [vmem:[#allocation36 + $0x58] sm:$0xf0]  ;;  %s12630_s12 = smov 80  }
 0x35b   : > { %v2371_v18 = vld [vmem:[%s2370_s16] sm:$0x1]  ;;  %v2391_v19 = vrot.slane %v2383_v15, 5  ;;  %v9338_v15 = vor.u32 %v10380_v10, %v9335_v12  ;;  %s12631_s16 = smov 16  }
 0x35c   : > { %v2394_v20 = vsel %vm2393_vm1, %v2371_v18, %v2385_v16  ;;  %v9342_v16 = vor.u32 %v10382_v14, %v9341_v13  ;;  %v10378_v18 = vld [vmem:[#allocation36 + $0x38] sm:$0xf0] }
 0x35d   : > { %v2396_v21 = vsel %vm2395_vm2, %v2394_v20, %v2388_v17  ;;  %2625 = vmatpush.bf16.msra.mxu2 %v9338_v15  ;;  %v9321_v17 = vld [vmem:[#allocation36 + $0x30] sm:$0xf] }
 0x35e   : > { %v13502_v22 = vsel %vm2397_vm3, %v2396_v21, %v2391_v19  ;;  %2638 = vmatpush.bf16.msra.mxu3 %v9342_v16  ;;  %v10377_v19 = vld [vmem:[#allocation36 + $0x34] sm:$0xf]  ;;  %v9322_v20 = vor.u32 %v10378_v18, %v9321_v17  ;;  %v9323_v21 = vld [vmem:[#allocation36 + $0x3c] sm:$0xf0] }
 0x35f   : > { %v2402_v23 = vsel %vm2401_vm4, %v13502_v22, 0.0  ;;  %v9326_v25 = vor.u32 %v10377_v19, %v9323_v21 }
 0x360   : > { %2403 = vadd.xlane.f32.xlu0 %v2402_v23  ;;  %v9329_v23 = vld [vmem:[#allocation36 + $0x38] sm:$0xf]  ;;  %2613 = vmatpush.bf16.msra.mxu1 %v9322_v20 }
 0x361   : > { %v9330_v26 = vor.u32 %v10379_v24, %v9329_v23  ;;  %2626 = vmatpush.bf16.msra.mxu2 %v9326_v25 }
 0x363   : > { %2639 = vmatpush.bf16.msra.mxu3 %v9330_v26 }
 0x364   : > { %2614 = vmatpush.bf16.msra.mxu1 %v9310_v30 }
 0x365   : > { %2627 = vmatpush.bf16.msra.mxu2 %v9314_v34 }
 0x367   : > { %2640 = vmatpush.bf16.msra.mxu3 %v9318_v35 }
 0x3d3   : > { %v2404_v40 = vpop.xlane.xlu0 %2403 }
 0x3d4   : > { %v2412_v41 = vmul.f32 %v13506_v39, %v2404_v40  ;;  %v9299_v40 = vld [vmem:[#allocation36 + $0xc] sm:$0xf0] }
 0x3d5   : > { %v9302_v45 = vor.u32 %v10371_v38, %v9299_v40 }
 0x3d6   : > { %v13510_v42 = vsub.f32 %v13502_v22, %v2412_v41  ;;  %v9305_v41 = vld [vmem:[#allocation36 + $0x8] sm:$0xf] }
 0x3d7   : > { %2628 = vmatpush.bf16.msra.mxu2 %v9302_v45 }
 0x3d8   : > { %v2414_v43 = vmul.f32 %v13510_v42, %v13510_v42 }
 0x3da   : > { %v2415_v44 = vsel %vm2401_vm4, %v2414_v43, 0.0  ;;  %v10373_v43 = vld [vmem:[#allocation36 + $0x10] sm:$0xf0] }
 0x3db   : > { %2416 = vadd.xlane.f32.xlu0 %v2415_v44  ;;  %v9298_v44 = vor.u32 %v10372_v37, %v9297_v36  ;;  %v9306_v46 = vor.u32 %v10373_v43, %v9305_v41 }
 0x3dd   : > { %2615 = vmatpush.bf16.msra.mxu1 %v9298_v44  ;;  %2641 = vmatpush.bf16.msra.mxu3 %v9306_v46 }
 0x44e   : > { %v2417_v47 = vpop.xlane.xlu0 %2416 }
 0x44f   : > { %v2418_v48 = vmul.f32 %v2417_v47, %v13506_v39 }
 0x451   : > { %v2419_v49 = vadd.f32 1e-06, %v2418_v48 }
 0x453   : > { %11083 = vrsqrt.f32 %v2419_v49  ;;  %vm2426_vm7 = vweird.f32 %v2419_v49 }
 0x459   : > { %v11084_v50 = vpop.eup %11083 }
 0x45a   : > { %v2421_v51 = vmul.f32 %v11084_v50, %v2419_v49  ;;  %vm2427_vm6 = vweird.f32 %v11084_v50 }
 0x45b   : > { %vm2428_vm8 = vmor %vm2426_vm7, %vm2427_vm6 }
 0x45c   : > { %v2422_v52 = vmul.f32 %v11084_v50, %v2421_v51 }
 0x45e   : > { %v2423_v53 = vmul.f32 0.5, %v2422_v52 }
 0x460   : > { %v2424_v54 = vsub.f32 1.5, %v2423_v53 }
 0x462   : > { %v2425_v55 = vmul.f32 %v11084_v50, %v2424_v54 }
 0x464   : > { %v2429_v57 = vsel %vm2428_vm8, %v11084_v50, %v2425_v55 }
 0x465   : > { %v2430_v58 = vmul.f32 %v2429_v57, %v13510_v42 }
 0x467   : > { %v2434_v60 = vmul.f32 %v11048_v56, %v2430_v58 }
 0x469   : > { %v2438_v61 = vadd.f32 %v11049_v59, %v2434_v60 }
 0x46b   : > { %v2439_v62 = vpack.c.bf16 %v2438_v61, %v2438_v61 }
 0x46d   : > { %2616 = vmatmul.bf16.vlgmr.msra.gmra.mxu1 %v2439_v62  ;;  %2629 = vmatmul.bf16.vlgmr.msra.gmra.mxu2 %v2439_v62 }
 0x46e   : > { %2642 = vmatmul.bf16.vlgmr.msra.gmra.mxu3 %v2439_v62 }
 0x4ea   : > { %v2617_v1 = vpop.f32.mrf.mxu1 }
 0x4eb   : > { %v2618_v2 = vadd.f32 %v2617_v1, %v2474_v0 }
 0x4ed   : > { %2651 = vrot.lane.b32.xlu2 %v2618_v2, %s14847_s3  ;;  %2648 = vrot.lane.b32.xlu1 %v2618_v2, %s14845_s4  ;;  %v2699_v9 = vmul.f32 0.25, %v2618_v2 }
 0x4f0   : > { %v2630_v42 = vpop.f32.mrf.mxu2 }
 0x4f1   : > { %v2631_v5 = vadd.f32 %v2630_v42, %v2475_v3  ;;  %v2643_v6 = vpop.f32.mrf.mxu3 }
 0x4f2   : > { %v13520_v7 = vadd.f32 %v2643_v6, %v2476_v4  ;;  %v2619_v8 = vpop.f32.mrf.mxu1 }
 0x4f3   : > { %2678 = vrot.lane.b32.xlu0 %v2631_v5, %s12627_s23  ;;  %9391 = vmatpush.xpose.msk.msrb.mxu0 %vm2344_vm0, %v2631_v5 }
 0x4f4   : > { %9407 = vmatpush.msk.msrb.mxu1 %vm2401_vm4, %v13520_v7 }
 0x4f5   : > { %2672 = vrot.lane.b32.xlu2 %v2631_v5, %s14847_s3  ;;  %2670 = vrot.lane.b32.xlu1 %v2631_v5, %s14845_s4 }
 0x4f6   : > { %9392 = vmatmul.msk.f32.vlgmr.msrb.gmra.mxu0 %vm2344_vm0, %v2699_v9 }
 0x4f8   : > { %v2632_v10 = vpop.f32.mrf.mxu2 }
 0x4f9   : > { %v2645_v11 = vpop.f32.mrf.mxu3 }
 0x4fb   : > { %2657 = vrot.lane.b32.xlu0 %v2618_v2, %s14843_s29 }
 0x4fd   : > { %2680 = vrot.lane.b32.xlu2 %v2631_v5, %s12629_s8  ;;  %2660 = vrot.lane.b32.xlu1 %v2618_v2, %s12627_s23 }
 0x505   : > { %2674 = vrot.lane.b32.xlu2 %v2631_v5, %s12630_s12  ;;  %2663 = vrot.lane.b32.xlu1 %v2618_v2, %s12629_s8 }
 0x50d   : > { %2676 = vrot.lane.b32.xlu2 %v2631_v5, %s14843_s29  ;;  %2654 = vrot.lane.b32.xlu1 %v2618_v2, %s12630_s12 }
 0x515   : > { %2666 = vrot.lane.b32.xlu2 %v2618_v2, %s12631_s16  ;;  %2682 = vrot.lane.b32.xlu1 %v2631_v5, %s12631_s16 }
 0x547   : > { %v2652_v12 = vpop.permute.xlu2 %2651 }
 0x548   : > { %v2701_v23 = vmul.f32 0.25, %v2652_v12 }
 0x54f   : > { %v2673_v13 = vpop.permute.xlu2 %2672 }
 0x557   : > { %v2681_v14 = vpop.permute.xlu2 %2680 }
 0x558   : > { %9403 = vmatpush.xpose.msk.msrb.mxu3 %vm2344_vm0, %v2681_v14 }
 0x55f   : > { %v2649_v15 = vpop.permute.xlu1 %2648  ;;  %v2675_v18 = vpop.permute.xlu2 %2674 }
 0x560   : > { %v2700_v19 = vmul.f32 0.25, %v2649_v15 }
 0x565   : > { %v2679_v16 = vpop.permute.xlu0 %2678 }
 0x566   : > { %9401 = vmatpush.xpose.msk.msrb.mxu2 %vm2344_vm0, %v2679_v16 }
 0x567   : > { %v2671_v17 = vpop.permute.xlu1 %2670  ;;  %v2677_v24 = vpop.permute.xlu2 %2676 }
 0x568   : > { %9393 = vmatpush.xpose.msk.msra.mxu0 %vm2344_vm0, %v2671_v17 }
 0x56b   : > { %9394 = vmatmul.msk.f32.vlgmr.msra.gmra.mxu0 %vm2344_vm0, %v2700_v19 }
 0x56c   : > { %9395 = vmatpush.xpose.msk.msrb.mxu0 %vm2344_vm0, %v2673_v13 }
 0x56d   : > { %v2658_v31 = vpop.permute.xlu0 %2657 }
 0x56e   : > { %v2703_v33 = vmul.f32 0.25, %v2658_v31 }
 0x56f   : > { %v2661_v20 = vpop.permute.xlu1 %2660  ;;  %v2667_v34 = vpop.permute.xlu2 %2666 }
 0x570   : > { %9397 = vmatpush.xpose.msk.msra.mxu0 %vm2344_vm0, %v2675_v18  ;;  %v2704_v21 = vmul.f32 0.25, %v2661_v20  ;;  %v2706_v35 = vmul.f32 0.25, %v2667_v34 }
 0x572   : > { %9402 = vmatmul.msk.f32.vlgmr.msrb.gmra.mxu2 %vm2344_vm0, %v2704_v21 }
 0x573   : > { %v2729_v25 = vpop.f32.mrf.mxu0  ;;  %9396 = vmatmul.msk.f32.vlgmr.msrb.gmra.mxu0 %vm2344_vm0, %v2701_v23 }
 0x574   : > { %9399 = vmatpush.xpose.msk.msrb.mxu0 %vm2344_vm0, %v2677_v24  ;;  %v2908_v26 = vsel %vm2907_vm9, %v2729_v25, -inf }
 0x575   : > { %2909 = vmax.xlane.f32.xlu0 %v2908_v26 }
 0x577   : > { %v2664_v27 = vpop.permute.xlu1 %2663 }
 0x578   : > { %v2705_v28 = vmul.f32 0.25, %v2664_v27 }
 0x57a   : > { %9404 = vmatmul.msk.f32.vlgmr.msrb.gmra.mxu3 %vm2344_vm0, %v2705_v28 }
 0x57f   : > { %v2655_v29 = vpop.permute.xlu1 %2654 }
 0x580   : > { %v2702_v30 = vmul.f32 0.25, %v2655_v29 }
 0x582   : > { %9398 = vmatmul.msk.f32.vlgmr.msra.gmra.mxu0 %vm2344_vm0, %v2702_v30 }
 0x587   : > { %v2683_v32 = vpop.permute.xlu1 %2682 }
 0x588   : > { %9405 = vmatpush.xpose.msk.msra.mxu0 %vm2344_vm0, %v2683_v32 }
 0x58a   : > { %9400 = vmatmul.msk.f32.vlgmr.msrb.gmra.mxu0 %vm2344_vm0, %v2703_v33 }
 0x592   : > { %9406 = vmatmul.msk.f32.vlgmr.msra.gmra.mxu0 %vm2344_vm0, %v2706_v35 }
 0x5e8   : > { %v2754_v36 = vpop.f32.mrf.mxu0  ;;  %v2910_v44 = vpop.xlane.xlu0 %2909 }
 0x5e9   : > { %v2911_v37 = vsel %vm2907_vm9, %v2754_v36, -inf  ;;  %v2932_v47 = vsub.f32 %v2729_v25, %v2910_v44 }
 0x5ea   : > { %2912 = vmax.xlane.f32.xlu0 %v2911_v37 }
 0x5eb   : > { %v2940_v50 = vmul.f32 1.442695, %v2932_v47 }
 0x5ed   : > { %11085 = vpow2.f32 %v2940_v50 }
 0x5f0   : > { %v2779_v38 = vpop.f32.mrf.mxu0 }
 0x5f1   : > { %v2914_v40 = vsel %vm2907_vm9, %v2779_v38, -inf }
 0x5f2   : > { %2915 = vmax.xlane.f32.xlu1 %v2914_v40 }
 0x5f3   : > { %v11086_v53 = vpop.eup %11085 }
 0x5f4   : > { %v2956_v55 = vsel %vm2907_vm9, %v11086_v53, 0.0 }
 0x5f5   : > { %v2854_v41 = vpop.f32.mrf.mxu2 }
 0x5f6   : > { %v2923_v43 = vsel %vm2907_vm9, %v2854_v41, -inf }
 0x5f7   : > { %2924 = vmax.xlane.f32.xlu2 %v2923_v43 }
 0x5fd   : > { %v2879_v45 = vpop.f32.mrf.mxu3 }
 0x5fe   : > { %v2926_v46 = vsel %vm2907_vm9, %v2879_v45, -inf }
 0x5ff   : > { %2927 = vmax.xlane.f32.xlu2 %v2926_v46  ;;  %v2804_v48 = vpop.f32.mrf.mxu0 }
 0x600   : > { %v2917_v49 = vsel %vm2907_vm9, %v2804_v48, -inf }
 0x601   : > { %2918 = vmax.xlane.f32.xlu1 %v2917_v49 }
 0x607   : > { %v2829_v51 = vpop.f32.mrf.mxu0 }
 0x608   : > { %v2920_v52 = vsel %vm2907_vm9, %v2829_v51, -inf }
 0x609   : > { %2921 = vmax.xlane.f32.xlu0 %v2920_v52 }
 0x60f   : > { %v2904_v54 = vpop.f32.mrf.mxu0 }
 0x610   : > { %v2929_v56 = vsel %vm2907_vm9, %v2904_v54, -inf }
 0x611   : > { %2957 = vadd.xlane.f32.xlu0 %v2956_v55  ;;  %2930 = vmax.xlane.f32.xlu2 %v2929_v56  ;;  %v3197_v55 = vld [vmem:[%s14974_s9] sm:$0xff] }
 0x625   : > { %2687 = vrot.lane.b32.xlu0 %v13520_v7, %s14847_s3 }
 0x629   : > { %2693 = vrot.lane.b32.xlu2 %v13520_v7, %s12627_s23 }
 0x65d   : > { %v2913_v57 = vpop.xlane.xlu0 %2912 }
 0x65e   : > { %v2933_v58 = vsub.f32 %v2754_v36, %v2913_v57  ;;  %v3202_v57 = vld [vmem:[%s14974_s9 + $0x28] sm:$0xff] }
 0x660   : > { %v2942_v59 = vmul.f32 1.442695, %v2933_v58 }
 0x662   : > { %11087 = vpow2.f32 %v2942_v59 }
 0x665   : > { %v2916_v60 = vpop.xlane.xlu1 %2915 }
 0x666   : > { %v2934_v61 = vsub.f32 %v2779_v38, %v2916_v60 }
 0x668   : > { %v13565_v62 = vpop.eup %11087  ;;  %v2944_v63 = vmul.f32 1.442695, %v2934_v61 }
 0x669   : > { %v2959_v0 = vsel %vm2907_vm9, %v13565_v62, 0.0 }
 0x66a   : > { %11089 = vpow2.f32 %v2944_v63  ;;  %v2925_v1 = vpop.xlane.xlu2 %2924  ;;  %2960 = vadd.xlane.f32.xlu1 %v2959_v0 }
 0x66b   : > { %v2937_v2 = vsub.f32 %v2854_v41, %v2925_v1  ;;  %v3201_v1 = vld [vmem:[%s14974_s9 + $0x20] sm:$0xff] }
 0x66d   : > { %v2950_v3 = vmul.f32 1.442695, %v2937_v2  ;;  %v3200_v2 = vld [vmem:[%s14974_s9 + $0x18] sm:$0xff] }
 0x66f   : > { %11091 = vpow2.f32 %v2950_v3  ;;  %v3199_v3 = vld [vmem:[%s14974_s9 + $0x10] sm:$0xff] }
 0x670   : > { %v11090_v4 = vpop.eup %11089 }
 0x671   : > { %v2962_v42 = vsel %vm2907_vm9, %v11090_v4, 0.0 }
 0x672   : > { %v2928_v5 = vpop.xlane.xlu2 %2927  ;;  %2963 = vadd.xlane.f32.xlu0 %v2962_v42  ;;  %v3204_v42 = vld [vmem:[%s14974_s9 + $0x38] sm:$0xff] }
 0x673   : > { %v2938_v6 = vsub.f32 %v2879_v45, %v2928_v5  ;;  %v3209_v5 = vld [vmem:[%s14974_s9 + $0x60] sm:$0xff] }
 0x674   : > { %v2919_v8 = vpop.xlane.xlu1 %2918 }
 0x675   : > { %v13570_v9 = vpop.eup %11091  ;;  %v2952_v10 = vmul.f32 1.442695, %v2938_v6  ;;  %v2935_v11 = vsub.f32 %v2804_v48, %v2919_v8  ;;  %v3208_v6 = vld [vmem:[%s14974_s9 + $0x58] sm:$0xff]  ;;  %v3203_v8 = vld [vmem:[%s14974_s9 + $0x30] sm:$0xff] }
 0x676   : > { %v2971_v12 = vsel %vm2907_vm9, %v13570_v9, 0.0 }
 0x677   : > { %11093 = vpow2.f32 %v2952_v10  ;;  %2972 = vadd.xlane.f32.xlu2 %v2971_v12  ;;  %v2946_v13 = vmul.f32 1.442695, %v2935_v11  ;;  %v3206_v10 = vld [vmem:[%s14974_s9 + $0x48] sm:$0xff] }
 0x679   : > { %11095 = vpow2.f32 %v2946_v13 }
 0x67c   : > { %v2922_v14 = vpop.xlane.xlu0 %2921 }
 0x67d   : > { %v11094_v15 = vpop.eup %11093  ;;  %v2936_v24 = vsub.f32 %v2829_v51, %v2922_v14 }
 0x67e   : > { %v2974_v16 = vsel %vm2907_vm9, %v11094_v15, 0.0 }
 0x67f   : > { %2975 = vadd.xlane.f32.xlu2 %v2974_v16  ;;  %v11096_v17 = vpop.eup %11095  ;;  %v2948_v27 = vmul.f32 1.442695, %v2936_v24  ;;  %v3205_v16 = vld [vmem:[%s14974_s9 + $0x40] sm:$0xff] }
 0x680   : > { %v2965_v19 = vsel %vm2907_vm9, %v11096_v17, 0.0 }
 0x683   : > { %2685 = vrot.lane.b32.xlu1 %v13520_v7, %s14845_s4 }
 0x684   : > { %v2958_v18 = vpop.xlane.xlu0 %2957  ;;  %v2931_v25 = vpop.xlane.xlu2 %2930 }
 0x685   : > { %11097 = vrcp.f32 %v2958_v18  ;;  %v2939_v26 = vsub.f32 %v2904_v54, %v2931_v25  ;;  %v3198_v54 = vld [vmem:[%s14973_s0 + $0x8] sm:$0xff]  ;;  %v3211_v18 = vld [vmem:[%s14974_s9 + $0x70] sm:$0xff]  ;;  %s14975_s0 = sld [smem:[#allocation117_spill]] }
 0x686   : > { %2695 = vrot.lane.b32.xlu0 %v13520_v7, %s12629_s8  ;;  %11099 = vpow2.f32 %v2948_v27 }
 0x687   : > { %2966 = vadd.xlane.f32.xlu2 %v2965_v19  ;;  %v2954_v28 = vmul.f32 1.442695, %v2939_v26 }
 0x689   : > { %11101 = vpow2.f32 %v2954_v28 }
 0x68b   : > { %v11098_v20 = vpop.eup %11097  ;;  %s14976_s17 = smov %s14975_s0 }
 0x68c   : > { %v2988_v21 = vmul.f32 %v11098_v20, %v11086_v53  ;;  %v11100_v29 = vpop.eup %11099  ;;  %v2694_v33 = vpop.permute.xlu2 %2693 }
 0x68d   : > { %v2968_v31 = vsel %vm2907_vm9, %v11100_v29, 0.0 }
 0x68e   : > { %9408 = vmatmul.msk.f32.vlgmr.msrb.gmra.mxu1 %vm2996_vm10, %v2988_v21 }
 0x68f   : > { %v11102_v30 = vpop.eup %11101 }
 0x690   : > { %v2977_v32 = vsel %vm2907_vm9, %v11102_v30, 0.0 }
 0x697   : > { %v2688_v23 = vpop.permute.xlu0 %2687 }
 0x698   : > { %9411 = vmatpush.msk.msra.mxu3 %vm2401_vm4, %v2688_v23 }
 0x69f   : > { %2689 = vrot.lane.b32.xlu2 %v13520_v7, %s12630_s12 }
 0x6a7   : > { %2691 = vrot.lane.b32.xlu2 %v13520_v7, %s14843_s29 }
 0x6ad   : > { %2969 = vadd.xlane.f32.xlu1 %v2968_v31 }
 0x6af   : > { %2697 = vrot.lane.b32.xlu2 %v13520_v7, %s12631_s16 }
 0x6b0   : > { %2978 = vadd.xlane.f32.xlu0 %v2977_v32 }
 0x6dd   : > { %v2961_v35 = vpop.xlane.xlu1 %2960 }
 0x6e5   : > { %v2964_v34 = vpop.xlane.xlu0 %2963 }
 0x6e6   : > { %11103 = vrcp.f32 %v2964_v34 }
 0x6e7   : > { %11105 = vrcp.f32 %v2961_v35 }
 0x6ea   : > { %v2973_v36 = vpop.xlane.xlu2 %2972 }
 0x6ec   : > { %v11104_v37 = vpop.eup %11103 }
 0x6ed   : > { %v2990_v38 = vmul.f32 %v11104_v37, %v11090_v4  ;;  %v11106_v40 = vpop.eup %11105  ;;  %v3210_v4 = vld [vmem:[%s14974_s9 + $0x68] sm:$0xff] }
 0x6ee   : > { %v2989_v43 = vmul.f32 %v11106_v40, %v13565_v62 }
 0x6ef   : > { %9412 = vmatmul.msk.f32.vlgmr.msra.gmra.mxu3 %vm2996_vm10, %v2990_v38 }
 0x6f2   : > { %v2976_v41 = vpop.xlane.xlu2 %2975 }
 0x6f3   : > { %11107 = vrcp.f32 %v2976_v41 }
 0x6f4   : > { %11109 = vrcp.f32 %v2973_v36 }
 0x6f5   : > { %v2686_v7 = vpop.permute.xlu1 %2685 }
 0x6f6   : > { %9409 = vmatpush.msk.msra.mxu2 %vm2401_vm4, %v2686_v7 }
 0x6f7   : > { %9410 = vmatmul.msk.f32.vlgmr.msra.gmra.mxu2 %vm2996_vm10, %v2989_v43 }
 0x6f8   : > { %9417 = vmatpush.msk.msrb.mxu2 %vm2401_vm4, %v2694_v33  ;;  %v2696_v44 = vpop.permute.xlu0 %2695 }
 0x6f9   : > { %v11108_v45 = vpop.eup %11107  ;;  %9419 = vmatpush.msk.msrb.mxu3 %vm2401_vm4, %v2696_v44 }
 0x6fa   : > { %v11110_v46 = vpop.eup %11109  ;;  %v2994_v47 = vmul.f32 %v11108_v45, %v11094_v15  ;;  %v2967_v48 = vpop.xlane.xlu2 %2966  ;;  %3253 = vmatpush.msra.mxu2 %v3200_v2  ;;  %v9529_v2 = vld [vmem:[%s14976_s17 + $0xc0] sm:$0xf] }
 0x6fb   : > { %11111 = vrcp.f32 %v2967_v48  ;;  %v2993_v49 = vmul.f32 %v11110_v46, %v13570_v9  ;;  %3276 = vmatpush.msra.mxu3 %v3202_v57  ;;  %v3207_v9 = vld [vmem:[%s14974_s9 + $0x50] sm:$0xff]  ;;  %v11050_v46 = vld [vmem:[#allocation29] ss:$0 sm:$0xff] }
 0x6fc   : > { %9420 = vmatmul.msk.f32.vlgmr.msrb.gmra.mxu3 %vm2996_vm10, %v2994_v47  ;;  %3254 = vmatpush.msra.mxu2 %v3199_v3  ;;  %v10421_v3 = vld [vmem:[%s14976_s17 + $0xcc] sm:$0xf0] }
 0x6fd   : > { %3277 = vmatpush.msra.mxu3 %v3201_v1 }
 0x6ff   : > { %9418 = vmatmul.msk.f32.vlgmr.msrb.gmra.mxu2 %vm2996_vm10, %v2993_v49  ;;  %3368 = vmatpush.msrb.mxu3 %v3210_v4  ;;  %v10419_v4 = vld [vmem:[%s14976_s17 + $0xc4] sm:$0xf] }
 0x700   : > { %3345 = vmatpush.msrb.mxu2 %v3208_v6  ;;  %v9537_v6 = vld [vmem:[%s14976_s17 + $0xc8] sm:$0xf] }
 0x701   : > { %v11112_v50 = vpop.eup %11111  ;;  %3369 = vmatpush.msrb.mxu3 %v3209_v5  ;;  %v9531_v5 = vld [vmem:[%s14976_s17 + $0xd0] sm:$0xf0] }
 0x702   : > { %v2991_v51 = vmul.f32 %v11112_v50, %v11096_v17  ;;  %v2690_v52 = vpop.permute.xlu2 %2689  ;;  %3346 = vmatpush.msrb.mxu2 %v3207_v9  ;;  %v3212_v17 = vld [vmem:[%s14974_s9 + $0x78] sm:$0xff]  ;;  %v9545_v50 = vld [vmem:[%s14975_s0 + $0xe0] sm:$0xf]  ;;  %v9534_v9 = vor.u32 %v10419_v4, %v9531_v5  ;;  %v9457_v5 = vld [vmem:[%s14976_s17 + $0x28] sm:$0xf]  ;;  %s14977_s0 = sld [smem:[#allocation118_spill]] }
 0x703   : > { %9413 = vmatpush.msk.msrb.mxu0 %vm2401_vm4, %v2690_v52  ;;  %v10423_v52 = vld [vmem:[%s14976_s17 + $0xe4] sm:$0xf] }
 0x704   : > { %9414 = vmatmul.msk.f32.vlgmr.msrb.gmra.mxu0 %vm2996_vm10, %v2991_v51  ;;  %v10425_v51 = vld [vmem:[%s14976_s17 + $0xec] sm:$0xf0] }
 0x708   : > { %s14978_s14 = smov %s14977_s0 }
 0x70a   : > { %v2692_v53 = vpop.permute.xlu2 %2691 }
 0x70b   : > { %9415 = vmatpush.msk.msra.mxu1 %vm2401_vm4, %v2692_v53  ;;  %v3019_v0 = vpop.f32.mrf.mxu1  ;;  %v9546_v53 = vor.u32 %v10425_v51, %v9545_v50  ;;  %v10408_v50 = vld [vmem:[%s14976_s17 + $0x6c] sm:$0xf]  ;;  %v9491_v51 = vld [vmem:[%s14976_s17 + $0x78] sm:$0xf0] }
 0x70d   : > { %3230 = vmatpush.msrb.mxu1 %v3198_v54  ;;  %v9547_v54 = vld [vmem:[%s14976_s17 + $0xf0] sm:$0xf0] }
 0x70e   : > { %v9550_v57 = vor.u32 %v10423_v52, %v9547_v54  ;;  %v9494_v52 = vor.u32 %v10408_v50, %v9491_v51  ;;  %v10405_v54 = vld [vmem:[%s14976_s17 + $0x4c] sm:$0xf0]  ;;  %v10432_v50 = vld [vmem:[%s14978_s14 + $0x28] sm:$0xff] }
 0x70f   : > { %3231 = vmatpush.msrb.mxu1 %v3197_v55  ;;  %v9553_v55 = vld [vmem:[%s14976_s17 + $0xe8] sm:$0xf]  ;;  %v10441_v51 = vld [vmem:[%s14978_s14 + $0x70] sm:$0xff] }
 0x712   : > { %v2698_v56 = vpop.permute.xlu2 %2697 }
 0x713   : > { %9421 = vmatpush.msk.msra.mxu0 %vm2401_vm4, %v2698_v56  ;;  %v10426_v56 = vld [vmem:[%s14976_s17 + $0xf4] sm:$0xf0] }
 0x715   : > { %3299 = vmatpush.msrb.mxu0 %v3204_v42  ;;  %v9530_v42 = vor.u32 %v10421_v3, %v9529_v2  ;;  %v10401_v2 = vld [vmem:[%s14976_s17 + $0x2c] sm:$0xf0]  ;;  %v10399_v3 = vld [vmem:[%s14976_s17 + $0x24] sm:$0xf] }
 0x717   : > { %3300 = vmatpush.msrb.mxu0 %v3203_v8  ;;  %v10422_v8 = vld [vmem:[%s14976_s17 + $0xd4] sm:$0xf0] }
 0x720   : > { %v2970_v58 = vpop.xlane.xlu1 %2969 }
 0x721   : > { %11113 = vrcp.f32 %v2970_v58  ;;  %v9554_v58 = vor.u32 %v10426_v56, %v9553_v55  ;;  %v10403_v55 = vld [vmem:[%s14976_s17 + $0x44] sm:$0xf] }
 0x723   : > { %v2979_v59 = vpop.xlane.xlu0 %2978 }
 0x724   : > { %11115 = vrcp.f32 %v2979_v59  ;;  %v10424_v59 = vld [vmem:[%s14976_s17 + $0xec] sm:$0xf] }
 0x727   : > { %v11114_v60 = vpop.eup %11113 }
 0x728   : > { %v2992_v61 = vmul.f32 %v11114_v60, %v11100_v29 }
 0x72a   : > { %v11116_v62 = vpop.eup %11115  ;;  %9416 = vmatmul.msk.f32.vlgmr.msra.gmra.mxu1 %vm2996_vm10, %v2992_v61 }
 0x72b   : > { %v2995_v63 = vmul.f32 %v11116_v62, %v11102_v30  ;;  %3322 = vmatpush.msra.mxu1 %v3206_v10  ;;  %v9538_v10 = vor.u32 %v10422_v8, %v9537_v6  ;;  %v10402_v6 = vld [vmem:[%s14976_s17 + $0x34] sm:$0xf0] }
 0x72d   : > { %9422 = vmatmul.msk.f32.vlgmr.msra.gmra.mxu0 %vm2996_vm10, %v2995_v63  ;;  %3323 = vmatpush.msra.mxu1 %v3205_v16  ;;  %v10415_v16 = vld [vmem:[%s14976_s17 + $0xa4] sm:$0xf] }
 0x72e   : > { %3391 = vmatpush.msra.mxu0 %v3212_v17 }
 0x730   : > { %3392 = vmatpush.msra.mxu0 %v3211_v18  ;;  %v9515_v18 = vld [vmem:[%s14976_s17 + $0xb0] sm:$0xf0] }
 0x732   : > { %9423 = vmatmul.msk.f32.vlgmr.msrb.gmra.mxu1 %vm2344_vm0, %v3019_v0 }
 0x733   : > { %3653 = vmatpush.bf16.msrb.mxu1 %v9546_v53  ;;  %v9465_v53 = vld [vmem:[%s14976_s17 + $0x40] sm:$0xf] }
 0x734   : > { %v9466_v56 = vor.u32 %v10405_v54, %v9465_v53  ;;  %v10431_v53 = vld [vmem:[%s14978_s14 + $0x20] sm:$0xff] }
 0x735   : > { %v10455_v54 = vld [vmem:[%s14978_s14 + $0xe0] sm:$0xff] }
 0x737   : > { %3654 = vmatpush.bf16.msrb.mxu1 %v9530_v42  ;;  %v9451_v42 = vld [vmem:[%s14976_s17 + $0x30] sm:$0xf0] }
 0x738   : > { %v9454_v8 = vor.u32 %v10399_v3, %v9451_v42  ;;  %v10437_v3 = vld [vmem:[%s14978_s14 + $0x50] sm:$0xff]  ;;  %v10427_v42 = vld [vmem:[%s14978_s14] sm:$0xff] }
 0x772   : > { %v3069_v11 = vpop.f32.mrf.mxu3 }
 0x773   : > { %9425 = vmatmul.msk.f32.vlgmr.msra.gmra.mxu3 %vm2344_vm0, %v3069_v11  ;;  %v10420_v11 = vld [vmem:[%s14976_s17 + $0xcc] sm:$0xf] }
 0x774   : > { %3679 = vmatpush.bf16.msra.mxu3 %v9554_v58  ;;  %v9473_v58 = vld [vmem:[%s14976_s17 + $0x48] sm:$0xf] }
 0x778   : > { %3680 = vmatpush.bf16.msra.mxu3 %v9538_v10  ;;  %v10400_v10 = vld [vmem:[%s14976_s17 + $0x2c] sm:$0xf] }
 0x77a   : > { %v3044_v12 = vpop.f32.mrf.mxu2 }
 0x77b   : > { %9424 = vmatmul.msk.f32.vlgmr.msra.gmra.mxu2 %vm2344_vm0, %v3044_v12  ;;  %v9539_v12 = vld [vmem:[%s14976_s17 + $0xd8] sm:$0xf0] }
 0x77c   : > { %3666 = vmatpush.bf16.msra.mxu2 %v9550_v57  ;;  %v9467_v57 = vld [vmem:[%s14976_s17 + $0x50] sm:$0xf0] }
 0x77f   : > { %v3169_v13 = vpop.f32.mrf.mxu3 }
 0x780   : > { %9429 = vmatmul.msk.f32.vlgmr.msrb.gmra.mxu3 %vm2344_vm0, %v3169_v13  ;;  %v9542_v13 = vor.u32 %v10420_v11, %v9539_v12  ;;  %3667 = vmatpush.bf16.msra.mxu2 %v9534_v9  ;;  %v9458_v9 = vor.u32 %v10402_v6, %v9457_v5  ;;  %v9459_v11 = vld [vmem:[%s14976_s17 + $0x38] sm:$0xf0]  ;;  %v9433_v12 = vld [vmem:[%s14976_s17] sm:$0xf]  ;;  %v10436_v6 = vld [vmem:[%s14978_s14 + $0x48] sm:$0xff] }
 0x781   : > { %v3094_v14 = vpop.f32.mrf.mxu0  ;;  %v10451_v5 = vld [vmem:[%s14978_s14 + $0xc0] sm:$0xff] }
 0x782   : > { %v3144_v15 = vpop.f32.mrf.mxu2  ;;  %9426 = vmatmul.msk.f32.vlgmr.msrb.gmra.mxu0 %vm2344_vm0, %v3094_v14  ;;  %v9513_v14 = vld [vmem:[%s14976_s17 + $0xa0] sm:$0xf] }
 0x783   : > { %9428 = vmatmul.msk.f32.vlgmr.msrb.gmra.mxu2 %vm2344_vm0, %v3144_v15  ;;  %v10417_v15 = vld [vmem:[%s14976_s17 + $0xac] sm:$0xf0] }
 0x784   : > { %v9514_v17 = vor.u32 %v10417_v15, %v9513_v14  ;;  %v10397_v14 = vld [vmem:[%s14976_s17 + $0xc] sm:$0xf0]  ;;  %v10395_v15 = vld [vmem:[%s14976_s17 + $0x4] sm:$0xf] }
 0x786   : > { %3655 = vmatpush.bf16.msrb.mxu1 %v9514_v17  ;;  %v9434_v17 = vor.u32 %v10397_v14, %v9433_v12 }
 0x7a7   : > { %v3119_v19 = vpop.f32.mrf.mxu1 }
 0x7a8   : > { %9427 = vmatmul.msk.f32.vlgmr.msra.gmra.mxu1 %vm2344_vm0, %v3119_v19  ;;  %v9521_v19 = vld [vmem:[%s14976_s17 + $0xa8] sm:$0xf] }
 0x7aa   : > { %v3194_v20 = vpop.f32.mrf.mxu0 }
 0x7ab   : > { %9430 = vmatmul.msk.f32.vlgmr.msra.gmra.mxu0 %vm2344_vm0, %v3194_v20  ;;  %v10418_v20 = vld [vmem:[%s14976_s17 + $0xb4] sm:$0xf0] }
 0x7af   : > { %v3233_v23 = vpop.f32.mrf.mxu1 }
 0x7b0   : > { %v3397_v25 = vsel %vm2401_vm4, %v3233_v23, 0.0  ;;  %v9522_v23 = vor.u32 %v10418_v20, %v9521_v19  ;;  %v9441_v19 = vld [vmem:[%s14976_s17 + $0x8] sm:$0xf]  ;;  %v10398_v20 = vld [vmem:[%s14976_s17 + $0x14] sm:$0xf0] }
 0x7b2   : > { %3681 = vmatpush.bf16.msra.mxu3 %v9522_v23  ;;  %v9442_v23 = vor.u32 %v10398_v20, %v9441_v19 }
 0x7f6   : > { %v3279_v26 = vpop.f32.mrf.mxu3 }
 0x7f7   : > { %v3400_v28 = vsel %vm2401_vm4, %v3279_v26, 0.0 }
 0x7fe   : > { %v3256_v21 = vpop.f32.mrf.mxu2 }
 0x7ff   : > { %v3398_v24 = vsel %vm2401_vm4, %v3256_v21, 0.0  ;;  %v3302_v29 = vpop.f32.mrf.mxu0  ;;  %v9518_v21 = vor.u32 %v10415_v16, %v9515_v18  ;;  %v9435_v16 = vld [vmem:[%s14976_s17 + $0x10] sm:$0xf0] }
 0x800   : > { %v3399_v27 = vadd.f32 %v3398_v24, %v3397_v25  ;;  %v3402_v31 = vsel %vm2401_vm4, %v3302_v29, 0.0  ;;  %v10416_v24 = vld [vmem:[%s14976_s17 + $0xac] sm:$0xf]  ;;  %v9523_v25 = vld [vmem:[%s14976_s17 + $0xb8] sm:$0xf0]  ;;  %v9438_v18 = vor.u32 %v10395_v15, %v9435_v16 }
 0x801   : > { %v9526_v26 = vor.u32 %v10416_v24, %v9523_v25  ;;  %3668 = vmatpush.bf16.msra.mxu2 %v9518_v21  ;;  %v10411_v29 = vld [vmem:[%s14976_s17 + $0x84] sm:$0xf]  ;;  %v10396_v21 = vld [vmem:[%s14976_s17 + $0xc] sm:$0xf]  ;;  %v9443_v24 = vld [vmem:[%s14976_s17 + $0x18] sm:$0xf0] }
 0x802   : > { %v3401_v30 = vadd.f32 %v3400_v28, %v3399_v27  ;;  %v9497_v27 = vld [vmem:[%s14976_s17 + $0x80] sm:$0xf]  ;;  %v10413_v28 = vld [vmem:[%s14976_s17 + $0x8c] sm:$0xf0]  ;;  %v9446_v25 = vor.u32 %v10396_v21, %v9443_v24 }
 0x803   : > { %v3371_v36 = vpop.f32.mrf.mxu3 }
 0x804   : > { %v3403_v32 = vadd.f32 %v3402_v31, %v3401_v30  ;;  %v3408_v43 = vsel %vm2401_vm4, %v3371_v36, 0.0  ;;  %v9498_v30 = vor.u32 %v10413_v28, %v9497_v27  ;;  %v9499_v31 = vld [vmem:[%s14976_s17 + $0x90] sm:$0xf0]  ;;  %v10412_v36 = vld [vmem:[%s14976_s17 + $0x8c] sm:$0xf]  ;;  %v10434_v27 = vld [vmem:[%s14977_s0 + $0x38] sm:$0xff] }
 0x805   : > { %v10458_v28 = vld [vmem:[%s14978_s14 + $0xf8] sm:$0xff]  ;;  %s14979_s0 = sld [smem:[#allocation110_spill]] }
 0x806   : > { %v3348_v33 = vpop.f32.mrf.mxu2  ;;  %3656 = vmatpush.bf16.msrb.mxu1 %v9498_v30  ;;  %v10433_v30 = vld [vmem:[%s14978_s14 + $0x30] sm:$0xff] }
 0x807   : > { %v3406_v38 = vsel %vm2401_vm4, %v3348_v33, 0.0  ;;  %v10414_v33 = vld [vmem:[%s14976_s17 + $0x94] sm:$0xf0] }
 0x825   : > { %v3325_v34 = vpop.f32.mrf.mxu1 }
 0x826   : > { %v3404_v35 = vsel %vm2401_vm4, %v3325_v34, 0.0  ;;  %v9502_v34 = vor.u32 %v10411_v29, %v9499_v31  ;;  %v10457_v31 = vld [vmem:[%s14978_s14 + $0xf0] sm:$0xff] }
 0x827   : > { %v3405_v37 = vadd.f32 %v3404_v35, %v3403_v32  ;;  %v9505_v32 = vld [vmem:[%s14976_s17 + $0x88] sm:$0xf] }
 0x828   : > { %v3394_v41 = vpop.f32.mrf.mxu0  ;;  %v9506_v35 = vor.u32 %v10414_v33, %v9505_v32  ;;  %3669 = vmatpush.bf16.msra.mxu2 %v9502_v34 }
 0x829   : > { %v3407_v40 = vadd.f32 %v3406_v38, %v3405_v37  ;;  %v3410_v44 = vsel %vm2401_vm4, %v3394_v41, 0.0  ;;  %v9507_v37 = vld [vmem:[%s14976_s17 + $0x98] sm:$0xf0]  ;;  %v10409_v41 = vld [vmem:[%s14976_s17 + $0x6c] sm:$0xf0] }
 0x82a   : > { %v9510_v38 = vor.u32 %v10412_v36, %v9507_v37  ;;  %3682 = vmatpush.bf16.msra.mxu3 %v9506_v35 }
 0x82b   : > { %v3409_v7 = vadd.f32 %v3408_v43, %v3407_v40  ;;  %v9481_v40 = vld [vmem:[%s14976_s17 + $0x60] sm:$0xf]  ;;  %v10407_v43 = vld [vmem:[%s14976_s17 + $0x64] sm:$0xf] }
 0x82d   : > { %v3411_v45 = vadd.f32 %v3410_v44, %v3409_v7  ;;  %v9482_v7 = vor.u32 %v10409_v41, %v9481_v40  ;;  %v9483_v44 = vld [vmem:[%s14976_s17 + $0x70] sm:$0xf0]  ;;  %v11051_v40 = vld [vmem:[#allocation35] ss:$0 sm:$0xff] }
 0x82f   : > { %v3412_v47 = vadd.f32 %v3411_v45, %v13502_v22  ;;  %v9555_v22 = vld [vmem:[%s14976_s17 + $0xf8] sm:$0xf0]  ;;  %v9489_v45 = vld [vmem:[%s14976_s17 + $0x68] sm:$0xf]  ;;  %3657 = vmatpush.bf16.msrb.mxu1 %v9482_v7  ;;  %v11052_v7 = vld [vmem:[#allocation33] ss:$0 sm:$0xff] }
 0x830   : > { %v9558_v60 = vor.u32 %v10424_v59, %v9555_v22  ;;  %v10406_v59 = vld [vmem:[%s14976_s17 + $0x54] sm:$0xf0]  ;;  %v9470_v22 = vor.u32 %v10403_v55, %v9467_v57  ;;  %v10440_v55 = vld [vmem:[%s14978_s14 + $0x68] sm:$0xff] }
 0x831   : > { %v13638_v48 = vadd.f32 %v11050_v46, %v3412_v47  ;;  %v10410_v46 = vld [vmem:[%s14976_s17 + $0x74] sm:$0xf0]  ;;  %v9486_v47 = vor.u32 %v10407_v43, %v9483_v44 }
 0x832   : > { %3692 = vmatpush.bf16.msrb.mxu0 %v9558_v60  ;;  %v9474_v60 = vor.u32 %v10406_v59, %v9473_v58  ;;  %v10430_v57 = vld [vmem:[%s14978_s14 + $0x18] sm:$0xff]  ;;  %v10439_v59 = vld [vmem:[%s14978_s14 + $0x60] sm:$0xff] }
 0x833   : > { %v3420_v49 = vsel %vm2401_vm4, %v13638_v48, 0.0  ;;  %3670 = vmatpush.bf16.msra.mxu2 %v9486_v47  ;;  %3658 = vmatpush.bf16.msrb.mxu1 %v9466_v56  ;;  %v10442_v47 = vld [vmem:[%s14978_s14 + $0x78] sm:$0xff]  ;;  %v10448_v56 = vld [vmem:[%s14978_s14 + $0xa8] sm:$0xff] }
 0x834   : > { %3421 = vadd.xlane.f32.xlu1 %v3420_v49  ;;  %v9490_v49 = vor.u32 %v10410_v46, %v9489_v45  ;;  %v10454_v58 = vld [vmem:[%s14978_s14 + $0xd8] sm:$0xff] }
 0x836   : > { %3693 = vmatpush.bf16.msrb.mxu0 %v9542_v13  ;;  %3683 = vmatpush.bf16.msra.mxu3 %v9490_v49  ;;  %v9462_v13 = vor.u32 %v10400_v10, %v9459_v11  ;;  %v10450_v49 = vld [vmem:[%s14978_s14 + $0xb8] sm:$0xff]  ;;  %v10435_v10 = vld [vmem:[%s14978_s14 + $0x40] sm:$0xff] }
 0x837   : > { %3671 = vmatpush.bf16.msra.mxu2 %v9470_v22  ;;  %v10447_v22 = vld [vmem:[%s14978_s14 + $0xa0] sm:$0xff] }
 0x838   : > { %v10443_v11 = vld [vmem:[%s14978_s14 + $0x80] sm:$0xff] }
 0x83a   : > { %3694 = vmatpush.bf16.msrb.mxu0 %v9526_v26  ;;  %3684 = vmatpush.bf16.msra.mxu3 %v9474_v60  ;;  %v10429_v60 = vld [vmem:[%s14978_s14 + $0x10] sm:$0xff] }
 0x83b   : > { %3672 = vmatpush.bf16.msra.mxu2 %v9454_v8  ;;  %v10444_v8 = vld [vmem:[%s14978_s14 + $0x88] sm:$0xff] }
 0x83e   : > { %3695 = vmatpush.bf16.msrb.mxu0 %v9510_v38  ;;  %3685 = vmatpush.bf16.msra.mxu3 %v9458_v9  ;;  %v3483_v9 = vld [vmem:[%s14979_s0] sm:$0xf]  ;;  %s14982_s0 = sadd.s32 2, %s13490_s11 }
 0x83f   : > { %3673 = vmatpush.bf16.msra.mxu2 %v9438_v18  ;;  %v3485_v12 = vperm.slane %v3483_v9, 0  ;;  %v3486_v19 = vperm.slane %v3483_v9, 1  ;;  %v3487_v21 = vperm.slane %v3483_v9, 2 }
 0x842   : > { %3696 = vmatpush.bf16.msrb.mxu0 %v9494_v52  ;;  %3686 = vmatpush.bf16.msra.mxu3 %v9442_v23  ;;  %v10449_v52 = vld [vmem:[%s14978_s14 + $0xb0] sm:$0xff] }
 0x843   : > { %4018 = vmatpush.bf16.msrb.mxu2 %v10442_v47 }
 0x846   : > { %4031 = vmatpush.bf16.msrb.mxu3 %v10450_v49 }
 0x847   : > { %4019 = vmatpush.bf16.msrb.mxu2 %v10441_v51 }
 0x84a   : > { %4032 = vmatpush.bf16.msrb.mxu3 %v10449_v52 }
 0x84b   : > { %4020 = vmatpush.bf16.msrb.mxu2 %v10440_v55 }
 0x84e   : > { %4033 = vmatpush.bf16.msrb.mxu3 %v10448_v56 }
 0x84f   : > { %4021 = vmatpush.bf16.msrb.mxu2 %v10439_v59 }
 0x852   : > { %4034 = vmatpush.bf16.msrb.mxu3 %v10447_v22 }
 0x8a7   : > { %v3422_v61 = vpop.xlane.xlu1 %3421 }
 0x8a8   : > { %v3423_v62 = vmul.f32 %v3422_v61, %v13506_v39  ;;  %v10404_v61 = vld [vmem:[%s14976_s17 + $0x4c] sm:$0xf] }
 0x8aa   : > { %v13652_v63 = vsub.f32 %v13638_v48, %v3423_v62  ;;  %v9475_v62 = vld [vmem:[%s14976_s17 + $0x58] sm:$0xf0] }
 0x8ac   : > { %v3425_v0 = vmul.f32 %v13652_v63, %v13652_v63 }
 0x8ae   : > { %v3426_v1 = vsel %vm2401_vm4, %v3425_v0, 0.0  ;;  %v9478_v0 = vor.u32 %v10404_v61, %v9475_v62  ;;  %v10453_v61 = vld [vmem:[%s14978_s14 + $0xd0] sm:$0xff]  ;;  %v10438_v62 = vld [vmem:[%s14978_s14 + $0x58] sm:$0xff] }
 0x8af   : > { %3427 = vadd.xlane.f32.xlu2 %v3426_v1  ;;  %v9449_v1 = vld [vmem:[%s14976_s17 + $0x20] sm:$0xf]  ;;  %4022 = vmatpush.bf16.msrb.mxu2 %v10438_v62 }
 0x8b0   : > { %3697 = vmatpush.bf16.msrb.mxu0 %v9478_v0  ;;  %v9450_v4 = vor.u32 %v10401_v2, %v9449_v1  ;;  %v10446_v0 = vld [vmem:[%s14978_s14 + $0x98] sm:$0xff]  ;;  %v10428_v1 = vld [vmem:[%s14978_s14 + $0x8] sm:$0xff] }
 0x8b1   : > { %v10452_v2 = vld [vmem:[%s14978_s14 + $0xc8] sm:$0xff]  ;;  %4035 = vmatpush.bf16.msrb.mxu3 %v10446_v0 }
 0x8b2   : > { %3659 = vmatpush.bf16.msrb.mxu1 %v9450_v4  ;;  %v10445_v4 = vld [vmem:[%s14978_s14 + $0x90] sm:$0xff] }
 0x8b3   : > { %4023 = vmatpush.bf16.msrb.mxu2 %v10437_v3 }
 0x8b4   : > { %3698 = vmatpush.bf16.msrb.mxu0 %v9462_v13  ;;  %v3488_v13 = vperm.slane %v3483_v9, 3 }
 0x8b5   : > { %4036 = vmatpush.bf16.msrb.mxu3 %v10445_v4 }
 0x8b6   : > { %3660 = vmatpush.bf16.msrb.mxu1 %v9434_v17 }
 0x8b7   : > { %4024 = vmatpush.bf16.msrb.mxu2 %v10436_v6 }
 0x8b8   : > { %3699 = vmatpush.bf16.msrb.mxu0 %v9446_v25 }
 0x8b9   : > { %4037 = vmatpush.bf16.msrb.mxu3 %v10444_v8  ;;  %v11053_v8 = vld [vmem:[#allocation27] ss:$0 sm:$0xff] }
 0x8ba   : > { %4005 = vmatpush.bf16.msra.mxu1 %v10434_v27 }
 0x8bb   : > { %4025 = vmatpush.bf16.msrb.mxu2 %v10435_v10 }
 0x8bc   : > { %4044 = vmatpush.bf16.msra.mxu0 %v10458_v28 }
 0x8bd   : > { %4038 = vmatpush.bf16.msrb.mxu3 %v10443_v11 }
 0x8be   : > { %4006 = vmatpush.bf16.msra.mxu1 %v10433_v30 }
 0x8c0   : > { %4045 = vmatpush.bf16.msra.mxu0 %v10457_v31 }
 0x8c2   : > { %4007 = vmatpush.bf16.msra.mxu1 %v10432_v50 }
 0x8c6   : > { %4008 = vmatpush.bf16.msra.mxu1 %v10431_v53 }
 0x8ca   : > { %4009 = vmatpush.bf16.msra.mxu1 %v10430_v57 }
 0x8ce   : > { %4010 = vmatpush.bf16.msra.mxu1 %v10429_v60 }
 0x8d2   : > { %4011 = vmatpush.bf16.msra.mxu1 %v10428_v1 }
 0x8d6   : > { %4012 = vmatpush.bf16.msra.mxu1 %v10427_v42 }
 0x922   : > { %v3428_v26 = vpop.xlane.xlu2 %3427 }
 0x923   : > { %v3429_v29 = vmul.f32 %v3428_v26, %v13506_v39 }
 0x925   : > { %v3430_v32 = vadd.f32 1e-06, %v3429_v29 }
 0x927   : > { %11117 = vrsqrt.f32 %v3430_v32  ;;  %vm3437_vm12 = vweird.f32 %v3430_v32 }
 0x92d   : > { %v11118_v33 = vpop.eup %11117 }
 0x92e   : > { %v3432_v34 = vmul.f32 %v11118_v33, %v3430_v32  ;;  %vm3438_vm11 = vweird.f32 %v11118_v33 }
 0x92f   : > { %vm3439_vm13 = vmor %vm3437_vm12, %vm3438_vm11  ;;  %vm5830_vm11 = vcmask 253952   ;;  %vm5834_vm12 = vcmask 254977  }
 0x930   : > { %v3433_v35 = vmul.f32 %v11118_v33, %v3432_v34 }
 0x932   : > { %v3434_v36 = vmul.f32 0.5, %v3433_v35 }
 0x934   : > { %v3435_v37 = vsub.f32 1.5, %v3434_v36 }
 0x936   : > { %v3436_v38 = vmul.f32 %v11118_v33, %v3435_v37 }
 0x938   : > { %v3440_v41 = vsel %vm3439_vm13, %v11118_v33, %v3436_v38  ;;  %vm5838_vm13 = vcmask 256002  }
 0x939   : > { %v3441_v43 = vmul.f32 %v3440_v41, %v13652_v63  ;;  %v10456_v63 = vld [vmem:[%s14978_s14 + $0xe8] sm:$0xff] }
 0x93a   : > { %4046 = vmatpush.bf16.msra.mxu0 %v10456_v63 }
 0x93b   : > { %v3445_v44 = vmul.f32 %v11051_v40, %v3441_v43 }
 0x93d   : > { %v3449_v45 = vadd.f32 %v11052_v7, %v3445_v44 }
 0x93e   : > { %4047 = vmatpush.bf16.msra.mxu0 %v10455_v54 }
 0x93f   : > { %v3450_v46 = vpack.c.bf16 %v3449_v45, %v3449_v45 }
 0x941   : > { %3661 = vmatmul.bf16.vlgmr.msrb.gmra.mxu1 %v3450_v46  ;;  %3674 = vmatmul.bf16.vlgmr.msra.gmra.mxu2 %v3450_v46 }
 0x942   : > { %3687 = vmatmul.bf16.vlgmr.msra.gmra.mxu3 %v3450_v46  ;;  %3700 = vmatmul.bf16.vlgmr.msrb.gmra.mxu0 %v3450_v46 }
 0x943   : > { %4048 = vmatpush.bf16.msra.mxu0 %v10454_v58 }
 0x947   : > { %4049 = vmatpush.bf16.msra.mxu0 %v10453_v61 }
 0x94b   : > { %4050 = vmatpush.bf16.msra.mxu0 %v10452_v2 }
 0x94f   : > { %4051 = vmatpush.bf16.msra.mxu0 %v10451_v5 }
 0x9be   : > { %v3662_v14 = vpop.f32.mrf.mxu1 }
 0x9bf   : > { %v3663_v15 = vadd.f32 %v3662_v14, %v3485_v12  ;;  %v3701_v16 = vpop.f32.mrf.mxu0 }
 0x9c0   : > { %v3702_v17 = vadd.f32 %v3701_v16, %v3488_v13 }
 0x9c1   : > { %v3709_v18 = vmul.f32 0.044715, %v3663_v15  ;;  %v3705_v52 = vmul.f32 0.5, %v3663_v15 }
 0x9c2   : > { %v3712_v20 = vmul.f32 0.044715, %v3702_v17  ;;  %v3708_v54 = vmul.f32 0.5, %v3702_v17 }
 0x9c3   : > { %v3713_v23 = vmul.f32 %v3709_v18, %v3663_v15 }
 0x9c4   : > { %v3716_v24 = vmul.f32 %v3712_v20, %v3702_v17  ;;  %v3675_v25 = vpop.f32.mrf.mxu2 }
 0x9c5   : > { %v3717_v26 = vmul.f32 %v3713_v23, %v3663_v15  ;;  %v3676_v27 = vadd.f32 %v3675_v25, %v3486_v19  ;;  %v3688_v28 = vpop.f32.mrf.mxu3  ;;  %v10481_v23 = vld [vmem:[#allocation53 + $0xb0] sm:$0xf0] }
 0x9c6   : > { %v3720_v29 = vmul.f32 %v3716_v24, %v3702_v17  ;;  %v3689_v30 = vadd.f32 %v3688_v28, %v3487_v21  ;;  %v3664_v31 = vpop.f32.mrf.mxu1  ;;  %v9773_v21 = vld [vmem:[#allocation53 + $0xa8] sm:$0xf]  ;;  %v10480_v24 = vld [vmem:[#allocation53 + $0xac] sm:$0xf]  ;;  %v10482_v28 = vld [vmem:[#allocation53 + $0xb8] sm:$0xf0] }
 0x9c7   : > { %v3710_v32 = vmul.f32 0.044715, %v3676_v27  ;;  %v3703_v33 = vpop.f32.mrf.mxu0  ;;  %v3721_v34 = vadd.f32 %v3717_v26, %v3663_v15  ;;  %v3706_v61 = vmul.f32 0.5, %v3676_v27  ;;  %v9774_v25 = vor.u32 %v10481_v23, %v9773_v21  ;;  %v9775_v26 = vld [vmem:[#allocation53 + $0xb4] sm:$0xf0] }
 0x9c8   : > { %v3711_v35 = vmul.f32 0.044715, %v3689_v30  ;;  %v3724_v36 = vadd.f32 %v3720_v29, %v3702_v17  ;;  %v3707_v0 = vmul.f32 0.5, %v3689_v30  ;;  %v9778_v29 = vor.u32 %v10480_v24, %v9775_v26  ;;  %v9703_v23 = vld [vmem:[#allocation53 + $0x24] sm:$0xf0] }
 0x9c9   : > { %v3714_v37 = vmul.f32 %v3710_v32, %v3676_v27  ;;  %v3725_v38 = vmul.f32 0.7978846, %v3721_v34  ;;  %4259 = vmatpush.bf16.msrb.mxu1 %v9774_v25  ;;  %v9709_v24 = vld [vmem:[#allocation53 + $0x20] sm:$0xf]  ;;  %v10464_v25 = vld [vmem:[#allocation53 + $0x28] sm:$0xf0] }
 0x9ca   : > { %v3715_v40 = vmul.f32 %v3711_v35, %v3689_v30  ;;  %v3728_v41 = vmul.f32 0.7978846, %v3724_v36  ;;  %4272 = vmatpush.bf16.msra.mxu2 %v9778_v29  ;;  %v9761_v35 = vld [vmem:[#allocation53 + $0x90] sm:$0xf]  ;;  %v10478_v36 = vld [vmem:[#allocation53 + $0x98] sm:$0xf0] }
 0x9cb   : > { %v3718_v43 = vmul.f32 %v3714_v37, %v3676_v27  ;;  %11119 = vtanh.f32 %v3725_v38  ;;  %v10477_v37 = vld [vmem:[#allocation53 + $0x94] sm:$0xf]  ;;  %v9762_v38 = vor.u32 %v10478_v36, %v9761_v35  ;;  %v10460_v29 = vld [vmem:[#allocation53 + $0x8] sm:$0xf0] }
 0x9cc   : > { %v3719_v7 = vmul.f32 %v3715_v40, %v3689_v30  ;;  %v3677_v44 = vpop.f32.mrf.mxu2  ;;  %11121 = vtanh.f32 %v3728_v41  ;;  %v9763_v40 = vld [vmem:[#allocation53 + $0x9c] sm:$0xf0]  ;;  %v9769_v41 = vld [vmem:[#allocation53 + $0x98] sm:$0xf] }
 0x9cd   : > { %v3690_v45 = vpop.f32.mrf.mxu3  ;;  %v3722_v46 = vadd.f32 %v3718_v43, %v3676_v27  ;;  %v9781_v27 = vld [vmem:[#allocation53 + $0xb0] sm:$0xf]  ;;  %v10479_v43 = vld [vmem:[#allocation53 + $0xa0] sm:$0xf0]  ;;  %4260 = vmatpush.bf16.msrb.mxu1 %v9762_v38 }
 0x9ce   : > { %v3723_v47 = vadd.f32 %v3719_v7, %v3689_v30  ;;  %v9782_v30 = vor.u32 %v10482_v28, %v9781_v27  ;;  %v9766_v7 = vor.u32 %v10477_v37, %v9763_v40  ;;  %v9770_v44 = vor.u32 %v10479_v43, %v9769_v41  ;;  %v9749_v45 = vld [vmem:[#allocation53 + $0x78] sm:$0xf]  ;;  %v9689_v28 = vld [vmem:[#allocation53] sm:$0xf] }
 0x9cf   : > { %v3726_v49 = vmul.f32 0.7978846, %v3722_v46  ;;  %v10475_v46 = vld [vmem:[#allocation53 + $0x80] sm:$0xf0]  ;;  %v9710_v27 = vor.u32 %v10464_v25, %v9709_v24 }
 0x9d0   : > { %v3727_v50 = vmul.f32 0.7978846, %v3723_v47  ;;  %4285 = vmatpush.bf16.msra.mxu3 %v9782_v30  ;;  %4273 = vmatpush.bf16.msra.mxu2 %v9766_v7  ;;  %v10474_v47 = vld [vmem:[#allocation53 + $0x7c] sm:$0xf]  ;;  %v10459_v30 = vld [vmem:[#allocation53 + $0x4] sm:$0xf] }
 0x9d1   : > { %v11120_v63 = vpop.eup %11119  ;;  %11123 = vtanh.f32 %v3726_v49  ;;  %v9750_v49 = vor.u32 %v10475_v46, %v9749_v45 }
 0x9d2   : > { %v11122_v51 = vpop.eup %11121  ;;  %v3733_v53 = vadd.f32 1.0, %v11120_v63  ;;  %11125 = vtanh.f32 %v3727_v50  ;;  %v9751_v50 = vld [vmem:[#allocation53 + $0x84] sm:$0xf0]  ;;  %v9757_v63 = vld [vmem:[#allocation53 + $0x80] sm:$0xf] }
 0x9d3   : > { %v3736_v55 = vadd.f32 1.0, %v11122_v51  ;;  %v10476_v51 = vld [vmem:[#allocation53 + $0x88] sm:$0xf0]  ;;  %4261 = vmatpush.bf16.msrb.mxu1 %v9750_v49 }
 0x9d4   : > { %v3737_v56 = vmul.f32 %v3733_v53, %v3705_v52  ;;  %4286 = vmatpush.bf16.msra.mxu3 %v9770_v44  ;;  %v9754_v52 = vor.u32 %v10474_v47, %v9751_v50  ;;  %v9758_v53 = vor.u32 %v10476_v51, %v9757_v63  ;;  %v11054_v47 = vld [vmem:[#allocation44] ss:$0 sm:$0xff]  ;;  %v11055_v63 = vld [vmem:[#allocation42] ss:$0 sm:$0xff] }
 0x9d5   : > { %v3740_v57 = vmul.f32 %v3736_v55, %v3708_v54  ;;  %v9737_v54 = vld [vmem:[#allocation53 + $0x60] sm:$0xf]  ;;  %v10472_v55 = vld [vmem:[#allocation53 + $0x68] sm:$0xf0] }
 0x9d6   : > { %v3741_v58 = vpack.c.bf16 %v3737_v56, %v3737_v56  ;;  %4274 = vmatpush.bf16.msra.mxu2 %v9754_v52  ;;  %v10471_v56 = vld [vmem:[#allocation53 + $0x64] sm:$0xf] }
 0x9d7   : > { %v11124_v59 = vpop.eup %11123  ;;  %v3744_v22 = vpack.c.bf16 %v3740_v57, %v3740_v57  ;;  %v9738_v57 = vor.u32 %v10472_v55, %v9737_v54  ;;  %v4123_v54 = vld [vmem:[#allocation41] sm:$0x7] }
 0x9d8   : > { %v11126_v60 = vpop.eup %11125  ;;  %4013 = vmatmul.bf16.vlgmr.msra.gmra.mxu1 %v3741_v58  ;;  %v3734_v62 = vadd.f32 1.0, %v11124_v59  ;;  %4287 = vmatpush.bf16.msra.mxu3 %v9758_v53  ;;  %v9739_v58 = vld [vmem:[#allocation53 + $0x6c] sm:$0xf0]  ;;  %v9745_v59 = vld [vmem:[#allocation53 + $0x68] sm:$0xf]  ;;  %v4125_v55 = vperm.slane %v4123_v54, 0 }
 0x9d9   : > { %4052 = vmatmul.bf16.vlgmr.msra.gmra.mxu0 %v3744_v22  ;;  %v3735_v1 = vadd.f32 1.0, %v11126_v60  ;;  %v10473_v22 = vld [vmem:[#allocation53 + $0x70] sm:$0xf0]  ;;  %v9742_v60 = vor.u32 %v10471_v56, %v9739_v58  ;;  %4262 = vmatpush.bf16.msrb.mxu1 %v9738_v57  ;;  %v4126_v58 = vperm.slane %v4123_v54, 1 }
 0x9da   : > { %v3738_v2 = vmul.f32 %v3734_v62, %v3706_v61  ;;  %v9746_v61 = vor.u32 %v10473_v22, %v9745_v59  ;;  %v9725_v62 = vld [vmem:[#allocation53 + $0x48] sm:$0xf] }
 0x9db   : > { %v3739_v3 = vmul.f32 %v3735_v1, %v3707_v0  ;;  %4275 = vmatpush.bf16.msra.mxu2 %v9742_v60  ;;  %v10469_v0 = vld [vmem:[#allocation53 + $0x50] sm:$0xf0]  ;;  %v10468_v1 = vld [vmem:[#allocation53 + $0x4c] sm:$0xf] }
 0x9dc   : > { %v3742_v4 = vpack.c.bf16 %v3738_v2, %v3738_v2  ;;  %4288 = vmatpush.bf16.msra.mxu3 %v9746_v61  ;;  %v9726_v2 = vor.u32 %v10469_v0, %v9725_v62 }
 0x9dd   : > { %v3743_v42 = vpack.c.bf16 %v3739_v3, %v3739_v3  ;;  %v9727_v3 = vld [vmem:[#allocation53 + $0x54] sm:$0xf0] }
 0x9de   : > { %4026 = vmatmul.bf16.vlgmr.msrb.gmra.mxu2 %v3742_v4  ;;  %v9733_v4 = vld [vmem:[#allocation53 + $0x50] sm:$0xf]  ;;  %4263 = vmatpush.bf16.msrb.mxu1 %v9726_v2 }
 0x9df   : > { %4039 = vmatmul.bf16.vlgmr.msrb.gmra.mxu3 %v3743_v42  ;;  %v10470_v42 = vld [vmem:[#allocation53 + $0x58] sm:$0xf0] }
 0xa55   : > { %v4014_v5 = vpop.f32.mrf.mxu1 }
 0xa56   : > { %v4053_v6 = vpop.f32.mrf.mxu0  ;;  %v4015_v11 = vadd.f32 %v11053_v8, %v4014_v5  ;;  %v9730_v5 = vor.u32 %v10468_v1, %v9727_v3  ;;  %v9713_v8 = vld [vmem:[#allocation53 + $0x30] sm:$0xf]  ;;  %v4127_v1 = vperm.slane %v4123_v54, 2 }
 0xa58   : > { %4276 = vmatpush.bf16.msra.mxu2 %v9730_v5 }
 0xa5d   : > { %v4016_v9 = vpop.f32.mrf.mxu1 }
 0xa5e   : > { %v4055_v10 = vpop.f32.mrf.mxu0  ;;  %v10466_v9 = vld [vmem:[#allocation53 + $0x38] sm:$0xf0] }
 0xa5f   : > { %v10465_v10 = vld [vmem:[#allocation53 + $0x34] sm:$0xf] }
 0xa61   : > { %v4027_v12 = vpop.f32.mrf.mxu2 }
 0xa62   : > { %v4028_v13 = vadd.f32 %v4027_v12, %v4015_v11  ;;  %v4040_v14 = vpop.f32.mrf.mxu3  ;;  %v9714_v11 = vor.u32 %v10466_v9, %v9713_v8  ;;  %v9715_v12 = vld [vmem:[#allocation53 + $0x3c] sm:$0xf0] }
 0xa64   : > { %v4041_v15 = vadd.f32 %v4040_v14, %v4028_v13  ;;  %v9721_v13 = vld [vmem:[#allocation53 + $0x38] sm:$0xf]  ;;  %v10467_v14 = vld [vmem:[#allocation53 + $0x40] sm:$0xf0]  ;;  %4264 = vmatpush.bf16.msrb.mxu1 %v9714_v11 }
 0xa66   : > { %v4054_v16 = vadd.f32 %v4053_v6, %v4041_v15  ;;  %v9734_v6 = vor.u32 %v10470_v42, %v9733_v4  ;;  %v9718_v15 = vor.u32 %v10465_v10, %v9715_v12 }
 0xa68   : > { %v13749_v17 = vadd.f32 %v4054_v16, %v13638_v48  ;;  %4289 = vmatpush.bf16.msra.mxu3 %v9734_v6  ;;  %v9722_v16 = vor.u32 %v10467_v14, %v9721_v13  ;;  %4277 = vmatpush.bf16.msra.mxu2 %v9718_v15 }
 0xa69   : > { %v4029_v18 = vpop.f32.mrf.mxu2 }
 0xa6a   : > { %v4042_v19 = vpop.f32.mrf.mxu3  ;;  %v4060_v20 = vsel %vm2401_vm4, %v13749_v17, 0.0  ;;  %v9701_v18 = vld [vmem:[#allocation53 + $0x18] sm:$0xf] }
 0xa6b   : > { %4061 = vadd.xlane.f32.xlu1 %v4060_v20  ;;  %v10463_v19 = vld [vmem:[#allocation53 + $0x20] sm:$0xf0]  ;;  %v10462_v20 = vld [vmem:[#allocation53 + $0x1c] sm:$0xf] }
 0xa6c   : > { %4290 = vmatpush.bf16.msra.mxu3 %v9722_v16  ;;  %v9702_v21 = vor.u32 %v10463_v19, %v9701_v18  ;;  %v9706_v26 = vor.u32 %v10462_v20, %v9703_v23 }
 0xa6e   : > { %4265 = vmatpush.bf16.msrb.mxu1 %v9702_v21  ;;  %4278 = vmatpush.bf16.msra.mxu2 %v9706_v26 }
 0xa70   : > { %4291 = vmatpush.bf16.msra.mxu3 %v9710_v27 }
 0xade   : > { %v4062_v48 = vpop.xlane.xlu1 %4061 }
 0xadf   : > { %v4063_v31 = vmul.f32 %v4062_v48, %v13506_v39  ;;  %v9690_v48 = vor.u32 %v10460_v29, %v9689_v28 }
 0xae1   : > { %v13755_v32 = vsub.f32 %v13749_v17, %v4063_v31  ;;  %v9691_v31 = vld [vmem:[#allocation53 + $0xc] sm:$0xf0]  ;;  %4266 = vmatpush.bf16.msrb.mxu1 %v9690_v48 }
 0xae2   : > { %v9694_v35 = vor.u32 %v10459_v30, %v9691_v31 }
 0xae3   : > { %v4065_v33 = vmul.f32 %v13755_v32, %v13755_v32 }
 0xae4   : > { %4279 = vmatpush.bf16.msra.mxu2 %v9694_v35 }
 0xae5   : > { %v4066_v34 = vsel %vm2401_vm4, %v4065_v33, 0.0  ;;  %v9697_v33 = vld [vmem:[#allocation53 + $0x8] sm:$0xf] }
 0xae6   : > { %4067 = vadd.xlane.f32.xlu0 %v4066_v34  ;;  %v10461_v34 = vld [vmem:[#allocation53 + $0x10] sm:$0xf0] }
 0xae7   : > { %v9698_v36 = vor.u32 %v10461_v34, %v9697_v33 }
 0xae9   : > { %4292 = vmatpush.bf16.msra.mxu3 %v9698_v36 }
 0xb59   : > { %v4068_v37 = vpop.xlane.xlu0 %4067 }
 0xb5a   : > { %v4069_v38 = vmul.f32 %v4068_v37, %v13506_v39 }
 0xb5c   : > { %v4070_v40 = vadd.f32 1e-06, %v4069_v38 }
 0xb5e   : > { %11127 = vrsqrt.f32 %v4070_v40  ;;  %vm4077_vm15 = vweird.f32 %v4070_v40 }
 0xb64   : > { %v11128_v41 = vpop.eup %11127 }
 0xb65   : > { %v4072_v43 = vmul.f32 %v11128_v41, %v4070_v40  ;;  %vm4078_vm14 = vweird.f32 %v11128_v41 }
 0xb66   : > { %vm4079_vm1 = vmor %vm4077_vm15, %vm4078_vm14  ;;  %vm5842_vm14 = vcmask 257027  }
 0xb67   : > { %v4073_v7 = vmul.f32 %v11128_v41, %v4072_v43 }
 0xb69   : > { %v4074_v44 = vmul.f32 0.5, %v4073_v7 }
 0xb6b   : > { %v4075_v45 = vsub.f32 1.5, %v4074_v44 }
 0xb6d   : > { %v4076_v46 = vmul.f32 %v11128_v41, %v4075_v45 }
 0xb6f   : > { %v4080_v49 = vsel %vm4079_vm1, %v11128_v41, %v4076_v46 }
 0xb70   : > { %v4081_v50 = vmul.f32 %v4080_v49, %v13755_v32 }
 0xb72   : > { %v4085_v51 = vmul.f32 %v11054_v47, %v4081_v50 }
 0xb74   : > { %v4089_v52 = vadd.f32 %v11055_v63, %v4085_v51 }
 0xb76   : > { %v4090_v53 = vpack.c.bf16 %v4089_v52, %v4089_v52 }
 0xb78   : > { %4267 = vmatmul.bf16.vlgmr.msrb.gmra.mxu1 %v4090_v53  ;;  %4280 = vmatmul.bf16.vlgmr.msra.gmra.mxu2 %v4090_v53 }
 0xb79   : > { %4293 = vmatmul.bf16.vlgmr.msra.gmra.mxu3 %v4090_v53 }
 0xbf5   : > { %v4268_v56 = vpop.f32.mrf.mxu1 }
 0xbf6   : > { %v4269_v57 = vadd.f32 %v4268_v56, %v4125_v55 }
 0xbf8   : > { %4311 = vrot.lane.b32.xlu1 %v4269_v57, %s12627_s23  ;;  %4302 = vrot.lane.b32.xlu2 %v4269_v57, %s14847_s3  ;;  %v4350_v61 = vmul.f32 0.25, %v4269_v57 }
 0xbf9   : > { %4299 = vrot.lane.b32.xlu0 %v4269_v57, %s14845_s4 }
 0xbfb   : > { %v4281_v59 = vpop.f32.mrf.mxu2 }
 0xbfc   : > { %v4282_v32 = vadd.f32 %v4281_v59, %v4126_v58  ;;  %v4294_v22 = vpop.f32.mrf.mxu3 }
 0xbfd   : > { %v4270_v60 = vpop.f32.mrf.mxu1  ;;  %v13778_v2 = vadd.f32 %v4294_v22, %v4127_v1 }
 0xbfe   : > { %9783 = vmatpush.xpose.msk.msrb.mxu0 %vm2344_vm0, %v4282_v32 }
 0xc00   : > { %4321 = vrot.lane.b32.xlu1 %v4282_v32, %s14845_s4  ;;  %4308 = vrot.lane.b32.xlu2 %v4269_v57, %s14843_s29 }
 0xc01   : > { %4329 = vrot.lane.b32.xlu0 %v4282_v32, %s12627_s23  ;;  %9784 = vmatmul.msk.f32.vlgmr.msrb.gmra.mxu0 %vm2344_vm0, %v4350_v61 }
 0xc03   : > { %v4283_v62 = vpop.f32.mrf.mxu2 }
 0xc04   : > { %v4296_v0 = vpop.f32.mrf.mxu3 }
 0xc08   : > { %4323 = vrot.lane.b32.xlu1 %v4282_v32, %s14847_s3 }
 0xc09   : > { %4331 = vrot.lane.b32.xlu0 %v4282_v32, %s12629_s8 }
 0xc10   : > { %4314 = vrot.lane.b32.xlu1 %v4269_v57, %s12629_s8 }
 0xc11   : > { %4325 = vrot.lane.b32.xlu0 %v4282_v32, %s12630_s12 }
 0xc18   : > { %4305 = vrot.lane.b32.xlu1 %v4269_v57, %s12630_s12 }
 0xc19   : > { %4327 = vrot.lane.b32.xlu0 %v4282_v32, %s14843_s29 }
 0xc20   : > { %4333 = vrot.lane.b32.xlu1 %v4282_v32, %s12631_s16 }
 0xc21   : > { %4317 = vrot.lane.b32.xlu0 %v4269_v57, %s12631_s16 }
 0xc29   : > { %4336 = vrot.lane.b32.xlu0 %v13778_v2, %s14845_s4 }
 0xc31   : > { %4344 = vrot.lane.b32.xlu0 %v13778_v2, %s12627_s23  ;;  %s14980_s23 = sld [smem:[#allocation120_spill]] }
 0xc52   : > { %v4303_v9 = vpop.permute.xlu2 %4302 }
 0xc53   : > { %v4352_v12 = vmul.f32 0.25, %v4303_v9 }
 0xc5a   : > { %v4309_v19 = vpop.permute.xlu2 %4308 }
 0xc5b   : > { %v4354_v24 = vmul.f32 0.25, %v4309_v19 }
 0xc6a   : > { %v4312_v3 = vpop.permute.xlu1 %4311 }
 0xc6b   : > { %v4300_v4 = vpop.permute.xlu0 %4299  ;;  %v4355_v8 = vmul.f32 0.25, %v4312_v3 }
 0xc6c   : > { %v4351_v6 = vmul.f32 0.25, %v4300_v4 }
 0xc72   : > { %v4322_v42 = vpop.permute.xlu1 %4321 }
 0xc73   : > { %v4330_v5 = vpop.permute.xlu0 %4329  ;;  %9785 = vmatpush.xpose.msk.msra.mxu0 %vm2344_vm0, %v4322_v42 }
 0xc74   : > { %9793 = vmatpush.xpose.msk.msrb.mxu2 %vm2344_vm0, %v4330_v5 }
 0xc76   : > { %9786 = vmatmul.msk.f32.vlgmr.msra.gmra.mxu0 %vm2344_vm0, %v4351_v6 }
 0xc77   : > { %9794 = vmatmul.msk.f32.vlgmr.msrb.gmra.mxu2 %vm2344_vm0, %v4355_v8 }
 0xc7a   : > { %v4324_v10 = vpop.permute.xlu1 %4323 }
 0xc7b   : > { %v4332_v11 = vpop.permute.xlu0 %4331  ;;  %9787 = vmatpush.xpose.msk.msrb.mxu0 %vm2344_vm0, %v4324_v10 }
 0xc7c   : > { %9795 = vmatpush.xpose.msk.msrb.mxu3 %vm2344_vm0, %v4332_v11 }
 0xc7e   : > { %v4380_v13 = vpop.f32.mrf.mxu0  ;;  %9788 = vmatmul.msk.f32.vlgmr.msrb.gmra.mxu0 %vm2344_vm0, %v4352_v12 }
 0xc7f   : > { %v4558_v14 = vsel %vm2907_vm9, %v4380_v13, -inf }
 0xc80   : > { %4559 = vmax.xlane.f32.xlu2 %v4558_v14 }
 0xc82   : > { %v4315_v15 = vpop.permute.xlu1 %4314 }
 0xc83   : > { %v4356_v16 = vmul.f32 0.25, %v4315_v15  ;;  %v4326_v18 = vpop.permute.xlu0 %4325 }
 0xc84   : > { %9789 = vmatpush.xpose.msk.msra.mxu0 %vm2344_vm0, %v4326_v18 }
 0xc85   : > { %9796 = vmatmul.msk.f32.vlgmr.msrb.gmra.mxu3 %vm2344_vm0, %v4356_v16 }
 0xc8a   : > { %v4306_v20 = vpop.permute.xlu1 %4305 }
 0xc8b   : > { %v4353_v21 = vmul.f32 0.25, %v4306_v20  ;;  %v4328_v23 = vpop.permute.xlu0 %4327 }
 0xc8c   : > { %9791 = vmatpush.xpose.msk.msra.mxu1 %vm2344_vm0, %v4328_v23 }
 0xc8d   : > { %9790 = vmatmul.msk.f32.vlgmr.msra.gmra.mxu0 %vm2344_vm0, %v4353_v21 }
 0xc8f   : > { %9792 = vmatmul.msk.f32.vlgmr.msra.gmra.mxu1 %vm2344_vm0, %v4354_v24 }
 0xc90   : > { %9799 = vmatpush.msk.msrb.mxu1 %vm2401_vm4, %v13778_v2 }
 0xc92   : > { %v4334_v25 = vpop.permute.xlu1 %4333 }
 0xc93   : > { %v4318_v26 = vpop.permute.xlu0 %4317  ;;  %9797 = vmatpush.xpose.msk.msrb.mxu0 %vm2344_vm0, %v4334_v25 }
 0xc94   : > { %v4357_v27 = vmul.f32 0.25, %v4318_v26 }
 0xc96   : > { %9798 = vmatmul.msk.f32.vlgmr.msrb.gmra.mxu0 %vm2344_vm0, %v4357_v27 }
 0xc9b   : > { %v4337_v28 = vpop.permute.xlu0 %4336 }
 0xc9c   : > { %9801 = vmatpush.msk.msra.mxu2 %vm2401_vm4, %v4337_v28 }
 0xca3   : > { %v4345_v29 = vpop.permute.xlu0 %4344 }
 0xca4   : > { %9809 = vmatpush.msk.msrb.mxu2 %vm2401_vm4, %v4345_v29 }
 0xcf3   : > { %v4405_v30 = vpop.f32.mrf.mxu0  ;;  %v4560_v45 = vpop.xlane.xlu2 %4559 }
 0xcf4   : > { %v4561_v48 = vsel %vm2907_vm9, %v4405_v30, -inf  ;;  %v4582_v46 = vsub.f32 %v4380_v13, %v4560_v45 }
 0xcf5   : > { %4562 = vmax.xlane.f32.xlu2 %v4561_v48 }
 0xcf6   : > { %v4590_v47 = vmul.f32 1.442695, %v4582_v46  ;;  %v4847_v46 = vld [vmem:[#allocation51 + $0x8] sm:$0xff] }
 0xcf8   : > { %11129 = vpow2.f32 %v4590_v47 }
 0xcfa   : > { %v4505_v31 = vpop.f32.mrf.mxu2 }
 0xcfb   : > { %v4573_v33 = vsel %vm2907_vm9, %v4505_v31, -inf  ;;  %v4430_v34 = vpop.f32.mrf.mxu0 }
 0xcfc   : > { %4574 = vmax.xlane.f32.xlu0 %v4573_v33  ;;  %v4564_v43 = vsel %vm2907_vm9, %v4430_v34, -inf }
 0xcfe   : > { %v11130_v49 = vpop.eup %11129 }
 0xcff   : > { %v4606_v50 = vsel %vm2907_vm9, %v11130_v49, 0.0 }
 0xd08   : > { %v4530_v35 = vpop.f32.mrf.mxu3 }
 0xd09   : > { %v4576_v36 = vsel %vm2907_vm9, %v4530_v35, -inf }
 0xd0a   : > { %4577 = vmax.xlane.f32.xlu1 %v4576_v36  ;;  %v4455_v37 = vpop.f32.mrf.mxu0 }
 0xd0b   : > { %v4567_v38 = vsel %vm2907_vm9, %v4455_v37, -inf }
 0xd0c   : > { %v4480_v40 = vpop.f32.mrf.mxu1  ;;  %4568 = vmax.xlane.f32.xlu0 %v4567_v38 }
 0xd0d   : > { %v4570_v41 = vsel %vm2907_vm9, %v4480_v40, -inf }
 0xd0e   : > { %4571 = vmax.xlane.f32.xlu2 %v4570_v41 }
 0xd12   : > { %4565 = vmax.xlane.f32.xlu1 %v4564_v43 }
 0xd13   : > { %v4555_v7 = vpop.f32.mrf.mxu0 }
 0xd14   : > { %v4579_v44 = vsel %vm2907_vm9, %v4555_v7, -inf }
 0xd1a   : > { %4580 = vmax.xlane.f32.xlu1 %v4579_v44 }
 0xd20   : > { %4346 = vrot.lane.b32.xlu0 %v13778_v2, %s12629_s8  ;;  %s5828_s8 = sld [smem:[#allocation5 + %s13490_s11]] }
 0xd26   : > { %4338 = vrot.lane.b32.xlu2 %v13778_v2, %s14847_s3  ;;  %s14984_s3 = sld [smem:[#allocation136_spill]]  ;;  %s5829_s1 = scalar_lea.vmem [#allocation3], %s5828_s8 }
 0xd27   : > { %s14856_s8 = smov 124  }
 0xd4f   : > { %4607 = vadd.xlane.f32.xlu2 %v4606_v50  ;;  %v4846_v50 = vld [vmem:[#allocation51] sm:$0xff] }
 0xd68   : > { %v4563_v63 = vpop.xlane.xlu2 %4562 }
 0xd69   : > { %v4583_v51 = vsub.f32 %v4405_v30, %v4563_v63  ;;  %v4849_v63 = vld [vmem:[#allocation51 + $0x18] sm:$0xff] }
 0xd6b   : > { %v4592_v52 = vmul.f32 1.442695, %v4583_v51 }
 0xd6d   : > { %11131 = vpow2.f32 %v4592_v52 }
 0xd6f   : > { %v4575_v56 = vpop.xlane.xlu0 %4574 }
 0xd70   : > { %v4587_v59 = vsub.f32 %v4505_v31, %v4575_v56  ;;  %v4848_v56 = vld [vmem:[#allocation51 + $0x10] sm:$0xff] }
 0xd72   : > { %v4600_v61 = vmul.f32 1.442695, %v4587_v59  ;;  %v4851_v59 = vld [vmem:[#allocation51 + $0x28] sm:$0xff] }
 0xd73   : > { %v11132_v53 = vpop.eup %11131 }
 0xd74   : > { %v4609_v54 = vsel %vm2907_vm9, %v11132_v53, 0.0 }
 0xd75   : > { %4610 = vadd.xlane.f32.xlu0 %v4609_v54 }
 0xd7d   : > { %v4578_v55 = vpop.xlane.xlu1 %4577 }
 0xd7e   : > { %v4588_v4 = vsub.f32 %v4530_v35, %v4578_v55 }
 0xd7f   : > { %v4569_v1 = vpop.xlane.xlu0 %4568 }
 0xd80   : > { %v4602_v6 = vmul.f32 1.442695, %v4588_v4  ;;  %v4585_v11 = vsub.f32 %v4455_v37, %v4569_v1  ;;  %v4858_v1 = vld [vmem:[#allocation51 + $0x60] sm:$0xff]  ;;  %v4861_v4 = vld [vmem:[#allocation51 + $0x78] sm:$0xff] }
 0xd81   : > { %v4572_v57 = vpop.xlane.xlu2 %4571 }
 0xd82   : > { %v4586_v58 = vsub.f32 %v4480_v40, %v4572_v57  ;;  %v4596_v13 = vmul.f32 1.442695, %v4585_v11  ;;  %v4855_v57 = vld [vmem:[#allocation51 + $0x48] sm:$0xff] }
 0xd84   : > { %v4598_v32 = vmul.f32 1.442695, %v4586_v58  ;;  %v4854_v58 = vld [vmem:[#allocation51 + $0x40] sm:$0xff] }
 0xd85   : > { %v4566_v22 = vpop.xlane.xlu1 %4565 }
 0xd86   : > { %11133 = vpow2.f32 %v4598_v32  ;;  %v4584_v60 = vsub.f32 %v4430_v34, %v4566_v22  ;;  %v4850_v32 = vld [vmem:[#allocation51 + $0x20] sm:$0xff]  ;;  %v4857_v22 = vld [vmem:[#allocation51 + $0x58] sm:$0xff] }
 0xd88   : > { %v4594_v62 = vmul.f32 1.442695, %v4584_v60 }
 0xd89   : > { %v4339_v0 = vpop.permute.xlu2 %4338  ;;  %4342 = vrot.lane.b32.xlu0 %v13778_v2, %s14843_s29  ;;  %s14983_s29 = sadd.s32 3, %s13490_s11 }
 0xd8a   : > { %11135 = vpow2.f32 %v4594_v62  ;;  %9803 = vmatpush.msk.msra.mxu3 %vm2401_vm4, %v4339_v0  ;;  %v4859_v62 = vld [vmem:[#allocation51 + $0x68] sm:$0xff]  ;;  %v4853_v0 = vld [vmem:[#allocation51 + $0x38] sm:$0xff]  ;;  %s5840_s4 = sld [smem:[#allocation5 + %s14983_s29]]  ;;  %s14987_s29 = smov 96  }
 0xd8b   : > { %11137 = vpow2.f32 %v4600_v61  ;;  %v4856_v61 = vld [vmem:[#allocation51 + $0x50] sm:$0xff] }
 0xd8c   : > { %v11134_v3 = vpop.eup %11133  ;;  %11139 = vpow2.f32 %v4602_v6 }
 0xd8d   : > { %v4618_v42 = vsel %vm2907_vm9, %v11134_v3, 0.0  ;;  %v4581_v14 = vpop.xlane.xlu1 %4580  ;;  %11141 = vpow2.f32 %v4596_v13 }
 0xd8e   : > { %4619 = vadd.xlane.f32.xlu1 %v4618_v42  ;;  %v4589_v16 = vsub.f32 %v4555_v7, %v4581_v14 }
 0xd90   : > { %v11136_v5 = vpop.eup %11135  ;;  %v4604_v19 = vmul.f32 1.442695, %v4589_v16 }
 0xd91   : > { %v4612_v8 = vsel %vm2907_vm9, %v11136_v5, 0.0  ;;  %v11138_v9 = vpop.eup %11137 }
 0xd92   : > { %4613 = vadd.xlane.f32.xlu2 %v4612_v8  ;;  %v4347_v10 = vpop.permute.xlu0 %4346  ;;  %v4621_v12 = vsel %vm2907_vm9, %v11138_v9, 0.0  ;;  %v11140_v15 = vpop.eup %11139  ;;  %11143 = vpow2.f32 %v4604_v19  ;;  %v4860_v8 = vld [vmem:[#allocation51 + $0x70] sm:$0xff] }
 0xd93   : > { %9811 = vmatpush.msk.msrb.mxu3 %vm2401_vm4, %v4347_v10  ;;  %v4624_v18 = vsel %vm2907_vm9, %v11140_v15, 0.0  ;;  %v11142_v20 = vpop.eup %11141 }
 0xd94   : > { %v4615_v21 = vsel %vm2907_vm9, %v11142_v20, 0.0 }
 0xd96   : > { %4622 = vadd.xlane.f32.xlu1 %v4621_v12 }
 0xd98   : > { %v11144_v23 = vpop.eup %11143 }
 0xd99   : > { %v4627_v24 = vsel %vm2907_vm9, %v11144_v23, 0.0  ;;  %vm5825_vm9 = vcmask 261120  }
 0xd9e   : > { %4625 = vadd.xlane.f32.xlu1 %v4624_v18 }
 0xda6   : > { %4616 = vadd.xlane.f32.xlu1 %v4615_v21 }
 0xdaa   : > { %4340 = vrot.lane.b32.xlu2 %v13778_v2, %s12630_s12  ;;  %s14981_s12 = sadd.s32 1, %s13490_s11  ;;  %s12634_s11 = smov 120  }
 0xdae   : > { %4628 = vadd.xlane.f32.xlu1 %v4627_v24 }
 0xdc2   : > { %v4608_v25 = vpop.xlane.xlu2 %4607 }
 0xdc3   : > { %11145 = vrcp.f32 %v4608_v25 }
 0xdc7   : > { %4348 = vrot.lane.b32.xlu1 %v13778_v2, %s12631_s16  ;;  %s5832_s16 = sld [smem:[#allocation5 + %s14981_s12]]  ;;  %s5841_s12 = scalar_lea.vmem [#allocation3], %s5840_s4 }
 0xdc8   : > { %s14852_s4 = smov 108  }
 0xdc9   : > { %v11146_v26 = vpop.eup %11145 }
 0xdca   : > { %v4638_v27 = vmul.f32 %v11146_v26, %v11130_v49 }
 0xdcc   : > { %9800 = vmatmul.msk.f32.vlgmr.msrb.gmra.mxu1 %vm2996_vm10, %v4638_v27 }
 0xdcd   : > { %s5833_s2 = scalar_lea.vmem [#allocation3], %s5832_s16  ;;  %s14854_s16 = smov 104  }
 0xde8   : > { %v4611_v28 = vpop.xlane.xlu0 %4610 }
 0xde9   : > { %11147 = vrcp.f32 %v4611_v28 }
 0xdef   : > { %v11148_v29 = vpop.eup %11147 }
 0xdf0   : > { %v4639_v30 = vmul.f32 %v11148_v29, %v11132_v53 }
 0xdf2   : > { %9802 = vmatmul.msk.f32.vlgmr.msra.gmra.mxu2 %vm2996_vm10, %v4639_v30 }
 0xdf3   : > { %4902 = vmatpush.msra.mxu2 %v4849_v63  ;;  %v10512_v63 = vld [vmem:[#allocation48 + $0xec] sm:$0xf] }
 0xdf5   : > { %4903 = vmatpush.msra.mxu2 %v4848_v56 }
 0xdfb   : > { %v4343_v48 = vpop.permute.xlu0 %4342 }
 0xdfc   : > { %9807 = vmatpush.msk.msra.mxu1 %vm2401_vm4, %v4343_v48 }
 0xdfe   : > { %4879 = vmatpush.msrb.mxu1 %v4847_v46  ;;  %v9945_v46 = vld [vmem:[#allocation48 + $0xe8] sm:$0xf] }
 0xe00   : > { %4880 = vmatpush.msrb.mxu1 %v4846_v50 }
 0xe01   : > { %v4620_v31 = vpop.xlane.xlu1 %4619 }
 0xe02   : > { %11149 = vrcp.f32 %v4620_v31 }
 0xe05   : > { %v4614_v33 = vpop.xlane.xlu2 %4613 }
 0xe06   : > { %11151 = vrcp.f32 %v4614_v33 }
 0xe08   : > { %v11150_v34 = vpop.eup %11149 }
 0xe09   : > { %v4642_v35 = vmul.f32 %v11150_v34, %v11134_v3  ;;  %v4623_v2 = vpop.xlane.xlu1 %4622  ;;  %v4852_v3 = vld [vmem:[#allocation51 + $0x30] sm:$0xff] }
 0xe0a   : > { %11153 = vrcp.f32 %v4623_v2 }
 0xe0b   : > { %9808 = vmatmul.msk.f32.vlgmr.msra.gmra.mxu1 %vm2996_vm10, %v4642_v35 }
 0xe0c   : > { %v11152_v36 = vpop.eup %11151  ;;  %4971 = vmatpush.msra.mxu1 %v4855_v57  ;;  %v9921_v57 = vld [vmem:[#allocation48 + $0xc0] sm:$0xf] }
 0xe0d   : > { %v4640_v37 = vmul.f32 %v11152_v36, %v11136_v5  ;;  %v4341_v38 = vpop.permute.xlu2 %4340  ;;  %v11056_v36 = vld [vmem:[#allocation39] ss:$0 sm:$0xff] }
 0xe0e   : > { %9805 = vmatpush.msk.msra.mxu0 %vm2401_vm4, %v4341_v38  ;;  %4972 = vmatpush.msra.mxu1 %v4854_v58  ;;  %v10509_v58 = vld [vmem:[#allocation48 + $0xcc] sm:$0xf0] }
 0xe0f   : > { %9804 = vmatmul.msk.f32.vlgmr.msra.gmra.mxu3 %vm2996_vm10, %v4640_v37 }
 0xe10   : > { %v11154_v40 = vpop.eup %11153  ;;  %4925 = vmatpush.msra.mxu3 %v4851_v59  ;;  %v10507_v59 = vld [vmem:[#allocation48 + $0xc4] sm:$0xf] }
 0xe11   : > { %v4643_v41 = vmul.f32 %v11154_v40, %v11138_v9  ;;  %v4626_v43 = vpop.xlane.xlu1 %4625 }
 0xe12   : > { %11155 = vrcp.f32 %v4626_v43  ;;  %4926 = vmatpush.msra.mxu3 %v4850_v32  ;;  %v10513_v43 = vld [vmem:[#allocation48 + $0xec] sm:$0xf0]  ;;  %v9922_v32 = vor.u32 %v10509_v58, %v9921_v57  ;;  %v10487_v58 = vld [vmem:[#allocation48 + $0x24] sm:$0xf] }
 0xe13   : > { %9810 = vmatmul.msk.f32.vlgmr.msrb.gmra.mxu2 %vm2996_vm10, %v4643_v41  ;;  %v9937_v41 = vld [vmem:[#allocation48 + $0xe0] sm:$0xf]  ;;  %v10489_v57 = vld [vmem:[#allocation48 + $0x2c] sm:$0xf0] }
 0xe14   : > { %4994 = vmatpush.msrb.mxu2 %v4857_v22  ;;  %v9923_v22 = vld [vmem:[#allocation48 + $0xd0] sm:$0xf0] }
 0xe16   : > { %4995 = vmatpush.msrb.mxu2 %v4856_v61  ;;  %v10510_v61 = vld [vmem:[#allocation48 + $0xd4] sm:$0xf0] }
 0xe18   : > { %v11156_v7 = vpop.eup %11155 }
 0xe19   : > { %v4644_v44 = vmul.f32 %v11156_v7, %v11140_v15  ;;  %v4617_v45 = vpop.xlane.xlu1 %4616  ;;  %v10511_v7 = vld [vmem:[#allocation48 + $0xe4] sm:$0xf] }
 0xe1a   : > { %11157 = vrcp.f32 %v4617_v45  ;;  %v9939_v45 = vld [vmem:[#allocation48 + $0xf0] sm:$0xf0] }
 0xe1b   : > { %9812 = vmatmul.msk.f32.vlgmr.msrb.gmra.mxu3 %vm2996_vm10, %v4644_v44  ;;  %v9938_v44 = vor.u32 %v10513_v43, %v9937_v41  ;;  %v10496_v41 = vld [vmem:[#allocation48 + $0x6c] sm:$0xf]  ;;  %v9883_v43 = vld [vmem:[#allocation48 + $0x78] sm:$0xf0] }
 0xe1c   : > { %5017 = vmatpush.msrb.mxu3 %v4859_v62  ;;  %v9926_v62 = vor.u32 %v10507_v59, %v9923_v22  ;;  %v9849_v22 = vld [vmem:[#allocation48 + $0x28] sm:$0xf] }
 0xe1e   : > { %5018 = vmatpush.msrb.mxu3 %v4858_v1  ;;  %v10508_v1 = vld [vmem:[#allocation48 + $0xcc] sm:$0xf] }
 0xe20   : > { %v11158_v47 = vpop.eup %11157 }
 0xe21   : > { %v4641_v49 = vmul.f32 %v11158_v47, %v11142_v20  ;;  %v4629_v51 = vpop.xlane.xlu1 %4628  ;;  %v10514_v47 = vld [vmem:[#allocation48 + $0xf4] sm:$0xf0] }
 0xe22   : > { %11159 = vrcp.f32 %v4629_v51  ;;  %v9946_v50 = vor.u32 %v10514_v47, %v9945_v46  ;;  %v9947_v51 = vld [vmem:[#allocation48 + $0xf8] sm:$0xf0]  ;;  %v10491_v46 = vld [vmem:[#allocation48 + $0x44] sm:$0xf] }
 0xe23   : > { %9806 = vmatmul.msk.f32.vlgmr.msra.gmra.mxu0 %vm2996_vm10, %v4641_v49  ;;  %v9942_v49 = vor.u32 %v10511_v7, %v9939_v45  ;;  %v9886_v7 = vor.u32 %v10496_v41, %v9883_v43  ;;  %v10493_v45 = vld [vmem:[#allocation48 + $0x4c] sm:$0xf0]  ;;  %v10520_v41 = vld [vmem:[#allocation50 + $0x28] sm:$0xff] }
 0xe24   : > { %v10544_v43 = vld [vmem:[#allocation50 + $0xe8] sm:$0xff] }
 0xe28   : > { %v11160_v52 = vpop.eup %11159 }
 0xe29   : > { %v4645_v53 = vmul.f32 %v11160_v52, %v11144_v23  ;;  %v9950_v52 = vor.u32 %v10512_v63, %v9947_v51  ;;  %v10494_v63 = vld [vmem:[#allocation48 + $0x54] sm:$0xf0] }
 0xe39   : > { %v4349_v54 = vpop.permute.xlu1 %4348 }
 0xe3a   : > { %9813 = vmatpush.msk.msrb.mxu0 %vm2401_vm4, %v4349_v54 }
 0xe3b   : > { %9814 = vmatmul.msk.f32.vlgmr.msrb.gmra.mxu0 %vm2996_vm10, %v4645_v53 }
 0xe3c   : > { %4948 = vmatpush.msra.mxu0 %v4853_v0 }
 0xe3e   : > { %4949 = vmatpush.msra.mxu0 %v4852_v3  ;;  %v9931_v3 = vld [vmem:[#allocation48 + $0xd8] sm:$0xf0] }
 0xe40   : > { %5040 = vmatpush.msrb.mxu0 %v4861_v4  ;;  %v9934_v4 = vor.u32 %v10508_v1, %v9931_v3  ;;  %v9851_v1 = vld [vmem:[#allocation48 + $0x38] sm:$0xf0]  ;;  %v9825_v3 = vld [vmem:[#allocation48] sm:$0xf] }
 0xe42   : > { %5041 = vmatpush.msrb.mxu0 %v4860_v8 }
 0xe49   : > { %v4668_v55 = vpop.f32.mrf.mxu1 }
 0xe4a   : > { %9815 = vmatmul.msk.f32.vlgmr.msrb.gmra.mxu1 %vm2344_vm0, %v4668_v55 }
 0xe4b   : > { %5302 = vmatpush.bf16.msrb.mxu1 %v9938_v44  ;;  %v9857_v44 = vld [vmem:[#allocation48 + $0x40] sm:$0xf] }
 0xe4c   : > { %v9858_v47 = vor.u32 %v10493_v45, %v9857_v44  ;;  %v10537_v44 = vld [vmem:[#allocation50 + $0xb0] sm:$0xff]  ;;  %v10543_v45 = vld [vmem:[#allocation50 + $0xe0] sm:$0xff] }
 0xe4f   : > { %5303 = vmatpush.bf16.msrb.mxu1 %v9922_v32  ;;  %v9843_v32 = vld [vmem:[#allocation48 + $0x30] sm:$0xf0] }
 0xe75   : > { %v4693_v60 = vpop.f32.mrf.mxu2 }
 0xe76   : > { %9816 = vmatmul.msk.f32.vlgmr.msra.gmra.mxu2 %vm2344_vm0, %v4693_v60  ;;  %v9929_v60 = vld [vmem:[#allocation48 + $0xc8] sm:$0xf] }
 0xe77   : > { %5315 = vmatpush.bf16.msra.mxu2 %v9942_v49  ;;  %v9930_v0 = vor.u32 %v10510_v61, %v9929_v60  ;;  %v9859_v49 = vld [vmem:[#allocation48 + $0x50] sm:$0xf0]  ;;  %v10490_v60 = vld [vmem:[#allocation48 + $0x34] sm:$0xf0]  ;;  %v9846_v61 = vor.u32 %v10487_v58, %v9843_v32  ;;  %v10515_v32 = vld [vmem:[#allocation50] sm:$0xff] }
 0xe78   : > { %v9862_v51 = vor.u32 %v10491_v46, %v9859_v49  ;;  %v10528_v46 = vld [vmem:[#allocation50 + $0x68] sm:$0xff]  ;;  %v10518_v49 = vld [vmem:[#allocation50 + $0x18] sm:$0xff]  ;;  %v10525_v58 = vld [vmem:[#allocation50 + $0x50] sm:$0xff] }
 0xe7b   : > { %5316 = vmatpush.bf16.msra.mxu2 %v9926_v62  ;;  %v9850_v62 = vor.u32 %v10490_v60, %v9849_v22  ;;  %v10539_v22 = vld [vmem:[#allocation50 + $0xc0] sm:$0xff]  ;;  %v10524_v60 = vld [vmem:[#allocation50 + $0x48] sm:$0xff] }
 0xe88   : > { %v4768_v42 = vpop.f32.mrf.mxu1 }
 0xe89   : > { %9819 = vmatmul.msk.f32.vlgmr.msra.gmra.mxu1 %vm2344_vm0, %v4768_v42  ;;  %v9905_v42 = vld [vmem:[#allocation48 + $0xa0] sm:$0xf] }
 0xe92   : > { %v4718_v5 = vpop.f32.mrf.mxu3 }
 0xe93   : > { %9817 = vmatmul.msk.f32.vlgmr.msra.gmra.mxu3 %vm2344_vm0, %v4718_v5  ;;  %v10505_v5 = vld [vmem:[#allocation48 + $0xac] sm:$0xf0] }
 0xe94   : > { %5328 = vmatpush.bf16.msra.mxu3 %v9946_v50  ;;  %v9906_v8 = vor.u32 %v10505_v5, %v9905_v42  ;;  %v9865_v50 = vld [vmem:[#allocation48 + $0x48] sm:$0xf]  ;;  %v10485_v42 = vld [vmem:[#allocation48 + $0xc] sm:$0xf0]  ;;  %v10483_v5 = vld [vmem:[#allocation48 + $0x4] sm:$0xf] }
 0xe96   : > { %v4793_v6 = vpop.f32.mrf.mxu2  ;;  %5304 = vmatpush.bf16.msrb.mxu1 %v9906_v8  ;;  %v9826_v8 = vor.u32 %v10485_v42, %v9825_v3 }
 0xe97   : > { %9820 = vmatmul.msk.f32.vlgmr.msrb.gmra.mxu2 %vm2344_vm0, %v4793_v6  ;;  %v10503_v6 = vld [vmem:[#allocation48 + $0xa4] sm:$0xf] }
 0xe98   : > { %5329 = vmatpush.bf16.msra.mxu3 %v9930_v0  ;;  %v10488_v0 = vld [vmem:[#allocation48 + $0x2c] sm:$0xf] }
 0xe9e   : > { %v4818_v9 = vpop.f32.mrf.mxu3 }
 0xe9f   : > { %9821 = vmatmul.msk.f32.vlgmr.msrb.gmra.mxu3 %vm2344_vm0, %v4818_v9  ;;  %v9907_v9 = vld [vmem:[#allocation48 + $0xb0] sm:$0xf0] }
 0xea0   : > { %v4743_v10 = vpop.f32.mrf.mxu0 }
 0xea1   : > { %9818 = vmatmul.msk.f32.vlgmr.msra.gmra.mxu0 %vm2344_vm0, %v4743_v10  ;;  %v9913_v10 = vld [vmem:[#allocation48 + $0xa8] sm:$0xf] }
 0xea2   : > { %5341 = vmatpush.bf16.msra.mxu0 %v9950_v52  ;;  %v9866_v52 = vor.u32 %v10494_v63, %v9865_v50  ;;  %v10542_v50 = vld [vmem:[#allocation50 + $0xd8] sm:$0xff]  ;;  %v10527_v63 = vld [vmem:[#allocation50 + $0x60] sm:$0xff] }
 0xea6   : > { %5342 = vmatpush.bf16.msra.mxu0 %v9934_v4  ;;  %v9854_v4 = vor.u32 %v10488_v0, %v9851_v1  ;;  %v10523_v0 = vld [vmem:[#allocation50 + $0x40] sm:$0xff] }
 0xea7   : > { %v10531_v1 = vld [vmem:[#allocation50 + $0x80] sm:$0xff] }
 0xeb8   : > { %v4843_v11 = vpop.f32.mrf.mxu0 }
 0xeb9   : > { %9822 = vmatmul.msk.f32.vlgmr.msrb.gmra.mxu0 %vm2344_vm0, %v4843_v11  ;;  %v10506_v11 = vld [vmem:[#allocation48 + $0xb4] sm:$0xf0] }
 0xec7   : > { %v4882_v13 = vpop.f32.mrf.mxu1 }
 0xec8   : > { %v5046_v18 = vsel %vm2401_vm4, %v4882_v13, 0.0  ;;  %v9914_v13 = vor.u32 %v10506_v11, %v9913_v10  ;;  %v9833_v10 = vld [vmem:[#allocation48 + $0x8] sm:$0xf]  ;;  %v10486_v11 = vld [vmem:[#allocation48 + $0x14] sm:$0xf0] }
 0xeca   : > { %5330 = vmatpush.bf16.msra.mxu3 %v9914_v13  ;;  %v9834_v13 = vor.u32 %v10486_v11, %v9833_v10 }
 0xef9   : > { %v4905_v12 = vpop.f32.mrf.mxu2 }
 0xefa   : > { %v5047_v15 = vsel %vm2401_vm4, %v4905_v12, 0.0  ;;  %v9910_v12 = vor.u32 %v10503_v6, %v9907_v9  ;;  %v9827_v6 = vld [vmem:[#allocation48 + $0x10] sm:$0xf0] }
 0xefb   : > { %v5048_v20 = vadd.f32 %v5047_v15, %v5046_v18  ;;  %v9915_v15 = vld [vmem:[#allocation48 + $0xb8] sm:$0xf0]  ;;  %v9889_v18 = vld [vmem:[#allocation48 + $0x80] sm:$0xf]  ;;  %v9830_v9 = vor.u32 %v10483_v5, %v9827_v6 }
 0xefc   : > { %5317 = vmatpush.bf16.msra.mxu2 %v9910_v12  ;;  %v10484_v12 = vld [vmem:[#allocation48 + $0xc] sm:$0xf] }
 0xf06   : > { %v4974_v24 = vpop.f32.mrf.mxu1 }
 0xf07   : > { %v5053_v26 = vsel %vm2401_vm4, %v4974_v24, 0.0  ;;  %v9897_v24 = vld [vmem:[#allocation48 + $0x88] sm:$0xf] }
 0xf16   : > { %v4928_v14 = vpop.f32.mrf.mxu3 }
 0xf17   : > { %v5049_v19 = vsel %vm2401_vm4, %v4928_v14, 0.0  ;;  %v10504_v14 = vld [vmem:[#allocation48 + $0xac] sm:$0xf] }
 0xf18   : > { %v5050_v23 = vadd.f32 %v5049_v19, %v5048_v20  ;;  %v10501_v19 = vld [vmem:[#allocation48 + $0x8c] sm:$0xf0]  ;;  %v10499_v20 = vld [vmem:[#allocation48 + $0x84] sm:$0xf] }
 0xf1a   : > { %v4997_v27 = vpop.f32.mrf.mxu2 }
 0xf1b   : > { %v5055_v29 = vsel %vm2401_vm4, %v4997_v27, 0.0 }
 0xf1e   : > { %v4951_v16 = vpop.f32.mrf.mxu0 }
 0xf1f   : > { %v5051_v21 = vsel %vm2401_vm4, %v4951_v16, 0.0  ;;  %v9918_v16 = vor.u32 %v10504_v14, %v9915_v15  ;;  %v9835_v14 = vld [vmem:[#allocation48 + $0x18] sm:$0xf0] }
 0xf20   : > { %v5052_v25 = vadd.f32 %v5051_v21, %v5050_v23  ;;  %v9890_v21 = vor.u32 %v10501_v19, %v9889_v18  ;;  %v9891_v23 = vld [vmem:[#allocation48 + $0x90] sm:$0xf0]  ;;  %v9838_v15 = vor.u32 %v10484_v12, %v9835_v14  ;;  %v10522_v18 = vld [vmem:[#allocation50 + $0x38] sm:$0xff] }
 0xf21   : > { %5343 = vmatpush.bf16.msra.mxu0 %v9918_v16  ;;  %v10546_v19 = vld [vmem:[#allocation50 + $0xf8] sm:$0xff] }
 0xf22   : > { %v5054_v28 = vadd.f32 %v5053_v26, %v5052_v25  ;;  %v5020_v30 = vpop.f32.mrf.mxu3  ;;  %v10502_v25 = vld [vmem:[#allocation48 + $0x94] sm:$0xf0]  ;;  %v9894_v26 = vor.u32 %v10499_v20, %v9891_v23  ;;  %5305 = vmatpush.bf16.msrb.mxu1 %v9890_v21  ;;  %v10521_v21 = vld [vmem:[#allocation50 + $0x30] sm:$0xff] }
 0xf23   : > { %v5057_v31 = vsel %vm2401_vm4, %v5020_v30, 0.0  ;;  %v9898_v27 = vor.u32 %v10502_v25, %v9897_v24  ;;  %v10545_v23 = vld [vmem:[#allocation50 + $0xf0] sm:$0xff] }
 0xf24   : > { %v5056_v48 = vadd.f32 %v5055_v29, %v5054_v28  ;;  %v10500_v28 = vld [vmem:[#allocation48 + $0x8c] sm:$0xf]  ;;  %v9899_v29 = vld [vmem:[#allocation48 + $0x98] sm:$0xf0]  ;;  %5318 = vmatpush.bf16.msra.mxu2 %v9894_v26 }
 0xf25   : > { %v9902_v30 = vor.u32 %v10500_v28, %v9899_v29  ;;  %5331 = vmatpush.bf16.msra.mxu3 %v9898_v27 }
 0xf26   : > { %v5058_v33 = vadd.f32 %v5057_v31, %v5056_v48  ;;  %v9873_v48 = vld [vmem:[#allocation48 + $0x60] sm:$0xf]  ;;  %v10497_v31 = vld [vmem:[#allocation48 + $0x6c] sm:$0xf0] }
 0xf27   : > { %5344 = vmatpush.bf16.msra.mxu0 %v9902_v30 }
 0xf2b   : > { %5345 = vmatpush.bf16.msra.mxu0 %v9886_v7  ;;  %v10529_v7 = vld [vmem:[#allocation50 + $0x70] sm:$0xff] }
 0xf36   : > { %v5043_v34 = vpop.f32.mrf.mxu0 }
 0xf37   : > { %v5059_v35 = vsel %vm2401_vm4, %v5043_v34, 0.0  ;;  %v9874_v34 = vor.u32 %v10497_v31, %v9873_v48  ;;  %v11057_v48 = vld [vmem:[#allocation47] ss:$0 sm:$0xff] }
 0xf38   : > { %v5060_v2 = vadd.f32 %v5059_v35, %v5058_v33  ;;  %v10495_v33 = vld [vmem:[#allocation48 + $0x64] sm:$0xf]  ;;  %v9875_v35 = vld [vmem:[#allocation48 + $0x70] sm:$0xf0] }
 0xf39   : > { %5306 = vmatpush.bf16.msrb.mxu1 %v9874_v34  ;;  %v11058_v34 = vld [vmem:[#allocation45] ss:$0 sm:$0xff] }
 0xf3a   : > { %v5061_v37 = vadd.f32 %v5060_v2, %v13749_v17  ;;  %v9881_v2 = vld [vmem:[#allocation48 + $0x68] sm:$0xf] }
 0xf3c   : > { %v13858_v38 = vadd.f32 %v11056_v36, %v5061_v37  ;;  %v10498_v36 = vld [vmem:[#allocation48 + $0x74] sm:$0xf0]  ;;  %v9878_v37 = vor.u32 %v10495_v33, %v9875_v35 }
 0xf3d   : > { %5307 = vmatpush.bf16.msrb.mxu1 %v9858_v47  ;;  %v10536_v47 = vld [vmem:[#allocation50 + $0xa8] sm:$0xff] }
 0xf3e   : > { %v5069_v40 = vsel %vm2401_vm4, %v13858_v38, 0.0  ;;  %5319 = vmatpush.bf16.msra.mxu2 %v9878_v37  ;;  %v10530_v37 = vld [vmem:[#allocation50 + $0x78] sm:$0xff] }
 0xf3f   : > { %5070 = vadd.xlane.f32.xlu2 %v5069_v40  ;;  %v9882_v40 = vor.u32 %v10498_v36, %v9881_v2 }
 0xf41   : > { %5332 = vmatpush.bf16.msra.mxu3 %v9882_v40  ;;  %v10538_v40 = vld [vmem:[#allocation50 + $0xb8] sm:$0xff] }
 0xf42   : > { %5320 = vmatpush.bf16.msra.mxu2 %v9862_v51  ;;  %v10535_v51 = vld [vmem:[#allocation50 + $0xa0] sm:$0xff] }
 0xf45   : > { %5333 = vmatpush.bf16.msra.mxu3 %v9866_v52  ;;  %v10517_v52 = vld [vmem:[#allocation50 + $0x10] sm:$0xff] }
 0xf46   : > { %5321 = vmatpush.bf16.msra.mxu2 %v9846_v61  ;;  %v10532_v61 = vld [vmem:[#allocation50 + $0x88] sm:$0xff] }
 0xf49   : > { %5334 = vmatpush.bf16.msra.mxu3 %v9850_v62  ;;  %v5132_v62 = vld [vmem:[%s14980_s23] sm:$0xf]  ;;  %s5836_s23 = sld [smem:[#allocation5 + %s14982_s0]]  ;;  %s14858_s0 = smov 100  }
 0xf4a   : > { %5322 = vmatpush.bf16.msra.mxu2 %v9830_v9  ;;  %v5134_v3 = vperm.slane %v5132_v62, 0  ;;  %v5135_v10 = vperm.slane %v5132_v62, 1  ;;  %v5136_v12 = vperm.slane %v5132_v62, 2 }
 0xf4d   : > { %5335 = vmatpush.bf16.msra.mxu3 %v9834_v13 }
 0xf4e   : > { %5667 = vmatpush.bf16.msrb.mxu2 %v10530_v37 }
 0xf4f   : > { %s5837_s6 = scalar_lea.vmem [#allocation3], %s5836_s23  ;;  %s14988_s23 = smov 112  }
 0xf51   : > { %5680 = vmatpush.bf16.msrb.mxu3 %v10538_v40 }
 0xf52   : > { %5668 = vmatpush.bf16.msrb.mxu2 %v10529_v7 }
 0xf55   : > { %5681 = vmatpush.bf16.msrb.mxu3 %v10537_v44 }
 0xf56   : > { %5669 = vmatpush.bf16.msrb.mxu2 %v10528_v46 }
 0xf59   : > { %5682 = vmatpush.bf16.msrb.mxu3 %v10536_v47 }
 0xf5a   : > { %5670 = vmatpush.bf16.msrb.mxu2 %v10527_v63 }
 0xf5d   : > { %5683 = vmatpush.bf16.msrb.mxu3 %v10535_v51 }
 0xfb2   : > { %v5071_v17 = vpop.xlane.xlu2 %5070 }
 0xfb3   : > { %v5072_v53 = vmul.f32 %v5071_v17, %v13506_v39  ;;  %v10492_v17 = vld [vmem:[#allocation48 + $0x4c] sm:$0xf] }
 0xfb5   : > { %v13864_v54 = vsub.f32 %v13858_v38, %v5072_v53  ;;  %v9867_v53 = vld [vmem:[#allocation48 + $0x58] sm:$0xf0] }
 0xfb7   : > { %v5074_v55 = vmul.f32 %v13864_v54, %v13864_v54 }
 0xfb9   : > { %v5075_v56 = vsel %vm2401_vm4, %v5074_v55, 0.0  ;;  %v9870_v55 = vor.u32 %v10492_v17, %v9867_v53  ;;  %v10541_v17 = vld [vmem:[#allocation50 + $0xd0] sm:$0xff]  ;;  %v10526_v53 = vld [vmem:[#allocation50 + $0x58] sm:$0xff] }
 0xfba   : > { %5076 = vadd.xlane.f32.xlu0 %v5075_v56  ;;  %v9841_v56 = vld [vmem:[#allocation48 + $0x20] sm:$0xf]  ;;  %5671 = vmatpush.bf16.msrb.mxu2 %v10526_v53 }
 0xfbb   : > { %5346 = vmatpush.bf16.msra.mxu0 %v9870_v55  ;;  %v9842_v59 = vor.u32 %v10489_v57, %v9841_v56  ;;  %v10534_v55 = vld [vmem:[#allocation50 + $0x98] sm:$0xff]  ;;  %v10516_v56 = vld [vmem:[#allocation50 + $0x8] sm:$0xff] }
 0xfbc   : > { %v10540_v57 = vld [vmem:[#allocation50 + $0xc8] sm:$0xff]  ;;  %5684 = vmatpush.bf16.msrb.mxu3 %v10534_v55 }
 0xfbd   : > { %5308 = vmatpush.bf16.msrb.mxu1 %v9842_v59  ;;  %v10533_v59 = vld [vmem:[#allocation50 + $0x90] sm:$0xff] }
 0xfbe   : > { %5672 = vmatpush.bf16.msrb.mxu2 %v10525_v58 }
 0xfbf   : > { %5347 = vmatpush.bf16.msra.mxu0 %v9854_v4  ;;  %v5137_v4 = vperm.slane %v5132_v62, 3 }
 0xfc0   : > { %5685 = vmatpush.bf16.msrb.mxu3 %v10533_v59 }
 0xfc1   : > { %5309 = vmatpush.bf16.msrb.mxu1 %v9826_v8 }
 0xfc2   : > { %5673 = vmatpush.bf16.msrb.mxu2 %v10524_v60 }
 0xfc3   : > { %5348 = vmatpush.bf16.msra.mxu0 %v9838_v15 }
 0xfc4   : > { %5686 = vmatpush.bf16.msrb.mxu3 %v10532_v61  ;;  %v11059_v61 = vld [vmem:[#allocation38] ss:$0 sm:$0xff] }
 0xfc5   : > { %5654 = vmatpush.bf16.msra.mxu1 %v10522_v18 }
 0xfc6   : > { %5674 = vmatpush.bf16.msrb.mxu2 %v10523_v0 }
 0xfc7   : > { %5693 = vmatpush.bf16.msrb.mxu0 %v10546_v19 }
 0xfc8   : > { %5687 = vmatpush.bf16.msrb.mxu3 %v10531_v1 }
 0xfc9   : > { %5655 = vmatpush.bf16.msra.mxu1 %v10521_v21 }
 0xfcb   : > { %5694 = vmatpush.bf16.msrb.mxu0 %v10545_v23 }
 0xfcd   : > { %5656 = vmatpush.bf16.msra.mxu1 %v10520_v41 }
 0xfcf   : > { %5695 = vmatpush.bf16.msrb.mxu0 %v10544_v43 }
 0xfd3   : > { %5696 = vmatpush.bf16.msrb.mxu0 %v10543_v45 }
 0xfd7   : > { %5697 = vmatpush.bf16.msrb.mxu0 %v10542_v50 }
 0xfdb   : > { %5698 = vmatpush.bf16.msrb.mxu0 %v10541_v17 }
 0xfdf   : > { %5699 = vmatpush.bf16.msrb.mxu0 %v10540_v57 }
 0xfe3   : > { %5700 = vmatpush.bf16.msrb.mxu0 %v10539_v22 }
0x102d   : > { %v5077_v16 = vpop.xlane.xlu0 %5076 }
0x102e   : > { %v5078_v20 = vmul.f32 %v5077_v16, %v13506_v39 }
0x1030   : > { %v5079_v24 = vadd.f32 1e-06, %v5078_v20 }
0x1032   : > { %11161 = vrsqrt.f32 %v5079_v24  ;;  %vm5086_vm3 = vweird.f32 %v5079_v24 }
0x1038   : > { %v11162_v25 = vpop.eup %11161 }
0x1039   : > { %v5081_v26 = vmul.f32 %v11162_v25, %v5079_v24  ;;  %vm5087_vm2 = vweird.f32 %v11162_v25 }
0x103a   : > { %vm5088_vm5 = vmor %vm5086_vm3, %vm5087_vm2 }
0x103b   : > { %v5082_v27 = vmul.f32 %v11162_v25, %v5081_v26 }
0x103d   : > { %v5083_v28 = vmul.f32 0.5, %v5082_v27 }
0x103f   : > { %v5084_v29 = vsub.f32 1.5, %v5083_v28 }
0x1041   : > { %v5085_v30 = vmul.f32 %v11162_v25, %v5084_v29 }
0x1043   : > { %v5089_v31 = vsel %vm5088_vm5, %v11162_v25, %v5085_v30 }
0x1044   : > { %v5090_v33 = vmul.f32 %v5089_v31, %v13864_v54  ;;  %v10519_v54 = vld [vmem:[#allocation50 + $0x20] sm:$0xff] }
0x1045   : > { %5657 = vmatpush.bf16.msra.mxu1 %v10519_v54 }
0x1046   : > { %v5094_v35 = vmul.f32 %v11057_v48, %v5090_v33 }
0x1048   : > { %v5098_v2 = vadd.f32 %v11058_v34, %v5094_v35 }
0x1049   : > { %5658 = vmatpush.bf16.msra.mxu1 %v10518_v49 }
0x104a   : > { %v5099_v36 = vpack.c.bf16 %v5098_v2, %v5098_v2 }
0x104c   : > { %5310 = vmatmul.bf16.vlgmr.msrb.gmra.mxu1 %v5099_v36  ;;  %5323 = vmatmul.bf16.vlgmr.msra.gmra.mxu2 %v5099_v36 }
0x104d   : > { %5336 = vmatmul.bf16.vlgmr.msra.gmra.mxu3 %v5099_v36  ;;  %5349 = vmatmul.bf16.vlgmr.msra.gmra.mxu0 %v5099_v36 }
0x104e   : > { %5659 = vmatpush.bf16.msra.mxu1 %v10517_v52 }
0x1052   : > { %5660 = vmatpush.bf16.msra.mxu1 %v10516_v56 }
0x1056   : > { %5661 = vmatpush.bf16.msra.mxu1 %v10515_v32 }
0x10c9   : > { %v5311_v42 = vpop.f32.mrf.mxu1 }
0x10ca   : > { %v5312_v5 = vadd.f32 %v5311_v42, %v5134_v3  ;;  %v5350_v6 = vpop.f32.mrf.mxu0 }
0x10cb   : > { %v5351_v8 = vadd.f32 %v5350_v6, %v5137_v4 }
0x10cc   : > { %v5358_v9 = vmul.f32 0.044715, %v5312_v5  ;;  %v5354_v44 = vmul.f32 0.5, %v5312_v5 }
0x10cd   : > { %v5361_v11 = vmul.f32 0.044715, %v5351_v8  ;;  %v5357_v45 = vmul.f32 0.5, %v5351_v8 }
0x10ce   : > { %v5362_v13 = vmul.f32 %v5358_v9, %v5312_v5 }
0x10cf   : > { %v5365_v14 = vmul.f32 %v5361_v11, %v5351_v8  ;;  %v5324_v15 = vpop.f32.mrf.mxu2 }
0x10d0   : > { %v5366_v16 = vmul.f32 %v5362_v13, %v5312_v5  ;;  %v5325_v18 = vadd.f32 %v5324_v15, %v5135_v10  ;;  %v5337_v19 = vpop.f32.mrf.mxu3 }
0x10d1   : > { %v5369_v20 = vmul.f32 %v5365_v14, %v5351_v8  ;;  %v5338_v21 = vadd.f32 %v5337_v19, %v5136_v12  ;;  %v5313_v23 = vpop.f32.mrf.mxu1  ;;  %v10554_v12 = vld [vmem:[%s12950_s21 + $0x38] sm:$0xff]  ;;  %v10552_v19 = vld [vmem:[%s12950_s21 + $0x28] sm:$0xff] }
0x10d2   : > { %v5359_v24 = vmul.f32 0.044715, %v5325_v18  ;;  %v5352_v25 = vpop.f32.mrf.mxu0  ;;  %v5370_v26 = vadd.f32 %v5366_v16, %v5312_v5  ;;  %v5355_v17 = vmul.f32 0.5, %v5325_v18  ;;  %5808 = vmatpush.bf16.msrb.mxu1 %v10554_v12  ;;  %v10549_v23 = vld [vmem:[%s12950_s21 + $0x10] sm:$0xff] }
0x10d3   : > { %v5373_v27 = vadd.f32 %v5369_v20, %v5351_v8  ;;  %v5360_v28 = vmul.f32 0.044715, %v5338_v21  ;;  %v5356_v55 = vmul.f32 0.5, %v5338_v21  ;;  %v10551_v20 = vld [vmem:[%s12950_s21 + $0x20] sm:$0xff] }
0x10d4   : > { %v5363_v29 = vmul.f32 %v5359_v24, %v5325_v18  ;;  %v5374_v30 = vmul.f32 0.7978846, %v5370_v26  ;;  %v10548_v24 = vld [vmem:[%s12950_s21 + $0x8] sm:$0xff]  ;;  %v10547_v25 = vld [vmem:[%s12950_s21] sm:$0xff] }
0x10d5   : > { %v5377_v48 = vmul.f32 0.7978846, %v5373_v27  ;;  %v5364_v31 = vmul.f32 %v5360_v28, %v5338_v21 }
0x10d6   : > { %v5367_v33 = vmul.f32 %v5363_v29, %v5325_v18  ;;  %11163 = vtanh.f32 %v5374_v30 }
0x10d7   : > { %11165 = vtanh.f32 %v5377_v48  ;;  %v5368_v34 = vmul.f32 %v5364_v31, %v5338_v21  ;;  %v5326_v35 = vpop.f32.mrf.mxu2 }
0x10d8   : > { %v5339_v2 = vpop.f32.mrf.mxu3  ;;  %v5371_v36 = vadd.f32 %v5367_v33, %v5325_v18  ;;  %v11060_v35 = vld [vmem:[#allocation56] ss:$0 sm:$0xff] }
0x10d9   : > { %v5372_v37 = vadd.f32 %v5368_v34, %v5338_v21  ;;  %v10550_v21 = vld [vmem:[%s12950_s21 + $0x18] sm:$0xff] }
0x10da   : > { %v5375_v40 = vmul.f32 0.7978846, %v5371_v36 }
0x10db   : > { %v5376_v41 = vmul.f32 0.7978846, %v5372_v37  ;;  %v11061_v37 = vld [vmem:[#allocation54] ss:$0 sm:$0xff] }
0x10dc   : > { %v11164_v43 = vpop.eup %11163  ;;  %11167 = vtanh.f32 %v5375_v40 }
0x10dd   : > { %v11166_v7 = vpop.eup %11165  ;;  %v5382_v54 = vadd.f32 1.0, %v11164_v43  ;;  %11169 = vtanh.f32 %v5376_v41  ;;  %v11063_v43 = vld [vmem:[#allocation57] ss:$0 sm:$0xff] }
0x10de   : > { %v5385_v46 = vadd.f32 1.0, %v11166_v7  ;;  %5826 = vst.msk [vmem:[#allocation3] sm:$0xff] %vm5825_vm9, %v11063_v43  ;;  %v11062_v7 = vld [vmem:[#allocation62] ss:$0 sm:$0xff] }
0x10df   : > { %v5386_v47 = vmul.f32 %v5382_v54, %v5354_v44  ;;  %5827 = vst.msk [vmem:[#allocation3 + $0x8] sm:$0xff] %vm5825_vm9, %v11063_v43 }
0x10e0   : > { %v5389_v49 = vmul.f32 %v5385_v46, %v5357_v45  ;;  %v5847_v46 = vld [vmem:[%s14984_s3 + $0x8] sm:$0xff] }
0x10e1   : > { %v5390_v50 = vpack.c.bf16 %v5386_v47, %v5386_v47  ;;  %v5846_v47 = vld [vmem:[%s14984_s3] sm:$0xff] }
0x10e2   : > { %v11168_v63 = vpop.eup %11167  ;;  %v5393_v51 = vpack.c.bf16 %v5389_v49, %v5389_v49 }
0x10e3   : > { %v11170_v52 = vpop.eup %11169  ;;  %5662 = vmatmul.bf16.vlgmr.msra.gmra.mxu1 %v5390_v50  ;;  %v5383_v53 = vadd.f32 1.0, %v11168_v63 }
0x10e4   : > { %5701 = vmatmul.bf16.vlgmr.msrb.gmra.mxu0 %v5393_v51  ;;  %v5384_v56 = vadd.f32 1.0, %v11170_v52 }
0x10e5   : > { %v5387_v57 = vmul.f32 %v5383_v53, %v5355_v17  ;;  %v12632_v53 = vmov 32.0  }
0x10e6   : > { %v5388_v58 = vmul.f32 %v5384_v56, %v5356_v55 }
0x10e7   : > { %v5391_v59 = vpack.c.bf16 %v5387_v57, %v5387_v57 }
0x10e8   : > { %v5392_v32 = vpack.c.bf16 %v5388_v58, %v5388_v58 }
0x10e9   : > { %5675 = vmatmul.bf16.vlgmr.msrb.gmra.mxu2 %v5391_v59 }
0x10ea   : > { %5688 = vmatmul.bf16.vlgmr.msrb.gmra.mxu3 %v5392_v32 }
0x1160   : > { %v5663_v22 = vpop.f32.mrf.mxu1 }
0x1161   : > { %v5702_v60 = vpop.f32.mrf.mxu0  ;;  %v5664_v1 = vadd.f32 %v11059_v61, %v5663_v22 }
0x1168   : > { %v5665_v62 = vpop.f32.mrf.mxu1 }
0x1169   : > { %v5704_v0 = vpop.f32.mrf.mxu0 }
0x116c   : > { %v5676_v3 = vpop.f32.mrf.mxu2 }
0x116d   : > { %v5677_v4 = vadd.f32 %v5676_v3, %v5664_v1  ;;  %v5689_v42 = vpop.f32.mrf.mxu3 }
0x116f   : > { %v5690_v5 = vadd.f32 %v5689_v42, %v5677_v4 }
0x1171   : > { %v5703_v6 = vadd.f32 %v5702_v60, %v5690_v5 }
0x1173   : > { %v5706_v8 = vadd.f32 %v5703_v6, %v13858_v38  ;;  %v10553_v38 = vld [vmem:[%s12950_s21 + $0x30] sm:$0xff] }
0x1174   : > { %v5678_v9 = vpop.f32.mrf.mxu2  ;;  %5809 = vmatpush.bf16.msrb.mxu1 %v10553_v38 }
0x1175   : > { %v5691_v10 = vpop.f32.mrf.mxu3  ;;  %v5709_v11 = vsel %vm2401_vm4, %v5706_v8, 0.0 }
0x1176   : > { %5710 = vadd.xlane.f32.xlu1 %v5709_v11 }
0x1178   : > { %5810 = vmatpush.bf16.msrb.mxu1 %v10552_v19 }
0x117c   : > { %5811 = vmatpush.bf16.msrb.mxu1 %v10551_v20 }
0x1180   : > { %5812 = vmatpush.bf16.msrb.mxu1 %v10550_v21 }
0x1184   : > { %5813 = vmatpush.bf16.msrb.mxu1 %v10549_v23 }
0x1188   : > { %5814 = vmatpush.bf16.msrb.mxu1 %v10548_v24 }
0x118c   : > { %5815 = vmatpush.bf16.msrb.mxu1 %v10547_v25 }
0x11e9   : > { %v5711_v13 = vpop.xlane.xlu1 %5710 }
0x11ea   : > { %v5712_v14 = vmul.f32 %v5711_v13, %v13506_v39 }
0x11ec   : > { %v5713_v15 = vsub.f32 %v5706_v8, %v5712_v14 }
0x11ee   : > { %v5714_v16 = vmul.f32 %v5713_v15, %v5713_v15 }
0x11f0   : > { %v5715_v18 = vsel %vm2401_vm4, %v5714_v16, 0.0 }
0x11f1   : > { %5716 = vadd.xlane.f32.xlu2 %v5715_v18 }
0x1264   : > { %v5717_v26 = vpop.xlane.xlu2 %5716 }
0x1265   : > { %v5718_v27 = vmul.f32 %v5717_v26, %v13506_v39 }
0x1267   : > { %v5719_v28 = vadd.f32 1e-06, %v5718_v27  ;;  %v11064_v27 = vld [vmem:[#allocation9] ss:$0 sm:$0xff] }
0x1269   : > { %11171 = vrsqrt.f32 %v5719_v28  ;;  %vm5726_vm7 = vweird.f32 %v5719_v28 }
0x126a   : > { %11173 = vrcp.f32 %v12632_v53 }
0x126f   : > { %v11172_v29 = vpop.eup %11171 }
0x1270   : > { %v5721_v30 = vmul.f32 %v11172_v29, %v5719_v28  ;;  %vm5727_vm6 = vweird.f32 %v11172_v29  ;;  %v11174_v55 = vpop.eup %11173 }
0x1271   : > { %vm5728_vm8 = vmor %vm5726_vm7, %vm5727_vm6  ;;  %v5859_v56 = vmul.f32 32.0, %v11174_v55  ;;  %vm5863_vm15 = vweird.f32 %v11174_v55 }
0x1272   : > { %v5722_v48 = vmul.f32 %v11172_v29, %v5721_v30  ;;  %v11065_v30 = vld [vmem:[#allocation6] ss:$0 sm:$0xff] }
0x1273   : > { %v5860_v57 = vsub.f32 1.0, %v5859_v56 }
0x1274   : > { %v5723_v31 = vmul.f32 0.5, %v5722_v48 }
0x1275   : > { %v5861_v58 = vmul.f32 %v11174_v55, %v5860_v57 }
0x1276   : > { %v5724_v33 = vsub.f32 1.5, %v5723_v31 }
0x1277   : > { %v5862_v59 = vadd.f32 %v11174_v55, %v5861_v58 }
0x1278   : > { %v5725_v34 = vmul.f32 %v11172_v29, %v5724_v33 }
0x1279   : > { %v13904_v32 = vsel %vm5863_vm15, %v11174_v55, %v5862_v59 }
0x127a   : > { %v5729_v2 = vsel %vm5728_vm8, %v11172_v29, %v5725_v34 }
0x127b   : > { %v5730_v36 = vmul.f32 %v5729_v2, %v5713_v15 }
0x127d   : > { %v5734_v39 = vmul.f32 %v11060_v35, %v5730_v36 }
0x127f   : > { %v5738_v40 = vadd.f32 %v11061_v37, %v5734_v39 }
0x1281   : > { %v5739_v41 = vpack.c.bf16 %v5738_v40, %v5738_v40 }
0x1283   : > { %5816 = vmatmul.bf16.vlgmr.msrb.gmra.mxu1 %v5739_v41 }
0x1300   : > { %v5817_v44 = vpop.f32.mrf.mxu1 }
0x1301   : > { %v5818_v54 = vadd.f32 %v11062_v7, %v5817_v44 }
0x1303   : > { %5831 = vst.msk [vmem:[%s5829_s1] sm:$0x1] %vm5830_vm11, %v5818_v54  ;;  %s14985_s1 = sld [smem:[#allocation97_spill]] }
0x1304   : > { %5835 = vst.msk [vmem:[%s5833_s2 - $0x1] sm:$0x2] %vm5834_vm12, %v5818_v54  ;;  %s14986_s2 = sld [smem:[#allocation89_spill]] }
0x1305   : > { %5839 = vst.msk [vmem:[%s5837_s6 - $0x2] sm:$0x4] %vm5838_vm13, %v5818_v54  ;;  %s14860_s6 = smov 116  }
0x1306   : > { %5843 = vst.msk [vmem:[%s5841_s12 - $0x3] sm:$0x8] %vm5842_vm14, %v5818_v54  ;;  %s14989_s12 = smov 64  }
0x1308   : > { %v5819_v45 = vpop.f32.mrf.mxu1 }
0x1309   : > { %v10556_v6 = vld [vmem:[%s14985_s1 + $0x8] sm:$0xff]  ;;  %v10555_v8 = vld [vmem:[%s14985_s1] sm:$0xff]  ;;  %s15001_s1 = smov 100  }
0x130a   : > { %5943 = vmatpush.bf16.msra.mxu2 %v10556_v6  ;;  %v11066_v39 = vld [vmem:[%s14986_s2] ss:$0 sm:$0xff]  ;;  %s14990_s2 = sld [smem:[#allocation96_spill]] }
0x130d   : > { %v5845_v49 = vld [vmem:[#allocation3 + $0x8] sm:$0xff]  ;;  %v5844_v50 = vld [vmem:[#allocation3] sm:$0xff] }
0x130e   : > { %v13896_v63 = vadd.f32 %v5847_v46, %v5845_v49  ;;  %v13898_v51 = vadd.f32 %v5846_v47, %v5844_v50  ;;  %5944 = vmatpush.bf16.msra.mxu2 %v10555_v8 }
0x1310   : > { %v5855_v52 = vsel %vm5825_vm9, %v13896_v63, 0.0  ;;  %v5852_v17 = vsel %vm5825_vm9, %v13898_v51, 0.0 }
0x1311   : > { %5856 = vadd.xlane.f32.xlu2 %v5855_v52  ;;  %5853 = vadd.xlane.f32.xlu0 %v5852_v17 }
0x1384   : > { %v5857_v22 = vpop.xlane.xlu2 %5856  ;;  %v5854_v60 = vpop.xlane.xlu0 %5853 }
0x1385   : > { %v5866_v61 = vmul.f32 %v13904_v32, %v5857_v22  ;;  %v5865_v62 = vmul.f32 %v13904_v32, %v5854_v60 }
0x1387   : > { %v5868_v0 = vsub.f32 %v13896_v63, %v5866_v61  ;;  %v5867_v1 = vsub.f32 %v13898_v51, %v5865_v62 }
0x1389   : > { %v5870_v3 = vmul.f32 %v5868_v0, %v5868_v0  ;;  %v5869_v4 = vmul.f32 %v5867_v1, %v5867_v1 }
0x138b   : > { %v5874_v42 = vsel %vm5825_vm9, %v5870_v3, 0.0  ;;  %v5871_v5 = vsel %vm5825_vm9, %v5869_v4, 0.0 }
0x138c   : > { %5875 = vadd.xlane.f32.xlu2 %v5874_v42  ;;  %5872 = vadd.xlane.f32.xlu0 %v5871_v5 }
0x13ff   : > { %v5876_v9 = vpop.xlane.xlu2 %5875  ;;  %v5873_v10 = vpop.xlane.xlu0 %5872 }
0x1400   : > { %v5878_v11 = vmul.f32 %v5876_v9, %v13904_v32  ;;  %v5877_v12 = vmul.f32 %v5873_v10, %v13904_v32 }
0x1402   : > { %v5880_v13 = vadd.f32 1e-06, %v5878_v11  ;;  %v5879_v14 = vadd.f32 1e-06, %v5877_v12 }
0x1404   : > { %11175 = vrsqrt.f32 %v5880_v13  ;;  %vm5897_vm3 = vweird.f32 %v5880_v13  ;;  %vm5887_vm6 = vweird.f32 %v5879_v14 }
0x1405   : > { %11177 = vrsqrt.f32 %v5879_v14 }
0x140a   : > { %v11176_v15 = vpop.eup %11175 }
0x140b   : > { %v11178_v16 = vpop.eup %11177  ;;  %v5892_v18 = vmul.f32 %v11176_v15, %v5880_v13  ;;  %vm5898_vm1 = vweird.f32 %v11176_v15 }
0x140c   : > { %v5882_v38 = vmul.f32 %v11178_v16, %v5879_v14  ;;  %vm5888_vm2 = vweird.f32 %v11178_v16  ;;  %vm5899_vm5 = vmor %vm5897_vm3, %vm5898_vm1 }
0x140d   : > { %v5893_v19 = vmul.f32 %v11176_v15, %v5892_v18  ;;  %vm5889_vm7 = vmor %vm5887_vm6, %vm5888_vm2 }
0x140e   : > { %v5883_v20 = vmul.f32 %v11178_v16, %v5882_v38 }
0x140f   : > { %v5894_v21 = vmul.f32 0.5, %v5893_v19 }
0x1410   : > { %v5884_v23 = vmul.f32 0.5, %v5883_v20 }
0x1411   : > { %v5895_v24 = vsub.f32 1.5, %v5894_v21 }
0x1412   : > { %v5885_v25 = vsub.f32 1.5, %v5884_v23 }
0x1413   : > { %v5896_v26 = vmul.f32 %v11176_v15, %v5895_v24 }
0x1414   : > { %v5886_v28 = vmul.f32 %v11178_v16, %v5885_v25 }
0x1415   : > { %v5900_v29 = vsel %vm5899_vm5, %v11176_v15, %v5896_v26 }
0x1416   : > { %v5902_v48 = vmul.f32 %v5900_v29, %v5868_v0  ;;  %v5890_v31 = vsel %vm5889_vm7, %v11178_v16, %v5886_v28 }
0x1417   : > { %v5901_v33 = vmul.f32 %v5890_v31, %v5867_v1 }
0x1418   : > { %v5907_v34 = vmul.f32 %v11064_v27, %v5902_v48 }
0x1419   : > { %v5906_v35 = vmul.f32 %v11064_v27, %v5901_v33 }
0x141a   : > { %v5912_v2 = vadd.f32 %v11065_v30, %v5907_v34 }
0x141b   : > { %v5911_v36 = vadd.f32 %v11065_v30, %v5906_v35 }
0x141d   : > { %v5913_v37 = vpack.c.bf16 %v5912_v2, %v5911_v36 }
0x141f   : > { %10119 = vmatmul.msk.bf16.vlgmr.msra.gmra.mxu2 %vm5825_vm9, %v5913_v37 }
0x14a2   : > { %v5946_v40 = vpop.f32.mrf.mxu2 }
0x14a3   : > { %v13918_v41 = vadd.f32 %v11066_v39, %v5946_v40 }
0x14a5   : > { %5965 = vrot.lane.b32.xlu1 %v13918_v41, %s14860_s6  ;;  %v5995_v55 = vmul.f32 0.5, %v13918_v41 }
0x14aa   : > { %v5948_v43 = vpop.f32.mrf.mxu2 }
0x14ab   : > { %v13922_v7 = vadd.f32 %v11066_v39, %v5948_v43 }
0x14ad   : > { %5961 = vrot.lane.b32.xlu2 %v13922_v7, %s12634_s11  ;;  %5967 = vrot.lane.b32.xlu0 %v13922_v7, %s14860_s6  ;;  %v5996_v59 = vmul.f32 0.5, %v13922_v7  ;;  %v10967_v10 = vpack.i.bf16 %v13918_v41, %v13922_v7 }
0x14ae   : > { %5977 = vrot.lane.b32.xlu1 %v13918_v41, %s14852_s4 }
0x14b5   : > { %6013 = vrot.lane.b32.xlu2 %v13922_v7, %s14987_s29  ;;  %5959 = vrot.lane.b32.xlu0 %v13918_v41, %s12634_s11 }
0x14b6   : > { %5955 = vrot.lane.b32.xlu1 %v13922_v7, %s14856_s8 }
0x14bd   : > { %5985 = vrot.lane.b32.xlu2 %v13922_v7, %s14854_s16  ;;  %5979 = vrot.lane.b32.xlu0 %v13922_v7, %s14852_s4  ;;  %s14991_s4 = sld [smem:[#allocation88_spill]] }
0x14be   : > { %5991 = vrot.lane.b32.xlu1 %v13922_v7, %s14858_s0 }
0x14c5   : > { %5983 = vrot.lane.b32.xlu2 %v13918_v41, %s14854_s16  ;;  %6011 = vrot.lane.b32.xlu0 %v13918_v41, %s14987_s29  ;;  %s14993_s16 = sld [smem:[#allocation95_spill]] }
0x14cd   : > { %5953 = vrot.lane.b32.xlu0 %v13918_v41, %s14856_s8  ;;  %s14994_s8 = smov %s14993_s16 }
0x14d5   : > { %5989 = vrot.lane.b32.xlu0 %v13918_v41, %s14858_s0  ;;  %s14995_s0 = sld [smem:[#allocation86_spill]] }
0x14dd   : > { %5973 = vrot.lane.b32.xlu0 %v13922_v7, %s14988_s23 }
0x1507   : > { %v13952_v44 = vpop.permute.xlu2 %5961 }
0x1508   : > { %v6000_v20 = vmul.f32 0.5, %v13952_v44 }
0x150f   : > { %v6014_v54 = vpop.permute.xlu2 %6013 }
0x1510   : > { %10120 = vmatpush.xpose.msk.msra.mxu3 %vm2996_vm10, %v6014_v54 }
0x1517   : > { %v5966_v45 = vpop.permute.xlu1 %5965  ;;  %v13970_v52 = vpop.permute.xlu2 %5985 }
0x1518   : > { %6122 = vrot.lane.b32.xlu2 %v5966_v45, %s14987_s29  ;;  %v6001_v5 = vmul.f32 0.5, %v5966_v45  ;;  %v6008_v34 = vmul.f32 0.5, %v13970_v52 }
0x151f   : > { %v5968_v46 = vpop.permute.xlu0 %5967  ;;  %v13981_v56 = vpop.permute.xlu2 %5983 }
0x1520   : > { %6124 = vrot.lane.b32.xlu1 %v5968_v46, %s14987_s29  ;;  %6087 = vrot.lane.b32.xlu2 %v13952_v44, %s14987_s29  ;;  %v13959_v47 = vpop.permute.xlu1 %5977  ;;  %v10977_v60 = vpack.i.bf16 %v5966_v45, %v5968_v46  ;;  %v10987_v62 = vpack.i.bf16 %v13981_v56, %v13970_v52  ;;  %v6002_v9 = vmul.f32 0.5, %v5968_v46  ;;  %v6007_v28 = vmul.f32 0.5, %v13981_v56 }
0x1521   : > { %v6005_v15 = vmul.f32 0.5, %v13959_v47 }
0x1527   : > { %v5960_v49 = vpop.permute.xlu0 %5959 }
0x1528   : > { %5971 = vrot.lane.b32.xlu1 %v13918_v41, %s14988_s23  ;;  %6196 = vrot.lane.b32.xlu2 %v13959_v47, %s14987_s29  ;;  %v13972_v17 = vpop.permute.xlu1 %5955  ;;  %v5999_v14 = vmul.f32 0.5, %v5960_v49  ;;  %v10972_v16 = vpack.i.bf16 %v5960_v49, %v13952_v44 }
0x1529   : > { %v5998_v48 = vmul.f32 0.5, %v13972_v17 }
0x152f   : > { %v13965_v50 = vpop.permute.xlu0 %5979 }
0x1530   : > { %6198 = vrot.lane.b32.xlu0 %v13965_v50, %s14987_s29  ;;  %6085 = vrot.lane.b32.xlu1 %v5960_v49, %s14987_s29  ;;  %v13983_v58 = vpop.permute.xlu1 %5991  ;;  %v6006_v21 = vmul.f32 0.5, %v13965_v50 }
0x1531   : > { %v6010_v35 = vmul.f32 0.5, %v13983_v58 }
0x1537   : > { %v6012_v53 = vpop.permute.xlu0 %6011 }
0x1538   : > { %10121 = vmatpush.xpose.msk.msra.mxu3 %vm2996_vm10, %v6012_v53  ;;  %6235 = vrot.lane.b32.xlu1 %v13970_v52, %s14987_s29 }
0x1539   : > { %6050 = vrot.lane.b32.xlu0 %v13972_v17, %s14987_s29 }
0x153b   : > { %10122 = vmatmul.msk.f32.vlgmr.msra.gmra.mxu3 %vm2996_vm10, %v5995_v55 }
0x153f   : > { %v5954_v57 = vpop.permute.xlu0 %5953 }
0x1540   : > { %6233 = vrot.lane.b32.xlu1 %v13981_v56, %s14987_s29  ;;  %6048 = vrot.lane.b32.xlu2 %v5954_v57, %s14987_s29  ;;  %v10982_v0 = vpack.i.bf16 %v5954_v57, %v13972_v17  ;;  %v5997_v23 = vmul.f32 0.5, %v5954_v57 }
0x1541   : > { %6272 = vrot.lane.b32.xlu0 %v13983_v58, %s14987_s29 }
0x1543   : > { %10123 = vmatmul.msk.f32.gmra.mxu3 %vm2996_vm10, %v5996_v59 }
0x1547   : > { %v13992_v22 = vpop.permute.xlu0 %5989 }
0x1548   : > { %6270 = vrot.lane.b32.xlu2 %v13992_v22, %s14987_s29  ;;  %v6009_v31 = vmul.f32 0.5, %v13992_v22 }
0x154f   : > { %v13996_v61 = vpop.permute.xlu0 %5973 }
0x1550   : > { %10978 = vrot.lane.b32.xlu2 %v10977_v60, %s14989_s12  ;;  %6161 = vrot.lane.b32.xlu0 %v13996_v61, %s14987_s29  ;;  %v6004_v54 = vmul.f32 0.5, %v13996_v61 }
0x1558   : > { %10983 = vrot.lane.b32.xlu2 %v10982_v0, %s14989_s12  ;;  %10988 = vrot.lane.b32.xlu0 %v10987_v62, %s14989_s12 }
0x1572   : > { %v6123_v1 = vpop.permute.xlu2 %6122 }
0x157a   : > { %v6088_v3 = vpop.permute.xlu2 %6087 }
0x157b   : > { %10128 = vmatpush.xpose.msk.msrb.mxu2 %vm2996_vm10, %v6088_v3 }
0x1582   : > { %v6197_v4 = vpop.permute.xlu2 %6196 }
0x1592   : > { %v6125_v42 = vpop.permute.xlu1 %6124 }
0x1593   : > { %10132 = vmatpush.xpose.msk.msrb.mxu3 %vm2996_vm10, %v6125_v42 }
0x1597   : > { %10133 = vmatpush.xpose.msk.msrb.mxu3 %vm2996_vm10, %v6123_v1 }
0x159a   : > { %v6049_v6 = vpop.permute.xlu2 %6048  ;;  %v14009_v8 = vpop.permute.xlu1 %5971  ;;  %10134 = vmatmul.msk.f32.vlgmr.msrb.gmra.mxu3 %vm2996_vm10, %v6001_v5 }
0x159b   : > { %6159 = vrot.lane.b32.xlu1 %v14009_v8, %s14987_s29  ;;  %v6003_v43 = vmul.f32 0.5, %v14009_v8 }
0x15a2   : > { %v6199_v11 = vpop.permute.xlu0 %6198  ;;  %v6271_v12 = vpop.permute.xlu2 %6270  ;;  %10135 = vmatmul.msk.f32.gmra.mxu3 %vm2996_vm10, %v6002_v9 }
0x15a3   : > { %v6086_v13 = vpop.permute.xlu1 %6085  ;;  %10968 = vrot.lane.b32.xlu1 %v10967_v10, %s14989_s12  ;;  %10140 = vmatpush.xpose.msk.msra.mxu3 %vm2996_vm10, %v6199_v11 }
0x15a4   : > { %10129 = vmatpush.xpose.msk.msrb.mxu2 %vm2996_vm10, %v6086_v13 }
0x15a7   : > { %10130 = vmatmul.msk.f32.vlgmr.msrb.gmra.mxu2 %vm2996_vm10, %v5999_v14  ;;  %10141 = vmatpush.xpose.msk.msra.mxu3 %vm2996_vm10, %v6197_v4 }
0x15aa   : > { %v10979_v18 = vpop.permute.xlu2 %10978  ;;  %10142 = vmatmul.msk.f32.vlgmr.msra.gmra.mxu3 %vm2996_vm10, %v6005_v15  ;;  %v10992_v15 = vpack.i.bf16 %v13992_v22, %v13983_v58 }
0x15ab   : > { %v6051_v38 = vpop.permute.xlu0 %6050  ;;  %v6236_v19 = vpop.permute.xlu1 %6235  ;;  %10973 = vrot.lane.b32.xlu1 %v10972_v16, %s14989_s12  ;;  %v10980_v30 = vunpack.i.l.bf16 %v10979_v18  ;;  %v10981_v33 = vunpack.i.h.bf16 %v10979_v18 }
0x15ac   : > { %10124 = vmatpush.xpose.msk.msra.mxu0 %vm2996_vm10, %v6051_v38  ;;  %10144 = vmatpush.xpose.msk.msra.mxu2 %vm2996_vm10, %v6236_v19 }
0x15af   : > { %10131 = vmatmul.msk.f32.gmra.mxu2 %vm2996_vm10, %v6000_v20 }
0x15b0   : > { %10125 = vmatpush.xpose.msk.msra.mxu0 %vm2996_vm10, %v6049_v6 }
0x15b2   : > { %v10984_v24 = vpop.permute.xlu2 %10983  ;;  %10143 = vmatmul.msk.f32.gmra.mxu3 %vm2996_vm10, %v6006_v21 }
0x15b3   : > { %v10985_v25 = vunpack.i.l.bf16 %v10984_v24  ;;  %10126 = vmatmul.msk.f32.vlgmr.msra.gmra.mxu0 %vm2996_vm10, %v5997_v23  ;;  %v6273_v26 = vpop.permute.xlu0 %6272  ;;  %v6234_v27 = vpop.permute.xlu1 %6233  ;;  %v10986_v29 = vunpack.i.h.bf16 %v10984_v24 }
0x15b4   : > { %10145 = vmatpush.xpose.msk.msra.mxu2 %vm2996_vm10, %v6234_v27  ;;  %10148 = vmatpush.xpose.msk.msrb.mxu3 %vm2996_vm10, %v6273_v26 }
0x15b5   : > { %6544 = vmatpush.msra.mxu1 %v10985_v25 }
0x15b7   : > { %10146 = vmatmul.msk.f32.vlgmr.msra.gmra.mxu2 %vm2996_vm10, %v6007_v28  ;;  %6545 = vmatpush.msra.mxu1 %v10986_v29 }
0x15b8   : > { %10149 = vmatpush.xpose.msk.msrb.mxu3 %vm2996_vm10, %v6271_v12 }
0x15bb   : > { %10127 = vmatmul.msk.f32.gmra.mxu0 %vm2996_vm10, %v5998_v48  ;;  %10150 = vmatmul.msk.f32.vlgmr.msrb.gmra.mxu3 %vm2996_vm10, %v6009_v31 }
0x15bc   : > { %6614 = vmatpush.msra.mxu3 %v10980_v30 }
0x15be   : > { %6615 = vmatpush.msra.mxu3 %v10981_v33  ;;  %v6042_v36 = vpop.f32.mrf.mxu3 }
0x15bf   : > { %10147 = vmatmul.msk.f32.gmra.mxu2 %vm2996_vm10, %v6008_v34  ;;  %v6307_v37 = vsel %vm2344_vm0, %v6042_v36, -inf }
0x15c2   : > { %v6162_v2 = vpop.permute.xlu0 %6161 }
0x15c3   : > { %10151 = vmatmul.msk.f32.gmra.mxu3 %vm2996_vm10, %v6010_v35  ;;  %10136 = vmatpush.xpose.msk.msrb.mxu0 %vm2996_vm10, %v6162_v2 }
0x15c6   : > { %v6045_v39 = vpop.f32.mrf.mxu3 }
0x15c7   : > { %v6310_v40 = vsel %vm2344_vm0, %v6045_v39, -inf }
0x15ca   : > { %v10989_v52 = vpop.permute.xlu0 %10988 }
0x15cb   : > { %v10990_v56 = vunpack.i.l.bf16 %v10989_v52  ;;  %v10991_v57 = vunpack.i.h.bf16 %v10989_v52 }
0x15d5   : > { %6308 = vmax.xlane.f32.xlu1 %v6307_v37 }
0x15dd   : > { %6311 = vmax.xlane.f32.xlu1 %v6310_v40 }
0x160d   : > { %v6160_v41 = vpop.permute.xlu1 %6159 }
0x160e   : > { %10137 = vmatpush.xpose.msk.msrb.mxu0 %vm2996_vm10, %v6160_v41 }
0x1611   : > { %10138 = vmatmul.msk.f32.vlgmr.msrb.gmra.mxu0 %vm2996_vm10, %v6003_v43 }
0x1615   : > { %v10969_v7 = vpop.permute.xlu1 %10968 }
0x1616   : > { %v10970_v44 = vunpack.i.l.bf16 %v10969_v7  ;;  %v10971_v45 = vunpack.i.h.bf16 %v10969_v7 }
0x1618   : > { %6509 = vmatpush.msra.mxu0 %v10970_v44 }
0x1619   : > { %10139 = vmatmul.msk.f32.gmra.mxu0 %vm2996_vm10, %v6004_v54 }
0x161a   : > { %6510 = vmatpush.msra.mxu0 %v10971_v45 }
0x161d   : > { %v10974_v46 = vpop.permute.xlu1 %10973  ;;  %v14055_v49 = vpop.f32.mrf.mxu3 }
0x161e   : > { %v10975_v17 = vunpack.i.l.bf16 %v10974_v46  ;;  %v6325_v53 = vsel %vm2344_vm0, %v14055_v49, -inf  ;;  %v10976_v55 = vunpack.i.h.bf16 %v10974_v46 }
0x161f   : > { %6326 = vmax.xlane.f32.xlu0 %v6325_v53 }
0x1620   : > { %6579 = vmatpush.msrb.mxu2 %v10975_v17 }
0x1622   : > { %6580 = vmatpush.msrb.mxu2 %v10976_v55 }
0x1624   : > { %6719 = vmatpush.msra.mxu2 %v10990_v56 }
0x1625   : > { %v14059_v59 = vpop.f32.mrf.mxu3 }
0x1626   : > { %6720 = vmatpush.msra.mxu2 %v10991_v57  ;;  %v6328_v14 = vsel %vm2344_vm0, %v14059_v59, -inf }
0x162a   : > { %v6116_v3 = vpop.f32.mrf.mxu2 }
0x162b   : > { %v6319_v6 = vsel %vm2344_vm0, %v6116_v3, -inf }
0x162d   : > { %v14061_v60 = vpop.f32.mrf.mxu3 }
0x162e   : > { %v6337_v62 = vsel %vm2344_vm0, %v14061_v60, -inf }
0x162f   : > { %6338 = vmax.xlane.f32.xlu1 %v6337_v62 }
0x1630   : > { %v6079_v0 = vpop.f32.mrf.mxu0 }
0x1631   : > { %v6313_v1 = vsel %vm2344_vm0, %v6079_v0, -inf }
0x1632   : > { %6314 = vmax.xlane.f32.xlu2 %v6313_v1  ;;  %v14072_v10 = vpop.f32.mrf.mxu2 }
0x1633   : > { %v6322_v13 = vsel %vm2344_vm0, %v14072_v10, -inf }
0x1635   : > { %v14066_v4 = vpop.f32.mrf.mxu3 }
0x1636   : > { %v6340_v42 = vsel %vm2344_vm0, %v14066_v4, -inf }
0x1637   : > { %6341 = vmax.xlane.f32.xlu1 %v6340_v42 }
0x1638   : > { %v6082_v5 = vpop.f32.mrf.mxu0 }
0x1639   : > { %v6316_v9 = vsel %vm2344_vm0, %v6082_v5, -inf }
0x163a   : > { %6320 = vmax.xlane.f32.xlu2 %v6319_v6  ;;  %6317 = vmax.xlane.f32.xlu0 %v6316_v9  ;;  %v14097_v27 = vpop.f32.mrf.mxu2 }
0x163b   : > { %v6343_v29 = vsel %vm2344_vm0, %v14097_v27, -inf }
0x163e   : > { %v14074_v11 = vpop.f32.mrf.mxu3 }
0x163f   : > { %v6349_v12 = vsel %vm2344_vm0, %v14074_v11, -inf }
0x1640   : > { %6350 = vmax.xlane.f32.xlu1 %v6349_v12 }
0x1642   : > { %6323 = vmax.xlane.f32.xlu2 %v6322_v13  ;;  %6329 = vmax.xlane.f32.xlu0 %v6328_v14  ;;  %v14105_v48 = vpop.f32.mrf.mxu2 }
0x1643   : > { %v6346_v2 = vsel %vm2344_vm0, %v14105_v48, -inf }
0x1646   : > { %v14107_v31 = vpop.f32.mrf.mxu3 }
0x1648   : > { %v6309_v16 = vpop.xlane.xlu1 %6308 }
0x1649   : > { %v6355_v18 = vsub.f32 %v6042_v36, %v6309_v16  ;;  %v6352_v36 = vsel %vm2344_vm0, %v14107_v31, -inf }
0x164b   : > { %v6371_v38 = vmul.f32 1.442695, %v6355_v18 }
0x164d   : > { %11179 = vpow2.f32 %v6371_v38 }
0x1650   : > { %v6312_v19 = vpop.xlane.xlu1 %6311 }
0x1651   : > { %v6356_v20 = vsub.f32 %v6045_v39, %v6312_v19 }
0x1653   : > { %v6373_v24 = vmul.f32 1.442695, %v6356_v20  ;;  %v14089_v25 = vpop.eup %11179 }
0x1654   : > { %v6403_v58 = vsel %vm2344_vm0, %v14089_v25, 0.0 }
0x1655   : > { %11181 = vpow2.f32 %v6373_v24 }
0x1659   : > { %10993 = vrot.lane.b32.xlu1 %v10992_v15, %s14989_s12 }
0x165b   : > { %v14099_v28 = vpop.eup %11181 }
0x165c   : > { %v6406_v30 = vsel %vm2344_vm0, %v14099_v28, 0.0 }
0x168e   : > { %v14085_v21 = vpop.f32.mrf.mxu0 }
0x168f   : > { %v6331_v23 = vsel %vm2344_vm0, %v14085_v21, -inf }
0x1690   : > { %6332 = vmax.xlane.f32.xlu2 %v6331_v23 }
0x1692   : > { %v6327_v33 = vpop.xlane.xlu0 %6326 }
0x1693   : > { %v6361_v37 = vsub.f32 %v14055_v49, %v6327_v33 }
0x1695   : > { %v6383_v40 = vmul.f32 1.442695, %v6361_v37 }
0x1696   : > { %v14091_v26 = vpop.f32.mrf.mxu0 }
0x1697   : > { %v6334_v22 = vsel %vm2344_vm0, %v14091_v26, -inf }
0x1698   : > { %6404 = vadd.xlane.f32.xlu2 %v6403_v58  ;;  %6335 = vmax.xlane.f32.xlu0 %v6334_v22 }
0x16a0   : > { %6344 = vmax.xlane.f32.xlu2 %v6343_v29  ;;  %6407 = vadd.xlane.f32.xlu0 %v6406_v30 }
0x16a2   : > { %v6339_v44 = vpop.xlane.xlu1 %6338 }
0x16a3   : > { %v6365_v19 = vsub.f32 %v14061_v60, %v6339_v44 }
0x16a5   : > { %v6315_v34 = vpop.xlane.xlu2 %6314  ;;  %v6391_v20 = vmul.f32 1.442695, %v6365_v19 }
0x16a6   : > { %v6357_v35 = vsub.f32 %v6079_v0, %v6315_v34 }
0x16a8   : > { %v6375_v39 = vmul.f32 1.442695, %v6357_v35  ;;  %6347 = vmax.xlane.f32.xlu0 %v6346_v2  ;;  %6353 = vmax.xlane.f32.xlu2 %v6352_v36 }
0x16aa   : > { %11183 = vpow2.f32 %v6375_v39  ;;  %v14123_v57 = vpop.xlane.xlu1 %6341 }
0x16ab   : > { %11185 = vpow2.f32 %v6383_v40 }
0x16ad   : > { %v6321_v41 = vpop.xlane.xlu2 %6320  ;;  %v6318_v43 = vpop.xlane.xlu0 %6317 }
0x16ae   : > { %v6359_v7 = vsub.f32 %v6116_v3, %v6321_v41  ;;  %v6358_v46 = vsub.f32 %v6082_v5, %v6318_v43 }
0x16b0   : > { %v14114_v54 = vpop.eup %11183  ;;  %v6379_v45 = vmul.f32 1.442695, %v6359_v7  ;;  %v6377_v49 = vmul.f32 1.442695, %v6358_v46 }
0x16b1   : > { %v6409_v52 = vsel %vm2344_vm0, %v14114_v54, 0.0  ;;  %v14118_v53 = vpop.eup %11185 }
0x16b2   : > { %11187 = vpow2.f32 %v6379_v45  ;;  %6410 = vadd.xlane.f32.xlu0 %v6409_v52  ;;  %v6421_v62 = vsel %vm2344_vm0, %v14118_v53, 0.0 }
0x16b3   : > { %11189 = vpow2.f32 %v6377_v49  ;;  %v6351_v9 = vpop.xlane.xlu1 %6350 }
0x16b4   : > { %v6369_v23 = vsub.f32 %v14074_v11, %v6351_v9 }
0x16b5   : > { %v6324_v17 = vpop.xlane.xlu2 %6323  ;;  %v6330_v3 = vpop.xlane.xlu0 %6329 }
0x16b6   : > { %v6360_v56 = vsub.f32 %v14072_v10, %v6324_v17  ;;  %v6362_v5 = vsub.f32 %v14059_v59, %v6330_v3  ;;  %v10997_v59 = vpack.i.bf16 %v14009_v8, %v13996_v61  ;;  %v6399_v24 = vmul.f32 1.442695, %v6369_v23 }
0x16b7   : > { %v6366_v17 = vsub.f32 %v14066_v4, %v14123_v57 }
0x16b8   : > { %v14120_v55 = vpop.eup %11187  ;;  %v6381_v1 = vmul.f32 1.442695, %v6360_v56  ;;  %v6385_v10 = vmul.f32 1.442695, %v6362_v5 }
0x16b9   : > { %v6415_v0 = vsel %vm2344_vm0, %v14120_v55, 0.0  ;;  %v14129_v42 = vpop.eup %11189 }
0x16ba   : > { %6422 = vadd.xlane.f32.xlu0 %v6421_v62  ;;  %6416 = vadd.xlane.f32.xlu2 %v6415_v0  ;;  %11191 = vpow2.f32 %v6381_v1  ;;  %v6412_v6 = vsel %vm2344_vm0, %v14129_v42, 0.0 }
0x16bb   : > { %11193 = vpow2.f32 %v6385_v10 }
0x16bc   : > { %11195 = vpow2.f32 %v6391_v20 }
0x16bd   : > { %11197 = vpow2.f32 %v6399_v24 }
0x16c0   : > { %v14134_v12 = vpop.eup %11191 }
0x16c1   : > { %v6418_v13 = vsel %vm2344_vm0, %v14134_v12, 0.0  ;;  %v14138_v16 = vpop.eup %11193 }
0x16c2   : > { %6413 = vadd.xlane.f32.xlu0 %v6412_v6  ;;  %v6424_v38 = vsel %vm2344_vm0, %v14138_v16, 0.0  ;;  %v14147_v58 = vpop.eup %11195 }
0x16c3   : > { %v6433_v61 = vsel %vm2344_vm0, %v14147_v58, 0.0  ;;  %v14151_v8 = vpop.eup %11197 }
0x16c4   : > { %v6445_v22 = vsel %vm2344_vm0, %v14151_v8, 0.0 }
0x16ca   : > { %6419 = vadd.xlane.f32.xlu0 %v6418_v13 }
0x16cb   : > { %v10994_v14 = vpop.permute.xlu1 %10993 }
0x16cc   : > { %v10995_v15 = vunpack.i.l.bf16 %v10994_v14  ;;  %v10996_v18 = vunpack.i.h.bf16 %v10994_v14 }
0x16ce   : > { %6754 = vmatpush.msrb.mxu3 %v10995_v15 }
0x16d0   : > { %6755 = vmatpush.msrb.mxu3 %v10996_v18 }
0x16d2   : > { %6425 = vadd.xlane.f32.xlu0 %v6424_v38  ;;  %10998 = vrot.lane.b32.xlu2 %v10997_v59, %s14989_s12 }
0x16fb   : > { %6434 = vadd.xlane.f32.xlu2 %v6433_v61 }
0x1703   : > { %6446 = vadd.xlane.f32.xlu2 %v6445_v22  ;;  %v6333_v29 = vpop.xlane.xlu2 %6332 }
0x1704   : > { %v6363_v60 = vsub.f32 %v14085_v21, %v6333_v29 }
0x1706   : > { %v6387_v30 = vmul.f32 1.442695, %v6363_v60 }
0x1708   : > { %11199 = vpow2.f32 %v6387_v30 }
0x170b   : > { %v6405_v11 = vpop.xlane.xlu2 %6404  ;;  %v6336_v33 = vpop.xlane.xlu0 %6335 }
0x170c   : > { %11201 = vrcp.f32 %v6405_v11 }
0x170e   : > { %v14156_v34 = vpop.eup %11199 }
0x170f   : > { %v6427_v35 = vsel %vm2344_vm0, %v14156_v34, 0.0 }
0x1710   : > { %6428 = vadd.xlane.f32.xlu0 %v6427_v35 }
0x1712   : > { %v11202_v2 = vpop.eup %11201 }
0x1713   : > { %v6467_v36 = vmul.f32 %v11202_v2, %v14089_v25  ;;  %v6345_v37 = vpop.xlane.xlu2 %6344  ;;  %v6408_v39 = vpop.xlane.xlu0 %6407  ;;  %v6364_v25 = vsub.f32 %v14091_v26, %v6336_v33  ;;  %v6393_v26 = vmul.f32 1.442695, %v6366_v17 }
0x1714   : > { %v6367_v40 = vsub.f32 %v14097_v27, %v6345_v37  ;;  %11203 = vrcp.f32 %v6408_v39 }
0x1715   : > { %10152 = vmatmul.msk.f32.vlgmr.msra.gmra.mxu0 %vm2344_vm0, %v6467_v36 }
0x1716   : > { %v6395_v21 = vmul.f32 1.442695, %v6367_v40 }
0x1718   : > { %11205 = vpow2.f32 %v6395_v21 }
0x171a   : > { %v11204_v41 = vpop.eup %11203 }
0x171b   : > { %v6348_v43 = vpop.xlane.xlu0 %6347  ;;  %v6354_v7 = vpop.xlane.xlu2 %6353  ;;  %v6468_v44 = vmul.f32 %v11204_v41, %v14099_v28  ;;  %v6389_v28 = vmul.f32 1.442695, %v6364_v25  ;;  %v6764_v41 = vld [vmem:[%s14990_s2 + $0x4] sm:$0xf] }
0x171c   : > { %v6368_v45 = vsub.f32 %v14105_v48, %v6348_v43  ;;  %v6370_v46 = vsub.f32 %v14107_v31, %v6354_v7  ;;  %v11002_v48 = vpack.i.bf16 %v13959_v47, %v13965_v50  ;;  %v6765_v43 = vld [vmem:[%s14990_s2 + $0x8] sm:$0xf] }
0x171d   : > { %10153 = vmatmul.msk.f32.gmra.mxu0 %vm2344_vm0, %v6468_v44 }
0x171e   : > { %v14168_v52 = vpop.eup %11205  ;;  %v6397_v27 = vmul.f32 1.442695, %v6368_v45  ;;  %v6401_v49 = vmul.f32 1.442695, %v6370_v46 }
0x171f   : > { %v6439_v56 = vsel %vm2344_vm0, %v14168_v52, 0.0 }
0x1720   : > { %11207 = vpow2.f32 %v6397_v27  ;;  %6440 = vadd.xlane.f32.xlu1 %v6439_v56 }
0x1721   : > { %11209 = vpow2.f32 %v6401_v49 }
0x1722   : > { %11211 = vpow2.f32 %v6389_v28 }
0x1724   : > { %11003 = vrot.lane.b32.xlu0 %v11002_v48, %s14989_s12 }
0x1725   : > { %v6411_v31 = vpop.xlane.xlu0 %6410 }
0x1726   : > { %v14177_v62 = vpop.eup %11207  ;;  %11213 = vrcp.f32 %v6411_v31 }
0x1727   : > { %v14179_v0 = vpop.eup %11209  ;;  %11215 = vpow2.f32 %v6393_v26  ;;  %v6442_v4 = vsel %vm2344_vm0, %v14177_v62, 0.0 }
0x1728   : > { %6443 = vadd.xlane.f32.xlu1 %v6442_v4  ;;  %v6448_v57 = vsel %vm2344_vm0, %v14179_v0, 0.0  ;;  %v14185_v47 = vpop.eup %11211 }
0x1729   : > { %6449 = vadd.xlane.f32.xlu2 %v6448_v57  ;;  %v6430_v9 = vsel %vm2344_vm0, %v14185_v47, 0.0 }
0x172c   : > { %v11214_v50 = vpop.eup %11213 }
0x172d   : > { %v14187_v1 = vpop.eup %11215  ;;  %v6469_v3 = vmul.f32 %v11214_v50, %v14114_v54  ;;  %v6423_v5 = vpop.xlane.xlu0 %6422 }
0x172e   : > { %v6417_v6 = vpop.xlane.xlu2 %6416  ;;  %11217 = vrcp.f32 %v6423_v5  ;;  %v6436_v10 = vsel %vm2344_vm0, %v14187_v1, 0.0  ;;  %v6768_v5 = vld [vmem:[%s14990_s2 + $0x14] sm:$0xf] }
0x172f   : > { %11219 = vrcp.f32 %v6417_v6  ;;  %10154 = vmatmul.msk.f32.vlgmr.msra.gmra.mxu1 %vm2344_vm0, %v6469_v3  ;;  %v6767_v3 = vld [vmem:[%s14990_s2 + $0x10] sm:$0xf]  ;;  %v6769_v6 = vld [vmem:[%s14990_s2 + $0x18] sm:$0xf] }
0x1730   : > { %6431 = vadd.xlane.f32.xlu1 %v6430_v9 }
0x1731   : > { %6437 = vadd.xlane.f32.xlu2 %v6436_v10 }
0x1734   : > { %v11218_v13 = vpop.eup %11217 }
0x1735   : > { %v11220_v14 = vpop.eup %11219  ;;  %v6473_v15 = vmul.f32 %v11218_v13, %v14118_v53  ;;  %v6414_v18 = vpop.xlane.xlu0 %6413 }
0x1736   : > { %v10999_v54 = vpop.permute.xlu2 %10998  ;;  %v6471_v59 = vmul.f32 %v11220_v14, %v14120_v55  ;;  %11221 = vrcp.f32 %v6414_v18 }
0x1737   : > { %v11000_v38 = vunpack.i.l.bf16 %v10999_v54  ;;  %10158 = vmatmul.msk.f32.vlgmr.msra.gmra.mxu3 %vm2344_vm0, %v6473_v15  ;;  %v11001_v19 = vunpack.i.h.bf16 %v10999_v54 }
0x1738   : > { %10156 = vmatmul.msk.f32.vlgmr.msrb.gmra.mxu2 %vm2344_vm0, %v6471_v59 }
0x1739   : > { %6649 = vmatpush.msrb.mxu0 %v11000_v38  ;;  %10174 = vmatpush.msk.msrb.mxu2 %vm2401_vm4, %v6765_v43 }
0x173b   : > { %6650 = vmatpush.msrb.mxu0 %v11001_v19 }
0x173c   : > { %v11222_v20 = vpop.eup %11221 }
0x173d   : > { %v6420_v23 = vpop.xlane.xlu0 %6419  ;;  %v6470_v24 = vmul.f32 %v11222_v20, %v14129_v42 }
0x173e   : > { %11223 = vrcp.f32 %v6420_v23 }
0x173f   : > { %10155 = vmatmul.msk.f32.gmra.mxu1 %vm2344_vm0, %v6470_v24 }
0x1744   : > { %v11224_v53 = vpop.eup %11223 }
0x1745   : > { %v6426_v61 = vpop.xlane.xlu0 %6425  ;;  %v6472_v55 = vmul.f32 %v11224_v53, %v14134_v12 }
0x1746   : > { %11225 = vrcp.f32 %v6426_v61 }
0x1747   : > { %10157 = vmatmul.msk.f32.gmra.mxu2 %vm2344_vm0, %v6472_v55 }
0x174c   : > { %v11226_v22 = vpop.eup %11225 }
0x174d   : > { %v6474_v29 = vmul.f32 %v11226_v22, %v14138_v16  ;;  %v6763_v16 = vld [vmem:[%s14990_s2] sm:$0xf] }
0x174e   : > { %10168 = vmatpush.msk.msra.mxu0 %vm2401_vm4, %v6763_v16 }
0x174f   : > { %10159 = vmatmul.msk.f32.gmra.mxu3 %vm2344_vm0, %v6474_v29 }
0x176e   : > { %v6435_v60 = vpop.xlane.xlu2 %6434 }
0x1776   : > { %v6447_v30 = vpop.xlane.xlu2 %6446 }
0x1777   : > { %11227 = vrcp.f32 %v6447_v30 }
0x177d   : > { %v11228_v42 = vpop.eup %11227 }
0x177e   : > { %v6481_v11 = vmul.f32 %v11228_v42, %v14151_v8 }
0x1780   : > { %10166 = vmatmul.msk.f32.vlgmr.msrb.gmra.mxu3 %vm2344_vm0, %v6481_v11 }
0x1783   : > { %v6429_v33 = vpop.xlane.xlu0 %6428 }
0x1784   : > { %11229 = vrcp.f32 %v6429_v33 }
0x1785   : > { %11231 = vrcp.f32 %v6435_v60 }
0x178a   : > { %v11230_v12 = vpop.eup %11229 }
0x178b   : > { %v6475_v35 = vmul.f32 %v11230_v12, %v14156_v34  ;;  %v11232_v8 = vpop.eup %11231  ;;  %v6766_v34 = vld [vmem:[%s14990_s2 + $0xc] sm:$0xf] }
0x178c   : > { %v6477_v21 = vmul.f32 %v11232_v8, %v14147_v58  ;;  %10177 = vmatpush.msk.msra.mxu3 %vm2401_vm4, %v6766_v34 }
0x178d   : > { %10160 = vmatmul.msk.f32.vlgmr.msrb.gmra.mxu0 %vm2344_vm0, %v6475_v35 }
0x178e   : > { %10180 = vmatpush.msk.msrb.mxu0 %vm2401_vm4, %v6767_v3 }
0x1792   : > { %v6512_v26 = vpop.f32.mrf.mxu0 }
0x1793   : > { %v6441_v2 = vpop.xlane.xlu1 %6440 }
0x1794   : > { %11233 = vrcp.f32 %v6441_v2 }
0x1796   : > { %v11004_v36 = vpop.permute.xlu0 %11003 }
0x1797   : > { %v11005_v37 = vunpack.i.l.bf16 %v11004_v36  ;;  %v11006_v39 = vunpack.i.h.bf16 %v11004_v36 }
0x1799   : > { %6684 = vmatpush.msrb.mxu1 %v11005_v37 }
0x179a   : > { %v11234_v40 = vpop.eup %11233  ;;  %v6515_v4 = vpop.f32.mrf.mxu0 }
0x179b   : > { %v6479_v7 = vmul.f32 %v11234_v40, %v14168_v52  ;;  %6685 = vmatpush.msrb.mxu1 %v11006_v39  ;;  %v6444_v44 = vpop.xlane.xlu1 %6443 }
0x179c   : > { %11235 = vrcp.f32 %v6444_v44  ;;  %v6450_v45 = vpop.xlane.xlu2 %6449  ;;  %10162 = vmatmul.msk.f32.vlgmr.msrb.gmra.mxu1 %vm2344_vm0, %v6477_v21 }
0x179d   : > { %11237 = vrcp.f32 %v6450_v45  ;;  %10164 = vmatmul.msk.f32.vlgmr.msra.gmra.mxu2 %vm2344_vm0, %v6479_v7  ;;  %10171 = vmatpush.msk.msra.mxu1 %vm2401_vm4, %v6764_v41 }
0x179e   : > { %10186 = vmatpush.msk.msra.mxu2 %vm2401_vm4, %v6769_v6 }
0x179f   : > { %10183 = vmatpush.msk.msrb.mxu1 %vm2401_vm4, %v6768_v5 }
0x17a2   : > { %v11236_v58 = vpop.eup %11235 }
0x17a3   : > { %v11238_v46 = vpop.eup %11237  ;;  %v6432_v25 = vpop.xlane.xlu1 %6431  ;;  %v6480_v52 = vmul.f32 %v11236_v58, %v14177_v62 }
0x17a4   : > { %11239 = vrcp.f32 %v6432_v25  ;;  %v6438_v27 = vpop.xlane.xlu2 %6437  ;;  %v6482_v49 = vmul.f32 %v11238_v46, %v14179_v0 }
0x17a5   : > { %11241 = vrcp.f32 %v6438_v27  ;;  %10165 = vmatmul.msk.f32.gmra.mxu2 %vm2344_vm0, %v6480_v52  ;;  %v11067_v27 = vld [vmem:[%s14991_s4] ss:$0 sm:$0xff]  ;;  %s14992_s4 = sld [smem:[#allocation94_spill]] }
0x17a6   : > { %10167 = vmatmul.msk.f32.gmra.mxu3 %vm2344_vm0, %v6482_v49 }
0x17aa   : > { %v11240_v17 = vpop.eup %11239 }
0x17ab   : > { %v11242_v56 = vpop.eup %11241  ;;  %v6476_v28 = vmul.f32 %v11240_v17, %v14185_v47 }
0x17ac   : > { %v6478_v48 = vmul.f32 %v11242_v56, %v14187_v1  ;;  %v6547_v31 = vpop.f32.mrf.mxu1  ;;  %v6770_v1 = vld [vmem:[%s14990_s2 + $0x1c] sm:$0xf]  ;;  %s15002_s2 = smov 104  }
0x17ad   : > { %10161 = vmatmul.msk.f32.gmra.mxu0 %vm2344_vm0, %v6476_v28  ;;  %10189 = vmatpush.msk.msrb.mxu3 %vm2401_vm4, %v6770_v1 }
0x17ae   : > { %10163 = vmatmul.msk.f32.gmra.mxu1 %vm2344_vm0, %v6478_v48 }
0x17b5   : > { %10169 = vmatmul.msk.f32.vlgmr.msra.gmra.mxu0 %vm2996_vm10, %v6512_v26 }
0x17b6   : > { %10172 = vmatmul.msk.f32.vlgmr.msra.gmra.mxu1 %vm2996_vm10, %v6547_v31 }
0x17ba   : > { %v6617_v62 = vpop.f32.mrf.mxu3 }
0x17bb   : > { %v6582_v0 = vpop.f32.mrf.mxu2  ;;  %10178 = vmatmul.msk.f32.vlgmr.msra.gmra.mxu3 %vm2996_vm10, %v6617_v62 }
0x17bc   : > { %10175 = vmatmul.msk.f32.vlgmr.msrb.gmra.mxu2 %vm2996_vm10, %v6582_v0  ;;  %v6550_v57 = vpop.f32.mrf.mxu1 }
0x17bd   : > { %10170 = vmatmul.msk.f32.gmra.mxu0 %vm2996_vm10, %v6515_v4 }
0x17be   : > { %10173 = vmatmul.msk.f32.gmra.mxu1 %vm2996_vm10, %v6550_v57 }
0x17ca   : > { %v6585_v47 = vpop.f32.mrf.mxu2 }
0x17cb   : > { %10176 = vmatmul.msk.f32.gmra.mxu2 %vm2996_vm10, %v6585_v47 }
0x17d2   : > { %v6620_v50 = vpop.f32.mrf.mxu3 }
0x17d3   : > { %10179 = vmatmul.msk.f32.gmra.mxu3 %vm2996_vm10, %v6620_v50 }
0x1803   : > { %v6757_v9 = vpop.f32.mrf.mxu3 }
0x1804   : > { %10190 = vmatmul.msk.f32.vlgmr.msrb.gmra.mxu3 %vm2996_vm10, %v6757_v9 }
0x180a   : > { %v6652_v10 = vpop.f32.mrf.mxu0 }
0x180b   : > { %10181 = vmatmul.msk.f32.vlgmr.msrb.gmra.mxu0 %vm2996_vm10, %v6652_v10 }
0x1819   : > { %v6687_v13 = vpop.f32.mrf.mxu1 }
0x181a   : > { %10184 = vmatmul.msk.f32.vlgmr.msrb.gmra.mxu1 %vm2996_vm10, %v6687_v13 }
0x1820   : > { %v6722_v14 = vpop.f32.mrf.mxu2 }
0x1821   : > { %10187 = vmatmul.msk.f32.vlgmr.msra.gmra.mxu2 %vm2996_vm10, %v6722_v14 }
0x1828   : > { %v6725_v15 = vpop.f32.mrf.mxu2 }
0x1829   : > { %v6760_v18 = vpop.f32.mrf.mxu3  ;;  %10188 = vmatmul.msk.f32.gmra.mxu2 %vm2996_vm10, %v6725_v15 }
0x182a   : > { %10191 = vmatmul.msk.f32.gmra.mxu3 %vm2996_vm10, %v6760_v18  ;;  %v6655_v54 = vpop.f32.mrf.mxu0 }
0x182b   : > { %v6690_v59 = vpop.f32.mrf.mxu1  ;;  %10182 = vmatmul.msk.f32.gmra.mxu0 %vm2996_vm10, %v6655_v54 }
0x182c   : > { %10185 = vmatmul.msk.f32.gmra.mxu1 %vm2996_vm10, %v6690_v59 }
0x1832   : > { %v6797_v38 = vpop.f32.mrf.mxu0 }
0x1833   : > { %v6829_v19 = vpop.f32.mrf.mxu1  ;;  %v7027_v61 = vsel %vm5825_vm9, %v6797_v38, 0.0 }
0x1834   : > { %v7028_v55 = vsel %vm5825_vm9, %v6829_v19, 0.0  ;;  %v10558_v19 = vld [vmem:[%s14992_s4 + $0x8] sm:$0xff] }
0x1835   : > { %v7029_v29 = vadd.f32 %v7028_v55, %v7027_v61  ;;  %7151 = vmatpush.bf16.msra.mxu0 %v10558_v19 }
0x183a   : > { %v6800_v23 = vpop.f32.mrf.mxu0 }
0x183b   : > { %v6832_v53 = vpop.f32.mrf.mxu1  ;;  %v7042_v2 = vsel %vm5825_vm9, %v6800_v23, 0.0 }
0x183c   : > { %v7043_v36 = vsel %vm5825_vm9, %v6832_v53, 0.0 }
0x183d   : > { %v7044_v40 = vadd.f32 %v7043_v36, %v7042_v2 }
0x183e   : > { %v6893_v24 = vpop.f32.mrf.mxu3 }
0x183f   : > { %v6861_v20 = vpop.f32.mrf.mxu2  ;;  %v7032_v12 = vsel %vm5825_vm9, %v6893_v24, 0.0  ;;  %v10557_v24 = vld [vmem:[%s14992_s4] sm:$0xff] }
0x1840   : > { %v7030_v22 = vsel %vm5825_vm9, %v6861_v20, 0.0  ;;  %7152 = vmatpush.bf16.msra.mxu0 %v10557_v24 }
0x1841   : > { %v7031_v30 = vadd.f32 %v7030_v22, %v7029_v29 }
0x1843   : > { %v7033_v16 = vadd.f32 %v7032_v12, %v7031_v30 }
0x184e   : > { %v6864_v60 = vpop.f32.mrf.mxu2 }
0x184f   : > { %v7045_v39 = vsel %vm5825_vm9, %v6864_v60, 0.0 }
0x1850   : > { %v7046_v44 = vadd.f32 %v7045_v39, %v7044_v40 }
0x1856   : > { %v6896_v42 = vpop.f32.mrf.mxu3 }
0x1857   : > { %v7047_v34 = vsel %vm5825_vm9, %v6896_v42, 0.0 }
0x1858   : > { %v7048_v46 = vadd.f32 %v7047_v34, %v7046_v44 }
0x1887   : > { %v7021_v21 = vpop.f32.mrf.mxu3 }
0x1888   : > { %v6925_v11 = vpop.f32.mrf.mxu0  ;;  %v7040_v58 = vsel %vm5825_vm9, %v7021_v21, 0.0  ;;  %v11069_v21 = vld [vmem:[#allocation11] ss:$0 sm:$0xff] }
0x1889   : > { %v7034_v35 = vsel %vm5825_vm9, %v6925_v11, 0.0 }
0x188a   : > { %v7035_v37 = vadd.f32 %v7034_v35, %v7033_v16 }
0x1897   : > { %v6957_v33 = vpop.f32.mrf.mxu1 }
0x1898   : > { %v7036_v8 = vsel %vm5825_vm9, %v6957_v33, 0.0 }
0x1899   : > { %v7037_v41 = vadd.f32 %v7036_v8, %v7035_v37  ;;  %v11068_v8 = vld [vmem:[#allocation12] ss:$0 sm:$0xff] }
0x18a4   : > { %v6989_v43 = vpop.f32.mrf.mxu2 }
0x18a5   : > { %v7038_v7 = vsel %vm5825_vm9, %v6989_v43, 0.0 }
0x18a6   : > { %v7039_v45 = vadd.f32 %v7038_v7, %v7037_v41 }
0x18a8   : > { %v7041_v25 = vadd.f32 %v7040_v58, %v7039_v45  ;;  %v6928_v52 = vpop.f32.mrf.mxu0  ;;  %v10566_v58 = vld [vmem:[%s14993_s16 + $0x38] sm:$0xff]  ;;  %s14996_s16 = sld [smem:[#allocation87_spill]] }
0x18a9   : > { %v7049_v49 = vsel %vm5825_vm9, %v6928_v52, 0.0  ;;  %v6960_v17 = vpop.f32.mrf.mxu1  ;;  %7246 = vmatpush.bf16.msra.mxu1 %v10566_v58  ;;  %v10563_v52 = vld [vmem:[%s14994_s8 + $0x20] sm:$0xff] }
0x18aa   : > { %v7057_v56 = vadd.f32 %v7041_v25, %v13898_v51  ;;  %v7050_v28 = vadd.f32 %v7049_v49, %v7048_v46  ;;  %v7051_v48 = vsel %vm5825_vm9, %v6960_v17, 0.0  ;;  %v10565_v46 = vld [vmem:[%s14994_s8 + $0x30] sm:$0xff]  ;;  %v10564_v25 = vld [vmem:[%s14994_s8 + $0x28] sm:$0xff] }
0x18ab   : > { %v10561_v49 = vld [vmem:[%s14994_s8 + $0x10] sm:$0xff]  ;;  %v10560_v17 = vld [vmem:[%s14994_s8 + $0x8] sm:$0xff] }
0x18ac   : > { %v7052_v26 = vadd.f32 %v7051_v48, %v7050_v28  ;;  %v6992_v31 = vpop.f32.mrf.mxu2  ;;  %v14269_v62 = vadd.f32 %v11067_v27, %v7057_v56  ;;  %v11070_v56 = vld [vmem:[%s14995_s0] ss:$0 sm:$0xff]  ;;  %s14997_s0 = sld [smem:[#allocation107_spill]] }
0x18ad   : > { %v7053_v0 = vsel %vm5825_vm9, %v6992_v31, 0.0  ;;  %v7024_v4 = vpop.f32.mrf.mxu3  ;;  %7247 = vmatpush.bf16.msra.mxu1 %v10565_v46  ;;  %v10559_v28 = vld [vmem:[%s14994_s8] sm:$0xff] }
0x18ae   : > { %v7054_v57 = vadd.f32 %v7053_v0, %v7052_v26  ;;  %v7067_v47 = vsel %vm5825_vm9, %v14269_v62, 0.0  ;;  %v7055_v50 = vsel %vm5825_vm9, %v7024_v4, 0.0 }
0x18af   : > { %7068 = vadd.xlane.f32.xlu0 %v7067_v47 }
0x18b0   : > { %v7056_v1 = vadd.f32 %v7055_v50, %v7054_v57 }
0x18b1   : > { %7248 = vmatpush.bf16.msra.mxu1 %v10564_v25 }
0x18b2   : > { %v7058_v51 = vadd.f32 %v7056_v1, %v13896_v63  ;;  %s14998_s6 = smov %s14997_s0 }
0x18b4   : > { %v14276_v3 = vadd.f32 %v11067_v27, %v7058_v51  ;;  %v10562_v27 = vld [vmem:[%s14994_s8 + $0x18] sm:$0xff] }
0x18b5   : > { %7249 = vmatpush.bf16.msra.mxu1 %v10563_v52 }
0x18b6   : > { %v7070_v5 = vsel %vm5825_vm9, %v14276_v3, 0.0 }
0x18b7   : > { %7071 = vadd.xlane.f32.xlu1 %v7070_v5 }
0x18b9   : > { %7250 = vmatpush.bf16.msra.mxu1 %v10562_v27 }
0x18bd   : > { %7251 = vmatpush.bf16.msra.mxu1 %v10561_v49 }
0x18c1   : > { %7252 = vmatpush.bf16.msra.mxu1 %v10560_v17 }
0x18c5   : > { %7253 = vmatpush.bf16.msra.mxu1 %v10559_v28  ;;  %v11072_v28 = vld [vmem:[#allocation21] ss:$0 sm:$0xff] }
0x1922   : > { %v7069_v6 = vpop.xlane.xlu0 %7068 }
0x1923   : > { %v7073_v9 = vmul.f32 %v7069_v6, %v13904_v32 }
0x1925   : > { %v7075_v10 = vsub.f32 %v14269_v62, %v7073_v9 }
0x1927   : > { %v7077_v13 = vmul.f32 %v7075_v10, %v7075_v10 }
0x1929   : > { %v7079_v14 = vsel %vm5825_vm9, %v7077_v13, 0.0 }
0x192a   : > { %7080 = vadd.xlane.f32.xlu1 %v7079_v14  ;;  %v7072_v15 = vpop.xlane.xlu1 %7071 }
0x192b   : > { %v7074_v63 = vmul.f32 %v7072_v15, %v13904_v32 }
0x192d   : > { %v7076_v18 = vsub.f32 %v14276_v3, %v7074_v63 }
0x192f   : > { %v7078_v54 = vmul.f32 %v7076_v18, %v7076_v18 }
0x1931   : > { %v7082_v59 = vsel %vm5825_vm9, %v7078_v54, 0.0 }
0x1932   : > { %7083 = vadd.xlane.f32.xlu1 %v7082_v59 }
0x199d   : > { %v7081_v38 = vpop.xlane.xlu1 %7080 }
0x199e   : > { %v7085_v20 = vmul.f32 %v7081_v38, %v13904_v32 }
0x19a0   : > { %v7087_v23 = vadd.f32 1e-06, %v7085_v20  ;;  %v11071_v20 = vld [vmem:[%s14996_s16] ss:$0 sm:$0xff]  ;;  %s14999_s16 = smov 116  }
0x19a2   : > { %11243 = vrsqrt.f32 %v7087_v23  ;;  %vm7095_vm11 = vweird.f32 %v7087_v23 }
0x19a5   : > { %v7084_v53 = vpop.xlane.xlu1 %7083 }
0x19a6   : > { %v7086_v61 = vmul.f32 %v7084_v53, %v13904_v32 }
0x19a8   : > { %v11244_v55 = vpop.eup %11243  ;;  %v7088_v22 = vadd.f32 1e-06, %v7086_v61 }
0x19a9   : > { %v7090_v29 = vmul.f32 %v11244_v55, %v7087_v23  ;;  %vm7096_vm8 = vweird.f32 %v11244_v55 }
0x19aa   : > { %11245 = vrsqrt.f32 %v7088_v22  ;;  %vm7097_vm12 = vmor %vm7095_vm11, %vm7096_vm8  ;;  %vm7105_vm14 = vweird.f32 %v7088_v22 }
0x19ab   : > { %v7091_v60 = vmul.f32 %v11244_v55, %v7090_v29 }
0x19ad   : > { %v7092_v30 = vmul.f32 0.5, %v7091_v60 }
0x19af   : > { %v7093_v42 = vsub.f32 1.5, %v7092_v30 }
0x19b0   : > { %v11246_v11 = vpop.eup %11245 }
0x19b1   : > { %v7094_v33 = vmul.f32 %v11244_v55, %v7093_v42  ;;  %v7100_v12 = vmul.f32 %v11246_v11, %v7088_v22  ;;  %vm7106_vm13 = vweird.f32 %v11246_v11 }
0x19b2   : > { %vm7107_vm15 = vmor %vm7105_vm14, %vm7106_vm13 }
0x19b3   : > { %v7101_v35 = vmul.f32 %v11246_v11, %v7100_v12  ;;  %v7098_v16 = vsel %vm7097_vm12, %v11244_v55, %v7094_v33 }
0x19b4   : > { %v7109_v37 = vmul.f32 %v7098_v16, %v7075_v10 }
0x19b5   : > { %v7102_v2 = vmul.f32 0.5, %v7101_v35 }
0x19b6   : > { %v7114_v41 = vmul.f32 %v11068_v8, %v7109_v37 }
0x19b7   : > { %v7103_v36 = vsub.f32 1.5, %v7102_v2 }
0x19b8   : > { %v7119_v7 = vadd.f32 %v11069_v21, %v7114_v41 }
0x19b9   : > { %v7104_v39 = vmul.f32 %v11246_v11, %v7103_v36 }
0x19bb   : > { %v7108_v40 = vsel %vm7107_vm15, %v11246_v11, %v7104_v39 }
0x19bc   : > { %v7110_v43 = vmul.f32 %v7108_v40, %v7076_v18  ;;  %v10567_v40 = vld [vmem:[%s14998_s6] sm:$0xff] }
0x19be   : > { %v7115_v34 = vmul.f32 %v11068_v8, %v7110_v43  ;;  %v10568_v8 = vld [vmem:[%s14997_s0 + $0x8] sm:$0xff]  ;;  %s15000_s0 = smov 124  }
0x19bf   : > { %7348 = vmatpush.bf16.msrb.mxu2 %v10568_v8 }
0x19c0   : > { %v7120_v44 = vadd.f32 %v11069_v21, %v7115_v34 }
0x19c2   : > { %v7121_v45 = vpack.c.bf16 %v7120_v44, %v7119_v7 }
0x19c3   : > { %7349 = vmatpush.bf16.msrb.mxu2 %v10567_v40 }
0x19c4   : > { %10200 = vmatmul.msk.bf16.vlgmr.msra.gmra.mxu0 %vm5825_vm9, %v7121_v45 }
0x1a41   : > { %v7154_v48 = vpop.f32.mrf.mxu0 }
0x1a42   : > { %v7155_v26 = vadd.f32 %v11070_v56, %v7154_v48 }
0x1a44   : > { %v7161_v31 = vmul.f32 0.044715, %v7155_v26  ;;  %v7159_v63 = vmul.f32 0.5, %v7155_v26 }
0x1a46   : > { %v7163_v0 = vmul.f32 %v7161_v31, %v7155_v26 }
0x1a48   : > { %v7165_v4 = vmul.f32 %v7163_v0, %v7155_v26  ;;  %v11073_v0 = vld [vmem:[#allocation20] ss:$0 sm:$0xff] }
0x1a49   : > { %v7156_v57 = vpop.f32.mrf.mxu0 }
0x1a4a   : > { %v7167_v47 = vadd.f32 %v7165_v4, %v7155_v26  ;;  %v7157_v50 = vadd.f32 %v11070_v56, %v7156_v57 }
0x1a4c   : > { %v7162_v1 = vmul.f32 0.044715, %v7157_v50  ;;  %v7169_v51 = vmul.f32 0.7978846, %v7167_v47  ;;  %v7160_v18 = vmul.f32 0.5, %v7157_v50 }
0x1a4e   : > { %v7164_v5 = vmul.f32 %v7162_v1, %v7157_v50  ;;  %11247 = vtanh.f32 %v7169_v51 }
0x1a50   : > { %v7166_v6 = vmul.f32 %v7164_v5, %v7157_v50  ;;  %v11074_v5 = vld [vmem:[#allocation18] ss:$0 sm:$0xff] }
0x1a52   : > { %v7168_v9 = vadd.f32 %v7166_v6, %v7157_v50 }
0x1a54   : > { %v7170_v10 = vmul.f32 0.7978846, %v7168_v9  ;;  %v11248_v13 = vpop.eup %11247 }
0x1a55   : > { %v7173_v14 = vadd.f32 1.0, %v11248_v13 }
0x1a56   : > { %11249 = vtanh.f32 %v7170_v10 }
0x1a57   : > { %v7175_v59 = vmul.f32 %v7173_v14, %v7159_v63 }
0x1a5c   : > { %v11250_v15 = vpop.eup %11249 }
0x1a5d   : > { %v7174_v54 = vadd.f32 1.0, %v11250_v15 }
0x1a5f   : > { %v7176_v38 = vmul.f32 %v7174_v54, %v7160_v18 }
0x1a61   : > { %v7177_v19 = vpack.c.bf16 %v7176_v38, %v7175_v59 }
0x1a63   : > { %7254 = vmatmul.bf16.vlgmr.msra.gmra.mxu1 %v7177_v19 }
0x1ae0   : > { %v7255_v23 = vpop.f32.mrf.mxu1 }
0x1ae1   : > { %v7256_v24 = vadd.f32 %v11071_v20, %v7255_v23 }
0x1ae3   : > { %v14302_v53 = vadd.f32 %v7256_v24, %v14269_v62 }
0x1ae5   : > { %v7264_v61 = vsel %vm5825_vm9, %v14302_v53, 0.0 }
0x1ae6   : > { %7265 = vadd.xlane.f32.xlu2 %v7264_v61 }
0x1ae8   : > { %v7257_v55 = vpop.f32.mrf.mxu1 }
0x1ae9   : > { %v7258_v22 = vadd.f32 %v11071_v20, %v7257_v55 }
0x1aeb   : > { %v14307_v29 = vadd.f32 %v7258_v22, %v14276_v3 }
0x1aed   : > { %v7267_v60 = vsel %vm5825_vm9, %v14307_v29, 0.0 }
0x1aee   : > { %7268 = vadd.xlane.f32.xlu0 %v7267_v60 }
0x1b59   : > { %v7266_v30 = vpop.xlane.xlu2 %7265 }
0x1b5a   : > { %v7270_v42 = vmul.f32 %v7266_v30, %v13904_v32 }
0x1b5c   : > { %v7272_v62 = vsub.f32 %v14302_v53, %v7270_v42 }
0x1b5e   : > { %v7274_v11 = vmul.f32 %v7272_v62, %v7272_v62 }
0x1b60   : > { %v7276_v33 = vsel %vm5825_vm9, %v7274_v11, 0.0 }
0x1b61   : > { %v7269_v12 = vpop.xlane.xlu0 %7268  ;;  %7277 = vadd.xlane.f32.xlu1 %v7276_v33 }
0x1b62   : > { %v7271_v35 = vmul.f32 %v7269_v12, %v13904_v32 }
0x1b64   : > { %v7273_v3 = vsub.f32 %v14307_v29, %v7271_v35 }
0x1b66   : > { %v7275_v16 = vmul.f32 %v7273_v3, %v7273_v3 }
0x1b68   : > { %v7279_v2 = vsel %vm5825_vm9, %v7275_v16, 0.0 }
0x1b69   : > { %7280 = vadd.xlane.f32.xlu2 %v7279_v2 }
0x1bd4   : > { %v7278_v36 = vpop.xlane.xlu1 %7277 }
0x1bd5   : > { %v7282_v37 = vmul.f32 %v7278_v36, %v13904_v32 }
0x1bd7   : > { %v7284_v39 = vadd.f32 1e-06, %v7282_v37 }
0x1bd9   : > { %11251 = vrsqrt.f32 %v7284_v39  ;;  %vm7292_vm2 = vweird.f32 %v7284_v39 }
0x1bdc   : > { %v7281_v21 = vpop.xlane.xlu2 %7280 }
0x1bdd   : > { %v7283_v41 = vmul.f32 %v7281_v21, %v13904_v32 }
0x1bdf   : > { %v11252_v43 = vpop.eup %11251  ;;  %v7285_v34 = vadd.f32 1e-06, %v7283_v41 }
0x1be0   : > { %v7287_v7 = vmul.f32 %v11252_v43, %v7284_v39  ;;  %vm7293_vm1 = vweird.f32 %v11252_v43 }
0x1be1   : > { %11253 = vrsqrt.f32 %v7285_v34  ;;  %vm7294_vm3 = vmor %vm7292_vm2, %vm7293_vm1  ;;  %vm7302_vm6 = vweird.f32 %v7285_v34 }
0x1be2   : > { %v7288_v44 = vmul.f32 %v11252_v43, %v7287_v7 }
0x1be4   : > { %v7289_v45 = vmul.f32 0.5, %v7288_v44 }
0x1be6   : > { %v7290_v58 = vsub.f32 1.5, %v7289_v45 }
0x1be7   : > { %v11254_v46 = vpop.eup %11253 }
0x1be8   : > { %v7291_v25 = vmul.f32 %v11252_v43, %v7290_v58  ;;  %v7297_v52 = vmul.f32 %v11254_v46, %v7285_v34  ;;  %vm7303_vm5 = vweird.f32 %v11254_v46 }
0x1be9   : > { %vm7304_vm7 = vmor %vm7302_vm6, %vm7303_vm5 }
0x1bea   : > { %v7298_v27 = vmul.f32 %v11254_v46, %v7297_v52  ;;  %v7295_v49 = vsel %vm7294_vm3, %v11252_v43, %v7291_v25 }
0x1beb   : > { %v7306_v48 = vmul.f32 %v7295_v49, %v7272_v62 }
0x1bec   : > { %v7299_v17 = vmul.f32 0.5, %v7298_v27 }
0x1bed   : > { %v7311_v4 = vmul.f32 %v11072_v28, %v7306_v48 }
0x1bee   : > { %v7300_v56 = vsub.f32 1.5, %v7299_v17 }
0x1bef   : > { %v7316_v50 = vadd.f32 %v11073_v0, %v7311_v4 }
0x1bf0   : > { %v7301_v26 = vmul.f32 %v11254_v46, %v7300_v56 }
0x1bf2   : > { %v7305_v31 = vsel %vm7304_vm7, %v11254_v46, %v7301_v26 }
0x1bf3   : > { %v7307_v57 = vmul.f32 %v7305_v31, %v7273_v3 }
0x1bf5   : > { %v7312_v47 = vmul.f32 %v11072_v28, %v7307_v57 }
0x1bf7   : > { %v7317_v1 = vadd.f32 %v11073_v0, %v7312_v47 }
0x1bf9   : > { %v7318_v51 = vpack.c.bf16 %v7317_v1, %v7316_v50 }
0x1bfb   : > { %10241 = vmatmul.msk.bf16.vlgmr.msrb.gmra.mxu2 %vm5825_vm9, %v7318_v51 }
0x1c7e   : > { %v7351_v6 = vpop.f32.mrf.mxu2 }
0x1c7f   : > { %v14322_v9 = vadd.f32 %v11074_v5, %v7351_v6 }
0x1c81   : > { %7364 = vrot.lane.b32.xlu2 %v14322_v9, %s12634_s11  ;;  %v7400_v12 = vmul.f32 0.5, %v14322_v9 }
0x1c86   : > { %v7353_v10 = vpop.f32.mrf.mxu2 }
0x1c87   : > { %v14326_v13 = vadd.f32 %v11074_v5, %v7353_v10 }
0x1c89   : > { %7372 = vrot.lane.b32.xlu1 %v14326_v13, %s14999_s16  ;;  %7366 = vrot.lane.b32.xlu0 %v14326_v13, %s12634_s11  ;;  %v11017_v14 = vpack.i.bf16 %v14322_v9, %v14326_v13  ;;  %s15003_s11 = smov 108   ;;  %v7401_v16 = vmul.f32 0.5, %v14326_v13 }
0x1c8a   : > { %7358 = vrot.lane.b32.xlu2 %v14322_v9, %s15000_s0 }
0x1c91   : > { %7360 = vrot.lane.b32.xlu1 %v14326_v13, %s15000_s0  ;;  %7370 = vrot.lane.b32.xlu0 %v14322_v9, %s14999_s16  ;;  %s2320_s16 = sand.u32 1, %s12507_s5  }
0x1c92   : > { %7394 = vrot.lane.b32.xlu2 %v14322_v9, %s15001_s1  ;;  %s9286_s0 = sshll.u32 %s2320_s16, 4  ;;  %s8708_s4 = scalar_lea.sflag [#allocation8], %s2320_s16 }
0x1c99   : > { %7396 = vrot.lane.b32.xlu1 %v14326_v13, %s15001_s1  ;;  %7390 = vrot.lane.b32.xlu0 %v14326_v13, %s15002_s2  ;;  %s15004_s1 = sld [smem:[#allocation106_spill]] }
0x1c9a   : > { %7378 = vrot.lane.b32.xlu2 %v14326_v13, %s14988_s23 }
0x1ca1   : > { %7418 = vrot.lane.b32.xlu1 %v14326_v13, %s14987_s29  ;;  %7388 = vrot.lane.b32.xlu0 %v14322_v9, %s15002_s2  ;;  %s15008_s2 = sld [smem:[#allocation135_spill]] }
0x1ca2   : > { %7382 = vrot.lane.b32.xlu2 %v14322_v9, %s15003_s11 }
0x1ca9   : > { %7384 = vrot.lane.b32.xlu1 %v14326_v13, %s15003_s11  ;;  %7416 = vrot.lane.b32.xlu0 %v14322_v9, %s14987_s29  ;;  %s10581_s11 = sshll.u32 %s12980_s15, 4 }
0x1cb1   : > { %7376 = vrot.lane.b32.xlu0 %v14322_v9, %s14988_s23 }
0x1cdb   : > { %v7365_v15 = vpop.permute.xlu2 %7364 }
0x1cdc   : > { %7490 = vrot.lane.b32.xlu2 %v7365_v15, %s14987_s29  ;;  %v7404_v40 = vmul.f32 0.5, %v7365_v15 }
0x1ce4   : > { %v14366_v54 = vpop.permute.xlu2 %7358 }
0x1ce5   : > { %v7402_v52 = vmul.f32 0.5, %v14366_v54 }
0x1cec   : > { %v14380_v23 = vpop.permute.xlu2 %7394 }
0x1ced   : > { %v7414_v28 = vmul.f32 0.5, %v14380_v23 }
0x1cf4   : > { %v14394_v22 = vpop.permute.xlu2 %7378 }
0x1cf5   : > { %v7409_v1 = vmul.f32 0.5, %v14394_v22 }
0x1cfb   : > { %v14361_v63 = vpop.permute.xlu1 %7372  ;;  %v7367_v18 = vpop.permute.xlu0 %7366 }
0x1cfc   : > { %7492 = vrot.lane.b32.xlu1 %v7367_v18, %s14987_s29  ;;  %7529 = vrot.lane.b32.xlu0 %v14361_v63, %s14987_s29  ;;  %v14409_v33 = vpop.permute.xlu2 %7382  ;;  %v11007_v35 = vpack.i.bf16 %v7365_v15, %v7367_v18  ;;  %v7405_v7 = vmul.f32 0.5, %v7367_v18  ;;  %v7407_v46 = vmul.f32 0.5, %v14361_v63 }
0x1cfd   : > { %v7410_v0 = vmul.f32 0.5, %v14409_v33 }
0x1d03   : > { %v14368_v59 = vpop.permute.xlu1 %7360  ;;  %v14370_v38 = vpop.permute.xlu0 %7370 }
0x1d04   : > { %v11022_v19 = vpack.i.bf16 %v14366_v54, %v14368_v59  ;;  %v11012_v20 = vpack.i.bf16 %v14370_v38, %v14361_v63  ;;  %7455 = vrot.lane.b32.xlu0 %v14368_v59, %s14987_s29  ;;  %7527 = vrot.lane.b32.xlu1 %v14370_v38, %s14987_s29  ;;  %v7406_v34 = vmul.f32 0.5, %v14370_v38  ;;  %v7403_v48 = vmul.f32 0.5, %v14368_v59 }
0x1d0b   : > { %v14382_v24 = vpop.permute.xlu1 %7396  ;;  %v14384_v61 = vpop.permute.xlu0 %7390 }
0x1d0c   : > { %v11032_v55 = vpack.i.bf16 %v14380_v23, %v14382_v24  ;;  %7677 = vrot.lane.b32.xlu0 %v14382_v24, %s14987_s29  ;;  %7640 = vrot.lane.b32.xlu2 %v14384_v61, %s14987_s29  ;;  %v7413_v26 = vmul.f32 0.5, %v14384_v61  ;;  %v7415_v4 = vmul.f32 0.5, %v14382_v24 }
0x1d0d   : > { %7453 = vrot.lane.b32.xlu1 %v14366_v54, %s14987_s29 }
0x1d13   : > { %v7419_v60 = vpop.permute.xlu1 %7418  ;;  %v14396_v30 = vpop.permute.xlu0 %7388 }
0x1d14   : > { %v11027_v42 = vpack.i.bf16 %v14396_v30, %v14384_v61  ;;  %10242 = vmatpush.xpose.msk.msra.mxu3 %vm2996_vm10, %v7419_v60  ;;  %7638 = vrot.lane.b32.xlu2 %v14396_v30, %s14987_s29  ;;  %v7412_v49 = vmul.f32 0.5, %v14396_v30 }
0x1d15   : > { %7675 = vrot.lane.b32.xlu1 %v14380_v23, %s14987_s29  ;;  %7566 = vrot.lane.b32.xlu0 %v14394_v22, %s14987_s29 }
0x1d1b   : > { %v14407_v62 = vpop.permute.xlu1 %7384  ;;  %v7417_v11 = vpop.permute.xlu0 %7416 }
0x1d1c   : > { %10243 = vmatpush.xpose.msk.msra.mxu3 %vm2996_vm10, %v7417_v11  ;;  %7603 = vrot.lane.b32.xlu2 %v14407_v62, %s14987_s29  ;;  %v7411_v50 = vmul.f32 0.5, %v14407_v62 }
0x1d1d   : > { %7601 = vrot.lane.b32.xlu0 %v14409_v33, %s14987_s29 }
0x1d1f   : > { %10244 = vmatmul.msk.f32.vlgmr.msra.gmra.mxu3 %vm2996_vm10, %v7400_v12 }
0x1d23   : > { %v14418_v3 = vpop.permute.xlu0 %7376 }
0x1d24   : > { %11008 = vrot.lane.b32.xlu2 %v11007_v35, %s14989_s12  ;;  %7564 = vrot.lane.b32.xlu1 %v14418_v3, %s14987_s29  ;;  %v7408_v47 = vmul.f32 0.5, %v14418_v3  ;;  %s15005_s29 = sld [smem:[#allocation104_spill]] }
0x1d27   : > { %10245 = vmatmul.msk.f32.gmra.mxu3 %vm2996_vm10, %v7401_v16 }
0x1d2a   : > { %s15006_s23 = smov %s15005_s29 }
0x1d36   : > { %v7491_v2 = vpop.permute.xlu2 %7490 }
0x1d66   : > { %v7641_v36 = vpop.permute.xlu2 %7640 }
0x1d6e   : > { %v7493_v8 = vpop.permute.xlu1 %7492  ;;  %v7530_v37 = vpop.permute.xlu0 %7529 }
0x1d6f   : > { %v7639_v39 = vpop.permute.xlu2 %7638  ;;  %10250 = vmatpush.xpose.msk.msra.mxu2 %vm2996_vm10, %v7493_v8  ;;  %10254 = vmatpush.xpose.msk.msrb.mxu3 %vm2996_vm10, %v7530_v37 }
0x1d73   : > { %10251 = vmatpush.xpose.msk.msra.mxu2 %vm2996_vm10, %v7491_v2 }
0x1d76   : > { %v7528_v21 = vpop.permute.xlu1 %7527  ;;  %v7456_v41 = vpop.permute.xlu0 %7455  ;;  %10252 = vmatmul.msk.f32.vlgmr.msra.gmra.mxu2 %vm2996_vm10, %v7404_v40 }
0x1d77   : > { %10266 = vmatpush.xpose.msk.msrb.mxu2 %vm2996_vm10, %v7641_v36  ;;  %v7604_v43 = vpop.permute.xlu2 %7603  ;;  %10246 = vmatpush.xpose.msk.msrb.mxu0 %vm2996_vm10, %v7456_v41 }
0x1d78   : > { %10255 = vmatpush.xpose.msk.msrb.mxu3 %vm2996_vm10, %v7528_v21  ;;  %10262 = vmatpush.xpose.msk.msrb.mxu1 %vm2996_vm10, %v7604_v43 }
0x1d7b   : > { %10267 = vmatpush.xpose.msk.msrb.mxu2 %vm2996_vm10, %v7639_v39  ;;  %10256 = vmatmul.msk.f32.vlgmr.msrb.gmra.mxu3 %vm2996_vm10, %v7406_v34 }
0x1d7e   : > { %v7678_v44 = vpop.permute.xlu0 %7677  ;;  %10253 = vmatmul.msk.f32.gmra.mxu2 %vm2996_vm10, %v7405_v7 }
0x1d7f   : > { %v7454_v45 = vpop.permute.xlu1 %7453  ;;  %v11009_v58 = vpop.permute.xlu2 %11008  ;;  %10270 = vmatpush.xpose.msk.msra.mxu3 %vm2996_vm10, %v7678_v44 }
0x1d80   : > { %v11010_v25 = vunpack.i.l.bf16 %v11009_v58  ;;  %10247 = vmatpush.xpose.msk.msrb.mxu0 %vm2996_vm10, %v7454_v45  ;;  %v11011_v27 = vunpack.i.h.bf16 %v11009_v58 }
0x1d82   : > { %7984 = vmatpush.msra.mxu2 %v11010_v25 }
0x1d83   : > { %10257 = vmatmul.msk.f32.gmra.mxu3 %vm2996_vm10, %v7407_v46  ;;  %10248 = vmatmul.msk.f32.vlgmr.msrb.gmra.mxu0 %vm2996_vm10, %v7402_v52 }
0x1d84   : > { %7985 = vmatpush.msra.mxu2 %v11011_v27 }
0x1d86   : > { %10268 = vmatmul.msk.f32.vlgmr.msrb.gmra.mxu2 %vm2996_vm10, %v7412_v49 }
0x1d87   : > { %v7676_v17 = vpop.permute.xlu1 %7675  ;;  %v7567_v56 = vpop.permute.xlu0 %7566 }
0x1d88   : > { %10258 = vmatpush.xpose.msk.msra.mxu0 %vm2996_vm10, %v7567_v56  ;;  %10271 = vmatpush.xpose.msk.msra.mxu3 %vm2996_vm10, %v7676_v17 }
0x1d8b   : > { %10249 = vmatmul.msk.f32.gmra.mxu0 %vm2996_vm10, %v7403_v48  ;;  %10272 = vmatmul.msk.f32.vlgmr.msra.gmra.mxu3 %vm2996_vm10, %v7414_v28 }
0x1d8e   : > { %10269 = vmatmul.msk.f32.gmra.mxu2 %vm2996_vm10, %v7413_v26 }
0x1d8f   : > { %v7602_v31 = vpop.permute.xlu0 %7601 }
0x1d90   : > { %10263 = vmatpush.xpose.msk.msrb.mxu1 %vm2996_vm10, %v7602_v31 }
0x1d93   : > { %10264 = vmatmul.msk.f32.vlgmr.msrb.gmra.mxu1 %vm2996_vm10, %v7410_v0  ;;  %10273 = vmatmul.msk.f32.gmra.mxu3 %vm2996_vm10, %v7415_v4 }
0x1d96   : > { %v7565_v57 = vpop.permute.xlu1 %7564 }
0x1d97   : > { %10259 = vmatpush.xpose.msk.msra.mxu0 %vm2996_vm10, %v7565_v57 }
0x1d9a   : > { %10260 = vmatmul.msk.f32.vlgmr.msra.gmra.mxu0 %vm2996_vm10, %v7408_v47 }
0x1d9b   : > { %10265 = vmatmul.msk.f32.gmra.mxu1 %vm2996_vm10, %v7411_v50 }
0x1da2   : > { %v7447_v51 = vpop.f32.mrf.mxu3  ;;  %10261 = vmatmul.msk.f32.gmra.mxu0 %vm2996_vm10, %v7409_v1 }
0x1da3   : > { %v7712_v5 = vsel %vm2344_vm0, %v7447_v51, -inf }
0x1da4   : > { %7713 = vmax.xlane.f32.xlu0 %v7712_v5 }
0x1daa   : > { %v7450_v6 = vpop.f32.mrf.mxu3 }
0x1dab   : > { %v7715_v10 = vsel %vm2344_vm0, %v7450_v6, -inf }
0x1dac   : > { %7716 = vmax.xlane.f32.xlu2 %v7715_v10 }
0x1df9   : > { %v14473_v11 = vpop.f32.mrf.mxu2 }
0x1dfa   : > { %v7724_v34 = vsel %vm2344_vm0, %v14473_v11, -inf }
0x1dfe   : > { %v14471_v60 = vpop.f32.mrf.mxu3 }
0x1dff   : > { %v7730_v16 = vsel %vm2344_vm0, %v14471_v60, -inf }
0x1e00   : > { %v14467_v15 = vpop.f32.mrf.mxu0 }
0x1e01   : > { %v7718_v18 = vsel %vm2344_vm0, %v14467_v15, -inf  ;;  %v14485_v8 = vpop.f32.mrf.mxu2 }
0x1e02   : > { %7719 = vmax.xlane.f32.xlu1 %v7718_v18  ;;  %v7727_v31 = vsel %vm2344_vm0, %v14485_v8, -inf }
0x1e06   : > { %v14481_v2 = vpop.f32.mrf.mxu3 }
0x1e07   : > { %v7733_v39 = vsel %vm2344_vm0, %v14481_v2, -inf }
0x1e08   : > { %v14475_v12 = vpop.f32.mrf.mxu0 }
0x1e09   : > { %v7721_v35 = vsel %vm2344_vm0, %v14475_v12, -inf  ;;  %v14497_v44 = vpop.f32.mrf.mxu2 }
0x1e0a   : > { %7722 = vmax.xlane.f32.xlu0 %v7721_v35  ;;  %7731 = vmax.xlane.f32.xlu1 %v7730_v16  ;;  %v7748_v0 = vsel %vm2344_vm0, %v14497_v44, -inf }
0x1e0e   : > { %v14513_v48 = vpop.f32.mrf.mxu3 }
0x1e0f   : > { %v7754_v50 = vsel %vm2344_vm0, %v14513_v48, -inf }
0x1e10   : > { %v14483_v36 = vpop.f32.mrf.mxu1 }
0x1e11   : > { %v7742_v37 = vsel %vm2344_vm0, %v14483_v36, -inf  ;;  %v14511_v28 = vpop.f32.mrf.mxu2 }
0x1e12   : > { %7743 = vmax.xlane.f32.xlu2 %v7742_v37  ;;  %7734 = vmax.xlane.f32.xlu0 %v7733_v39  ;;  %v7751_v26 = vsel %vm2344_vm0, %v14511_v28, -inf }
0x1e16   : > { %v14523_v57 = vpop.f32.mrf.mxu3 }
0x1e17   : > { %v14491_v40 = vpop.f32.mrf.mxu0  ;;  %v7714_v21 = vpop.xlane.xlu0 %7713  ;;  %v7757_v1 = vsel %vm2344_vm0, %v14523_v57, -inf }
0x1e18   : > { %v7760_v41 = vsub.f32 %v7447_v51, %v7714_v21  ;;  %v7736_v43 = vsel %vm2344_vm0, %v14491_v40, -inf  ;;  %v14499_v45 = vpop.f32.mrf.mxu1 }
0x1e19   : > { %7737 = vmax.xlane.f32.xlu1 %v7736_v43  ;;  %v7745_v27 = vsel %vm2344_vm0, %v14499_v45, -inf }
0x1e1a   : > { %v7776_v7 = vmul.f32 1.442695, %v7760_v41  ;;  %7725 = vmax.xlane.f32.xlu2 %v7724_v34 }
0x1e1c   : > { %11255 = vpow2.f32 %v7776_v7 }
0x1e1f   : > { %v14501_v58 = vpop.f32.mrf.mxu0  ;;  %v7717_v46 = vpop.xlane.xlu2 %7716 }
0x1e20   : > { %v7761_v25 = vsub.f32 %v7450_v6, %v7717_v46  ;;  %v7739_v52 = vsel %vm2344_vm0, %v14501_v58, -inf }
0x1e21   : > { %7740 = vmax.xlane.f32.xlu0 %v7739_v52 }
0x1e22   : > { %v14507_v49 = vpop.eup %11255  ;;  %7746 = vmax.xlane.f32.xlu2 %v7745_v27  ;;  %v7778_v17 = vmul.f32 1.442695, %v7761_v25 }
0x1e23   : > { %v7808_v56 = vsel %vm2344_vm0, %v14507_v49, 0.0 }
0x1e24   : > { %7809 = vadd.xlane.f32.xlu1 %v7808_v56  ;;  %11257 = vpow2.f32 %v7778_v17 }
0x1e29   : > { %7752 = vmax.xlane.f32.xlu0 %v7751_v26 }
0x1e2a   : > { %7728 = vmax.xlane.f32.xlu2 %v7727_v31  ;;  %v14521_v4 = vpop.eup %11257 }
0x1e2b   : > { %v7811_v47 = vsel %vm2344_vm0, %v14521_v4, 0.0 }
0x1e2c   : > { %7749 = vmax.xlane.f32.xlu1 %v7748_v0 }
0x1e31   : > { %7812 = vadd.xlane.f32.xlu0 %v7811_v47 }
0x1e32   : > { %7755 = vmax.xlane.f32.xlu2 %v7754_v50 }
0x1e34   : > { %7758 = vmax.xlane.f32.xlu1 %v7757_v1 }
0x1e45   : > { %11023 = vrot.lane.b32.xlu0 %v11022_v19, %s14989_s12 }
0x1e4a   : > { %11018 = vrot.lane.b32.xlu2 %v11017_v14, %s14989_s12 }
0x1e4d   : > { %11013 = vrot.lane.b32.xlu1 %v11012_v20, %s14989_s12 }
0x1e52   : > { %11028 = vrot.lane.b32.xlu2 %v11027_v42, %s14989_s12 }
0x1e5a   : > { %11033 = vrot.lane.b32.xlu2 %v11032_v55, %s14989_s12 }
0x1e75   : > { %v7720_v54 = vpop.xlane.xlu1 %7719 }
0x1e76   : > { %v7762_v59 = vsub.f32 %v14467_v15, %v7720_v54 }
0x1e78   : > { %v7780_v9 = vmul.f32 1.442695, %v7762_v59 }
0x1e7a   : > { %11259 = vpow2.f32 %v7780_v9 }
0x1e7d   : > { %v7732_v13 = vpop.xlane.xlu1 %7731  ;;  %v7723_v20 = vpop.xlane.xlu0 %7722 }
0x1e7e   : > { %v7766_v14 = vsub.f32 %v14471_v60, %v7732_v13  ;;  %v7763_v15 = vsub.f32 %v14475_v12, %v7723_v20 }
0x1e80   : > { %v14553_v63 = vpop.eup %11259  ;;  %v7788_v38 = vmul.f32 1.442695, %v7766_v14  ;;  %v7782_v35 = vmul.f32 1.442695, %v7763_v15 }
0x1e81   : > { %v7814_v19 = vsel %vm2344_vm0, %v14553_v63, 0.0 }
0x1e82   : > { %7815 = vadd.xlane.f32.xlu0 %v7814_v19  ;;  %11261 = vpow2.f32 %v7788_v38 }
0x1e85   : > { %v7744_v61 = vpop.xlane.xlu2 %7743  ;;  %v7735_v42 = vpop.xlane.xlu0 %7734 }
0x1e86   : > { %v7770_v23 = vsub.f32 %v14483_v36, %v7744_v61  ;;  %v7767_v46 = vsub.f32 %v14481_v2, %v7735_v42 }
0x1e88   : > { %v7796_v24 = vmul.f32 1.442695, %v7770_v23  ;;  %v14558_v55 = vpop.eup %11261  ;;  %v7790_v26 = vmul.f32 1.442695, %v7767_v46 }
0x1e89   : > { %v7826_v30 = vsel %vm2344_vm0, %v14558_v55, 0.0 }
0x1e8a   : > { %11263 = vpow2.f32 %v7796_v24  ;;  %7827 = vadd.xlane.f32.xlu0 %v7826_v30 }
0x1e8c   : > { %v7738_v6 = vpop.xlane.xlu1 %7737 }
0x1e8d   : > { %v7726_v51 = vpop.xlane.xlu2 %7725 }
0x1e8e   : > { %v7764_v5 = vsub.f32 %v14473_v11, %v7726_v51  ;;  %v7768_v11 = vsub.f32 %v14491_v40, %v7738_v6 }
0x1e90   : > { %v14563_v10 = vpop.eup %11263  ;;  %v7784_v18 = vmul.f32 1.442695, %v7764_v5  ;;  %v7792_v12 = vmul.f32 1.442695, %v7768_v11 }
0x1e91   : > { %v7838_v60 = vsel %vm2344_vm0, %v14563_v10, 0.0 }
0x1e92   : > { %11265 = vpow2.f32 %v7784_v18  ;;  %7839 = vadd.xlane.f32.xlu1 %v7838_v60 }
0x1e93   : > { %11267 = vpow2.f32 %v7782_v35 }
0x1e94   : > { %v7741_v16 = vpop.xlane.xlu0 %7740  ;;  %11269 = vpow2.f32 %v7792_v12 }
0x1e95   : > { %v14568_v36 = vpop.xlane.xlu2 %7746 }
0x1e97   : > { %v7810_v37 = vpop.xlane.xlu1 %7809 }
0x1e98   : > { %v14570_v39 = vpop.eup %11265 }
0x1e99   : > { %v7820_v21 = vsel %vm2344_vm0, %v14570_v39, 0.0  ;;  %v14575_v43 = vpop.eup %11267 }
0x1e9a   : > { %7821 = vadd.xlane.f32.xlu1 %v7820_v21  ;;  %v7817_v17 = vsel %vm2344_vm0, %v14575_v43, 0.0  ;;  %v14583_v0 = vpop.eup %11269 }
0x1e9b   : > { %v7832_v50 = vsel %vm2344_vm0, %v14583_v0, 0.0 }
0x1e9c   : > { %v7753_v7 = vpop.xlane.xlu0 %7752 }
0x1e9d   : > { %v7729_v41 = vpop.xlane.xlu2 %7728  ;;  %v7773_v40 = vsub.f32 %v14511_v28, %v7753_v7  ;;  %v7769_v28 = vsub.f32 %v14501_v58, %v7741_v16 }
0x1e9e   : > { %v7765_v34 = vsub.f32 %v14485_v8, %v7729_v41 }
0x1e9f   : > { %v7750_v25 = vpop.xlane.xlu1 %7749  ;;  %v7802_v31 = vmul.f32 1.442695, %v7773_v40  ;;  %v7794_v58 = vmul.f32 1.442695, %v7769_v28  ;;  %v11042_v40 = vpack.i.bf16 %v14409_v33, %v14407_v62 }
0x1ea0   : > { %v7786_v52 = vmul.f32 1.442695, %v7765_v34  ;;  %v7772_v27 = vsub.f32 %v14497_v44, %v7750_v25 }
0x1ea2   : > { %11271 = vpow2.f32 %v7786_v52  ;;  %v7800_v56 = vmul.f32 1.442695, %v7772_v27  ;;  %7818 = vadd.xlane.f32.xlu1 %v7817_v17  ;;  %v7771_v17 = vsub.f32 %v14499_v45, %v14568_v36 }
0x1ea4   : > { %11273 = vpow2.f32 %v7800_v56  ;;  %v7813_v59 = vpop.xlane.xlu0 %7812  ;;  %v7798_v56 = vmul.f32 1.442695, %v7771_v17  ;;  %v8174_v17 = vld [vmem:[%s15004_s1 + $0x18] sm:$0xf] }
0x1ea5   : > { %v7756_v8 = vpop.xlane.xlu2 %7755  ;;  %11275 = vpow2.f32 %v7790_v26 }
0x1ea6   : > { %11277 = vrcp.f32 %v7810_v37  ;;  %v7774_v44 = vsub.f32 %v14513_v48, %v7756_v8 }
0x1ea7   : > { %11279 = vpow2.f32 %v7802_v31  ;;  %v7759_v13 = vpop.xlane.xlu1 %7758 }
0x1ea8   : > { %v14585_v2 = vpop.eup %11271  ;;  %v7804_v9 = vmul.f32 1.442695, %v7774_v44  ;;  %11281 = vrcp.f32 %v7813_v59  ;;  %v7775_v61 = vsub.f32 %v14523_v57, %v7759_v13 }
0x1ea9   : > { %v7823_v47 = vsel %vm2344_vm0, %v14585_v2, 0.0 }
0x1eaa   : > { %v14593_v1 = vpop.eup %11273  ;;  %7824 = vadd.xlane.f32.xlu0 %v7823_v47  ;;  %7833 = vadd.xlane.f32.xlu1 %v7832_v50  ;;  %11283 = vpow2.f32 %v7804_v9  ;;  %v7806_v51 = vmul.f32 1.442695, %v7775_v61 }
0x1eab   : > { %v7844_v54 = vsel %vm2344_vm0, %v14593_v1, 0.0  ;;  %v14597_v48 = vpop.eup %11275  ;;  %11285 = vpow2.f32 %v7794_v58 }
0x1eac   : > { %7845 = vadd.xlane.f32.xlu2 %v7844_v54  ;;  %v11278_v38 = vpop.eup %11277  ;;  %v7829_v30 = vsel %vm2344_vm0, %v14597_v48, 0.0  ;;  %11287 = vpow2.f32 %v7806_v51 }
0x1ead   : > { %v11019_v14 = vpop.permute.xlu2 %11018  ;;  %v14599_v20 = vpop.eup %11279  ;;  %v7872_v24 = vmul.f32 %v11278_v38, %v14507_v49  ;;  %11289 = vpow2.f32 %v7798_v56 }
0x1eae   : > { %v11020_v19 = vunpack.i.l.bf16 %v11019_v14  ;;  %v11021_v23 = vunpack.i.h.bf16 %v11019_v14  ;;  %v7847_v42 = vsel %vm2344_vm0, %v14599_v20, 0.0  ;;  %v11282_v5 = vpop.eup %11281 }
0x1eaf   : > { %v7873_v37 = vmul.f32 %v11282_v5, %v14521_v4  ;;  %v11037_v4 = vpack.i.bf16 %v14418_v3, %v14394_v22 }
0x1eb0   : > { %7914 = vmatpush.msrb.mxu0 %v11020_v19  ;;  %v14608_v57 = vpop.eup %11283 }
0x1eb1   : > { %v14610_v18 = vpop.eup %11285  ;;  %v7850_v16 = vsel %vm2344_vm0, %v14608_v57, 0.0 }
0x1eb2   : > { %7830 = vadd.xlane.f32.xlu0 %v7829_v30  ;;  %7915 = vmatpush.msrb.mxu0 %v11021_v23  ;;  %v7835_v11 = vsel %vm2344_vm0, %v14610_v18, 0.0  ;;  %v14618_v12 = vpop.eup %11287  ;;  %v8168_v30 = vld [vmem:[%s15004_s1] sm:$0xf] }
0x1eb3   : > { %7848 = vadd.xlane.f32.xlu1 %v7847_v42  ;;  %10274 = vmatmul.msk.f32.vlgmr.msrb.gmra.mxu0 %vm2344_vm0, %v7872_v24  ;;  %v7853_v46 = vsel %vm2344_vm0, %v14618_v12, 0.0  ;;  %v14630_v22 = vpop.eup %11289 }
0x1eb4   : > { %v7841_v3 = vsel %vm2344_vm0, %v14630_v22, 0.0 }
0x1eb5   : > { %v11029_v6 = vpop.permute.xlu2 %11028 }
0x1eb6   : > { %v11030_v15 = vunpack.i.l.bf16 %v11029_v6  ;;  %v11031_v60 = vunpack.i.h.bf16 %v11029_v6 }
0x1eb7   : > { %v11024_v49 = vpop.permute.xlu0 %11023 }
0x1eb8   : > { %v11025_v35 = vunpack.i.l.bf16 %v11024_v49  ;;  %8124 = vmatpush.msrb.mxu2 %v11030_v15  ;;  %v11026_v21 = vunpack.i.h.bf16 %v11024_v49 }
0x1eba   : > { %7851 = vadd.xlane.f32.xlu0 %v7850_v16  ;;  %8125 = vmatpush.msrb.mxu2 %v11031_v60 }
0x1ebb   : > { %7836 = vadd.xlane.f32.xlu1 %v7835_v11  ;;  %10275 = vmatmul.msk.f32.gmra.mxu0 %vm2344_vm0, %v7873_v37 }
0x1ebc   : > { %7949 = vmatpush.msra.mxu1 %v11025_v35 }
0x1ebd   : > { %v11034_v34 = vpop.permute.xlu2 %11033 }
0x1ebe   : > { %7950 = vmatpush.msra.mxu1 %v11026_v21  ;;  %v11035_v52 = vunpack.i.l.bf16 %v11034_v34  ;;  %v11036_v27 = vunpack.i.h.bf16 %v11034_v34 }
0x1ebf   : > { %v11014_v41 = vpop.permute.xlu1 %11013 }
0x1ec0   : > { %v11015_v7 = vunpack.i.l.bf16 %v11014_v41  ;;  %v11016_v25 = vunpack.i.h.bf16 %v11014_v41 }
0x1ec2   : > { %7854 = vadd.xlane.f32.xlu0 %v7853_v46  ;;  %8019 = vmatpush.msrb.mxu3 %v11015_v7 }
0x1ec4   : > { %11038 = vrot.lane.b32.xlu2 %v11037_v4, %s14989_s12  ;;  %8020 = vmatpush.msrb.mxu3 %v11016_v25  ;;  %v8171_v25 = vld [vmem:[%s15004_s1 + $0xc] sm:$0xf] }
0x1ec6   : > { %8159 = vmatpush.msra.mxu3 %v11035_v52 }
0x1ec8   : > { %8160 = vmatpush.msra.mxu3 %v11036_v27 }
0x1ed6   : > { %11043 = vrot.lane.b32.xlu0 %v11042_v40, %s14989_s12  ;;  %v8172_v40 = vld [vmem:[%s15004_s1 + $0x10] sm:$0xf]  ;;  %s15007_s12 = sld [smem:[#allocation105_spill]] }
0x1eed   : > { %7842 = vadd.xlane.f32.xlu2 %v7841_v3 }
0x1ef5   : > { %v7816_v26 = vpop.xlane.xlu0 %7815 }
0x1ef6   : > { %11291 = vrcp.f32 %v7816_v26 }
0x1efc   : > { %v11292_v31 = vpop.eup %11291 }
0x1efd   : > { %v7874_v8 = vmul.f32 %v11292_v31, %v14553_v63  ;;  %v7828_v44 = vpop.xlane.xlu0 %7827 }
0x1efe   : > { %11293 = vrcp.f32 %v7828_v44 }
0x1eff   : > { %10276 = vmatmul.msk.f32.vlgmr.msra.gmra.mxu1 %vm2344_vm0, %v7874_v8  ;;  %v8173_v8 = vld [vmem:[%s15004_s1 + $0x14] sm:$0xf] }
0x1f04   : > { %v11294_v62 = vpop.eup %11293 }
0x1f05   : > { %v7840_v33 = vpop.xlane.xlu1 %7839  ;;  %v7878_v45 = vmul.f32 %v11294_v62, %v14558_v55 }
0x1f07   : > { %10280 = vmatmul.msk.f32.vlgmr.msrb.gmra.mxu3 %vm2344_vm0, %v7878_v45 }
0x1f08   : > { %10299 = vmatpush.msk.msrb.mxu3 %vm2401_vm4, %v8171_v25 }
0x1f0d   : > { %v7822_v36 = vpop.xlane.xlu1 %7821 }
0x1f0e   : > { %11295 = vrcp.f32 %v7822_v36 }
0x1f14   : > { %v11296_v28 = vpop.eup %11295 }
0x1f15   : > { %v7876_v47 = vmul.f32 %v11296_v28, %v14570_v39  ;;  %v7819_v50 = vpop.xlane.xlu1 %7818 }
0x1f16   : > { %11297 = vrcp.f32 %v7819_v50 }
0x1f17   : > { %10278 = vmatmul.msk.f32.vlgmr.msra.gmra.mxu2 %vm2344_vm0, %v7876_v47 }
0x1f1c   : > { %v11298_v63 = vpop.eup %11297 }
0x1f1d   : > { %v7825_v54 = vpop.xlane.xlu0 %7824  ;;  %v7834_v59 = vpop.xlane.xlu1 %7833  ;;  %v7875_v9 = vmul.f32 %v11298_v63, %v14575_v43 }
0x1f1e   : > { %11299 = vrcp.f32 %v7825_v54 }
0x1f1f   : > { %10277 = vmatmul.msk.f32.gmra.mxu1 %vm2344_vm0, %v7875_v9  ;;  %v7846_v55 = vpop.xlane.xlu2 %7845  ;;  %11301 = vrcp.f32 %v7834_v59 }
0x1f20   : > { %11303 = vrcp.f32 %v7846_v55 }
0x1f24   : > { %v11300_v58 = vpop.eup %11299 }
0x1f25   : > { %v7831_v13 = vpop.xlane.xlu0 %7830  ;;  %v7877_v39 = vmul.f32 %v11300_v58, %v14585_v2  ;;  %v11302_v19 = vpop.eup %11301 }
0x1f26   : > { %11305 = vrcp.f32 %v7831_v13  ;;  %v7849_v14 = vpop.xlane.xlu1 %7848  ;;  %v11304_v23 = vpop.eup %11303  ;;  %v7880_v24 = vmul.f32 %v11302_v19, %v14583_v0 }
0x1f27   : > { %10279 = vmatmul.msk.f32.gmra.mxu2 %vm2344_vm0, %v7877_v39  ;;  %v11039_v38 = vpop.permute.xlu2 %11038  ;;  %11307 = vrcp.f32 %v7849_v14  ;;  %v7884_v51 = vmul.f32 %v11304_v23, %v14593_v1 }
0x1f28   : > { %v11040_v61 = vunpack.i.l.bf16 %v11039_v38  ;;  %v11041_v43 = vunpack.i.h.bf16 %v11039_v38 }
0x1f2a   : > { %8054 = vmatpush.msra.mxu0 %v11040_v61 }
0x1f2c   : > { %v11306_v42 = vpop.eup %11305  ;;  %8055 = vmatpush.msra.mxu0 %v11041_v43 }
0x1f2d   : > { %v7852_v5 = vpop.xlane.xlu0 %7851  ;;  %10282 = vmatmul.msk.f32.vlgmr.msra.gmra.mxu0 %vm2344_vm0, %v7880_v24  ;;  %v7879_v2 = vmul.f32 %v11306_v42, %v14597_v48  ;;  %v11308_v0 = vpop.eup %11307 }
0x1f2e   : > { %11309 = vrcp.f32 %v7852_v5  ;;  %v7837_v6 = vpop.xlane.xlu1 %7836  ;;  %10290 = vmatpush.msk.msrb.mxu0 %vm2401_vm4, %v8168_v30  ;;  %v7885_v35 = vmul.f32 %v11308_v0, %v14599_v20 }
0x1f2f   : > { %11311 = vrcp.f32 %v7837_v6  ;;  %10281 = vmatmul.msk.f32.gmra.mxu3 %vm2344_vm0, %v7879_v2  ;;  %10286 = vmatmul.msk.f32.vlgmr.msrb.gmra.mxu2 %vm2344_vm0, %v7884_v51 }
0x1f30   : > { %v7917_v37 = vpop.f32.mrf.mxu0  ;;  %10302 = vmatpush.msk.msra.mxu0 %vm2401_vm4, %v8172_v40 }
0x1f34   : > { %v11310_v15 = vpop.eup %11309 }
0x1f35   : > { %v11312_v49 = vpop.eup %11311  ;;  %v7886_v60 = vmul.f32 %v11310_v15, %v14608_v57  ;;  %v7855_v1 = vpop.xlane.xlu0 %7854 }
0x1f36   : > { %11313 = vrcp.f32 %v7855_v1  ;;  %v7881_v48 = vmul.f32 %v11312_v49, %v14610_v18 }
0x1f37   : > { %10287 = vmatmul.msk.f32.gmra.mxu2 %vm2344_vm0, %v7885_v35  ;;  %10288 = vmatmul.msk.f32.vlgmr.msra.gmra.mxu3 %vm2344_vm0, %v7886_v60  ;;  %11315 = vrcp.f32 %v7840_v33 }
0x1f38   : > { %10283 = vmatmul.msk.f32.gmra.mxu0 %vm2344_vm0, %v7881_v48  ;;  %v7920_v20 = vpop.f32.mrf.mxu0  ;;  %v11075_v48 = vld [vmem:[#allocation17] ss:$0 sm:$0xff] }
0x1f3c   : > { %v11314_v16 = vpop.eup %11313 }
0x1f3d   : > { %v7887_v11 = vmul.f32 %v11314_v16, %v14618_v12  ;;  %v11316_v18 = vpop.eup %11315  ;;  %v8169_v12 = vld [vmem:[%s15004_s1 + $0x4] sm:$0xf] }
0x1f3e   : > { %v7882_v34 = vmul.f32 %v11316_v18, %v14563_v10  ;;  %v8170_v10 = vld [vmem:[%s15004_s1 + $0x8] sm:$0xf] }
0x1f3f   : > { %10289 = vmatmul.msk.f32.gmra.mxu3 %vm2344_vm0, %v7887_v11  ;;  %10296 = vmatpush.msk.msra.mxu2 %vm2401_vm4, %v8170_v10 }
0x1f40   : > { %10291 = vmatmul.msk.f32.vlgmr.msrb.gmra.mxu0 %vm2996_vm10, %v7917_v37 }
0x1f41   : > { %10308 = vmatpush.msk.msrb.mxu2 %vm2401_vm4, %v8174_v17 }
0x1f48   : > { %10292 = vmatmul.msk.f32.gmra.mxu0 %vm2996_vm10, %v7920_v20  ;;  %v11044_v57 = vpop.permute.xlu0 %11043 }
0x1f49   : > { %v11045_v21 = vunpack.i.l.bf16 %v11044_v57  ;;  %v11046_v41 = vunpack.i.h.bf16 %v11044_v57 }
0x1f4b   : > { %8089 = vmatpush.msrb.mxu1 %v11045_v21 }
0x1f4d   : > { %8090 = vmatpush.msrb.mxu1 %v11046_v41 }
0x1f4e   : > { %10284 = vmatmul.msk.f32.vlgmr.msrb.gmra.mxu1 %vm2344_vm0, %v7882_v34 }
0x1f4f   : > { %10293 = vmatpush.msk.msra.mxu1 %vm2401_vm4, %v8169_v12 }
0x1f51   : > { %10305 = vmatpush.msk.msrb.mxu1 %vm2401_vm4, %v8173_v8 }
0x1f60   : > { %v7843_v7 = vpop.xlane.xlu2 %7842 }
0x1f61   : > { %11317 = vrcp.f32 %v7843_v7 }
0x1f67   : > { %v11318_v46 = vpop.eup %11317 }
0x1f68   : > { %v7883_v4 = vmul.f32 %v11318_v46, %v14630_v22  ;;  %v8175_v22 = vld [vmem:[%s15004_s1 + $0x1c] sm:$0xf]  ;;  %s8719_s1 = scalar_lea.hbm %s12955_s10, %s10581_s11 }
0x1f69   : > { %10311 = vmatpush.msk.msra.mxu3 %vm2401_vm4, %v8175_v22  ;;  %s8722_s3 = sshll.u32 %s8719_s1, 4  ;;  %s8723_s3 = int_to_ptr.hbm [resolvable:$true] %s8722_s3 }
0x1f6a   : > { %10285 = vmatmul.msk.f32.gmra.mxu1 %vm2344_vm0, %v7883_v4  ;;  %s12389_s6 = sshra.s32 %s8723_s3, 4  ;;  %s12390_s6 = int_to_ptr.hbm [resolvable:$true] %s12389_s6 }
0x1f6b   : > { %s12391_s15 = scalar_lea.hbm %s12390_s6, 16  ;;  %p12396_p4 = scmp.lt.s32.totalorder %s12390_s6, %s12955_s10 }
0x1f6c   : > { %p12392_p1 = scmp.ne.s32.totalorder %s12390_s6, %s12391_s15 }
0x1f6e   : > { %p12393_p2 = pnand %p12392_p1, %p12997_p10 }
0x1f70   : > { %p12394_p3 = pneg %p12393_p2 }
0x1f7c   : > { %v7952_v52 = vpop.f32.mrf.mxu1 }
0x1f7d   : > { %10294 = vmatmul.msk.f32.vlgmr.msra.gmra.mxu1 %vm2996_vm10, %v7952_v52 }
0x1f8a   : > { %v8022_v27 = vpop.f32.mrf.mxu3 }
0x1f8b   : > { %10300 = vmatmul.msk.f32.vlgmr.msrb.gmra.mxu3 %vm2996_vm10, %v8022_v27 }
0x1f9a   : > { %v7987_v56 = vpop.f32.mrf.mxu2 }
0x1f9b   : > { %10297 = vmatmul.msk.f32.vlgmr.msra.gmra.mxu2 %vm2996_vm10, %v7987_v56 }
0x1f9c   : > { %v7955_v3 = vpop.f32.mrf.mxu1 }
0x1f9d   : > { %10295 = vmatmul.msk.f32.gmra.mxu1 %vm2996_vm10, %v7955_v3 }
0x1faa   : > { %v7990_v26 = vpop.f32.mrf.mxu2  ;;  %v8057_v31 = vpop.f32.mrf.mxu0 }
0x1fab   : > { %10298 = vmatmul.msk.f32.gmra.mxu2 %vm2996_vm10, %v7990_v26  ;;  %10303 = vmatmul.msk.f32.vlgmr.msra.gmra.mxu0 %vm2996_vm10, %v8057_v31 }
0x1fb2   : > { %v8025_v44 = vpop.f32.mrf.mxu3  ;;  %v8127_v62 = vpop.f32.mrf.mxu2 }
0x1fb3   : > { %10301 = vmatmul.msk.f32.gmra.mxu3 %vm2996_vm10, %v8025_v44  ;;  %10309 = vmatmul.msk.f32.vlgmr.msrb.gmra.mxu2 %vm2996_vm10, %v8127_v62 }
0x1fb5   : > { %v8060_v33 = vpop.f32.mrf.mxu0 }
0x1fb6   : > { %10304 = vmatmul.msk.f32.gmra.mxu0 %vm2996_vm10, %v8060_v33 }
0x1fba   : > { %v8130_v45 = vpop.f32.mrf.mxu2  ;;  %v8162_v36 = vpop.f32.mrf.mxu3 }
0x1fbb   : > { %10310 = vmatmul.msk.f32.gmra.mxu2 %vm2996_vm10, %v8130_v45  ;;  %10312 = vmatmul.msk.f32.vlgmr.msra.gmra.mxu3 %vm2996_vm10, %v8162_v36 }
0x1fbd   : > { %v8202_v63 = vpop.f32.mrf.mxu0 }
0x1fbe   : > { %v8432_v39 = vsel %vm5825_vm9, %v8202_v63, 0.0 }
0x1fc2   : > { %v8165_v28 = vpop.f32.mrf.mxu3 }
0x1fc3   : > { %10313 = vmatmul.msk.f32.gmra.mxu3 %vm2996_vm10, %v8165_v28 }
0x1fc5   : > { %v8205_v55 = vpop.f32.mrf.mxu0 }
0x1fc6   : > { %v8447_v57 = vsel %vm5825_vm9, %v8205_v55, 0.0 }
0x1fcb   : > { %v8092_v47 = vpop.f32.mrf.mxu1 }
0x1fcc   : > { %10306 = vmatmul.msk.f32.vlgmr.msrb.gmra.mxu1 %vm2996_vm10, %v8092_v47 }
0x1fe7   : > { %v8095_v50 = vpop.f32.mrf.mxu1 }
0x1fe8   : > { %10307 = vmatmul.msk.f32.gmra.mxu1 %vm2996_vm10, %v8095_v50 }
0x1ffa   : > { %v8234_v59 = vpop.f32.mrf.mxu1 }
0x1ffb   : > { %v8433_v58 = vsel %vm5825_vm9, %v8234_v59, 0.0 }
0x1ffc   : > { %v8434_v38 = vadd.f32 %v8433_v58, %v8432_v39 }
0x200e   : > { %v8298_v9 = vpop.f32.mrf.mxu3 }
0x200f   : > { %v8437_v24 = vsel %vm5825_vm9, %v8298_v9, 0.0  ;;  %v10570_v9 = vld [vmem:[%s15005_s29 + $0x8] sm:$0xff]  ;;  %s2322_s29 = scalar_lea.vmem [#allocation63], %s9286_s0  ;;  %s12395_s0 = scalar_lea.hbm %s12955_s10, 32 }
0x2010   : > { %8556 = vmatpush.bf16.msrb.mxu0 %v10570_v9  ;;  %p12397_p5 = scmp.lt.s32.totalorder %s12395_s0, %s12391_s15 }
0x2012   : > { %p12398_p6 = por %p12397_p5, %p12396_p4 }
0x2014   : > { %p12399_p7 = pnand %p12398_p6, %p12394_p3 }
0x201a   : > { %v8237_v19 = vpop.f32.mrf.mxu1 }
0x201b   : > { %v8448_v20 = vsel %vm5825_vm9, %v8237_v19, 0.0 }
0x201c   : > { %v8449_v21 = vadd.f32 %v8448_v20, %v8447_v57  ;;  %v10578_v20 = vld [vmem:[%s15007_s12 + $0x38] sm:$0xff]  ;;  %v10577_v57 = vld [vmem:[%s15007_s12 + $0x30] sm:$0xff] }
0x201d   : > { %8651 = vmatpush.bf16.msra.mxu1 %v10578_v20 }
0x201e   : > { %v8266_v54 = vpop.f32.mrf.mxu2 }
0x201f   : > { %v8435_v14 = vsel %vm5825_vm9, %v8266_v54, 0.0 }
0x2020   : > { %v8436_v23 = vadd.f32 %v8435_v14, %v8434_v38 }
0x2021   : > { %8652 = vmatpush.bf16.msra.mxu1 %v10577_v57 }
0x2022   : > { %v8438_v42 = vadd.f32 %v8437_v24, %v8436_v23 }
0x2028   : > { %v8330_v43 = vpop.f32.mrf.mxu0 }
0x2029   : > { %v8439_v30 = vsel %vm5825_vm9, %v8330_v43, 0.0 }
0x202a   : > { %v8440_v51 = vadd.f32 %v8439_v30, %v8438_v42 }
0x202e   : > { %v8269_v13 = vpop.f32.mrf.mxu2 }
0x202f   : > { %v8450_v18 = vsel %vm5825_vm9, %v8269_v13, 0.0  ;;  %v10569_v13 = vld [vmem:[%s15006_s23] sm:$0xff] }
0x2030   : > { %v8451_v34 = vadd.f32 %v8450_v18, %v8449_v21  ;;  %8557 = vmatpush.bf16.msrb.mxu0 %v10569_v13  ;;  %v10576_v18 = vld [vmem:[%s15007_s12 + $0x28] sm:$0xff]  ;;  %v10575_v21 = vld [vmem:[%s15007_s12 + $0x20] sm:$0xff] }
0x2031   : > { %8653 = vmatpush.bf16.msra.mxu1 %v10576_v18 }
0x2033   : > { %v8333_v12 = vpop.f32.mrf.mxu0 }
0x2035   : > { %8654 = vmatpush.bf16.msra.mxu1 %v10575_v21 }
0x2036   : > { %v8301_v61 = vpop.f32.mrf.mxu3  ;;  %v8394_v5 = vpop.f32.mrf.mxu2 }
0x2037   : > { %v8443_v49 = vsel %vm5825_vm9, %v8394_v5, 0.0  ;;  %v8452_v41 = vsel %vm5825_vm9, %v8301_v61, 0.0 }
0x2038   : > { %v8453_v7 = vadd.f32 %v8452_v41, %v8451_v34  ;;  %v10574_v41 = vld [vmem:[%s15007_s12 + $0x18] sm:$0xff]  ;;  %v10573_v34 = vld [vmem:[%s15007_s12 + $0x10] sm:$0xff] }
0x2039   : > { %8655 = vmatpush.bf16.msra.mxu1 %v10574_v41 }
0x203d   : > { %8656 = vmatpush.bf16.msra.mxu1 %v10573_v34 }
0x203e   : > { %v8426_v0 = vpop.f32.mrf.mxu3  ;;  %v8397_v46 = vpop.f32.mrf.mxu2 }
0x203f   : > { %v8445_v1 = vsel %vm5825_vm9, %v8426_v0, 0.0  ;;  %v8458_v40 = vsel %vm5825_vm9, %v8397_v46, 0.0 }
0x2046   : > { %v8429_v52 = vpop.f32.mrf.mxu3 }
0x2047   : > { %v8460_v56 = vsel %vm5825_vm9, %v8429_v52, 0.0 }
0x2049   : > { %v8362_v2 = vpop.f32.mrf.mxu1 }
0x204a   : > { %v8441_v6 = vsel %vm5825_vm9, %v8362_v2, 0.0 }
0x204b   : > { %v8442_v15 = vadd.f32 %v8441_v6, %v8440_v51  ;;  %v11076_v6 = vld [vmem:[#allocation24] ss:$0 sm:$0xff] }
0x204d   : > { %v8444_v60 = vadd.f32 %v8443_v49, %v8442_v15  ;;  %v11077_v49 = vld [vmem:[#allocation23] ss:$0 sm:$0xff] }
0x204f   : > { %v8446_v35 = vadd.f32 %v8445_v1, %v8444_v60 }
0x2051   : > { %v8462_v16 = vadd.f32 %v8446_v35, %v14302_v53  ;;  %v8454_v53 = vsel %vm5825_vm9, %v8333_v12, 0.0  ;;  %v10572_v12 = vld [vmem:[%s15007_s12 + $0x8] sm:$0xff] }
0x2052   : > { %v8455_v25 = vadd.f32 %v8454_v53, %v8453_v7  ;;  %v11078_v7 = vld [vmem:[#allocation14] ss:$0 sm:$0xff]  ;;  %8657 = vmatpush.bf16.msra.mxu1 %v10572_v12  ;;  %v10571_v53 = vld [vmem:[%s15007_s12] sm:$0xff] }
0x2053   : > { %v14703_v37 = vadd.f32 %v11075_v48, %v8462_v16 }
0x2055   : > { %v8472_v11 = vsel %vm5825_vm9, %v14703_v37, 0.0 }
0x2056   : > { %8473 = vadd.xlane.f32.xlu1 %v8472_v11  ;;  %8658 = vmatpush.bf16.msra.mxu1 %v10571_v53 }
0x2065   : > { %v8365_v4 = vpop.f32.mrf.mxu1 }
0x2066   : > { %v8456_v10 = vsel %vm5825_vm9, %v8365_v4, 0.0 }
0x2067   : > { %v8457_v27 = vadd.f32 %v8456_v10, %v8455_v25 }
0x2069   : > { %v8459_v17 = vadd.f32 %v8458_v40, %v8457_v27 }
0x206b   : > { %v8461_v22 = vadd.f32 %v8460_v56, %v8459_v17 }
0x206d   : > { %v8463_v3 = vadd.f32 %v8461_v22, %v14307_v29 }
0x206f   : > { %v14716_v26 = vadd.f32 %v11075_v48, %v8463_v3 }
0x2071   : > { %v8475_v31 = vsel %vm5825_vm9, %v14716_v26, 0.0 }
0x2072   : > { %8476 = vadd.xlane.f32.xlu1 %v8475_v31 }
0x20c9   : > { %v8474_v8 = vpop.xlane.xlu1 %8473 }
0x20ca   : > { %v8478_v44 = vmul.f32 %v8474_v8, %v13904_v32 }
0x20cc   : > { %v8480_v62 = vsub.f32 %v14703_v37, %v8478_v44 }
0x20ce   : > { %v8482_v33 = vmul.f32 %v8480_v62, %v8480_v62 }
0x20d0   : > { %v8484_v45 = vsel %vm5825_vm9, %v8482_v33, 0.0 }
0x20d1   : > { %8485 = vadd.xlane.f32.xlu0 %v8484_v45 }
0x20e5   : > { %v8477_v36 = vpop.xlane.xlu1 %8476 }
0x20e6   : > { %v8479_v29 = vmul.f32 %v8477_v36, %v13904_v32 }
0x20e8   : > { %v8481_v28 = vsub.f32 %v14716_v26, %v8479_v29 }
0x20ea   : > { %v8483_v47 = vmul.f32 %v8481_v28, %v8481_v28 }
0x20ec   : > { %v8487_v50 = vsel %vm5825_vm9, %v8483_v47, 0.0 }
0x20ed   : > { %8488 = vadd.xlane.f32.xlu1 %v8487_v50 }
0x2144   : > { %v8486_v63 = vpop.xlane.xlu0 %8485 }
0x2145   : > { %v8490_v54 = vmul.f32 %v8486_v63, %v13904_v32 }
0x2147   : > { %v8492_v59 = vadd.f32 1e-06, %v8490_v54  ;;  %v10580_v54 = vld [vmem:[%s15008_s2 + $0x8] sm:$0xff] }
0x2148   : > { %8697 = vmatpush.bf16.msra.mxu2 %v10580_v54 }
0x2149   : > { %11319 = vrsqrt.f32 %v8492_v59  ;;  %vm8500_vm10 = vweird.f32 %v8492_v59 }
0x214f   : > { %v11320_v55 = vpop.eup %11319 }
0x2150   : > { %v8495_v58 = vmul.f32 %v11320_v55, %v8492_v59  ;;  %vm8501_vm4 = vweird.f32 %v11320_v55  ;;  %v10579_v59 = vld [vmem:[%s15008_s2] sm:$0xff]  ;;  %s8720_s2 = sshll.u32 %s2322_s29, 4  ;;  %s8721_s2 = int_to_ptr.vmem [resolvable:$true] %s8720_s2 }
0x2151   : > { %vm8502_vm8 = vmor %vm8500_vm10, %vm8501_vm4  ;;  %8698 = vmatpush.bf16.msra.mxu2 %v10579_v59 }
0x2152   : > { %v8496_v39 = vmul.f32 %v11320_v55, %v8495_v58 }
0x2154   : > { %v8497_v61 = vmul.f32 0.5, %v8496_v39 }
0x2156   : > { %v8498_v23 = vsub.f32 1.5, %v8497_v61  ;;  %v11080_v61 = vld [vmem:[#allocation59] ss:$0 sm:$0xff] }
0x2158   : > { %v8499_v24 = vmul.f32 %v11320_v55, %v8498_v23 }
0x215a   : > { %v8503_v51 = vsel %vm8502_vm8, %v11320_v55, %v8499_v24  ;;  %v11079_v55 = vld [vmem:[#allocation15] ss:$0 sm:$0xff] }
0x215b   : > { %v8514_v0 = vmul.f32 %v8503_v51, %v8480_v62 }
0x215d   : > { %v8519_v60 = vmul.f32 %v11076_v6, %v8514_v0 }
0x215f   : > { %v8524_v48 = vadd.f32 %v11077_v49, %v8519_v60 }
0x2160   : > { %v8489_v14 = vpop.xlane.xlu1 %8488 }
0x2161   : > { %v8491_v38 = vmul.f32 %v8489_v14, %v13904_v32 }
0x2163   : > { %v8493_v19 = vadd.f32 1e-06, %v8491_v38 }
0x2165   : > { %11321 = vrsqrt.f32 %v8493_v19  ;;  %vm8510_vm12 = vweird.f32 %v8493_v19 }
0x216b   : > { %v11322_v43 = vpop.eup %11321 }
0x216c   : > { %v8505_v30 = vmul.f32 %v11322_v43, %v8493_v19  ;;  %vm8511_vm11 = vweird.f32 %v11322_v43 }
0x216d   : > { %vm8512_vm13 = vmor %vm8510_vm12, %vm8511_vm11 }
0x216e   : > { %v8506_v42 = vmul.f32 %v11322_v43, %v8505_v30 }
0x2170   : > { %v8507_v5 = vmul.f32 0.5, %v8506_v42 }
0x2172   : > { %v8508_v2 = vsub.f32 1.5, %v8507_v5 }
0x2174   : > { %v8509_v32 = vmul.f32 %v11322_v43, %v8508_v2 }
0x2176   : > { %v8513_v15 = vsel %vm8512_vm13, %v11322_v43, %v8509_v32 }
0x2177   : > { %v8515_v1 = vmul.f32 %v8513_v15, %v8481_v28 }
0x2179   : > { %v8520_v35 = vmul.f32 %v11076_v6, %v8515_v1 }
0x217b   : > { %v8525_v16 = vadd.f32 %v11077_v49, %v8520_v35 }
0x217d   : > { %v8526_v11 = vpack.c.bf16 %v8525_v16, %v8524_v48 }
0x217f   : > { %10322 = vmatmul.msk.bf16.vlgmr.msrb.gmra.mxu0 %vm5825_vm9, %v8526_v11 }
0x21fc   : > { %v8559_v46 = vpop.f32.mrf.mxu0 }
0x21fd   : > { %v8560_v4 = vadd.f32 %v11078_v7, %v8559_v46 }
0x21ff   : > { %v8566_v25 = vmul.f32 0.044715, %v8560_v4  ;;  %v8564_v36 = vmul.f32 0.5, %v8560_v4 }
0x2201   : > { %v8568_v10 = vmul.f32 %v8566_v25, %v8560_v4 }
0x2203   : > { %v8570_v52 = vmul.f32 %v8568_v10, %v8560_v4 }
0x2204   : > { %v8561_v27 = vpop.f32.mrf.mxu0 }
0x2205   : > { %v8572_v40 = vadd.f32 %v8570_v52, %v8560_v4  ;;  %v8562_v17 = vadd.f32 %v11078_v7, %v8561_v27 }
0x2207   : > { %v8567_v56 = vmul.f32 0.044715, %v8562_v17  ;;  %v8574_v22 = vmul.f32 0.7978846, %v8572_v40  ;;  %v8565_v29 = vmul.f32 0.5, %v8562_v17 }
0x2209   : > { %v8569_v3 = vmul.f32 %v8567_v56, %v8562_v17  ;;  %11323 = vtanh.f32 %v8574_v22 }
0x220b   : > { %v8571_v31 = vmul.f32 %v8569_v3, %v8562_v17 }
0x220d   : > { %v8573_v8 = vadd.f32 %v8571_v31, %v8562_v17 }
0x220f   : > { %v8575_v44 = vmul.f32 0.7978846, %v8573_v8  ;;  %v11324_v62 = vpop.eup %11323 }
0x2210   : > { %v8578_v33 = vadd.f32 1.0, %v11324_v62 }
0x2211   : > { %11325 = vtanh.f32 %v8575_v44 }
0x2212   : > { %v8580_v47 = vmul.f32 %v8578_v33, %v8564_v36 }
0x2217   : > { %v11326_v45 = vpop.eup %11325 }
0x2218   : > { %v8579_v28 = vadd.f32 1.0, %v11326_v45 }
0x221a   : > { %v8581_v50 = vmul.f32 %v8579_v28, %v8565_v29 }
0x221c   : > { %v8582_v63 = vpack.c.bf16 %v8581_v50, %v8580_v47 }
0x221e   : > { %8659 = vmatmul.bf16.vlgmr.msra.gmra.mxu1 %v8582_v63 }
0x229b   : > { %v8660_v9 = vpop.f32.mrf.mxu1 }
0x229c   : > { %v8661_v58 = vadd.f32 %v11079_v55, %v8660_v9 }
0x229e   : > { %v8665_v14 = vadd.f32 %v8661_v58, %v14703_v37 }
0x22a3   : > { %v8662_v13 = vpop.f32.mrf.mxu1 }
0x22a4   : > { %v8663_v39 = vadd.f32 %v11079_v55, %v8662_v13 }
0x22a6   : > { %v8666_v38 = vadd.f32 %v8663_v39, %v14716_v26 }
0x22a8   : > { %v8667_v19 = vpack.c.bf16 %v8666_v38, %v8665_v14 }
0x22aa   : > { %10363 = vmatmul.msk.bf16.vlgmr.msra.gmra.mxu2 %vm5825_vm9, %v8667_v19 }
0x232d   : > { %v8700_v23 = vpop.f32.mrf.mxu2 }
0x232e   : > { %v8701_v43 = vadd.f32 %v11080_v61, %v8700_v23 }
0x2330   : > { %8705 = vst.msk [vmem:[%s2322_s29] sm:$0xff] %vm2344_vm0, %v8701_v43 }
0x2335   : > { %v8702_v37 = vpop.f32.mrf.mxu2 }
0x2336   : > { %v8703_v26 = vadd.f32 %v11080_v61, %v8702_v37 }
0x2338   : > { %8706 = vst.msk [vmem:[%s2322_s29 + $0x8] sm:$0xff] %vm2344_vm0, %v8703_v26 }
0x2339   : > { %12402 = shalt.err (!%p12399_p7)
}
0x233a   : > { %s12639_s1 = smov 128   ;;  %s12640_s11 = smov 8  }
0x233b   : > { %10730 = dma.vmem_to_hbm [thread:$0]  (%p12997_p10), %s8721_s2, 256, %s8723_s3, %s8708_s4, %s12639_s1, %s12639_s1, %s12640_s11  }
0x233c PF: > { %s15009_s16 = sld [smem:[#allocation140_spill]] }
0x233d   : > { %s15010_s29 = sld [smem:[#allocation138_spill]] }
0x2342   : > { %p10810_p8 = scmp.ge.s32.totalorder %s15009_s16, 2 }
0x2343   : > { %s8737_s9 = sand.u32 1, %s15010_s29  }
0x2344   : > { %p10733_p9 = pnand %p10810_p8, %p13001_p11  ;;  %s8738_s12 = scalar_lea.sflag [#allocation8], %s8737_s9 }
0x2346   : > { %p10734_p12 = pneg %p10733_p9 }
0x2348   : > { %12498 = dma.done.wait (%p10734_p12), %s8738_s12, 256  }
0x2349   : > { %12500 = vsyncadd (%p10734_p12), %s8738_s12, 4294967040  ;;  %s15012_s29 = sld [smem:[#allocation141_spill]]  ;;  %s15015_s0 = smov %s12507_s5 }
0x234a   : > { %s15013_s6 = sld [smem:[#allocation139_spill]] }
0x234b   : > { %s15014_s16 = sld [smem:[#allocation142_spill]] }
0x234f   : > { %p160_p13 = scmp.ge.s32.totalorder %s15012_s29, 4  }
0x2350   : > { %s15016_s5 = smov %s15013_s6 }
0x2351   :  { %162 = sbr.rel (!%p160_p13) target bundleno = 148 (0x94), region = 513 }
0x2356   :  { %8744 = vsyncpa [#allocation7], 1 }
0x2357   :  { %8746 = vsyncpa [#allocation7 + $0x1], 1 }
0x2358   :  { %8747 = vsyncpa [#allocation10], 1 }
0x2359   :  { %8748 = vsyncpa [#allocation13], 1 }
0x235a   :  { %8749 = vsyncpa [#allocation16], 1 }
0x235b   :  { %8750 = vsyncpa [#allocation19], 1 }
0x235c   :  { %8751 = vsyncpa [#allocation22], 1 }
0x235d   :  { %8752 = vsyncpa [#allocation25], 1 }
0x235e   :  { %8753 = vsyncpa [#allocation28], 1 }
0x235f   :  { %8754 = vsyncpa [#allocation31], 1 }
0x2360   :  { %8755 = vsyncpa [#allocation34], 1 }
0x2361   :  { %8756 = vsyncpa [#allocation37], 1 }
0x2362   :  { %8757 = vsyncpa [#allocation40], 1 }
0x2363   :  { %8758 = vsyncpa [#allocation43], 1 }
0x2364   :  { %8759 = vsyncpa [#allocation46], 1 }
0x2365   :  { %8760 = vsyncpa [#allocation49], 1 }
0x2366   :  { %8761 = vsyncpa [#allocation52], 1 }
0x2367   :  { %8762 = vsyncpa [#allocation55], 1 }
0x2368   :  { %8763 = vsyncpa [#allocation58], 1 }
0x2369   :  { %8764 = vsyncpa [#allocation61], 1 }
0x236a   :  { %8765 = vsyncpa [#allocation8], 1 }
0x236b   :  { %8767 = vsyncpa [#allocation8 + $0x1], 1 }

</bundles_post_ra>
